<compile_context>
chip_gen: v5e
topology: v5e:2x2
jax: 0.10.0
libtpu: 0.0.40
codegen_flags: <defaults>
</compile_context>

<pallas_src>
import jax
import jax.numpy as jnp
from jax import lax
from jax.experimental import pallas as pl
from jax.experimental.pallas import tpu as pltpu

IMAGE_SIZE = 28
OUT_DIM = IMAGE_SIZE * IMAGE_SIZE          # 784
OUT_PAD = 896                              # 7 * 128 (lane-dense output)
LATENT_DIM = 100
LATENT_PAD = 128                           # lane-dense z / w1
BN_EPS = 1e-5
NEG_SLOPE = 0.2


def _leaky_relu(x):
    return jnp.where(x > 0, x, NEG_SLOPE * x)


def _batchnorm_train(x, gamma, beta):
    # nn.BatchNorm1d, training mode: batch mean, biased batch variance, eps=1e-5,
    # fused into one per-feature scale/shift.  x: (B, F).
    mean = jnp.mean(x, axis=0, keepdims=True)
    var = jnp.mean(jnp.square(x - mean), axis=0, keepdims=True)
    scale = gamma * lax.rsqrt(var + BN_EPS)
    shift = beta - mean * scale
    return x * scale + shift


def _batchnorm_train_grouped(x, gamma, beta, groups, rows):
    # x: (groups*rows, F) where each consecutive `rows` rows form one independent
    # BatchNorm group (one module call).  Stats are computed per group.
    f = x.shape[-1]
    xg = x.reshape(groups, rows, f)
    mean = jnp.mean(xg, axis=1, keepdims=True)
    var = jnp.mean(jnp.square(xg - mean), axis=1, keepdims=True)
    scale = gamma * lax.rsqrt(var + BN_EPS)          # (1,F) broadcasts over groups
    shift = beta - mean * scale
    return (xg * scale + shift).reshape(x.shape)


def generator_kernel(z_ref,
                     w1_ref, b1_ref,
                     w2_ref, g2_ref, be2_ref,
                     w3_ref, g3_ref, be3_ref,
                     w4_ref, b4_ref,
                     out_ref):
    gps, b, _ = z_ref.shape                          # groups_per_step, rows/group
    bf = jnp.bfloat16
    z = z_ref[...].reshape(gps * b, LATENT_PAD)      # (rows, 128) f32

    # Linear(100 -> 256) + LeakyReLU   (zero-padded latent lanes contribute 0)
    h = jnp.dot(z.astype(bf), w1_ref[...],
                preferred_element_type=jnp.float32) + b1_ref[...]
    h = _leaky_relu(h)

    # Linear(256 -> 512) + BatchNorm1d(512) + LeakyReLU  (bias cancels in BN)
    h = jnp.dot(h.astype(bf), w2_ref[...], preferred_element_type=jnp.float32)
    h = _leaky_relu(_batchnorm_train_grouped(h, g2_ref[...], be2_ref[...], gps, b))

    # Linear(512 -> 1024) + BatchNorm1d(1024) + LeakyReLU  (bias cancels in BN)
    h = jnp.dot(h.astype(bf), w3_ref[...], preferred_element_type=jnp.float32)
    h = _leaky_relu(_batchnorm_train_grouped(h, g3_ref[...], be3_ref[...], gps, b))

    # Linear(1024 -> 784, padded to 896) + Tanh
    h = jnp.dot(h.astype(bf), w4_ref[...],
                preferred_element_type=jnp.float32) + b4_ref[...]
    out_ref[...] = jnp.tanh(h).reshape(gps, b, OUT_PAD)


def init_params(key):
    """Deterministic synthetic parameters (f32, stored as (in, out) so the kernel
    computes x @ W, equivalent to x @ W_pt.T)."""
    ks = jax.random.split(key, 8)
    dims = [(LATENT_DIM, 256), (256, 512), (512, 1024), (1024, OUT_DIM)]
    ws, bs = [], []
    for i, (din, dout) in enumerate(dims):
        bound = 1.0 / jnp.sqrt(din)
        ws.append(jax.random.uniform(ks[2 * i], (din, dout), jnp.float32, -bound, bound))
        bs.append(jax.random.uniform(ks[2 * i + 1], (1, dout), jnp.float32, -bound, bound))
    kg2, kb2, kg3, kb3 = jax.random.split(jax.random.fold_in(key, 123), 4)
    g2 = 1.0 + 0.1 * jax.random.normal(kg2, (1, 512), jnp.float32)
    be2 = 0.1 * jax.random.normal(kb2, (1, 512), jnp.float32)
    g3 = 1.0 + 0.1 * jax.random.normal(kg3, (1, 1024), jnp.float32)
    be3 = 0.1 * jax.random.normal(kb3, (1, 1024), jnp.float32)
    return (ws[0], bs[0],
            ws[1], bs[1], g2, be2,
            ws[2], bs[2], g3, be3,
            ws[3], bs[3])


def prepare_kernel_params(params):
    """Kernel-ready params: bf16 weights (halve HBM DMA bytes), lane padding,
    and pre-BN biases (b2, b3) dropped since they cancel under batch-norm."""
    (w1, b1, w2, b2, g2, be2, w3, b3, g3, be3, w4, b4) = params
    w1p = jnp.pad(w1, ((0, LATENT_PAD - LATENT_DIM), (0, 0))).astype(jnp.bfloat16)
    w4p = jnp.pad(w4, ((0, 0), (0, OUT_PAD - OUT_DIM))).astype(jnp.bfloat16)
    b4p = jnp.pad(b4, ((0, 0), (0, OUT_PAD - OUT_DIM)))
    return (w1p, b1,
            w2.astype(jnp.bfloat16), g2, be2,
            w3.astype(jnp.bfloat16), g3, be3,
            w4p, b4p)


def _generator_pallas(z_stack_pad, kernel_params, groups_per_step):
    """z_stack_pad: (G, B, LATENT_PAD) f32, G independent BN groups of B rows.
    Weights stay VMEM-resident (constant index_map) across the whole grid."""
    G, B, _ = z_stack_pad.shape
    assert G % groups_per_step == 0, "G must be divisible by groups_per_step"
    assert B % 8 == 0, "rows per BN group must be a sublane multiple (8)"
    steps = G // groups_per_step

    z_spec = pl.BlockSpec((groups_per_step, B, LATENT_PAD), lambda s: (s, 0, 0))
    out_spec = pl.BlockSpec((groups_per_step, B, OUT_PAD), lambda s: (s, 0, 0))
    # Full-array blocks with constant block index -> DMAed once, kept resident.
    weight_specs = [pl.BlockSpec(p.shape, lambda s: (0, 0)) for p in kernel_params]

    return pl.pallas_call(
        generator_kernel,
        out_shape=jax.ShapeDtypeStruct((G, B, OUT_PAD), jnp.float32),
        grid_spec=pltpu.PrefetchScalarGridSpec(
            num_scalar_prefetch=0,
            grid=(steps,),
            in_specs=[z_spec] + weight_specs,
            out_specs=out_spec,
        ),
        compiler_params=pltpu.CompilerParams(
            dimension_semantics=("parallel",),      # v7x: split steps across TCs
            vmem_limit_bytes=32 << 20,
        ),
    )(z_stack_pad, *kernel_params)


def generator_forward(z, kernel_params):
    """Single module call: z (B, 100) -> (B, 1, 28, 28); one BN group."""
    B = z.shape[0]
    z_pad = jnp.pad(z, ((0, 0), (0, LATENT_PAD - LATENT_DIM)))[None]   # (1, B, 128)
    flat = _generator_pallas(z_pad, kernel_params, groups_per_step=1)[0]
    return flat[:, :OUT_DIM].reshape(B, 1, IMAGE_SIZE, IMAGE_SIZE)


def generator_forward_batched(z_stack, kernel_params, groups_per_step=1):
    """G independent module calls (G independent BN groups), one pallas_call:
    z_stack (G, B, 100) -> (G, B, 1, 28, 28).  Weight DMA amortized over G."""
    G, B, _ = z_stack.shape
    z_pad = jnp.pad(z_stack, ((0, 0), (0, 0), (0, LATENT_PAD - LATENT_DIM)))
    flat = _generator_pallas(z_pad, kernel_params, groups_per_step)
    return flat[..., :OUT_DIM].reshape(G, B, 1, IMAGE_SIZE, IMAGE_SIZE)


def _reference_forward(z, params):
    """Pure-JAX reference for ONE module call, mirroring the kernel's bf16
    matmul precision (bf16 LHS and weights, f32 accumulate); keeps b2/b3 to
    verify they indeed cancel under training-mode BN."""
    (w1, b1, w2, b2, g2, be2, w3, b3, g3, be3, w4, b4) = params
    bf = lambda x: x.astype(jnp.bfloat16)
    dot = lambda x, w: jnp.dot(bf(x), bf(w), preferred_element_type=jnp.float32)
    h = _leaky_relu(dot(z, w1) + b1)
    h = _leaky_relu(_batchnorm_train(dot(h, w2) + b2, g2, be2))
    h = _leaky_relu(_batchnorm_train(dot(h, w3) + b3, g3, be3))
    h = jnp.tanh(dot(h, w4) + b4)
    return h.reshape(z.shape[0], 1, IMAGE_SIZE, IMAGE_SIZE)


if __name__ == "__main__":
    key = jax.random.PRNGKey(0)
    kz, kp = jax.random.split(key)
    G, B = 4, 8   # 4 independent generator batches of 8 (BN needs B > 1)
    z_stack = jax.random.normal(kz, (G, B, LATENT_DIM), jnp.float32)
    params = init_params(kp)
    kparams = prepare_kernel_params(params)

    # Multi-batch path: weights DMAed once; 2 BN groups (16 MXU rows) per step.
    imgs = generator_forward_batched(z_stack, kparams, groups_per_step=2)
    jax.block_until_ready(imgs)
    assert imgs.shape == (G, B, 1, IMAGE_SIZE, IMAGE_SIZE)

    # Single-call path (exact PyTorch Generator.forward semantics for one batch).
    img0 = generator_forward(z_stack[0], kparams)
    jax.block_until_ready(img0)
    assert img0.shape == (B, 1, IMAGE_SIZE, IMAGE_SIZE)

    refs = jnp.stack([_reference_forward(z_stack[g], params) for g in range(G)])
    assert jnp.allclose(imgs, refs, atol=2e-3, rtol=2e-3), "batched mismatch vs JAX reference"
    assert jnp.allclose(img0, refs[0], atol=2e-3, rtol=2e-3), "single-call mismatch vs JAX reference"
    print("KERNEL_OK")
</pallas_src>

<mosaic_0001>
module attributes {stable_mosaic.version = 11 : i64} {
  func.func @generator_kernel(%arg0: i32, %arg1: memref<2x8x128xf32, #tpu.memory_space<vmem>>, %arg2: memref<128x256xbf16, #tpu.memory_space<vmem>>, %arg3: memref<1x256xf32, #tpu.memory_space<vmem>>, %arg4: memref<256x512xbf16, #tpu.memory_space<vmem>>, %arg5: memref<1x512xf32, #tpu.memory_space<vmem>>, %arg6: memref<1x512xf32, #tpu.memory_space<vmem>>, %arg7: memref<512x1024xbf16, #tpu.memory_space<vmem>>, %arg8: memref<1x1024xf32, #tpu.memory_space<vmem>>, %arg9: memref<1x1024xf32, #tpu.memory_space<vmem>>, %arg10: memref<1024x896xbf16, #tpu.memory_space<vmem>>, %arg11: memref<1x896xf32, #tpu.memory_space<vmem>>, %arg12: memref<2x8x896xf32, #tpu.memory_space<vmem>>) attributes {dimension_semantics = [#tpu.dimension_semantics<parallel>], iteration_bounds = array<i64: 2>, scalar_prefetch = 0 : i64, scratch_operands = 0 : i64, tpu.core_type = #tpu.core_type<tc>, window_params = [{transform_indices = @transform_0, window_bounds = array<i64: 2, 8, 128>}, {pipeline_mode = #tpu.pipeline_mode<synchronous>, transform_indices = @transform_1, window_bounds = array<i64: 128, 256>}, {pipeline_mode = #tpu.pipeline_mode<synchronous>, transform_indices = @transform_2, window_bounds = array<i64: 1, 256>}, {pipeline_mode = #tpu.pipeline_mode<synchronous>, transform_indices = @transform_3, window_bounds = array<i64: 256, 512>}, {pipeline_mode = #tpu.pipeline_mode<synchronous>, transform_indices = @transform_4, window_bounds = array<i64: 1, 512>}, {pipeline_mode = #tpu.pipeline_mode<synchronous>, transform_indices = @transform_5, window_bounds = array<i64: 1, 512>}, {pipeline_mode = #tpu.pipeline_mode<synchronous>, transform_indices = @transform_6, window_bounds = array<i64: 512, 1024>}, {pipeline_mode = #tpu.pipeline_mode<synchronous>, transform_indices = @transform_7, window_bounds = array<i64: 1, 1024>}, {pipeline_mode = #tpu.pipeline_mode<synchronous>, transform_indices = @transform_8, window_bounds = array<i64: 1, 1024>}, {pipeline_mode = #tpu.pipeline_mode<synchronous>, transform_indices = @transform_9, window_bounds = array<i64: 1024, 896>}, {pipeline_mode = #tpu.pipeline_mode<synchronous>, transform_indices = @transform_10, window_bounds = array<i64: 1, 896>}, {transform_indices = @transform_11, window_bounds = array<i64: 2, 8, 896>}]} {
    %c0 = arith.constant 0 : index
    %c0_0 = arith.constant 0 : index
    %c0_1 = arith.constant 0 : index
    %0 = vector.load %arg1[%c0, %c0_0, %c0_1] : memref<2x8x128xf32, #tpu.memory_space<vmem>>, vector<2x8x128xf32>
    %1 = vector.shape_cast %0 : vector<2x8x128xf32> to vector<16x128xf32>
    %2 = arith.truncf %1 : vector<16x128xf32> to vector<16x128xbf16>
    %c0_2 = arith.constant 0 : index
    %c0_3 = arith.constant 0 : index
    %3 = vector.load %arg2[%c0_2, %c0_3] : memref<128x256xbf16, #tpu.memory_space<vmem>>, vector<128x256xbf16>
    %cst = arith.constant dense<0.000000e+00> : vector<16x256xf32>
    %4 = tpu.matmul %2, %3, %cst {dimension_numbers = #tpu.dot_dimension_numbers<[1], [0], [0], [1], [0, 0, 1, 1], [], []>} : vector<16x128xbf16>, vector<128x256xbf16>, vector<16x256xf32> -> vector<16x256xf32>
    %c0_4 = arith.constant 0 : index
    %c0_5 = arith.constant 0 : index
    %5 = vector.load %arg3[%c0_4, %c0_5] : memref<1x256xf32, #tpu.memory_space<vmem>>, vector<1x256xf32>
    %6 = vector.broadcast %5 : vector<1x256xf32> to vector<16x256xf32>
    %7 = arith.addf %4, %6 : vector<16x256xf32>
    %cst_6 = arith.constant 0.000000e+00 : f32
    %8 = vector.broadcast %cst_6 : f32 to vector<16x256xf32>
    %9 = arith.cmpf ogt, %7, %8 : vector<16x256xf32>
    %cst_7 = arith.constant 2.000000e-01 : f32
    %10 = vector.broadcast %cst_7 : f32 to vector<16x256xf32>
    %11 = arith.mulf %10, %7 : vector<16x256xf32>
    %12 = arith.select %9, %7, %11 : vector<16x256xi1>, vector<16x256xf32>
    %13 = arith.truncf %12 : vector<16x256xf32> to vector<16x256xbf16>
    %c0_8 = arith.constant 0 : index
    %c0_9 = arith.constant 0 : index
    %14 = vector.load %arg4[%c0_8, %c0_9] : memref<256x512xbf16, #tpu.memory_space<vmem>>, vector<256x512xbf16>
    %cst_10 = arith.constant dense<0.000000e+00> : vector<16x512xf32>
    %15 = tpu.matmul %13, %14, %cst_10 {dimension_numbers = #tpu.dot_dimension_numbers<[1], [0], [0], [1], [0, 0, 1, 1], [], []>} : vector<16x256xbf16>, vector<256x512xbf16>, vector<16x512xf32> -> vector<16x512xf32>
    %c0_11 = arith.constant 0 : index
    %c0_12 = arith.constant 0 : index
    %16 = vector.load %arg5[%c0_11, %c0_12] : memref<1x512xf32, #tpu.memory_space<vmem>>, vector<1x512xf32>
    %c0_13 = arith.constant 0 : index
    %c0_14 = arith.constant 0 : index
    %17 = vector.load %arg6[%c0_13, %c0_14] : memref<1x512xf32, #tpu.memory_space<vmem>>, vector<1x512xf32>
    %18 = vector.shape_cast %15 : vector<16x512xf32> to vector<2x8x512xf32>
    %cst_15 = arith.constant dense<0.000000e+00> : vector<2x512xf32>
    %19 = vector.multi_reduction <add>, %18, %cst_15 [1] : vector<2x8x512xf32> to vector<2x512xf32>
    %20 = vector.shape_cast %19 : vector<2x512xf32> to vector<2x1x512xf32>
    %cst_16 = arith.constant 8.000000e+00 : f32
    %21 = vector.broadcast %cst_16 : f32 to vector<2x1x512xf32>
    %22 = arith.divf %20, %21 : vector<2x1x512xf32>
    %23 = vector.broadcast %22 : vector<2x1x512xf32> to vector<2x8x512xf32>
    %24 = arith.subf %18, %23 : vector<2x8x512xf32>
    %25 = arith.mulf %24, %24 : vector<2x8x512xf32>
    %cst_17 = arith.constant dense<0.000000e+00> : vector<2x512xf32>
    %26 = vector.multi_reduction <add>, %25, %cst_17 [1] : vector<2x8x512xf32> to vector<2x512xf32>
    %27 = vector.shape_cast %26 : vector<2x512xf32> to vector<2x1x512xf32>
    %cst_18 = arith.constant 8.000000e+00 : f32
    %28 = vector.broadcast %cst_18 : f32 to vector<2x1x512xf32>
    %29 = arith.divf %27, %28 : vector<2x1x512xf32>
    %cst_19 = arith.constant 9.99999974E-6 : f32
    %30 = vector.broadcast %cst_19 : f32 to vector<2x1x512xf32>
    %31 = arith.addf %29, %30 : vector<2x1x512xf32>
    %32 = math.rsqrt %31 : vector<2x1x512xf32>
    %33 = vector.shape_cast %16 : vector<1x512xf32> to vector<1x1x512xf32>
    %34 = vector.broadcast %33 : vector<1x1x512xf32> to vector<2x1x512xf32>
    %35 = arith.mulf %34, %32 : vector<2x1x512xf32>
    %36 = arith.mulf %22, %35 : vector<2x1x512xf32>
    %37 = vector.shape_cast %17 : vector<1x512xf32> to vector<1x1x512xf32>
    %38 = vector.broadcast %37 : vector<1x1x512xf32> to vector<2x1x512xf32>
    %39 = arith.subf %38, %36 : vector<2x1x512xf32>
    %40 = vector.broadcast %35 : vector<2x1x512xf32> to vector<2x8x512xf32>
    %41 = arith.mulf %18, %40 : vector<2x8x512xf32>
    %42 = vector.broadcast %39 : vector<2x1x512xf32> to vector<2x8x512xf32>
    %43 = arith.addf %41, %42 : vector<2x8x512xf32>
    %44 = vector.shape_cast %43 : vector<2x8x512xf32> to vector<16x512xf32>
    %cst_20 = arith.constant 0.000000e+00 : f32
    %45 = vector.broadcast %cst_20 : f32 to vector<16x512xf32>
    %46 = arith.cmpf ogt, %44, %45 : vector<16x512xf32>
    %cst_21 = arith.constant 2.000000e-01 : f32
    %47 = vector.broadcast %cst_21 : f32 to vector<16x512xf32>
    %48 = arith.mulf %47, %44 : vector<16x512xf32>
    %49 = arith.select %46, %44, %48 : vector<16x512xi1>, vector<16x512xf32>
    %50 = arith.truncf %49 : vector<16x512xf32> to vector<16x512xbf16>
    %c0_22 = arith.constant 0 : index
    %c0_23 = arith.constant 0 : index
    %51 = vector.load %arg7[%c0_22, %c0_23] : memref<512x1024xbf16, #tpu.memory_space<vmem>>, vector<512x1024xbf16>
    %cst_24 = arith.constant dense<0.000000e+00> : vector<16x1024xf32>
    %52 = tpu.matmul %50, %51, %cst_24 {dimension_numbers = #tpu.dot_dimension_numbers<[1], [0], [0], [1], [0, 0, 1, 1], [], []>} : vector<16x512xbf16>, vector<512x1024xbf16>, vector<16x1024xf32> -> vector<16x1024xf32>
    %c0_25 = arith.constant 0 : index
    %c0_26 = arith.constant 0 : index
    %53 = vector.load %arg8[%c0_25, %c0_26] : memref<1x1024xf32, #tpu.memory_space<vmem>>, vector<1x1024xf32>
    %c0_27 = arith.constant 0 : index
    %c0_28 = arith.constant 0 : index
    %54 = vector.load %arg9[%c0_27, %c0_28] : memref<1x1024xf32, #tpu.memory_space<vmem>>, vector<1x1024xf32>
    %55 = vector.shape_cast %52 : vector<16x1024xf32> to vector<2x8x1024xf32>
    %cst_29 = arith.constant dense<0.000000e+00> : vector<2x1024xf32>
    %56 = vector.multi_reduction <add>, %55, %cst_29 [1] : vector<2x8x1024xf32> to vector<2x1024xf32>
    %57 = vector.shape_cast %56 : vector<2x1024xf32> to vector<2x1x1024xf32>
    %cst_30 = arith.constant 8.000000e+00 : f32
    %58 = vector.broadcast %cst_30 : f32 to vector<2x1x1024xf32>
    %59 = arith.divf %57, %58 : vector<2x1x1024xf32>
    %60 = vector.broadcast %59 : vector<2x1x1024xf32> to vector<2x8x1024xf32>
    %61 = arith.subf %55, %60 : vector<2x8x1024xf32>
    %62 = arith.mulf %61, %61 : vector<2x8x1024xf32>
    %cst_31 = arith.constant dense<0.000000e+00> : vector<2x1024xf32>
    %63 = vector.multi_reduction <add>, %62, %cst_31 [1] : vector<2x8x1024xf32> to vector<2x1024xf32>
    %64 = vector.shape_cast %63 : vector<2x1024xf32> to vector<2x1x1024xf32>
    %cst_32 = arith.constant 8.000000e+00 : f32
    %65 = vector.broadcast %cst_32 : f32 to vector<2x1x1024xf32>
    %66 = arith.divf %64, %65 : vector<2x1x1024xf32>
    %cst_33 = arith.constant 9.99999974E-6 : f32
    %67 = vector.broadcast %cst_33 : f32 to vector<2x1x1024xf32>
    %68 = arith.addf %66, %67 : vector<2x1x1024xf32>
    %69 = math.rsqrt %68 : vector<2x1x1024xf32>
    %70 = vector.shape_cast %53 : vector<1x1024xf32> to vector<1x1x1024xf32>
    %71 = vector.broadcast %70 : vector<1x1x1024xf32> to vector<2x1x1024xf32>
    %72 = arith.mulf %71, %69 : vector<2x1x1024xf32>
    %73 = arith.mulf %59, %72 : vector<2x1x1024xf32>
    %74 = vector.shape_cast %54 : vector<1x1024xf32> to vector<1x1x1024xf32>
    %75 = vector.broadcast %74 : vector<1x1x1024xf32> to vector<2x1x1024xf32>
    %76 = arith.subf %75, %73 : vector<2x1x1024xf32>
    %77 = vector.broadcast %72 : vector<2x1x1024xf32> to vector<2x8x1024xf32>
    %78 = arith.mulf %55, %77 : vector<2x8x1024xf32>
    %79 = vector.broadcast %76 : vector<2x1x1024xf32> to vector<2x8x1024xf32>
    %80 = arith.addf %78, %79 : vector<2x8x1024xf32>
    %81 = vector.shape_cast %80 : vector<2x8x1024xf32> to vector<16x1024xf32>
    %cst_34 = arith.constant 0.000000e+00 : f32
    %82 = vector.broadcast %cst_34 : f32 to vector<16x1024xf32>
    %83 = arith.cmpf ogt, %81, %82 : vector<16x1024xf32>
    %cst_35 = arith.constant 2.000000e-01 : f32
    %84 = vector.broadcast %cst_35 : f32 to vector<16x1024xf32>
    %85 = arith.mulf %84, %81 : vector<16x1024xf32>
    %86 = arith.select %83, %81, %85 : vector<16x1024xi1>, vector<16x1024xf32>
    %87 = arith.truncf %86 : vector<16x1024xf32> to vector<16x1024xbf16>
    %c0_36 = arith.constant 0 : index
    %c0_37 = arith.constant 0 : index
    %88 = vector.load %arg10[%c0_36, %c0_37] : memref<1024x896xbf16, #tpu.memory_space<vmem>>, vector<1024x896xbf16>
    %cst_38 = arith.constant dense<0.000000e+00> : vector<16x896xf32>
    %89 = tpu.matmul %87, %88, %cst_38 {dimension_numbers = #tpu.dot_dimension_numbers<[1], [0], [0], [1], [0, 0, 1, 1], [], []>} : vector<16x1024xbf16>, vector<1024x896xbf16>, vector<16x896xf32> -> vector<16x896xf32>
    %c0_39 = arith.constant 0 : index
    %c0_40 = arith.constant 0 : index
    %90 = vector.load %arg11[%c0_39, %c0_40] : memref<1x896xf32, #tpu.memory_space<vmem>>, vector<1x896xf32>
    %91 = vector.broadcast %90 : vector<1x896xf32> to vector<16x896xf32>
    %92 = arith.addf %89, %91 : vector<16x896xf32>
    %93 = math.tanh %92 : vector<16x896xf32>
    %94 = vector.shape_cast %93 : vector<16x896xf32> to vector<2x8x896xf32>
    %c0_41 = arith.constant 0 : index
    %c0_42 = arith.constant 0 : index
    %c0_43 = arith.constant 0 : index
    %95 = vector.load %arg12[%c0_41, %c0_42, %c0_43] : memref<2x8x896xf32, #tpu.memory_space<vmem>>, vector<2x8x896xf32>
    tpu.vector_store %arg12[%c0_41, %c0_42, %c0_43], %94 {strides = array<i32>} : memref<2x8x896xf32, #tpu.memory_space<vmem>>, vector<2x8x896xf32>,
    return
  }
  func.func @transform_0(%arg0: i32) -> (i32, i32, i32) {
    %c0_i32 = arith.constant 0 : i32
    %c0_i32_0 = arith.constant 0 : i32
    %c0_i32_1 = arith.constant 0 : i32
    return %arg0, %c0_i32, %c0_i32_0 : i32, i32, i32
  }
  func.func @transform_1(%arg0: i32) -> (i32, i32) {
    %c0_i32 = arith.constant 0 : i32
    %c0_i32_0 = arith.constant 0 : i32
    %c0_i32_1 = arith.constant 0 : i32
    return %c0_i32, %c0_i32_0 : i32, i32
  }
  func.func @transform_2(%arg0: i32) -> (i32, i32) {
    %c0_i32 = arith.constant 0 : i32
    %c0_i32_0 = arith.constant 0 : i32
    %c0_i32_1 = arith.constant 0 : i32
    return %c0_i32, %c0_i32_0 : i32, i32
  }
  func.func @transform_3(%arg0: i32) -> (i32, i32) {
    %c0_i32 = arith.constant 0 : i32
    %c0_i32_0 = arith.constant 0 : i32
    %c0_i32_1 = arith.constant 0 : i32
    return %c0_i32, %c0_i32_0 : i32, i32
  }
  func.func @transform_4(%arg0: i32) -> (i32, i32) {
    %c0_i32 = arith.constant 0 : i32
    %c0_i32_0 = arith.constant 0 : i32
    %c0_i32_1 = arith.constant 0 : i32
    return %c0_i32, %c0_i32_0 : i32, i32
  }
  func.func @transform_5(%arg0: i32) -> (i32, i32) {
    %c0_i32 = arith.constant 0 : i32
    %c0_i32_0 = arith.constant 0 : i32
    %c0_i32_1 = arith.constant 0 : i32
    return %c0_i32, %c0_i32_0 : i32, i32
  }
  func.func @transform_6(%arg0: i32) -> (i32, i32) {
    %c0_i32 = arith.constant 0 : i32
    %c0_i32_0 = arith.constant 0 : i32
    %c0_i32_1 = arith.constant 0 : i32
    return %c0_i32, %c0_i32_0 : i32, i32
  }
  func.func @transform_7(%arg0: i32) -> (i32, i32) {
    %c0_i32 = arith.constant 0 : i32
    %c0_i32_0 = arith.constant 0 : i32
    %c0_i32_1 = arith.constant 0 : i32
    return %c0_i32, %c0_i32_0 : i32, i32
  }
  func.func @transform_8(%arg0: i32) -> (i32, i32) {
    %c0_i32 = arith.constant 0 : i32
    %c0_i32_0 = arith.constant 0 : i32
    %c0_i32_1 = arith.constant 0 : i32
    return %c0_i32, %c0_i32_0 : i32, i32
  }
  func.func @transform_9(%arg0: i32) -> (i32, i32) {
    %c0_i32 = arith.constant 0 : i32
    %c0_i32_0 = arith.constant 0 : i32
    %c0_i32_1 = arith.constant 0 : i32
    return %c0_i32, %c0_i32_0 : i32, i32
  }
  func.func @transform_10(%arg0: i32) -> (i32, i32) {
    %c0_i32 = arith.constant 0 : i32
    %c0_i32_0 = arith.constant 0 : i32
    %c0_i32_1 = arith.constant 0 : i32
    return %c0_i32, %c0_i32_0 : i32, i32
  }
  func.func @transform_11(%arg0: i32) -> (i32, i32, i32) {
    %c0_i32 = arith.constant 0 : i32
    %c0_i32_0 = arith.constant 0 : i32
    %c0_i32_1 = arith.constant 0 : i32
    return %arg0, %c0_i32, %c0_i32_0 : i32, i32, i32
  }
}

</mosaic_0001>

<bundles_post_ra>
// kernel: tpu_custom_call.1
= control target key start
LH: loop header
LB: loop body
LE: loop exit
PB: predicated region body
PF: predicated region fallthrough
CT: control target
= control target key end

     0   :  { %s14336_s0 = inlined_call_operand.hbm [shape: f32[4,8,128], index: 0, kind: input, shape index: {}]   ;;  %s14337_s1 = inlined_call_operand.hbm [shape: bf16[128,256], index: 1, kind: input, shape index: {}]   ;;  %s14338_s2 = inlined_call_operand.hbm [shape: f32[1,256], index: 2, kind: input, shape index: {}]   ;;  %s14339_s3 = inlined_call_operand.hbm [shape: bf16[256,512], index: 3, kind: input, shape index: {}]   ;;  %s14340_s4 = inlined_call_operand.hbm [shape: f32[1,512], index: 4, kind: input, shape index: {}]   ;;  %s14341_s5 = inlined_call_operand.hbm [shape: f32[1,512], index: 5, kind: input, shape index: {}]   ;;  %s14342_s6 = inlined_call_operand.hbm [shape: bf16[512,1024], index: 6, kind: input, shape index: {}]   ;;  %s14343_s7 = inlined_call_operand.hbm [shape: f32[1,1024], index: 7, kind: input, shape index: {}]   ;;  %s14344_s8 = inlined_call_operand.hbm [shape: f32[1,1024], index: 8, kind: input, shape index: {}]   ;;  %s14345_s9 = inlined_call_operand.hbm [shape: bf16[1024,896], index: 9, kind: input, shape index: {}]   ;;  %s14346_s10 = inlined_call_operand.hbm [shape: f32[1,896], index: 10, kind: input, shape index: {}]   ;;  %s14347_s11 = inlined_call_operand.hbm [shape: f32[4,8,896], index: 11, kind: output, shape index: {}]  }
   0x1   :  { %14371 = sst [smem:[#allocation48_spill]] %s14337_s1 }
   0x2   :  { %14372 = sst [smem:[#allocation49_spill]] %s14338_s2 }
   0x3   :  { %14373 = sst [smem:[#allocation50_spill]] %s14339_s3 }
   0x4   :  { %14374 = sst [smem:[#allocation51_spill]] %s14340_s4 }
   0x5   :  { %14375 = sst [smem:[#allocation52_spill]] %s14347_s11 }
   0x6   :  { %16 = vsyncpa [#allocation3], 0 }
   0x7   :  { %18 = vsyncpa [#allocation3 + $0x1], 0 }
   0x8   :  { %19 = vsyncpa [#allocation6], 0 }
   0x9   :  { %20 = vsyncpa [#allocation9], 0 }
   0xa   :  { %21 = vsyncpa [#allocation12], 0 }
   0xb   :  { %22 = vsyncpa [#allocation15], 0 }
   0xc   :  { %23 = vsyncpa [#allocation18], 0 }
   0xd   :  { %24 = vsyncpa [#allocation4], 0 }
   0xe   :  { %26 = vsyncpa [#allocation4 + $0x1], 0  ;;  %s12781_s17 = smov 0   ;;  %s12783_s18 = smov 0  }
   0xf   :  { %s12785_s19 = smov 0   ;;  %s12787_s20 = smov 0  }
  0x10 LB: > { %s14376_s1 = sld [smem:[#allocation48_spill]]  ;;  %s12805_s24 = sadd.s32 4294967295, %s12698_s20   ;;  %s12698_s20 = sphi %s12787_s20, %s14485_s20   ;;  %s12694_s19 = sphi %s12785_s19, %s14484_s19   ;;  %s12690_s18 = sphi %s12783_s18, %s14483_s18   ;;  %s12686_s17 = sphi %s12781_s17, %s14482_s17  }
  0x11   : > { %p8089_p0 = scmp.ge.s32.totalorder %s12698_s20, 1  ;;  %p53_p1 = scmp.eq.s32.totalorder %s12805_s24, 0 }
  0x12   : > { %p299_p2 = scmp.lt.s32.totalorder %s12698_s20, 3  ;;  %s12700_s26 = smov [#allocation5]  }
  0x13   : > { %s312_s27 = sshll.u32 %s12700_s26, 4  ;;  %s14379_s3 = sld [smem:[#allocation50_spill]]  ;;  %s313_s27 = int_to_ptr.vmem [resolvable:$true] %s312_s27 }
  0x14   : > { %p12810_p3 = pnand %p8089_p0, %p299_p2  ;;  %s12701_s13 = smov [#allocation8]  }
  0x15   : > { %s338_s14 = sshll.u32 %s12701_s13, 4  ;;  %s14350_s15 = smov 128   ;;  %s339_s14 = int_to_ptr.vmem [resolvable:$true] %s338_s14 }
  0x16   : > { %s310_s23 = sshll.u32 %s14376_s1, 4  ;;  %p12088_p4 = pneg %p12810_p3  ;;  %s311_s23 = int_to_ptr.hbm [resolvable:$true] %s310_s23 }
  0x17   : > { %s14377_s25 = scalar_select %p12810_p3, 1, 0 }
  0x18   : > { %p12822_p6 = pnand %p12088_p4, %p53_p1  ;;  %s14351_s16 = smov 8  }
  0x19   : > { %14378 = sst [smem:[#allocation28_spill]] %s14377_s25  ;;  %s336_s30 = sshll.u32 %s14379_s3, 4  ;;  %s337_s30 = int_to_ptr.hbm [resolvable:$true] %s336_s30 }
  0x1a   : > { %12091 = dma.hbm_to_vmem [thread:$0]  (!%p12822_p6), %s311_s23, 2048, %s313_s27, [#allocation6], %s14350_s15, %s14350_s15, %s14351_s16  }
  0x1b   : > { %s12704_s21 = smov 256   ;;  %s12705_s22 = smov 16  }
  0x1c   : > { %12097 = dma.hbm_to_vmem [thread:$0]  (!%p12822_p6), %s337_s30, 8192, %s339_s14, [#allocation9], %s12704_s21, %s12704_s21, %s12705_s22  }
  0x1d   : > { %s363_s29 = sshll.u32 %s14341_s5, 4  ;;  %s12706_s1 = smov [#allocation11]   ;;  %s364_s29 = int_to_ptr.hbm [resolvable:$true] %s363_s29 }
  0x1e   : > { %s365_s13 = sshll.u32 %s12706_s1, 4  ;;  %s389_s25 = sshll.u32 %s14343_s7, 4  ;;  %s366_s13 = int_to_ptr.vmem [resolvable:$true] %s365_s13  ;;  %s390_s25 = int_to_ptr.hbm [resolvable:$true] %s389_s25 }
  0x1f   : > { %12103 = dma.hbm_to_vmem [thread:$0]  (!%p12822_p6), %s364_s29, 64, %s366_s13, [#allocation12]  }
  0x20   : > { %s12707_s23 = smov [#allocation14]   ;;  %s412_s14 = sshll.u32 %s14345_s9, 4  ;;  %s413_s14 = int_to_ptr.hbm [resolvable:$true] %s412_s14 }
  0x21   : > { %s391_s27 = sshll.u32 %s12707_s23, 4  ;;  %s12708_s1 = smov [#allocation17]   ;;  %s392_s27 = int_to_ptr.vmem [resolvable:$true] %s391_s27 }
  0x22   : > { %12109 = dma.hbm_to_vmem [thread:$0]  (!%p12822_p6), %s390_s25, 128, %s392_s27, [#allocation15]  }
  0x23   : > { %s414_s21 = sshll.u32 %s12708_s1, 4  ;;  %s14381_s2 = sld [smem:[#allocation49_spill]]  ;;  %s415_s21 = int_to_ptr.vmem [resolvable:$true] %s414_s21 }
  0x24   : > { %s12709_s26 = smov 448   ;;  %s12710_s28 = smov 28  }
  0x25   : > { %12115 = dma.hbm_to_vmem [thread:$0]  (!%p12822_p6), %s413_s14, 57344, %s415_s21, [#allocation18], %s12709_s26, %s12709_s26, %s12710_s28  }
  0x26   : > { %s12711_s15 = smov [#allocation7]   ;;  %s14382_s4 = sld [smem:[#allocation51_spill]] }
  0x27   : > { %s327_s29 = sshll.u32 %s12711_s15, 4  ;;  %s374_s1 = sshll.u32 %s14342_s6, 4  ;;  %s328_s29 = int_to_ptr.vmem [resolvable:$true] %s327_s29  ;;  %s375_s1 = int_to_ptr.hbm [resolvable:$true] %s374_s1 }
  0x28   : > { %s12712_s3 = smov [#allocation10]   ;;  %s12713_s14 = smov [#allocation13]  }
  0x29   : > { %s325_s22 = sshll.u32 %s14381_s2, 4  ;;  %s353_s11 = sshll.u32 %s12712_s3, 4  ;;  %s326_s22 = int_to_ptr.hbm [resolvable:$true] %s325_s22  ;;  %s354_s11 = int_to_ptr.vmem [resolvable:$true] %s353_s11 }
  0x2a   : > { %12094 = dma.hbm_to_vmem [thread:$0]  (!%p12822_p6), %s326_s22, 32, %s328_s29, [#allocation6]  }
  0x2b   : > { %s376_s21 = sshll.u32 %s12713_s14, 4  ;;  %s12714_s26 = smov 512   ;;  %s377_s21 = int_to_ptr.vmem [resolvable:$true] %s376_s21 }
  0x2c   : > { %s351_s25 = sshll.u32 %s14382_s4, 4  ;;  %s12715_s28 = smov 32   ;;  %s352_s25 = int_to_ptr.hbm [resolvable:$true] %s351_s25 }
  0x2d   : > { %12100 = dma.hbm_to_vmem [thread:$0]  (!%p12822_p6), %s352_s25, 64, %s354_s11, [#allocation9]  }
  0x2e   : > { %12106 = dma.hbm_to_vmem [thread:$0]  (!%p12822_p6), %s375_s1, 32768, %s377_s21, [#allocation12], %s12714_s26, %s12714_s26, %s12715_s28  }
  0x2f   : > { %s401_s29 = sshll.u32 %s14344_s8, 4  ;;  %s12716_s13 = smov [#allocation16]   ;;  %s402_s29 = int_to_ptr.hbm [resolvable:$true] %s401_s29 }
  0x30   : > { %s403_s23 = sshll.u32 %s12716_s13, 4  ;;  %s427_s30 = sshll.u32 %s14346_s10, 4  ;;  %s404_s23 = int_to_ptr.vmem [resolvable:$true] %s403_s23  ;;  %s428_s30 = int_to_ptr.hbm [resolvable:$true] %s427_s30 }
  0x31   : > { %12112 = dma.hbm_to_vmem [thread:$0]  (!%p12822_p6), %s402_s29, 128, %s404_s23, [#allocation15]  }
  0x32   : > { %s12717_s1 = smov [#allocation19]   ;;  %s8088_s11 = sadd.s32 4294967294, %s12698_s20  }
  0x33   : > { %s429_s3 = sshll.u32 %s12717_s1, 4  ;;  %s12875_s14 = sadd.s32 1, %s12698_s20   ;;  %s430_s3 = int_to_ptr.vmem [resolvable:$true] %s429_s3 }
  0x34   : > { %12118 = dma.hbm_to_vmem [thread:$0]  (!%p12822_p6), %s428_s30, 112, %s430_s3, [#allocation18]  }
  0x35   : > { %s36_s21 = ssub.s32 %s12698_s20, %s12875_s14  ;;  %s39_s26 = sadd.s32 1, %s12694_s19 }
  0x36   : > { %p37_p7 = scmp.eq.s32.totalorder %s36_s21, 0  ;;  %p46_p8 = scmp.ne.s32.totalorder %s12694_s19, %s12690_s18 }
  0x37   : > { %p47_p9 = scmp.eq.s32.totalorder %s12698_s20, 0  ;;  %p52_p10 = scmp.ne.s32.totalorder %s12690_s18, %s12686_s17 }
  0x38   : > { %s12886_s28 = scalar_select %p37_p7, %s12694_s19, %s39_s26  }
  0x39   : > { %p12888_p11 = por %p47_p9, %p46_p8  ;;  %p12894_p12 = por %p53_p1, %p52_p10 }
  0x3a   : > { %p286_p13 = scmp.eq.s32.totalorder %s12805_s24, 1  ;;  %p292_p0 = scmp.eq.s32.totalorder %s8088_s11, 1 }
  0x3b   : > { %p12137_p2 = scmp.lt.s32.totalorder %s12698_s20, 2  ;;  %s440_s15 = sand.u32 1, %s12694_s19  }
  0x3c   : > { %p12901_p4 = por %p286_p13, %p46_p8  ;;  %p12905_p6 = por %p292_p0, %p52_p10 }
  0x3d   : > { %s8101_s23 = sshll.u32 %s440_s15, 4  ;;  %s11257_s25 = sshll.u32 %s12698_s20, 4 }
  0x3e   : > { %s449_s1 = scalar_lea.hbm %s14336_s0, %s11257_s25  ;;  %s444_s3 = scalar_lea.vmem [#allocation2], %s8101_s23 }
  0x3f   : > { %s452_s21 = sshll.u32 %s444_s3, 4  ;;  %s450_s26 = sshll.u32 %s449_s1, 4  ;;  %s453_s21 = int_to_ptr.vmem [resolvable:$true] %s452_s21  ;;  %s451_s26 = int_to_ptr.hbm [resolvable:$true] %s450_s26 }
  0x40   : > { %p12915_p7 = pnand %p12137_p2, %p12888_p11  ;;  %s441_s16 = scalar_lea.sflag [#allocation3], %s440_s15 }
  0x41   : > { %s12582_s2 = sshra.s32 %s451_s26, 4  ;;  %s12589_s27 = scalar_lea.hbm %s14336_s0, 32  ;;  %s12583_s2 = int_to_ptr.hbm [resolvable:$true] %s12582_s2 }
  0x42   : > { %s12584_s4 = scalar_lea.hbm %s12583_s2, 16  ;;  %p12586_p9 = pneg %p12915_p7 }
  0x43   : > { %p12585_p8 = scmp.ne.s32.totalorder %s12583_s2, %s12584_s4  ;;  %p12590_p11 = scmp.lt.s32.totalorder %s12583_s2, %s14336_s0 }
  0x44   : > { %p12591_p0 = scmp.lt.s32.totalorder %s12589_s27, %s12584_s4 }
  0x45   : > { %p12587_p10 = pnand %p12586_p9, %p12585_p8 }
  0x46   : > { %p12592_p2 = por %p12591_p0, %p12590_p11 }
  0x47   : > { %p12588_p13 = pneg %p12587_p10 }
  0x49   : > { %p12593_p5 = pnand %p12592_p2, %p12588_p13 }
  0x4b   : > { %12596 = shalt.err (!%p12593_p5)
}
  0x4c   : > { %s14388_s15 = smov 8   ;;  %s14389_s1 = smov 128  }
  0x4d   : > { %12122 = dma.hbm_to_vmem [thread:$0]  (!%p12915_p7), %s451_s26, 256, %s453_s21, %s441_s16, %s14389_s1, %s14389_s1, %s14388_s15  }
  0x4e   : > { %464 = sbr.rel (%p12810_p3) target bundleno = 1526 (0x5f6), region = 64 }
  0x53   : > { %s12935_s23 = sand.u32 1, %s12690_s18  }
  0x54   : > { %s8105_s2 = sshll.u32 %s12935_s23, 4  ;;  %s467_s4 = scalar_lea.sflag [#allocation3], %s12935_s23 }
  0x55   : > { %s12939_s25 = scalar_lea.vmem [#allocation2], %s8105_s2 }
  0x56   : > { %12657 = dma.done.wait (%p12894_p12), %s467_s4, 256  }
  0x57   : > { %12659 = vsyncadd (%p12894_p12), %s467_s4, 4294967040 }
  0x58   : > { %12661 = dma.done.wait (%p53_p1), [#allocation6], 2080  }
  0x59   : > { %12663 = vsyncadd (%p53_p1), [#allocation6], 4294965216 }
  0x5a   : > { %12665 = dma.done.wait (%p53_p1), [#allocation9], 8256  }
  0x5b   : > { %12667 = vsyncadd (%p53_p1), [#allocation9], 4294959040 }
  0x5c   : > { %12669 = dma.done.wait (%p53_p1), [#allocation12], 32832  }
  0x5d   : > { %12671 = vsyncadd (%p53_p1), [#allocation12], 4294934464 }
  0x5e   : > { %12673 = dma.done.wait (%p53_p1), [#allocation15], 256  }
  0x5f   : > { %12675 = vsyncadd (%p53_p1), [#allocation15], 4294967040 }
  0x60   : > { %12677 = dma.done.wait (%p53_p1), [#allocation18], 57456  }
  0x61   : > { %12679 = vsyncadd (%p53_p1), [#allocation18], 4294909840  ;;  %v8174_v0 = vld [vmem:[#allocation5 + $0x70] sm:$0xf]  ;;  %v11273_v1 = vld [vmem:[#allocation5 + $0x74] sm:$0xf0] }
  0x62   : > { %v11272_v2 = vld [vmem:[#allocation5 + $0x74] sm:$0xf]  ;;  %v8175_v3 = vor.u32 %v11273_v1, %v8174_v0  ;;  %v8176_v4 = vld [vmem:[#allocation5 + $0x78] sm:$0xf0]  ;;  %v8166_v5 = vld [vmem:[#allocation5 + $0x60] sm:$0xf] }
  0x63   : > { %v11271_v6 = vld [vmem:[#allocation5 + $0x64] sm:$0xf0]  ;;  %v8179_v7 = vor.u32 %v11272_v2, %v8176_v4  ;;  %v11270_v8 = vld [vmem:[#allocation5 + $0x64] sm:$0xf]  ;;  %v8168_v9 = vld [vmem:[#allocation5 + $0x68] sm:$0xf0] }
  0x64   : > { %667 = vmatpush.bf16.msra.mxu0 %v8175_v3  ;;  %v8167_v10 = vor.u32 %v11271_v6, %v8166_v5  ;;  %v8171_v11 = vor.u32 %v11270_v8, %v8168_v9  ;;  %v8158_v12 = vld [vmem:[#allocation5 + $0x50] sm:$0xf]  ;;  %v11269_v13 = vld [vmem:[#allocation5 + $0x54] sm:$0xf0]  ;;  %v11268_v14 = vld [vmem:[#allocation5 + $0x54] sm:$0xf] }
  0x65   : > { %681 = vmatpush.bf16.msra.mxu1 %v8179_v7  ;;  %v8160_v15 = vld [vmem:[#allocation5 + $0x58] sm:$0xf0]  ;;  %v8159_v16 = vor.u32 %v11269_v13, %v8158_v12  ;;  %v8150_v18 = vld [vmem:[#allocation5 + $0x40] sm:$0xf]  ;;  %v11267_v19 = vld [vmem:[#allocation5 + $0x44] sm:$0xf0] }
  0x66   : > { %v8163_v17 = vor.u32 %v11268_v14, %v8160_v15  ;;  %v11266_v20 = vld [vmem:[#allocation5 + $0x44] sm:$0xf]  ;;  %v8152_v21 = vld [vmem:[#allocation5 + $0x48] sm:$0xf0]  ;;  %v8151_v22 = vor.u32 %v11267_v19, %v8150_v18  ;;  %v8142_v23 = vld [vmem:[#allocation5 + $0x30] sm:$0xf] }
  0x67   : > { %v8294_v24 = vld [vmem:[#allocation8 + $0xe0] sm:$0xf]  ;;  %v11304_v25 = vld [vmem:[#allocation8 + $0xec] sm:$0xf0]  ;;  %v8155_v26 = vor.u32 %v11266_v20, %v8152_v21  ;;  %v11265_v27 = vld [vmem:[#allocation5 + $0x34] sm:$0xf0] }
  0x68   : > { %668 = vmatpush.bf16.msra.mxu0 %v8167_v10  ;;  %v8295_v28 = vor.u32 %v11304_v25, %v8294_v24  ;;  %v8422_v29 = vld [vmem:[#allocation8 + $0x1e0] sm:$0xf]  ;;  %v11336_v30 = vld [vmem:[#allocation8 + $0x1ec] sm:$0xf0]  ;;  %v8144_v32 = vld [vmem:[#allocation5 + $0x38] sm:$0xf0]  ;;  %v8143_v37 = vor.u32 %v11265_v27, %v8142_v23 }
  0x69   : > { %682 = vmatpush.bf16.msra.mxu1 %v8171_v11  ;;  %v11264_v31 = vld [vmem:[#allocation5 + $0x34] sm:$0xf]  ;;  %v8423_v33 = vor.u32 %v11336_v30, %v8422_v29  ;;  %v8278_v34 = vld [vmem:[#allocation8 + $0xc0] sm:$0xf]  ;;  %v11263_v39 = vld [vmem:[#allocation5 + $0x24] sm:$0xf0] }
  0x6a   : > { %1093 = vmatpush.bf16.msra.mxu2 %v8295_v28  ;;  %v11300_v35 = vld [vmem:[#allocation8 + $0xcc] sm:$0xf0]  ;;  %v8406_v36 = vld [vmem:[#allocation8 + $0x1c0] sm:$0xf]  ;;  %v8147_v42 = vor.u32 %v11264_v31, %v8144_v32  ;;  %v8136_v44 = vld [vmem:[#allocation5 + $0x28] sm:$0xf0] }
  0x6b   : > { %v8134_v38 = vld [vmem:[#allocation5 + $0x20] sm:$0xf]  ;;  %1107 = vmatpush.bf16.msra.mxu3 %v8423_v33  ;;  %v8279_v40 = vor.u32 %v11300_v35, %v8278_v34  ;;  %v11332_v41 = vld [vmem:[#allocation8 + $0x1cc] sm:$0xf0]  ;;  %v11262_v43 = vld [vmem:[#allocation5 + $0x24] sm:$0xf] }
  0x6c   : > { %669 = vmatpush.bf16.msra.mxu0 %v8159_v16  ;;  %v8407_v45 = vor.u32 %v11332_v41, %v8406_v36  ;;  %v8262_v46 = vld [vmem:[#allocation8 + $0xa0] sm:$0xf]  ;;  %v11296_v47 = vld [vmem:[#allocation8 + $0xac] sm:$0xf0]  ;;  %v8135_v51 = vor.u32 %v11263_v39, %v8134_v38  ;;  %v8139_v56 = vor.u32 %v11262_v43, %v8136_v44  ;;  %v11261_v57 = vld [vmem:[#allocation5 + $0x14] sm:$0xf0] }
  0x6d   : > { %683 = vmatpush.bf16.msra.mxu1 %v8163_v17  ;;  %v8390_v48 = vld [vmem:[#allocation8 + $0x1a0] sm:$0xf]  ;;  %v11328_v49 = vld [vmem:[#allocation8 + $0x1ac] sm:$0xf0]  ;;  %v8263_v50 = vor.u32 %v11296_v47, %v8262_v46  ;;  %v8128_v61 = vld [vmem:[#allocation5 + $0x18] sm:$0xf0] }
  0x6e   : > { %1094 = vmatpush.bf16.msra.mxu2 %v8279_v40  ;;  %v8126_v52 = vld [vmem:[#allocation5 + $0x10] sm:$0xf]  ;;  %v8391_v53 = vor.u32 %v11328_v49, %v8390_v48  ;;  %v8246_v54 = vld [vmem:[#allocation8 + $0x80] sm:$0xf]  ;;  %v11260_v60 = vld [vmem:[#allocation5 + $0x14] sm:$0xf] }
  0x6f   : > { %1108 = vmatpush.bf16.msra.mxu3 %v8407_v45  ;;  %v11292_v55 = vld [vmem:[#allocation8 + $0x8c] sm:$0xf0]  ;;  %v8374_v58 = vld [vmem:[#allocation8 + $0x180] sm:$0xf]  ;;  %v8127_v0 = vor.u32 %v11261_v57, %v8126_v52  ;;  %v11259_v1 = vld [vmem:[#allocation5 + $0x4] sm:$0xf0]  ;;  %v8131_v5 = vor.u32 %v11260_v60, %v8128_v61 }
  0x70   : > { %670 = vmatpush.bf16.msra.mxu0 %v8151_v22  ;;  %v11324_v59 = vld [vmem:[#allocation8 + $0x18c] sm:$0xf0]  ;;  %v8118_v62 = vld [vmem:[#allocation5] sm:$0xf]  ;;  %v8247_v63 = vor.u32 %v11292_v55, %v8246_v54  ;;  %v11258_v6 = vld [vmem:[#allocation5 + $0x4] sm:$0xf] }
  0x71   : > { %684 = vmatpush.bf16.msra.mxu1 %v8155_v26  ;;  %v8375_v2 = vor.u32 %v11324_v59, %v8374_v58  ;;  %v8230_v3 = vld [vmem:[#allocation8 + $0x60] sm:$0xf]  ;;  %v11288_v4 = vld [vmem:[#allocation8 + $0x6c] sm:$0xf0]  ;;  %v8120_v9 = vld [vmem:[#allocation5 + $0x8] sm:$0xf0]  ;;  %v8119_v16 = vor.u32 %v11259_v1, %v8118_v62 }
  0x72   : > { %1095 = vmatpush.bf16.msra.mxu2 %v8263_v50  ;;  %v8358_v7 = vld [vmem:[#allocation8 + $0x160] sm:$0xf]  ;;  %v11320_v8 = vld [vmem:[#allocation8 + $0x16c] sm:$0xf0]  ;;  %v11302_v10 = vld [vmem:[#allocation8 + $0xe4] sm:$0xf]  ;;  %v8231_v15 = vor.u32 %v11288_v4, %v8230_v3  ;;  %v8123_v21 = vor.u32 %v11258_v6, %v8120_v9 }
  0x73   : > { %1109 = vmatpush.bf16.msra.mxu3 %v8391_v53  ;;  %v8296_v11 = vld [vmem:[#allocation8 + $0xf0] sm:$0xf0]  ;;  %v11334_v13 = vld [vmem:[#allocation8 + $0x1e4] sm:$0xf]  ;;  %v8359_v18 = vor.u32 %v11320_v8, %v8358_v7  ;;  %v8214_v19 = vld [vmem:[#allocation8 + $0x40] sm:$0xf] }
  0x74   : > { %671 = vmatpush.bf16.msra.mxu0 %v8143_v37  ;;  %v562_v12 = vld [vmem:[%s12939_s25] sm:$0xff]  ;;  %v563_v17 = vld [vmem:[%s12939_s25 + $0x8] sm:$0xff]  ;;  %v8299_v22 = vor.u32 %v11302_v10, %v8296_v11  ;;  %vm1444_vm8 = vcmask 1040384   ;;  %vm1446_vm9 = vcmask 1042434   ;;  %s12042_s16 = smul.u32 112, %s12935_s23  ;;  %s14480_s27 = sld [smem:[#allocation52_spill]] }
  0x75   : > { %685 = vmatpush.bf16.msra.mxu1 %v8147_v42  ;;  %v8424_v14 = vld [vmem:[#allocation8 + $0x1f0] sm:$0xf0]  ;;  %v11284_v20 = vld [vmem:[#allocation8 + $0x4c] sm:$0xf0]  ;;  %v8342_v23 = vld [vmem:[#allocation8 + $0x140] sm:$0xf]  ;;  %v564_v28 = vpack.c.bf16 %v563_v17, %v562_v12 }
  0x76   : > { %1096 = vmatpush.bf16.msra.mxu2 %v8247_v63  ;;  %v11316_v24 = vld [vmem:[#allocation8 + $0x14c] sm:$0xf0]  ;;  %v8427_v25 = vor.u32 %v11334_v13, %v8424_v14  ;;  %v11298_v26 = vld [vmem:[#allocation8 + $0xc4] sm:$0xf]  ;;  %v8280_v27 = vld [vmem:[#allocation8 + $0xd0] sm:$0xf0]  ;;  %v8215_v31 = vor.u32 %v11284_v20, %v8214_v19 }
  0x77   : > { %1110 = vmatpush.bf16.msra.mxu3 %v8375_v2  ;;  %v11330_v29 = vld [vmem:[#allocation8 + $0x1c4] sm:$0xf]  ;;  %v8408_v30 = vld [vmem:[#allocation8 + $0x1d0] sm:$0xf0]  ;;  %v8343_v32 = vor.u32 %v11316_v24, %v8342_v23  ;;  %v8198_v33 = vld [vmem:[#allocation8 + $0x20] sm:$0xf]  ;;  %v8283_v35 = vor.u32 %v11298_v26, %v8280_v27 }
  0x78   : > { %672 = vmatpush.bf16.msra.mxu0 %v8135_v51  ;;  %v11280_v34 = vld [vmem:[#allocation8 + $0x2c] sm:$0xf0]  ;;  %v8326_v36 = vld [vmem:[#allocation8 + $0x120] sm:$0xf]  ;;  %v8411_v38 = vor.u32 %v11330_v29, %v8408_v30  ;;  %v11294_v39 = vld [vmem:[#allocation8 + $0xa4] sm:$0xf] }
  0x79   : > { %686 = vmatpush.bf16.msra.mxu1 %v8139_v56  ;;  %v11312_v37 = vld [vmem:[#allocation8 + $0x12c] sm:$0xf0]  ;;  %v8264_v40 = vld [vmem:[#allocation8 + $0xb0] sm:$0xf0]  ;;  %v11326_v41 = vld [vmem:[#allocation8 + $0x1a4] sm:$0xf]  ;;  %v8199_v43 = vor.u32 %v11280_v34, %v8198_v33 }
  0x7a   : > { %1097 = vmatpush.bf16.msra.mxu2 %v8231_v15  ;;  %v8392_v42 = vld [vmem:[#allocation8 + $0x1b0] sm:$0xf0]  ;;  %v8327_v44 = vor.u32 %v11312_v37, %v8326_v36  ;;  %v8267_v45 = vor.u32 %v11294_v39, %v8264_v40  ;;  %v11290_v47 = vld [vmem:[#allocation8 + $0x84] sm:$0xf]  ;;  %v8182_v7 = vld [vmem:[#allocation8] sm:$0xf] }
  0x7b   : > { %1111 = vmatpush.bf16.msra.mxu3 %v8359_v18  ;;  %v8395_v46 = vor.u32 %v11326_v41, %v8392_v42  ;;  %v8248_v48 = vld [vmem:[#allocation8 + $0x90] sm:$0xf0]  ;;  %v11322_v49 = vld [vmem:[#allocation8 + $0x184] sm:$0xf]  ;;  %v11276_v8 = vld [vmem:[#allocation8 + $0xc] sm:$0xf0] }
  0x7c   : > { %673 = vmatpush.bf16.msra.mxu0 %v8127_v0  ;;  %v8376_v50 = vld [vmem:[#allocation8 + $0x190] sm:$0xf0]  ;;  %v8251_v51 = vor.u32 %v11290_v47, %v8248_v48  ;;  %v11286_v53 = vld [vmem:[#allocation8 + $0x64] sm:$0xf]  ;;  %v8310_v9 = vld [vmem:[#allocation8 + $0x100] sm:$0xf]  ;;  %v8183_v10 = vor.u32 %v11276_v8, %v8182_v7 }
  0x7d   : > { %687 = vmatpush.bf16.msra.mxu1 %v8131_v5  ;;  %v8379_v52 = vor.u32 %v11322_v49, %v8376_v50  ;;  %v8232_v54 = vld [vmem:[#allocation8 + $0x70] sm:$0xf0]  ;;  %v11318_v55 = vld [vmem:[#allocation8 + $0x164] sm:$0xf]  ;;  %v11308_v11 = vld [vmem:[#allocation8 + $0x10c] sm:$0xf0] }
  0x7e   : > { %1098 = vmatpush.bf16.msra.mxu2 %v8215_v31  ;;  %v8360_v56 = vld [vmem:[#allocation8 + $0x170] sm:$0xf0]  ;;  %v8235_v57 = vor.u32 %v11286_v53, %v8232_v54  ;;  %v11282_v59 = vld [vmem:[#allocation8 + $0x44] sm:$0xf]  ;;  %v8311_v14 = vor.u32 %v11308_v11, %v8310_v9  ;;  %v8302_v19 = vld [vmem:[#allocation8 + $0xe8] sm:$0xf] }
  0x7f   : > { %1112 = vmatpush.bf16.msra.mxu3 %v8343_v32  ;;  %v8363_v58 = vor.u32 %v11318_v55, %v8360_v56  ;;  %v8216_v60 = vld [vmem:[#allocation8 + $0x50] sm:$0xf0]  ;;  %v11314_v61 = vld [vmem:[#allocation8 + $0x144] sm:$0xf]  ;;  %v11305_v20 = vld [vmem:[#allocation8 + $0xf4] sm:$0xf0] }
  0x80   : > { %674 = vmatpush.bf16.msra.mxu0 %v8119_v16  ;;  %v8344_v62 = vld [vmem:[#allocation8 + $0x150] sm:$0xf0]  ;;  %v8219_v63 = vor.u32 %v11282_v59, %v8216_v60  ;;  %v11278_v1 = vld [vmem:[#allocation8 + $0x24] sm:$0xf]  ;;  %v11337_v23 = vld [vmem:[#allocation8 + $0x1f4] sm:$0xf0] }
  0x81   : > { %688 = vmatpush.bf16.msra.mxu1 %v8123_v21  ;;  %v8347_v0 = vor.u32 %v11314_v61, %v8344_v62  ;;  %v8200_v2 = vld [vmem:[#allocation8 + $0x30] sm:$0xf0]  ;;  %v11310_v3 = vld [vmem:[#allocation8 + $0x124] sm:$0xf]  ;;  %v8430_v21 = vld [vmem:[#allocation8 + $0x1e8] sm:$0xf] }
  0x82   : > { %1099 = vmatpush.bf16.msra.mxu2 %v8199_v43  ;;  %v8328_v4 = vld [vmem:[#allocation8 + $0x130] sm:$0xf0]  ;;  %v8203_v5 = vor.u32 %v11278_v1, %v8200_v2  ;;  %v11274_v12 = vld [vmem:[#allocation8 + $0x4] sm:$0xf]  ;;  %v11303_v24 = vld [vmem:[#allocation8 + $0xec] sm:$0xf]  ;;  %v8431_v26 = vor.u32 %v11337_v23, %v8430_v21 }
  0x83   : > { %675 = vmatmul.bf16.vlgmr.msra.gmra.mxu0 %v564_v28  ;;  %1113 = vmatpush.bf16.msra.mxu3 %v8327_v44  ;;  %v8331_v6 = vor.u32 %v11310_v3, %v8328_v4  ;;  %v8184_v13 = vld [vmem:[#allocation8 + $0x10] sm:$0xf0]  ;;  %v11306_v16 = vld [vmem:[#allocation8 + $0x104] sm:$0xf]  ;;  %v8432_v29 = vld [vmem:[#allocation8 + $0x1f8] sm:$0xf0] }
  0x84   : > { %1121 = vmatpush.bf16.msrb.mxu0 %v8299_v22  ;;  %689 = vmatmul.bf16.vlgmr.msra.gmra.mxu1 %v564_v28  ;;  %v8187_v15 = vor.u32 %v11274_v12, %v8184_v13  ;;  %v8312_v17 = vld [vmem:[#allocation8 + $0x110] sm:$0xf0]  ;;  %v8303_v22 = vor.u32 %v11305_v20, %v8302_v19  ;;  %v11335_v28 = vld [vmem:[#allocation8 + $0x1ec] sm:$0xf]  ;;  %v8286_v30 = vld [vmem:[#allocation8 + $0xc8] sm:$0xf] }
  0x85   : > { %1135 = vmatpush.bf16.msrb.mxu1 %v8427_v25  ;;  %v8315_v18 = vor.u32 %v11306_v16, %v8312_v17  ;;  %v8304_v25 = vld [vmem:[#allocation8 + $0xf8] sm:$0xf0]  ;;  %v8435_v31 = vor.u32 %v11335_v28, %v8432_v29  ;;  %v11301_v32 = vld [vmem:[#allocation8 + $0xd4] sm:$0xf0]  ;;  %v8414_v33 = vld [vmem:[#allocation8 + $0x1c8] sm:$0xf] }
  0x86   : > { %1100 = vmatpush.bf16.msra.mxu2 %v8183_v10  ;;  %v8307_v27 = vor.u32 %v11303_v24, %v8304_v25  ;;  %v11333_v34 = vld [vmem:[#allocation8 + $0x1d4] sm:$0xf0]  ;;  %v11299_v37 = vld [vmem:[#allocation8 + $0xcc] sm:$0xf]  ;;  %v8416_v41 = vld [vmem:[#allocation8 + $0x1d8] sm:$0xf0] }
  0x87   : > { %1114 = vmatpush.bf16.msra.mxu3 %v8311_v14  ;;  %v8415_v36 = vor.u32 %v11333_v34, %v8414_v33  ;;  %v11331_v39 = vld [vmem:[#allocation8 + $0x1cc] sm:$0xf]  ;;  %v8270_v43 = vld [vmem:[#allocation8 + $0xa8] sm:$0xf]  ;;  %v11297_v44 = vld [vmem:[#allocation8 + $0xb4] sm:$0xf0] }
  0x88   : > { %1122 = vmatpush.bf16.msrb.mxu0 %v8283_v35  ;;  %v8287_v35 = vor.u32 %v11301_v32, %v8286_v30  ;;  %v8419_v42 = vor.u32 %v11331_v39, %v8416_v41  ;;  %v11329_v47 = vld [vmem:[#allocation8 + $0x1b4] sm:$0xf0]  ;;  %v11295_v48 = vld [vmem:[#allocation8 + $0xac] sm:$0xf]  ;;  %v8272_v49 = vld [vmem:[#allocation8 + $0xb8] sm:$0xf0] }
  0x89   : > { %1136 = vmatpush.bf16.msrb.mxu1 %v8411_v38  ;;  %v8288_v38 = vld [vmem:[#allocation8 + $0xd8] sm:$0xf0]  ;;  %v8254_v55 = vld [vmem:[#allocation8 + $0x88] sm:$0xf]  ;;  %v11293_v56 = vld [vmem:[#allocation8 + $0x94] sm:$0xf0] }
  0x8a   : > { %1149 = vmatpush.bf16.msrb.mxu2 %v8303_v22  ;;  %v8291_v40 = vor.u32 %v11299_v37, %v8288_v38  ;;  %v8400_v53 = vld [vmem:[#allocation8 + $0x1b8] sm:$0xf0]  ;;  %v11325_v59 = vld [vmem:[#allocation8 + $0x194] sm:$0xf0]  ;;  %v11291_v60 = vld [vmem:[#allocation8 + $0x8c] sm:$0xf] }
  0x8b   : > { %1163 = vmatpush.bf16.msrb.mxu3 %v8431_v26  ;;  %v8256_v61 = vld [vmem:[#allocation8 + $0x98] sm:$0xf0]  ;;  %v8238_v3 = vld [vmem:[#allocation8 + $0x68] sm:$0xf]  ;;  %v11289_v4 = vld [vmem:[#allocation8 + $0x74] sm:$0xf0] }
  0x8c   : > { %1123 = vmatpush.bf16.msrb.mxu0 %v8267_v45  ;;  %v8398_v45 = vld [vmem:[#allocation8 + $0x1a8] sm:$0xf]  ;;  %v8384_v1 = vld [vmem:[#allocation8 + $0x198] sm:$0xf0]  ;;  %v11321_v7 = vld [vmem:[#allocation8 + $0x174] sm:$0xf0] }
  0x8d   : > { %1137 = vmatpush.bf16.msrb.mxu1 %v8395_v46  ;;  %v8271_v46 = vor.u32 %v11297_v44, %v8270_v43  ;;  %v8399_v50 = vor.u32 %v11329_v47, %v8398_v45  ;;  %v11287_v8 = vld [vmem:[#allocation8 + $0x6c] sm:$0xf]  ;;  %v8240_v9 = vld [vmem:[#allocation8 + $0x78] sm:$0xf0]  ;;  %v8222_v14 = vld [vmem:[#allocation8 + $0x48] sm:$0xf] }
  0x8e   : > { %1150 = vmatpush.bf16.msrb.mxu2 %v8287_v35  ;;  %v8243_v11 = vor.u32 %v11287_v8, %v8240_v9  ;;  %v11319_v12 = vld [vmem:[#allocation8 + $0x16c] sm:$0xf]  ;;  %v8368_v13 = vld [vmem:[#allocation8 + $0x178] sm:$0xf0]  ;;  %v11285_v16 = vld [vmem:[#allocation8 + $0x54] sm:$0xf0] }
  0x8f   : > { %1164 = vmatpush.bf16.msrb.mxu3 %v8415_v36  ;;  %v8350_v17 = vld [vmem:[#allocation8 + $0x148] sm:$0xf]  ;;  %v11283_v19 = vld [vmem:[#allocation8 + $0x4c] sm:$0xf]  ;;  %v8224_v20 = vld [vmem:[#allocation8 + $0x58] sm:$0xf0]  ;;  %v8223_v22 = vor.u32 %v11285_v16, %v8222_v14 }
  0x90   : > { %1124 = vmatpush.bf16.msrb.mxu0 %v8251_v51  ;;  %v8275_v51 = vor.u32 %v11295_v48, %v8272_v49  ;;  %v11315_v21 = vld [vmem:[#allocation8 + $0x14c] sm:$0xf]  ;;  %v8352_v23 = vld [vmem:[#allocation8 + $0x158] sm:$0xf0]  ;;  %v8227_v25 = vor.u32 %v11283_v19, %v8224_v20  ;;  %v8206_v26 = vld [vmem:[#allocation8 + $0x28] sm:$0xf] }
  0x91   : > { %1138 = vmatpush.bf16.msrb.mxu1 %v8379_v52  ;;  %v11327_v52 = vld [vmem:[#allocation8 + $0x1ac] sm:$0xf]  ;;  %v8334_v28 = vld [vmem:[#allocation8 + $0x128] sm:$0xf]  ;;  %v8355_v29 = vor.u32 %v11315_v21, %v8352_v23  ;;  %v11313_v30 = vld [vmem:[#allocation8 + $0x134] sm:$0xf0] }
  0x92   : > { %v8403_v54 = vor.u32 %v11327_v52, %v8400_v53  ;;  %1151 = vmatpush.bf16.msrb.mxu2 %v8271_v46  ;;  %v8208_v32 = vld [vmem:[#allocation8 + $0x38] sm:$0xf0]  ;;  %v11311_v33 = vld [vmem:[#allocation8 + $0x12c] sm:$0xf]  ;;  %v8335_v36 = vor.u32 %v11313_v30, %v8334_v28  ;;  %v8190_v38 = vld [vmem:[#allocation8 + $0x8] sm:$0xf] }
  0x93   : > { %1165 = vmatpush.bf16.msrb.mxu3 %v8399_v50  ;;  %v8336_v34 = vld [vmem:[#allocation8 + $0x138] sm:$0xf0]  ;;  %v11277_v39 = vld [vmem:[#allocation8 + $0x14] sm:$0xf0]  ;;  %v11275_v43 = vld [vmem:[#allocation8 + $0xc] sm:$0xf] }
  0x94   : > { %1125 = vmatpush.bf16.msrb.mxu0 %v8235_v57  ;;  %v8382_v57 = vld [vmem:[#allocation8 + $0x188] sm:$0xf]  ;;  %v8339_v41 = vor.u32 %v11311_v33, %v8336_v34  ;;  %v8192_v44 = vld [vmem:[#allocation8 + $0x18] sm:$0xf0]  ;;  %v11307_v45 = vld [vmem:[#allocation8 + $0x10c] sm:$0xf]  ;;  %v8191_v47 = vor.u32 %v11277_v39, %v8190_v38 }
  0x95   : > { %1139 = vmatpush.bf16.msrb.mxu1 %v8363_v58  ;;  %v8255_v58 = vor.u32 %v11293_v56, %v8254_v55  ;;  %v8383_v62 = vor.u32 %v11325_v59, %v8382_v57  ;;  %v8320_v46 = vld [vmem:[#allocation8 + $0x118] sm:$0xf0]  ;;  %v8195_v49 = vor.u32 %v11275_v43, %v8192_v44  ;;  %v12718_v8 = vmov 8.0   ;;  %s14239_s12 = scalar_lea.vmem [#allocation20], %s12042_s16  ;;  %s12043_s21 = smul.u32 112, %s12805_s24 }
  0x96   : > { %v581_v50 = vld [vmem:[#allocation7] sm:$0x3]  ;;  %12202 = vrcp.f32 %v12718_v8  ;;  %s7917_s22 = sshll.u32 %s14239_s12, 4  ;;  %s7904_s1 = scalar_lea.sflag [#allocation4], %s12935_s23  ;;  %s7918_s22 = int_to_ptr.vmem [resolvable:$true] %s7917_s22 }
  0x97   : > { %1152 = vmatpush.bf16.msrb.mxu2 %v8255_v58  ;;  %1166 = vmatpush.bf16.msrb.mxu3 %v8383_v62  ;;  %v583_v53 = vperm.slane %v581_v50, 0  ;;  %v584_v55 = vperm.slane %v581_v50, 1  ;;  %s7916_s30 = scalar_lea.hbm %s14480_s27, %s12043_s21  ;;  %s12632_s25 = scalar_lea.hbm %s14480_s27, 224 }
  0x98   : > { %1126 = vmatpush.bf16.msrb.mxu0 %v8219_v63  ;;  %v8259_v63 = vor.u32 %v11291_v60, %v8256_v61  ;;  %s7919_s15 = sshll.u32 %s7916_s30, 4  ;;  %s7920_s15 = int_to_ptr.hbm [resolvable:$true] %s7919_s15 }
  0x99   : > { %1140 = vmatpush.bf16.msrb.mxu1 %v8347_v0  ;;  %v11323_v0 = vld [vmem:[#allocation8 + $0x18c] sm:$0xf]  ;;  %s12626_s3 = sshra.s32 %s7920_s15, 4  ;;  %s12627_s3 = int_to_ptr.hbm [resolvable:$true] %s12626_s3 }
  0x9a   : > { %v8387_v2 = vor.u32 %v11323_v0, %v8384_v1  ;;  %s12628_s24 = scalar_lea.hbm %s12627_s3, 112  ;;  %p12633_p12 = scmp.lt.s32.totalorder %s12627_s3, %s14480_s27 }
  0x9b   : > { %p12629_p1 = scmp.ne.s32.totalorder %s12627_s3, %s12628_s24  ;;  %p12634_p7 = scmp.lt.s32.totalorder %s12632_s25, %s12628_s24 }
  0x9c   : > { %1127 = vmatpush.bf16.msrb.mxu0 %v8203_v5  ;;  %v8366_v5 = vld [vmem:[#allocation8 + $0x168] sm:$0xf]  ;;  %v12203_v9 = vpop.eup %12202 }
  0x9d   : > { %1141 = vmatpush.bf16.msrb.mxu1 %v8331_v6  ;;  %v8239_v6 = vor.u32 %v11289_v4, %v8238_v3  ;;  %v8367_v10 = vor.u32 %v11321_v7, %v8366_v5  ;;  %vm1260_vm4 = vweird.f32 %v12203_v9  ;;  %p12630_p3 = pnand %p12629_p1, %p12901_p4  ;;  %p12635_p8 = por %p12634_p7, %p12633_p12 }
  0x9f   : > { %1153 = vmatpush.bf16.msrb.mxu2 %v8239_v6  ;;  %1167 = vmatpush.bf16.msrb.mxu3 %v8367_v10  ;;  %v1256_v10 = vmul.f32 8.0, %v12203_v9  ;;  %p12631_p5 = pneg %p12630_p3 }
  0xa0   : > { %1128 = vmatpush.bf16.msrb.mxu0 %v8187_v15  ;;  %v8371_v15 = vor.u32 %v11319_v12, %v8368_v13 }
  0xa1   : > { %1142 = vmatpush.bf16.msrb.mxu1 %v8315_v18  ;;  %v11317_v18 = vld [vmem:[#allocation8 + $0x154] sm:$0xf0]  ;;  %v1257_v13 = vsub.f32 1.0, %v1256_v10  ;;  %p12636_p9 = pnand %p12635_p8, %p12631_p5 }
  0xa2   : > { %v8351_v24 = vor.u32 %v11317_v18, %v8350_v17 }
  0xa3   : > { %1154 = vmatpush.bf16.msrb.mxu2 %v8223_v22  ;;  %v1258_v16 = vmul.f32 %v12203_v9, %v1257_v13 }
  0xa4   : > { %1177 = vmatpush.bf16.msra.mxu0 %v8307_v27  ;;  %v11281_v27 = vld [vmem:[#allocation8 + $0x34] sm:$0xf0]  ;;  %1168 = vmatpush.bf16.msrb.mxu3 %v8351_v24 }
  0xa5   : > { %1191 = vmatpush.bf16.msra.mxu1 %v8435_v31  ;;  %v11279_v31 = vld [vmem:[#allocation8 + $0x2c] sm:$0xf]  ;;  %v8207_v35 = vor.u32 %v11281_v27, %v8206_v26  ;;  %v1259_v23 = vadd.f32 %v12203_v9, %v1258_v16 }
  0xa6   : > { %v8211_v37 = vor.u32 %v11279_v31, %v8208_v32 }
  0xa7   : > { %1155 = vmatpush.bf16.msrb.mxu2 %v8207_v35  ;;  %v12978_v31 = vsel %vm1260_vm4, %v12203_v9, %v1259_v23 }
  0xa8   : > { %1178 = vmatpush.bf16.msra.mxu0 %v8291_v40  ;;  %v8318_v40 = vld [vmem:[#allocation8 + $0x108] sm:$0xf]  ;;  %1169 = vmatpush.bf16.msrb.mxu3 %v8335_v36 }
  0xa9   : > { %1192 = vmatpush.bf16.msra.mxu1 %v8419_v42  ;;  %v11309_v42 = vld [vmem:[#allocation8 + $0x114] sm:$0xf0] }
  0xaa   : > { %v8319_v48 = vor.u32 %v11309_v42, %v8318_v40 }
  0xab   : > { %1156 = vmatpush.bf16.msrb.mxu2 %v8191_v47 }
  0xac   : > { %1179 = vmatpush.bf16.msra.mxu0 %v8275_v51  ;;  %v8323_v51 = vor.u32 %v11307_v45, %v8320_v46  ;;  %1170 = vmatpush.bf16.msrb.mxu3 %v8319_v48 }
  0xad   : > { %1193 = vmatpush.bf16.msra.mxu1 %v8403_v54 }
  0xb0   : > { %1180 = vmatpush.bf16.msra.mxu0 %v8259_v63 }
  0xb1   : > { %1194 = vmatpush.bf16.msra.mxu1 %v8387_v2 }
  0xb4   : > { %1181 = vmatpush.bf16.msra.mxu0 %v8243_v11 }
  0xb5   : > { %1195 = vmatpush.bf16.msra.mxu1 %v8371_v15 }
  0xb8   : > { %1182 = vmatpush.bf16.msra.mxu0 %v8227_v25 }
  0xb9   : > { %1196 = vmatpush.bf16.msra.mxu1 %v8355_v29 }
  0xbc   : > { %1183 = vmatpush.bf16.msra.mxu0 %v8211_v37 }
  0xbd   : > { %1197 = vmatpush.bf16.msra.mxu1 %v8339_v41 }
  0xc0   : > { %1184 = vmatpush.bf16.msra.mxu0 %v8195_v49 }
  0xc1   : > { %1198 = vmatpush.bf16.msra.mxu1 %v8323_v51 }
 0x100   : > { %v676_v52 = vpop.f32.mrf.mxu0 }
 0x101   : > { %v690_v54 = vpop.f32.mrf.mxu1  ;;  %v677_v56 = vadd.f32 %v676_v52, %v583_v53 }
 0x102   : > { %v691_v57 = vadd.f32 %v690_v54, %v584_v55 }
 0x103   : > { %v699_v59 = vmul.f32 0.2, %v677_v56  ;;  %vm695_vm0 = vcmp.gt.f32.partialorder %v677_v56, 0.0 }
 0x104   : > { %v700_v62 = vmul.f32 0.2, %v691_v57  ;;  %vm696_vm1 = vcmp.gt.f32.partialorder %v691_v57, 0.0 }
 0x105   : > { %v703_v2 = vsel %vm695_vm0, %v677_v56, %v699_v59 }
 0x106   : > { %v704_v4 = vsel %vm696_vm1, %v691_v57, %v700_v62 }
 0x108   : > { %v678_v58 = vpop.f32.mrf.mxu0 }
 0x109   : > { %v679_v60 = vadd.f32 %v678_v58, %v583_v53  ;;  %v692_v61 = vpop.f32.mrf.mxu1 }
 0x10a   : > { %v693_v63 = vadd.f32 %v692_v61, %v584_v55 }
 0x10b   : > { %vm697_vm2 = vcmp.gt.f32.partialorder %v679_v60, 0.0  ;;  %v701_v0 = vmul.f32 0.2, %v679_v60 }
 0x10c   : > { %vm698_vm3 = vcmp.gt.f32.partialorder %v693_v63, 0.0  ;;  %v702_v1 = vmul.f32 0.2, %v693_v63 }
 0x10d   : > { %v705_v3 = vsel %vm697_vm2, %v679_v60, %v701_v0 }
 0x10e   : > { %v707_v5 = vpack.c.bf16 %v705_v3, %v703_v2  ;;  %v706_v6 = vsel %vm698_vm3, %v693_v63, %v702_v1  ;;  %vm1448_vm3 = vcmask 1041408  }
 0x10f   : > { %v708_v7 = vpack.c.bf16 %v706_v6, %v704_v4 }
 0x110   : > { %1101 = vmatmul.bf16.vlgmr.msra.gmra.mxu2 %v707_v5  ;;  %1129 = vmatmul.bf16.vlgmr.msrb.gmra.mxu0 %v707_v5 }
 0x111   : > { %1115 = vmatmul.bf16.vlgmr.msra.gmra.mxu3 %v708_v7  ;;  %1143 = vmatmul.bf16.vlgmr.msrb.gmra.mxu1 %v708_v7 }
 0x120   : > { %1157 = vmatmul.bf16.vlgmr.msrb.gmra.mxu2 %v707_v5  ;;  %1185 = vmatmul.bf16.vlgmr.msra.gmra.mxu0 %v707_v5 }
 0x121   : > { %1171 = vmatmul.bf16.vlgmr.msrb.gmra.mxu3 %v708_v7  ;;  %1199 = vmatmul.bf16.vlgmr.msra.gmra.mxu1 %v708_v7 }
 0x18d   : > { %v1130_v11 = vpop.f32.mrf.mxu0 }
 0x18e   : > { %v1144_v12 = vpop.f32.mrf.mxu1 }
 0x18f   : > { %v12967_v14 = vadd.f32 %v1144_v12, %v1130_v11 }
 0x191   : > { %v1213_v15 = vrot.slane %v12967_v14, 4 }
 0x193   : > { %v1214_v17 = vadd.f32 %v1213_v15, %v12967_v14  ;;  %v1102_v18 = vpop.f32.mrf.mxu2 }
 0x194   : > { %v1116_v19 = vpop.f32.mrf.mxu3 }
 0x195   : > { %v1215_v20 = vrot.slane %v1214_v17, 2  ;;  %v12971_v21 = vadd.f32 %v1116_v19, %v1102_v18  ;;  %v1132_v22 = vpop.f32.mrf.mxu0 }
 0x196   : > { %v1146_v24 = vpop.f32.mrf.mxu1 }
 0x197   : > { %v1216_v25 = vadd.f32 %v1215_v20, %v1214_v17  ;;  %v1207_v26 = vrot.slane %v12971_v21, 4  ;;  %v12974_v27 = vadd.f32 %v1146_v24, %v1132_v22 }
 0x199   : > { %v1217_v28 = vrot.slane %v1216_v25, 1  ;;  %v1208_v29 = vadd.f32 %v1207_v26, %v12971_v21  ;;  %v1237_v30 = vrot.slane %v12974_v27, 4 }
 0x19b   : > { %v1218_v32 = vadd.f32 %v1217_v28, %v1216_v25  ;;  %v1209_v33 = vrot.slane %v1208_v29, 2  ;;  %v1238_v34 = vadd.f32 %v1237_v30, %v12974_v27  ;;  %v1104_v35 = vpop.f32.mrf.mxu2 }
 0x19c   : > { %v1118_v36 = vpop.f32.mrf.mxu3 }
 0x19d   : > { %v12982_v37 = vmul.f32 %v12978_v31, %v1218_v32  ;;  %v1210_v38 = vadd.f32 %v1209_v33, %v1208_v29  ;;  %v1239_v39 = vrot.slane %v1238_v34, 2  ;;  %v12984_v40 = vadd.f32 %v1118_v36, %v1104_v35  ;;  %v1186_v41 = vpop.f32.mrf.mxu0 }
 0x19e   : > { %v1200_v42 = vpop.f32.mrf.mxu1 }
 0x19f   : > { %v1271_v43 = vsub.f32 %v12967_v14, %v12982_v37  ;;  %v1211_v44 = vrot.slane %v1210_v38, 1  ;;  %v1240_v45 = vadd.f32 %v1239_v39, %v1238_v34  ;;  %v1231_v46 = vrot.slane %v12984_v40, 4 }
 0x1a0   : > { %v12989_v47 = vadd.f32 %v1200_v42, %v1186_v41 }
 0x1a1   : > { %v1279_v48 = vmul.f32 %v1271_v43, %v1271_v43  ;;  %v1212_v49 = vadd.f32 %v1211_v44, %v1210_v38  ;;  %v1241_v50 = vrot.slane %v1240_v45, 1  ;;  %v1232_v51 = vadd.f32 %v1231_v46, %v12984_v40 }
 0x1a2   : > { %v1225_v52 = vrot.slane %v12989_v47, 4 }
 0x1a3   : > { %v1292_v53 = vrot.slane %v1279_v48, 4  ;;  %v12994_v54 = vmul.f32 %v12978_v31, %v1212_v49  ;;  %v1242_v55 = vadd.f32 %v1241_v50, %v1240_v45  ;;  %v1233_v56 = vrot.slane %v1232_v51, 2  ;;  %v1158_v57 = vpop.f32.mrf.mxu2 }
 0x1a4   : > { %v1226_v58 = vadd.f32 %v1225_v52, %v12989_v47  ;;  %v1172_v59 = vpop.f32.mrf.mxu3 }
 0x1a5   : > { %v1293_v60 = vadd.f32 %v1292_v53, %v1279_v48  ;;  %v1270_v61 = vsub.f32 %v12971_v21, %v12994_v54  ;;  %v13000_v62 = vmul.f32 %v12978_v31, %v1242_v55  ;;  %v1234_v63 = vadd.f32 %v1233_v56, %v1232_v51  ;;  %v1188_v0 = vpop.f32.mrf.mxu0 }
 0x1a6   : > { %v1227_v1 = vrot.slane %v1226_v58, 2  ;;  %v13002_v2 = vadd.f32 %v1172_v59, %v1158_v57  ;;  %v1202_v3 = vpop.f32.mrf.mxu1  ;;  %v11398_v59 = vld [vmem:[#allocation13 + $0x1dc] sm:$0xf0] }
 0x1a7   : > { %v1294_v4 = vrot.slane %v1293_v60, 2  ;;  %v1278_v5 = vmul.f32 %v1270_v61, %v1270_v61  ;;  %v1275_v6 = vsub.f32 %v12974_v27, %v13000_v62  ;;  %v1235_v7 = vrot.slane %v1234_v63, 1 }
 0x1a8   : > { %v1228_v8 = vadd.f32 %v1227_v1, %v1226_v58  ;;  %v1219_v9 = vrot.slane %v13002_v2, 4  ;;  %v13007_v10 = vadd.f32 %v1202_v3, %v1188_v0  ;;  %v8662_v58 = vld [vmem:[#allocation13 + $0x1c0] sm:$0xf] }
 0x1a9   : > { %v1295_v11 = vadd.f32 %v1294_v4, %v1293_v60  ;;  %v1286_v12 = vrot.slane %v1278_v5, 4  ;;  %v1283_v13 = vmul.f32 %v1275_v6, %v1275_v6  ;;  %v1236_v15 = vadd.f32 %v1235_v7, %v1234_v63  ;;  %v11462_v6 = vld [vmem:[#allocation13 + $0x3dc] sm:$0xf0] }
 0x1aa   : > { %v1229_v16 = vrot.slane %v1228_v8, 1  ;;  %v1220_v17 = vadd.f32 %v1219_v9, %v13002_v2  ;;  %v1249_v18 = vrot.slane %v13007_v10, 4 }
 0x1ab   : > { %v1296_v19 = vrot.slane %v1295_v11, 1  ;;  %v1287_v20 = vadd.f32 %v1286_v12, %v1278_v5  ;;  %v1316_v22 = vrot.slane %v1283_v13, 4  ;;  %v13012_v23 = vmul.f32 %v12978_v31, %v1236_v15  ;;  %v1160_v24 = vpop.f32.mrf.mxu2  ;;  %v8918_v5 = vld [vmem:[#allocation13 + $0x3c0] sm:$0xf] }
 0x1ac   : > { %v1230_v25 = vadd.f32 %v1229_v16, %v1228_v8  ;;  %v1221_v26 = vrot.slane %v1220_v17, 2  ;;  %v1250_v28 = vadd.f32 %v1249_v18, %v13007_v10  ;;  %v1174_v29 = vpop.f32.mrf.mxu3  ;;  %v8919_v18 = vor.u32 %v11462_v6, %v8918_v5  ;;  %v8886_v5 = vld [vmem:[#allocation13 + $0x380] sm:$0xf] }
 0x1ad   : > { %v1297_v30 = vadd.f32 %v1296_v19, %v1295_v11  ;;  %v1288_v32 = vrot.slane %v1287_v20, 2  ;;  %v1317_v33 = vadd.f32 %v1316_v22, %v1283_v13  ;;  %v1274_v34 = vsub.f32 %v12984_v40, %v13012_v23  ;;  %v11454_v6 = vld [vmem:[#allocation13 + $0x39c] sm:$0xf0] }
 0x1ae   : > { %v13018_v35 = vmul.f32 %v12978_v31, %v1230_v25  ;;  %v1222_v36 = vadd.f32 %v1221_v26, %v1220_v17  ;;  %v1251_v38 = vrot.slane %v1250_v28, 2  ;;  %v13020_v39 = vadd.f32 %v1174_v29, %v1160_v24  ;;  %3119 = vmatpush.bf16.msra.mxu3 %v8919_v18  ;;  %v9398_v18 = vld [vmem:[#allocation13 + $0x780] sm:$0xf] }
 0x1af   : > { %v1335_v41 = vmul.f32 %v1297_v30, %v12978_v31  ;;  %v1289_v42 = vadd.f32 %v1288_v32, %v1287_v20  ;;  %v1318_v43 = vrot.slane %v1317_v33, 2  ;;  %v1282_v44 = vmul.f32 %v1274_v34, %v1274_v34  ;;  %v9174_v32 = vld [vmem:[#allocation13 + $0x5c0] sm:$0xf] }
 0x1b0   : > { %v1273_v45 = vsub.f32 %v12989_v47, %v13018_v35  ;;  %v1223_v46 = vrot.slane %v1222_v36, 1  ;;  %v1252_v48 = vadd.f32 %v1251_v38, %v1250_v28  ;;  %v1243_v49 = vrot.slane %v13020_v39, 4 }
 0x1b1   : > { %v1290_v50 = vrot.slane %v1289_v42, 1  ;;  %v1319_v51 = vadd.f32 %v1318_v43, %v1317_v33  ;;  %v1310_v52 = vrot.slane %v1282_v44, 4  ;;  %v13027_v60 = vadd.f32 1e-05, %v1335_v41  ;;  %v11526_v33 = vld [vmem:[#allocation13 + $0x5dc] sm:$0xf0] }
 0x1b2   : > { %v1281_v53 = vmul.f32 %v1273_v45, %v1273_v45  ;;  %v1224_v55 = vadd.f32 %v1223_v46, %v1222_v36  ;;  %v1253_v56 = vrot.slane %v1252_v48, 1  ;;  %v1244_v57 = vadd.f32 %v1243_v49, %v13020_v39  ;;  %v9430_v43 = vld [vmem:[#allocation13 + $0x7c0] sm:$0xf] }
 0x1b3   : > { %v1291_v61 = vadd.f32 %v1290_v50, %v1289_v42  ;;  %v1320_v63 = vrot.slane %v1319_v51, 1  ;;  %v1311_v0 = vadd.f32 %v1310_v52, %v1282_v44  ;;  %v8663_v11 = vor.u32 %v11398_v59, %v8662_v58  ;;  %v11590_v44 = vld [vmem:[#allocation13 + $0x7dc] sm:$0xf0] }
 0x1b4   : > { %v1304_v1 = vrot.slane %v1281_v53, 4  ;;  %v13030_v3 = vmul.f32 %v12978_v31, %v1224_v55  ;;  %v1254_v4 = vadd.f32 %v1253_v56, %v1252_v48  ;;  %v1245_v9 = vrot.slane %v1244_v57, 2 }
 0x1b5   : > { %v1334_v7 = vmul.f32 %v1291_v61, %v12978_v31  ;;  %v1321_v8 = vadd.f32 %v1320_v63, %v1319_v51  ;;  %v1312_v12 = vrot.slane %v1311_v0, 2  ;;  %12204 = vrsqrt.f32 %v13027_v60  ;;  %3105 = vmatpush.bf16.msra.mxu2 %v8663_v11  ;;  %v9142_v11 = vld [vmem:[#allocation13 + $0x580] sm:$0xf] }
 0x1b6   : > { %v1305_v13 = vadd.f32 %v1304_v1, %v1281_v53  ;;  %v1272_v15 = vsub.f32 %v13002_v2, %v13030_v3  ;;  %v13036_v16 = vmul.f32 %v12978_v31, %v1254_v4  ;;  %v1246_v17 = vadd.f32 %v1245_v9, %v1244_v57  ;;  %v8630_v1 = vld [vmem:[#allocation13 + $0x180] sm:$0xf] }
 0x1b7   : > { %v1313_v19 = vadd.f32 %v1312_v12, %v1311_v0  ;;  %v13041_v25 = vadd.f32 1e-05, %v1334_v7  ;;  %v1339_v28 = vmul.f32 %v1321_v8, %v12978_v31  ;;  %v9175_v49 = vor.u32 %v11526_v33, %v9174_v32  ;;  %v11390_v4 = vld [vmem:[#allocation13 + $0x19c] sm:$0xf0] }
 0x1b8   : > { %v1306_v20 = vrot.slane %v1305_v13, 2  ;;  %v1280_v22 = vmul.f32 %v1272_v15, %v1272_v15  ;;  %v1277_v24 = vsub.f32 %v13007_v10, %v13036_v16  ;;  %v1247_v26 = vrot.slane %v1246_v17, 1  ;;  %v11446_v32 = vld [vmem:[#allocation13 + $0x35c] sm:$0xf0] }
 0x1b9   : > { %v1314_v29 = vrot.slane %v1313_v19, 1  ;;  %12206 = vrsqrt.f32 %v13041_v25  ;;  %v13047_v50 = vadd.f32 1e-05, %v1339_v28  ;;  %3133 = vmatpush.bf16.msrb.mxu0 %v9175_v49  ;;  %v9431_v56 = vor.u32 %v11590_v44, %v9430_v43 }
 0x1ba   : > { %v1307_v30 = vadd.f32 %v1306_v20, %v1305_v13  ;;  %v1298_v34 = vrot.slane %v1280_v22, 4  ;;  %v1285_v36 = vmul.f32 %v1277_v24, %v1277_v24  ;;  %v1248_v42 = vadd.f32 %v1247_v26, %v1246_v17  ;;  %v11518_v17 = vld [vmem:[#allocation13 + $0x59c] sm:$0xf0] }
 0x1bb   : > { %v1315_v38 = vadd.f32 %v1314_v29, %v1313_v19  ;;  %v13044_v45 = vpop.eup %12204  ;;  %3147 = vmatpush.bf16.msrb.mxu1 %v9431_v56  ;;  %12208 = vrsqrt.f32 %v13047_v50  ;;  %v11582_v20 = vld [vmem:[#allocation13 + $0x79c] sm:$0xf0]  ;;  %vm1366_vm6 = vweird.f32 %v13027_v60  ;;  %vm1356_vm14 = vweird.f32 %v13041_v25 }
 0x1bc   : > { %v1308_v41 = vrot.slane %v1307_v30, 1  ;;  %v1299_v46 = vadd.f32 %v1298_v34, %v1280_v22  ;;  %v1328_v48 = vrot.slane %v1285_v36, 4  ;;  %v13050_v52 = vmul.f32 %v12978_v31, %v1248_v42  ;;  %v8598_v22 = vld [vmem:[#allocation13 + $0x140] sm:$0xf] }
 0x1bd   : > { %v1361_v57 = vmul.f32 %v13044_v45, %v13027_v60  ;;  %v1338_v58 = vmul.f32 %v1315_v38, %v12978_v31  ;;  %v11382_v24 = vld [vmem:[#allocation13 + $0x15c] sm:$0xf0]  ;;  %v8631_v34 = vor.u32 %v11390_v4, %v8630_v1  ;;  %v9143_v38 = vor.u32 %v11518_v17, %v9142_v11 }
 0x1be   : > { %v1309_v51 = vadd.f32 %v1308_v41, %v1307_v30  ;;  %v1300_v53 = vrot.slane %v1299_v46, 2  ;;  %v1329_v55 = vadd.f32 %v1328_v48, %v1285_v36  ;;  %v1276_v0 = vsub.f32 %v13020_v39, %v13050_v52  ;;  %v8854_v30 = vld [vmem:[#allocation13 + $0x340] sm:$0xf] }
 0x1bf   : > { %v13059_v7 = vpop.eup %12206  ;;  %v1362_v12 = vmul.f32 %v13044_v45, %v1361_v57  ;;  %v13064_v13 = vadd.f32 1e-05, %v1338_v58  ;;  %v8887_v36 = vor.u32 %v11454_v6, %v8886_v5  ;;  %v11510_v48 = vld [vmem:[#allocation13 + $0x55c] sm:$0xf0]  ;;  %3106 = vmatpush.bf16.msra.mxu2 %v8631_v34  ;;  %3134 = vmatpush.bf16.msrb.mxu0 %v9143_v38  ;;  %vm1367_vm5 = vweird.f32 %v13044_v45 }
 0x1c0   : > { %v1337_v59 = vmul.f32 %v1309_v51, %v12978_v31  ;;  %v1301_v61 = vadd.f32 %v1300_v53, %v1299_v46  ;;  %v1330_v63 = vrot.slane %v1329_v55, 2  ;;  %v1351_v26 = vmul.f32 %v13059_v7, %v13041_v25  ;;  %v9110_v46 = vld [vmem:[#allocation13 + $0x540] sm:$0xf]  ;;  %vm13106_vm7 = vmor %vm1366_vm6, %vm1367_vm5 }
 0x1c1   : > { %v1284_v29 = vmul.f32 %v1276_v0, %v1276_v0  ;;  %v13070_v41 = vpop.eup %12208  ;;  %v1363_v42 = vmul.f32 0.5, %v1362_v12  ;;  %3120 = vmatpush.bf16.msra.mxu3 %v8887_v36  ;;  %v9399_v51 = vor.u32 %v11582_v20, %v9398_v18  ;;  %v8599_v53 = vor.u32 %v11382_v24, %v8598_v22  ;;  %v9366_v56 = vld [vmem:[#allocation13 + $0x740] sm:$0xf] }
 0x1c2   : > { %v13061_v8 = vadd.f32 1e-05, %v1337_v59  ;;  %v1302_v9 = vrot.slane %v1301_v61, 1  ;;  %v1331_v15 = vadd.f32 %v1330_v63, %v1329_v55  ;;  %v8855_v55 = vor.u32 %v11446_v32, %v8854_v30  ;;  %v11574_v57 = vld [vmem:[#allocation13 + $0x75c] sm:$0xf0] }
 0x1c3   : > { %v1322_v44 = vrot.slane %v1284_v29, 4  ;;  %v1352_v58 = vmul.f32 %v13059_v7, %v1351_v26  ;;  %v8566_v59 = vld [vmem:[#allocation13 + $0x100] sm:$0xf]  ;;  %v1401_v1 = vmul.f32 %v13070_v41, %v13047_v50  ;;  %3148 = vmatpush.bf16.msrb.mxu1 %v9399_v51  ;;  %v1364_v11 = vsub.f32 1.5, %v1363_v42  ;;  %3107 = vmatpush.bf16.msra.mxu2 %v8599_v53 }
 0x1c4   : > { %12210 = vrsqrt.f32 %v13061_v8  ;;  %v1303_v19 = vadd.f32 %v1302_v9, %v1301_v61  ;;  %v1332_v28 = vrot.slane %v1331_v15, 1  ;;  %v11374_v61 = vld [vmem:[#allocation13 + $0x11c] sm:$0xf0]  ;;  %v9111_v20 = vor.u32 %v11510_v48, %v9110_v46 }
 0x1c5   : > { %12212 = vrsqrt.f32 %v13064_v13  ;;  %v8822_v63 = vld [vmem:[#allocation13 + $0x300] sm:$0xf]  ;;  %3121 = vmatpush.bf16.msra.mxu3 %v8855_v55  ;;  %v9367_v32 = vor.u32 %v11574_v57, %v9366_v56  ;;  %v1402_v38 = vmul.f32 %v13070_v41, %v1401_v1  ;;  %vm1357_vm10 = vweird.f32 %v13059_v7 }
 0x1c6   : > { %v1336_v33 = vmul.f32 %v1303_v19, %v12978_v31  ;;  %v1333_v43 = vadd.f32 %v1332_v28, %v1331_v15  ;;  %v11438_v5 = vld [vmem:[#allocation13 + $0x31c] sm:$0xf0]  ;;  %v1323_v19 = vadd.f32 %v1322_v44, %v1284_v29  ;;  %v13089_v28 = vmul.f32 0.5, %v1352_v58  ;;  %3135 = vmatpush.bf16.msrb.mxu0 %v9111_v20  ;;  %vm13155_vm0 = vmor %vm1356_vm14, %vm1357_vm10 }
 0x1c7   : > { %v9078_v6 = vld [vmem:[#allocation13 + $0x500] sm:$0xf]  ;;  %v8823_v42 = vor.u32 %v11438_v5, %v8822_v63  ;;  %v13095_v44 = vmul.f32 %v13044_v45, %v1364_v11  ;;  %3149 = vmatpush.bf16.msrb.mxu1 %v9367_v32  ;;  %vm1386_vm12 = vweird.f32 %v13061_v8  ;;  %vm1406_vm4 = vweird.f32 %v13047_v50  ;;  %v8984_v50 = vld [vmem:[#allocation13 + $0x460] sm:$0xf0] }
 0x1c8   : > { %v13073_v49 = vadd.f32 1e-05, %v1336_v33  ;;  %v1341_v4 = vmul.f32 %v1333_v43, %v12978_v31  ;;  %v11502_v9 = vld [vmem:[#allocation13 + $0x51c] sm:$0xf0]  ;;  %v8567_v33 = vor.u32 %v11374_v61, %v8566_v59  ;;  %v1324_v29 = vrot.slane %v1323_v19, 2 }
 0x1c9   : > { %v9334_v15 = vld [vmem:[#allocation13 + $0x700] sm:$0xf]  ;;  %v9079_v48 = vor.u32 %v11502_v9, %v9078_v6  ;;  %3122 = vmatpush.bf16.msra.mxu3 %v8823_v42  ;;  %vm1407_vm5 = vweird.f32 %v13070_v41 }
 0x1ca   : > { %v13076_v0 = vpop.eup %12210  ;;  %12214 = vrsqrt.f32 %v13073_v49  ;;  %v11566_v17 = vld [vmem:[#allocation13 + $0x71c] sm:$0xf0]  ;;  %v13085_v18 = vadd.f32 1e-05, %v1341_v4  ;;  %v1325_v57 = vadd.f32 %v1324_v29, %v1323_v19  ;;  %3108 = vmatpush.bf16.msra.mxu2 %v8567_v33  ;;  %vm1376_vm1 = vweird.f32 %v13073_v49 }
 0x1cb   : > { %v1381_v12 = vmul.f32 %v13076_v0, %v13061_v8  ;;  %v8534_v22 = vld [vmem:[#allocation13 + $0xc0] sm:$0xf]  ;;  %v13087_v26 = vpop.eup %12212  ;;  %v9335_v51 = vor.u32 %v11566_v17, %v9334_v15  ;;  %v1354_v15 = vsub.f32 1.5, %v13089_v28  ;;  %v13111_v17 = vmul.f32 0.5, %v1402_v38  ;;  %3136 = vmatpush.bf16.msrb.mxu0 %v9079_v48 }
 0x1cc   : > { %v11366_v24 = vld [vmem:[#allocation13 + $0xdc] sm:$0xf0]  ;;  %12216 = vrsqrt.f32 %v13085_v18  ;;  %v1391_v4 = vmul.f32 %v13087_v26, %v13064_v13  ;;  %v1326_v60 = vrot.slane %v1325_v57, 1  ;;  %vm1387_vm11 = vweird.f32 %v13076_v0 }
 0x1cd   : > { %v1382_v30 = vmul.f32 %v13076_v0, %v1381_v12  ;;  %v8790_v34 = vld [vmem:[#allocation13 + $0x2c0] sm:$0xf]  ;;  %v8535_v58 = vor.u32 %v11366_v24, %v8534_v22  ;;  %v1369_v22 = vsel %vm13106_vm7, %v13044_v45, %v13095_v44  ;;  %3150 = vmatpush.bf16.msrb.mxu1 %v9335_v51  ;;  %vm13147_vm15 = vmor %vm1386_vm12, %vm1387_vm11  ;;  %vm1397_vm6 = vweird.f32 %v13087_v26 }
 0x1ce   : > { %v11430_v36 = vld [vmem:[#allocation13 + $0x2dc] sm:$0xf0]  ;;  %v1392_v44 = vmul.f32 %v13087_v26, %v1391_v4  ;;  %vm1426_vm10 = vweird.f32 %v13085_v18  ;;  %vm13240_vm12 = vmor %vm1406_vm4, %vm1407_vm5 }
 0x1cf   : > { %v9046_v43 = vld [vmem:[#allocation13 + $0x4c0] sm:$0xf]  ;;  %v1383_v46 = vmul.f32 0.5, %v1382_v30  ;;  %v8791_v59 = vor.u32 %v11430_v36, %v8790_v34  ;;  %v1327_v36 = vadd.f32 %v1326_v60, %v1325_v57  ;;  %3109 = vmatpush.bf16.msra.mxu2 %v8535_v58 }
 0x1d0   : > { %v11494_v53 = vld [vmem:[#allocation13 + $0x4dc] sm:$0xf0]  ;;  %v13097_v56 = vpop.eup %12214 }
 0x1d1   : > { %v9302_v55 = vld [vmem:[#allocation13 + $0x6c0] sm:$0xf]  ;;  %v1384_v5 = vsub.f32 1.5, %v1383_v46  ;;  %v1371_v6 = vmul.f32 %v13097_v56, %v13073_v49  ;;  %v9047_v19 = vor.u32 %v11494_v53, %v9046_v43  ;;  %3123 = vmatpush.bf16.msra.mxu3 %v8791_v59  ;;  %v1340_v57 = vmul.f32 %v1327_v36, %v12978_v31  ;;  %v13176_v49 = vld [vmem:[#allocation10] sm:$0xf] }
 0x1d2   : > { %v11558_v61 = vld [vmem:[#allocation13 + $0x6dc] sm:$0xf0]  ;;  %v13118_v34 = vpop.eup %12216  ;;  %vm1377_vm13 = vweird.f32 %v13097_v56  ;;  %v1438_v36 = vrot.slane %v1369_v22, 7 }
 0x1d3   : > { %v8502_v1 = vld [vmem:[#allocation13 + $0x80] sm:$0xf]  ;;  %v1372_v24 = vmul.f32 %v13097_v56, %v1371_v6  ;;  %v9303_v30 = vor.u32 %v11558_v61, %v9302_v55  ;;  %v1385_v46 = vmul.f32 %v13076_v0, %v1384_v5  ;;  %v13127_v55 = vmul.f32 %v13059_v7, %v1354_v15  ;;  %3137 = vmatpush.bf16.msrb.mxu0 %v9047_v19  ;;  %vm13170_vm2 = vmor %vm1376_vm1, %vm1377_vm13 }
 0x1d4   : > { %v11358_v63 = vld [vmem:[#allocation13 + $0x9c] sm:$0xf0]  ;;  %v1421_v4 = vmul.f32 %v13118_v34, %v13085_v18  ;;  %v13151_v12 = vadd.f32 1e-05, %v1340_v57  ;;  %vm1427_vm7 = vweird.f32 %v13118_v34 }
 0x1d5   : > { %v8758_v9 = vld [vmem:[#allocation13 + $0x280] sm:$0xf]  ;;  %v8503_v38 = vor.u32 %v11358_v63, %v8502_v1  ;;  %v1373_v48 = vmul.f32 0.5, %v1372_v24  ;;  %3151 = vmatpush.bf16.msrb.mxu1 %v9303_v30  ;;  %v13159_v24 = vmul.f32 0.5, %v1392_v44  ;;  %v1389_v8 = vsel %vm13147_vm15, %v13076_v0, %v1385_v46  ;;  %vm13256_vm13 = vmor %vm1426_vm10, %vm1427_vm7 }
 0x1d6   : > { %v11422_v11 = vld [vmem:[#allocation13 + $0x29c] sm:$0xf0]  ;;  %12218 = vrsqrt.f32 %v13151_v12  ;;  %v1359_v22 = vsel %vm13155_vm0, %v13059_v7, %v13127_v55  ;;  %vm1416_vm14 = vweird.f32 %v13151_v12  ;;  %vm1396_vm15 = vweird.f32 %v13064_v13 }
 0x1d7   : > { %v9014_v20 = vld [vmem:[#allocation13 + $0x480] sm:$0xf]  ;;  %v8759_v29 = vor.u32 %v11422_v11, %v8758_v9  ;;  %v1374_v63 = vsub.f32 1.5, %v1373_v48  ;;  %3110 = vmatpush.bf16.msra.mxu2 %v8503_v38  ;;  %v1445_v11 = vsel %vm1444_vm8, %v1359_v22, %v1438_v36  ;;  %vm13273_vm1 = vmor %vm1396_vm15, %vm1397_vm6 }
 0x1d8   : > { %v11486_v32 = vld [vmem:[#allocation13 + $0x49c] sm:$0xf0] }
 0x1d9   : > { %v9270_v33 = vld [vmem:[#allocation13 + $0x680] sm:$0xf]  ;;  %v9015_v58 = vor.u32 %v11486_v32, %v9014_v20  ;;  %3124 = vmatpush.bf16.msra.mxu3 %v8759_v29  ;;  %v1375_v30 = vmul.f32 %v13097_v56, %v1374_v63  ;;  %v11458_v29 = vld [vmem:[#allocation13 + $0x3c4] sm:$0xf]  ;;  %v1394_v63 = vsub.f32 1.5, %v13159_v24 }
 0x1da   : > { %v11550_v28 = vld [vmem:[#allocation13 + $0x69c] sm:$0xf0] }
 0x1db   : > { %v8470_v42 = vld [vmem:[#allocation13 + $0x40] sm:$0xf]  ;;  %v9271_v5 = vor.u32 %v11550_v28, %v9270_v33  ;;  %v11394_v33 = vld [vmem:[#allocation13 + $0x1c4] sm:$0xf]  ;;  %3138 = vmatpush.bf16.msrb.mxu0 %v9015_v58 }
 0x1dc   : > { %v11350_v45 = vld [vmem:[#allocation13 + $0x5c] sm:$0xf0]  ;;  %v8664_v28 = vld [vmem:[#allocation13 + $0x1e0] sm:$0xf0]  ;;  %v13198_v38 = vpop.eup %12218 }
 0x1dd   : > { %v8726_v43 = vld [vmem:[#allocation13 + $0x240] sm:$0xf]  ;;  %v8471_v15 = vor.u32 %v11350_v45, %v8470_v42  ;;  %v8920_v42 = vld [vmem:[#allocation13 + $0x3e0] sm:$0xf0]  ;;  %v1379_v45 = vsel %vm13170_vm2, %v13097_v56, %v1375_v30  ;;  %3152 = vmatpush.bf16.msrb.mxu1 %v9271_v5  ;;  %v1404_v56 = vsub.f32 1.5, %v13111_v17  ;;  %v1411_v22 = vmul.f32 %v13198_v38, %v13151_v12 }
 0x1de   : > { %v11414_v51 = vld [vmem:[#allocation13 + $0x25c] sm:$0xf0]  ;;  %v1439_v57 = vrot.slane %v1379_v45, 6  ;;  %v11522_v58 = vld [vmem:[#allocation13 + $0x5c4] sm:$0xf]  ;;  %v8923_v5 = vor.u32 %v11458_v29, %v8920_v42  ;;  %vm1417_vm11 = vweird.f32 %v13198_v38 }
 0x1df   : > { %v13124_v53 = vld [vmem:[#allocation13 + $0x440] sm:$0xf]  ;;  %v8727_v60 = vor.u32 %v11414_v51, %v8726_v43  ;;  %v1422_v43 = vmul.f32 %v13118_v34, %v1421_v4  ;;  %3111 = vmatpush.bf16.msra.mxu2 %v8471_v15  ;;  %v8667_v4 = vor.u32 %v11394_v33, %v8664_v28  ;;  %v8888_v33 = vld [vmem:[#allocation13 + $0x3a0] sm:$0xf0]  ;;  %vm13267_vm0 = vmor %vm1416_vm14, %vm1417_vm11 }
 0x1e0   : > { %v11478_v59 = vld [vmem:[#allocation13 + $0x45c] sm:$0xf0]  ;;  %v11514_v28 = vld [vmem:[#allocation13 + $0x584] sm:$0xf] }
 0x1e1   : > { %v13131_v61 = vld [vmem:[#allocation13 + $0x640] sm:$0xf]  ;;  %v8983_v0 = vor.u32 %v11478_v59, %v13124_v53  ;;  %v1440_v53 = vrot.slane %v1389_v8, 5  ;;  %3125 = vmatpush.bf16.msra.mxu3 %v8727_v60  ;;  %v9176_v59 = vld [vmem:[#allocation13 + $0x5e0] sm:$0xf0] }
 0x1e2   : > { %v13133_v1 = vld [vmem:[#allocation13 + $0x65c] sm:$0xf0]  ;;  %v11386_v60 = vld [vmem:[#allocation13 + $0x184] sm:$0xf]  ;;  %v9179_v30 = vor.u32 %v11522_v58, %v9176_v59  ;;  %v1412_v58 = vmul.f32 %v13198_v38, %v1411_v22 }
 0x1e3   : > { %v13138_v6 = vld [vmem:[#allocation13] sm:$0xf]  ;;  %v9239_v44 = vor.u32 %v13133_v1, %v13131_v61  ;;  %v11586_v61 = vld [vmem:[#allocation13 + $0x7c4] sm:$0xf]  ;;  %v1447_v25 = vsel %vm1446_vm9, %v1439_v57, %v1440_v53  ;;  %3139 = vmatpush.bf16.msrb.mxu0 %v8983_v0 }
 0x1e4   : > { %v13140_v9 = vld [vmem:[#allocation13 + $0x1c] sm:$0xf0]  ;;  %v9432_v1 = vld [vmem:[#allocation13 + $0x7e0] sm:$0xf0] }
 0x1e5   : > { %v8694_v19 = vld [vmem:[#allocation13 + $0x200] sm:$0xf]  ;;  %v8439_v7 = vor.u32 %v13140_v9, %v13138_v6  ;;  %v8632_v6 = vld [vmem:[#allocation13 + $0x1a0] sm:$0xf0]  ;;  %3153 = vmatpush.bf16.msrb.mxu1 %v9239_v44 }
 0x1e6   : > { %v11406_v20 = vld [vmem:[#allocation13 + $0x21c] sm:$0xf0]  ;;  %v11450_v9 = vld [vmem:[#allocation13 + $0x384] sm:$0xf]  ;;  %v8635_v45 = vor.u32 %v11386_v60, %v8632_v6 }
 0x1e7   : > { %v13166_v32 = vld [vmem:[#allocation13 + $0x400] sm:$0xf]  ;;  %v8695_v55 = vor.u32 %v11406_v20, %v8694_v19  ;;  %v1449_v19 = vsel %vm1448_vm3, %v1445_v11, %v1447_v25  ;;  %v13196_v20 = vmul.f32 0.5, %v1422_v43  ;;  %3112 = vmatpush.bf16.msra.mxu2 %v8439_v7  ;;  %v9144_v0 = vld [vmem:[#allocation13 + $0x5a0] sm:$0xf0]  ;;  %v8891_v57 = vor.u32 %v11450_v9, %v8888_v33 }
 0x1e8   : > { %v11470_v46 = vld [vmem:[#allocation13 + $0x41c] sm:$0xf0]  ;;  %v13201_v36 = vmul.f32 %v1449_v19, %v13176_v49  ;;  %v11578_v29 = vld [vmem:[#allocation13 + $0x784] sm:$0xf]  ;;  %v9147_v59 = vor.u32 %v11514_v28, %v9144_v0 }
 0x1e9   : > { %v9206_v48 = vld [vmem:[#allocation13 + $0x600] sm:$0xf]  ;;  %v8951_v15 = vor.u32 %v11470_v46, %v13166_v32  ;;  %3126 = vmatpush.bf16.msra.mxu3 %v8695_v55  ;;  %v9435_v32 = vor.u32 %v11586_v61, %v9432_v1  ;;  %v9400_v42 = vld [vmem:[#allocation13 + $0x7a0] sm:$0xf0]  ;;  %v1424_v55 = vsub.f32 1.5, %v13196_v20 }
 0x1ea   : > { %v11534_v51 = vld [vmem:[#allocation13 + $0x61c] sm:$0xf0]  ;;  %v11378_v43 = vld [vmem:[#allocation13 + $0x144] sm:$0xf]  ;;  %v1462_v53 = vperm.slane %v13201_v36, 3 }
 0x1eb   : > { %v9207_v8 = vor.u32 %v11534_v51, %v9206_v48  ;;  %3161 = vmatpush.bf16.msrb.mxu2 %v8667_v4  ;;  %v8600_v44 = vld [vmem:[#allocation13 + $0x160] sm:$0xf0]  ;;  %v1460_v48 = vperm.slane %v13201_v36, 1  ;;  %v1461_v51 = vperm.slane %v13201_v36, 2  ;;  %3140 = vmatpush.bf16.msrb.mxu0 %v8951_v15  ;;  %v9403_v4 = vor.u32 %v11578_v29, %v9400_v42 }
 0x1ec   : > { %v11442_v46 = vld [vmem:[#allocation13 + $0x344] sm:$0xf]  ;;  %v1478_v11 = vmul.f32 %v1462_v53, %v13018_v35  ;;  %v8603_v60 = vor.u32 %v11378_v43, %v8600_v44  ;;  %v1405_v35 = vmul.f32 %v13070_v41, %v1404_v56  ;;  %v1425_v42 = vmul.f32 %v13118_v34, %v1424_v55 }
 0x1ed   : > { %3175 = vmatpush.bf16.msrb.mxu3 %v8923_v5  ;;  %v8856_v7 = vld [vmem:[#allocation13 + $0x360] sm:$0xf0]  ;;  %3154 = vmatpush.bf16.msrb.mxu1 %v9207_v8  ;;  %v1459_v5 = vperm.slane %v13201_v36, 0  ;;  %v1476_v61 = vmul.f32 %v1460_v48, %v12982_v37  ;;  %v1477_v1 = vmul.f32 %v1461_v51, %v13030_v3  ;;  %v1395_v56 = vmul.f32 %v13087_v26, %v1394_v63  ;;  %v13326_v36 = vld [vmem:[#allocation13 + $0x3e4] sm:$0xf0] }
 0x1ee   : > { %v11506_v25 = vld [vmem:[#allocation13 + $0x544] sm:$0xf]  ;;  %v8859_v6 = vor.u32 %v11442_v46, %v8856_v7  ;;  %v1493_v3 = vrot.slane %v1478_v11, 5 }
 0x1ef   : > { %3189 = vmatpush.bf16.msra.mxu0 %v9179_v30  ;;  %v9112_v15 = vld [vmem:[#allocation13 + $0x560] sm:$0xf0]  ;;  %3162 = vmatpush.bf16.msrb.mxu2 %v8635_v45  ;;  %v1491_v20 = vrot.slane %v1476_v61, 7  ;;  %v1492_v8 = vrot.slane %v1477_v1, 6  ;;  %v1413_v30 = vmul.f32 0.5, %v1412_v58  ;;  %v1475_v29 = vmul.f32 %v1459_v5, %v12994_v54 }
 0x1f0   : > { %v11570_v9 = vld [vmem:[#allocation13 + $0x744] sm:$0xf]  ;;  %v9115_v28 = vor.u32 %v11506_v25, %v9112_v15  ;;  %v13250_v61 = vld [vmem:[#allocation11] sm:$0xf] }
 0x1f1   : > { %3203 = vmatpush.bf16.msra.mxu1 %v9435_v32  ;;  %v9368_v37 = vld [vmem:[#allocation13 + $0x760] sm:$0xf0]  ;;  %3176 = vmatpush.bf16.msrb.mxu3 %v8891_v57  ;;  %v1414_v22 = vsub.f32 1.5, %v1413_v30  ;;  %v1497_v24 = vsel %vm1444_vm8, %v1475_v29, %v1491_v20  ;;  %v1498_v63 = vsel %vm1446_vm9, %v1492_v8, %v1493_v3  ;;  %v1399_v8 = vsel %vm13273_vm1, %v13087_v26, %v1395_v56 }
 0x1f2   : > { %v11370_v19 = vld [vmem:[#allocation13 + $0x104] sm:$0xf]  ;;  %v9371_v45 = vor.u32 %v11570_v9, %v9368_v37  ;;  %v1499_v13 = vsel %vm1448_vm3, %v1497_v24, %v1498_v63 }
 0x1f3   : > { %v8568_v33 = vld [vmem:[#allocation13 + $0x120] sm:$0xf0]  ;;  %3190 = vmatpush.bf16.msra.mxu0 %v9147_v59  ;;  %3163 = vmatpush.bf16.msrb.mxu2 %v8603_v60  ;;  %v1415_v7 = vmul.f32 %v13198_v38, %v1414_v22 }
 0x1f4   : > { %v11434_v32 = vld [vmem:[#allocation13 + $0x304] sm:$0xf]  ;;  %v8571_v44 = vor.u32 %v11370_v19, %v8568_v33 }
 0x1f5   : > { %v8824_v0 = vld [vmem:[#allocation13 + $0x320] sm:$0xf0]  ;;  %3204 = vmatpush.bf16.msra.mxu1 %v9403_v4  ;;  %3177 = vmatpush.bf16.msrb.mxu3 %v8859_v6  ;;  %v1409_v4 = vsel %vm13240_vm12, %v13070_v41, %v1405_v35  ;;  %v1429_v41 = vsel %vm13256_vm13, %v13118_v34, %v1425_v42  ;;  %v1419_v34 = vsel %vm13267_vm0, %v13198_v38, %v1415_v7 }
 0x1f6   : > { %v11498_v17 = vld [vmem:[#allocation13 + $0x504] sm:$0xf]  ;;  %v8827_v55 = vor.u32 %v11434_v32, %v8824_v0  ;;  %v1441_v20 = vrot.slane %v1409_v4, 7  ;;  %v1443_v35 = vrot.slane %v1429_v41, 5  ;;  %v13285_v38 = vsub.f32 %v13250_v61, %v1499_v13 }
 0x1f7   : > { %v9080_v43 = vld [vmem:[#allocation13 + $0x520] sm:$0xf0]  ;;  %3191 = vmatpush.bf16.msra.mxu0 %v9115_v28  ;;  %3164 = vmatpush.bf16.msrb.mxu2 %v8571_v44  ;;  %v1442_v28 = vrot.slane %v1419_v34, 6  ;;  %v1509_v13 = vmul.f32 %v1461_v51, %v13002_v2 }
 0x1f8   : > { %v11562_v46 = vld [vmem:[#allocation13 + $0x704] sm:$0xf]  ;;  %v9083_v1 = vor.u32 %v11498_v17, %v9080_v43  ;;  %v1450_v26 = vsel %vm1444_vm8, %v1399_v8, %v1441_v20  ;;  %v1519_v41 = vperm.slane %v13285_v38, 2  ;;  %v1520_v2 = vperm.slane %v13285_v38, 3 }
 0x1f9   : > { %v9336_v57 = vld [vmem:[#allocation13 + $0x720] sm:$0xf0]  ;;  %3205 = vmatpush.bf16.msra.mxu1 %v9371_v45  ;;  %3178 = vmatpush.bf16.msrb.mxu3 %v8827_v55  ;;  %v1451_v43 = vsel %vm1446_vm9, %v1442_v28, %v1443_v35 }
 0x1fa   : > { %v11362_v58 = vld [vmem:[#allocation13 + $0xc4] sm:$0xf]  ;;  %v9339_v15 = vor.u32 %v11562_v46, %v9336_v57  ;;  %v1452_v54 = vsel %vm1448_vm3, %v1450_v26, %v1451_v43 }
 0x1fb   : > { %v8536_v59 = vld [vmem:[#allocation13 + $0xe0] sm:$0xf0]  ;;  %3192 = vmatpush.bf16.msra.mxu0 %v9083_v1 }
 0x1fc   : > { %v11426_v11 = vld [vmem:[#allocation13 + $0x2c4] sm:$0xf]  ;;  %v8539_v9 = vor.u32 %v11362_v58, %v8536_v59  ;;  %v1507_v58 = vmul.f32 %v1459_v5, %v12971_v21  ;;  %v13294_v59 = vmul.f32 %v1452_v54, %v13176_v49 }
 0x1fd   : > { %v8792_v25 = vld [vmem:[#allocation13 + $0x2e0] sm:$0xf0]  ;;  %3206 = vmatpush.bf16.msra.mxu1 %v9339_v15 }
 0x1fe   : > { %v11490_v60 = vld [vmem:[#allocation13 + $0x4c4] sm:$0xf]  ;;  %v8795_v3 = vor.u32 %v11426_v11, %v8792_v25  ;;  %3165 = vmatpush.bf16.msrb.mxu2 %v8539_v9  ;;  %v1517_v25 = vperm.slane %v13285_v38, 0  ;;  %v1463_v6 = vperm.slane %v13294_v59, 0  ;;  %v1464_v21 = vperm.slane %v13294_v59, 1 }
 0x1ff   : > { %v9048_v12 = vld [vmem:[#allocation13 + $0x4e0] sm:$0xf0]  ;;  %v1465_v49 = vperm.slane %v13294_v59, 2  ;;  %v1466_v5 = vperm.slane %v13294_v59, 3 }
 0x200   : > { %v11554_v37 = vld [vmem:[#allocation13 + $0x6c4] sm:$0xf]  ;;  %v9051_v32 = vor.u32 %v11490_v60, %v9048_v12  ;;  %3179 = vmatpush.bf16.msrb.mxu3 %v8795_v3  ;;  %v1480_v20 = vmul.f32 %v1464_v21, %v13000_v62  ;;  %v1533_v51 = vadd.f32 %v1517_v25, %v1507_v58  ;;  %v1479_v62 = vmul.f32 %v1463_v6, %v13012_v23 }
 0x201   : > { %v9304_v19 = vld [vmem:[#allocation13 + $0x6e0] sm:$0xf0]  ;;  %v1481_v8 = vmul.f32 %v1465_v49, %v13050_v52  ;;  %v1482_v3 = vmul.f32 %v1466_v5, %v13036_v16  ;;  %v1508_v16 = vmul.f32 %v1460_v48, %v12967_v14  ;;  %v1514_v58 = vmul.f32 %v1466_v5, %v13007_v10 }
 0x202   : > { %v11354_v30 = vld [vmem:[#allocation13 + $0x84] sm:$0xf]  ;;  %v9307_v42 = vor.u32 %v11554_v37, %v9304_v19  ;;  %3193 = vmatpush.bf16.msra.mxu0 %v9051_v32  ;;  %v1518_v32 = vperm.slane %v13285_v38, 1  ;;  %v1549_v48 = vmul.f32 0.2, %v1533_v51  ;;  %vm1541_vm4 = vcmp.gt.f32.partialorder %v1533_v51, 0.0 }
 0x203   : > { %v8504_v33 = vld [vmem:[#allocation13 + $0xa0] sm:$0xf0]  ;;  %v1495_v52 = vrot.slane %v1481_v8, 6 }
 0x204   : > { %v11418_v0 = vld [vmem:[#allocation13 + $0x284] sm:$0xf]  ;;  %v8507_v56 = vor.u32 %v11354_v30, %v8504_v33  ;;  %3207 = vmatpush.bf16.msra.mxu1 %v9307_v42 }
 0x205   : > { %v8760_v29 = vld [vmem:[#allocation13 + $0x2a0] sm:$0xf0] }
 0x206   : > { %v11482_v22 = vld [vmem:[#allocation13 + $0x484] sm:$0xf]  ;;  %v8763_v24 = vor.u32 %v11418_v0, %v8760_v29  ;;  %3166 = vmatpush.bf16.msrb.mxu2 %v8507_v56  ;;  %v1535_v0 = vadd.f32 %v1519_v41, %v1509_v13 }
 0x207   : > { %v9016_v45 = vld [vmem:[#allocation13 + $0x4a0] sm:$0xf0] }
 0x208   : > { %v11546_v17 = vld [vmem:[#allocation13 + $0x684] sm:$0xf]  ;;  %v9019_v4 = vor.u32 %v11482_v22, %v9016_v45  ;;  %3180 = vmatpush.bf16.msrb.mxu3 %v8763_v24  ;;  %v1494_v22 = vrot.slane %v1480_v20, 7  ;;  %v1496_v45 = vrot.slane %v1482_v3, 5  ;;  %vm1543_vm2 = vcmp.gt.f32.partialorder %v1535_v0, 0.0 }
 0x209   : > { %v9272_v44 = vld [vmem:[#allocation13 + $0x6a0] sm:$0xf0] }
 0x20a   : > { %v11346_v46 = vld [vmem:[#allocation13 + $0x44] sm:$0xf]  ;;  %v9275_v18 = vor.u32 %v11546_v17, %v9272_v44  ;;  %3194 = vmatpush.bf16.msra.mxu0 %v9019_v4  ;;  %v1510_v17 = vmul.f32 %v1462_v53, %v12989_v47  ;;  %v1500_v26 = vsel %vm1444_vm8, %v1479_v62, %v1494_v22  ;;  %v1501_v43 = vsel %vm1446_vm9, %v1495_v52, %v1496_v45  ;;  %v13319_v44 = vld [vmem:[#allocation13 + $0x1c8] sm:$0xf] }
 0x20b   : > { %v8472_v57 = vld [vmem:[#allocation13 + $0x60] sm:$0xf0]  ;;  %v1502_v14 = vsel %vm1448_vm3, %v1500_v26, %v1501_v43  ;;  %v13324_v47 = vld [vmem:[#allocation13 + $0x3c8] sm:$0xf]  ;;  %v1551_v53 = vmul.f32 0.2, %v1535_v0 }
 0x20c   : > { %v11410_v63 = vld [vmem:[#allocation13 + $0x244] sm:$0xf]  ;;  %v8475_v15 = vor.u32 %v11346_v46, %v8472_v57  ;;  %3208 = vmatpush.bf16.msra.mxu1 %v9275_v18  ;;  %v13321_v46 = vld [vmem:[#allocation13 + $0x1e4] sm:$0xf0]  ;;  %v1534_v57 = vadd.f32 %v1518_v32, %v1508_v16  ;;  %v1536_v54 = vadd.f32 %v1520_v2, %v1510_v17  ;;  %v1506_v24 = vsub.f32 %v13250_v61, %v1502_v14 }
 0x20d   : > { %v8728_v7 = vld [vmem:[#allocation13 + $0x260] sm:$0xf0]  ;;  %v8671_v61 = vor.u32 %v13321_v46, %v13319_v44  ;;  %v1559_v10 = vsel %vm1543_vm2, %v1535_v0, %v1551_v53  ;;  %v9150_v62 = vld [vmem:[#allocation13 + $0x588] sm:$0xf] }
 0x20e   : > { %v11474_v55 = vld [vmem:[#allocation13 + $0x444] sm:$0xf]  ;;  %v8731_v34 = vor.u32 %v11410_v63, %v8728_v7  ;;  %3167 = vmatpush.bf16.msrb.mxu2 %v8475_v15  ;;  %v1511_v63 = vmul.f32 %v1463_v6, %v12984_v40  ;;  %v1512_v7 = vmul.f32 %v1464_v21, %v12974_v27  ;;  %v1521_v59 = vperm.slane %v1506_v24, 0  ;;  %v9438_v6 = vld [vmem:[#allocation13 + $0x7c8] sm:$0xf] }
 0x20f   : > { %v11538_v1 = vld [vmem:[#allocation13 + $0x644] sm:$0xf]  ;;  %v8987_v9 = vor.u32 %v11474_v55, %v8984_v50  ;;  %v1513_v55 = vmul.f32 %v1465_v49, %v13020_v39  ;;  %v1522_v4 = vperm.slane %v1506_v24, 1  ;;  %v1523_v50 = vperm.slane %v1506_v24, 2  ;;  %v11591_v21 = vld [vmem:[#allocation13 + $0x7e4] sm:$0xf0] }
 0x210   : > { %v9240_v11 = vld [vmem:[#allocation13 + $0x660] sm:$0xf0]  ;;  %3181 = vmatpush.bf16.msrb.mxu3 %v8731_v34  ;;  %v1552_v25 = vmul.f32 0.2, %v1536_v54  ;;  %v8927_v40 = vor.u32 %v13326_v36, %v13324_v47  ;;  %v1537_v27 = vadd.f32 %v1521_v59, %v1511_v63  ;;  %vm1544_vm5 = vcmp.gt.f32.partialorder %v1536_v54, 0.0 }
 0x211   : > { %v11338_v60 = vld [vmem:[#allocation13 + $0x4] sm:$0xf]  ;;  %v9243_v37 = vor.u32 %v11538_v1, %v9240_v11  ;;  %3195 = vmatpush.bf16.msra.mxu0 %v8987_v9  ;;  %v1524_v1 = vperm.slane %v1506_v24, 3  ;;  %v1550_v11 = vmul.f32 0.2, %v1534_v57  ;;  %v1538_v41 = vadd.f32 %v1522_v4, %v1512_v7 }
 0x212   : > { %v8440_v12 = vld [vmem:[#allocation13 + $0x20] sm:$0xf0]  ;;  %v1539_v39 = vadd.f32 %v1523_v50, %v1513_v55  ;;  %v1557_v15 = vsel %vm1541_vm4, %v1533_v51, %v1549_v48  ;;  %vm1542_vm6 = vcmp.gt.f32.partialorder %v1534_v57, 0.0  ;;  %v1553_v49 = vmul.f32 0.2, %v1537_v27 }
 0x213   : > { %v11402_v19 = vld [vmem:[#allocation13 + $0x204] sm:$0xf]  ;;  %v8443_v30 = vor.u32 %v11338_v60, %v8440_v12  ;;  %3209 = vmatpush.bf16.msra.mxu1 %v9243_v37  ;;  %v1540_v18 = vadd.f32 %v1524_v1, %v1514_v58  ;;  %v9182_v60 = vld [vmem:[#allocation13 + $0x5c8] sm:$0xf]  ;;  %v1554_v5 = vmul.f32 0.2, %v1538_v41  ;;  %v1558_v37 = vsel %vm1542_vm6, %v1534_v57, %v1550_v11 }
 0x214   : > { %v8696_v33 = vld [vmem:[#allocation13 + $0x220] sm:$0xf0]  ;;  %v11527_v12 = vld [vmem:[#allocation13 + $0x5e4] sm:$0xf0]  ;;  %vm1547_vm7 = vcmp.gt.f32.partialorder %v1539_v39, 0.0  ;;  %vm1545_vm11 = vcmp.gt.f32.partialorder %v1537_v27, 0.0  ;;  %v1560_v20 = vsel %vm1544_vm5, %v1536_v54, %v1552_v25  ;;  %v9439_v0 = vor.u32 %v11591_v21, %v9438_v6 }
 0x215   : > { %v11466_v35 = vld [vmem:[#allocation13 + $0x404] sm:$0xf]  ;;  %v8699_v38 = vor.u32 %v11402_v19, %v8696_v33  ;;  %3168 = vmatpush.bf16.msrb.mxu2 %v8443_v30  ;;  %vm1548_vm10 = vcmp.gt.f32.partialorder %v1540_v18, 0.0  ;;  %v1555_v13 = vmul.f32 0.2, %v1539_v39  ;;  %vm1546_vm12 = vcmp.gt.f32.partialorder %v1538_v41, 0.0 }
 0x216   : > { %v8952_v28 = vld [vmem:[#allocation13 + $0x420] sm:$0xf0]  ;;  %v1556_v34 = vmul.f32 0.2, %v1540_v18  ;;  %v1561_v9 = vsel %vm1545_vm11, %v1537_v27, %v1553_v49  ;;  %v1562_v19 = vsel %vm1546_vm12, %v1538_v41, %v1554_v5  ;;  %v9183_v51 = vor.u32 %v11527_v12, %v9182_v60  ;;  %v11519_v22 = vld [vmem:[#allocation13 + $0x5a4] sm:$0xf0] }
 0x217   : > { %v11530_v29 = vld [vmem:[#allocation13 + $0x604] sm:$0xf]  ;;  %v8955_v23 = vor.u32 %v11466_v35, %v8952_v28  ;;  %3182 = vmatpush.bf16.msrb.mxu3 %v8699_v38  ;;  %v1563_v8 = vsel %vm1547_vm7, %v1539_v39, %v1555_v13  ;;  %v13340_v3 = vpack.c.bf16 %v1561_v9, %v1557_v15  ;;  %v13342_v30 = vpack.c.bf16 %v1562_v19, %v1558_v37  ;;  %v8638_v35 = vld [vmem:[#allocation13 + $0x188] sm:$0xf] }
 0x218   : > { %v9208_v42 = vld [vmem:[#allocation13 + $0x620] sm:$0xf0]  ;;  %v1564_v33 = vsel %vm1548_vm10, %v1540_v18, %v1556_v34  ;;  %v11391_v28 = vld [vmem:[#allocation13 + $0x1a4] sm:$0xf0]  ;;  %v13344_v32 = vpack.c.bf16 %v1563_v8, %v1559_v10  ;;  %v9151_v43 = vor.u32 %v11519_v22, %v9150_v62 }
 0x219   : > { %v9211_v56 = vor.u32 %v11530_v29, %v9208_v42  ;;  %3196 = vmatpush.bf16.msra.mxu0 %v8955_v23  ;;  %v13346_v2 = vpack.c.bf16 %v1564_v33, %v1560_v20  ;;  %v8894_v29 = vld [vmem:[#allocation13 + $0x388] sm:$0xf]  ;;  %3113 = vmatmul.bf16.vlgmr.msra.gmra.mxu2 %v13340_v3  ;;  %v8639_v16 = vor.u32 %v11391_v28, %v8638_v35 }
 0x21a   : > { %v11455_v42 = vld [vmem:[#allocation13 + $0x3a4] sm:$0xf0]  ;;  %3127 = vmatmul.bf16.vlgmr.msra.gmra.mxu3 %v13342_v30  ;;  %3141 = vmatmul.bf16.vlgmr.msrb.gmra.mxu0 %v13344_v32 }
 0x21b   : > { %3210 = vmatpush.bf16.msra.mxu1 %v9211_v56  ;;  %v9406_v52 = vld [vmem:[#allocation13 + $0x788] sm:$0xf]  ;;  %3217 = vmatpush.bf16.msra.mxu2 %v8671_v61  ;;  %v8895_v17 = vor.u32 %v11455_v42, %v8894_v29 }
 0x21c   : > { %v11583_v45 = vld [vmem:[#allocation13 + $0x7a4] sm:$0xf0]  ;;  %3155 = vmatmul.bf16.vlgmr.msrb.gmra.mxu1 %v13346_v2  ;;  %3231 = vmatpush.bf16.msra.mxu3 %v8927_v40 }
 0x21d   : > { %v8606_v38 = vld [vmem:[#allocation13 + $0x148] sm:$0xf]  ;;  %3245 = vmatpush.bf16.msrb.mxu0 %v9183_v51  ;;  %v9407_v23 = vor.u32 %v11583_v45, %v9406_v52 }
 0x21e   : > { %v11383_v26 = vld [vmem:[#allocation13 + $0x164] sm:$0xf0] }
 0x21f   : > { %3259 = vmatpush.bf16.msrb.mxu1 %v9439_v0  ;;  %v8862_v56 = vld [vmem:[#allocation13 + $0x348] sm:$0xf]  ;;  %3218 = vmatpush.bf16.msra.mxu2 %v8639_v16  ;;  %v8607_v47 = vor.u32 %v11383_v26, %v8606_v38 }
 0x220   : > { %v11447_v44 = vld [vmem:[#allocation13 + $0x364] sm:$0xf0]  ;;  %3232 = vmatpush.bf16.msra.mxu3 %v8895_v17 }
 0x221   : > { %v9118_v46 = vld [vmem:[#allocation13 + $0x548] sm:$0xf]  ;;  %v8863_v36 = vor.u32 %v11447_v44, %v8862_v56  ;;  %3246 = vmatpush.bf16.msrb.mxu0 %v9151_v43 }
 0x222   : > { %v11511_v57 = vld [vmem:[#allocation13 + $0x564] sm:$0xf0] }
 0x223   : > { %v9374_v54 = vld [vmem:[#allocation13 + $0x748] sm:$0xf]  ;;  %3260 = vmatpush.bf16.msrb.mxu1 %v9407_v23  ;;  %v9119_v24 = vor.u32 %v11511_v57, %v9118_v46  ;;  %3219 = vmatpush.bf16.msra.mxu2 %v8607_v47 }
 0x224   : > { %v11575_v14 = vld [vmem:[#allocation13 + $0x764] sm:$0xf0]  ;;  %3233 = vmatpush.bf16.msra.mxu3 %v8863_v36  ;;  %v11395_v36 = vld [vmem:[#allocation13 + $0x1cc] sm:$0xf] }
 0x225   : > { %v8574_v48 = vld [vmem:[#allocation13 + $0x108] sm:$0xf]  ;;  %v9375_v63 = vor.u32 %v11575_v14, %v9374_v54  ;;  %3247 = vmatpush.bf16.msrb.mxu0 %v9119_v24  ;;  %v8928_v24 = vld [vmem:[#allocation13 + $0x3e8] sm:$0xf0] }
 0x226   : > { %v11375_v53 = vld [vmem:[#allocation13 + $0x124] sm:$0xf0] }
 0x227   : > { %v8830_v7 = vld [vmem:[#allocation13 + $0x308] sm:$0xf]  ;;  %v8575_v1 = vor.u32 %v11375_v53, %v8574_v48  ;;  %3261 = vmatpush.bf16.msrb.mxu1 %v9375_v63  ;;  %v8672_v48 = vld [vmem:[#allocation13 + $0x1e8] sm:$0xf0] }
 0x228   : > { %v11439_v55 = vld [vmem:[#allocation13 + $0x324] sm:$0xf0]  ;;  %v11459_v53 = vld [vmem:[#allocation13 + $0x3cc] sm:$0xf] }
 0x229   : > { %v9086_v58 = vld [vmem:[#allocation13 + $0x508] sm:$0xf]  ;;  %v8831_v11 = vor.u32 %v11439_v55, %v8830_v7  ;;  %3220 = vmatpush.bf16.msra.mxu2 %v8575_v1  ;;  %v11523_v63 = vld [vmem:[#allocation13 + $0x5cc] sm:$0xf] }
 0x22a   : > { %v11503_v59 = vld [vmem:[#allocation13 + $0x524] sm:$0xf0]  ;;  %3169 = vmatmul.bf16.vlgmr.msrb.gmra.mxu2 %v13340_v3  ;;  %3183 = vmatmul.bf16.vlgmr.msrb.gmra.mxu3 %v13342_v30 }
 0x22b   : > { %v9342_v4 = vld [vmem:[#allocation13 + $0x708] sm:$0xf]  ;;  %v9087_v40 = vor.u32 %v11503_v59, %v9086_v58  ;;  %3234 = vmatpush.bf16.msra.mxu3 %v8831_v11  ;;  %3197 = vmatmul.bf16.vlgmr.msra.gmra.mxu0 %v13344_v32  ;;  %v9184_v58 = vld [vmem:[#allocation13 + $0x5e8] sm:$0xf0]  ;;  %v8675_v11 = vor.u32 %v11395_v36, %v8672_v48 }
 0x22c   : > { %v11567_v50 = vld [vmem:[#allocation13 + $0x724] sm:$0xf0]  ;;  %3211 = vmatmul.bf16.vlgmr.msra.gmra.mxu1 %v13346_v2  ;;  %v11587_v59 = vld [vmem:[#allocation13 + $0x7cc] sm:$0xf] }
 0x22d   : > { %v8542_v25 = vld [vmem:[#allocation13 + $0xc8] sm:$0xf]  ;;  %v9343_v27 = vor.u32 %v11567_v50, %v9342_v4  ;;  %3248 = vmatpush.bf16.msrb.mxu0 %v9087_v40  ;;  %v9440_v4 = vld [vmem:[#allocation13 + $0x7e8] sm:$0xf0] }
 0x22e   : > { %v11367_v61 = vld [vmem:[#allocation13 + $0xe4] sm:$0xf0]  ;;  %v8640_v40 = vld [vmem:[#allocation13 + $0x1a8] sm:$0xf0] }
 0x22f   : > { %v8798_v41 = vld [vmem:[#allocation13 + $0x2c8] sm:$0xf]  ;;  %v8543_v12 = vor.u32 %v11367_v61, %v8542_v25  ;;  %3262 = vmatpush.bf16.msrb.mxu1 %v9343_v27  ;;  %v8931_v25 = vor.u32 %v11459_v53, %v8928_v24  ;;  %v11387_v61 = vld [vmem:[#allocation13 + $0x18c] sm:$0xf]  ;;  %v9187_v27 = vor.u32 %v11523_v63, %v9184_v58 }
 0x230   : > { %v11431_v39 = vld [vmem:[#allocation13 + $0x2e4] sm:$0xf0]  ;;  %v9312_v36 = vld [vmem:[#allocation13 + $0x6e8] sm:$0xf0] }
 0x231   : > { %v9054_v18 = vld [vmem:[#allocation13 + $0x4c8] sm:$0xf]  ;;  %v8799_v6 = vor.u32 %v11431_v39, %v8798_v41  ;;  %3221 = vmatpush.bf16.msra.mxu2 %v8543_v12  ;;  %v9443_v41 = vor.u32 %v11587_v59, %v9440_v4  ;;  %v11451_v39 = vld [vmem:[#allocation13 + $0x38c] sm:$0xf] }
 0x232   : > { %v11495_v10 = vld [vmem:[#allocation13 + $0x4e4] sm:$0xf0]  ;;  %v9408_v12 = vld [vmem:[#allocation13 + $0x7a8] sm:$0xf0] }
 0x233   : > { %v9310_v15 = vld [vmem:[#allocation13 + $0x6c8] sm:$0xf]  ;;  %v9055_v5 = vor.u32 %v11495_v10, %v9054_v18  ;;  %3235 = vmatpush.bf16.msra.mxu3 %v8799_v6  ;;  %v8896_v18 = vld [vmem:[#allocation13 + $0x3a8] sm:$0xf0]  ;;  %v8643_v6 = vor.u32 %v11387_v61, %v8640_v40 }
 0x234   : > { %v11559_v60 = vld [vmem:[#allocation13 + $0x6e4] sm:$0xf0]  ;;  %v11515_v10 = vld [vmem:[#allocation13 + $0x58c] sm:$0xf] }
 0x235   : > { %v8510_v21 = vld [vmem:[#allocation13 + $0x88] sm:$0xf]  ;;  %v9311_v13 = vor.u32 %v11559_v60, %v9310_v15  ;;  %3249 = vmatpush.bf16.msrb.mxu0 %v9055_v5  ;;  %v9152_v15 = vld [vmem:[#allocation13 + $0x5a8] sm:$0xf0] }
 0x236   : > { %v11359_v49 = vld [vmem:[#allocation13 + $0xa4] sm:$0xf0]  ;;  %v11579_v60 = vld [vmem:[#allocation13 + $0x78c] sm:$0xf] }
 0x237   : > { %v8766_v34 = vld [vmem:[#allocation13 + $0x288] sm:$0xf]  ;;  %v8511_v33 = vor.u32 %v11359_v49, %v8510_v21  ;;  %3263 = vmatpush.bf16.msrb.mxu1 %v9311_v13  ;;  %v8899_v21 = vor.u32 %v11451_v39, %v8896_v18  ;;  %v11379_v49 = vld [vmem:[#allocation13 + $0x14c] sm:$0xf]  ;;  %v9155_v13 = vor.u32 %v11515_v10, %v9152_v15 }
 0x238   : > { %v11423_v9 = vld [vmem:[#allocation13 + $0x2a4] sm:$0xf0]  ;;  %v8608_v5 = vld [vmem:[#allocation13 + $0x168] sm:$0xf0] }
 0x239   : > { %v9022_v37 = vld [vmem:[#allocation13 + $0x488] sm:$0xf]  ;;  %v8767_v35 = vor.u32 %v11423_v9, %v8766_v34  ;;  %3222 = vmatpush.bf16.msra.mxu2 %v8511_v33  ;;  %v9411_v34 = vor.u32 %v11579_v60, %v9408_v12  ;;  %v11443_v9 = vld [vmem:[#allocation13 + $0x34c] sm:$0xf] }
 0x23a   : > { %v11487_v19 = vld [vmem:[#allocation13 + $0x4a4] sm:$0xf0]  ;;  %v9376_v33 = vld [vmem:[#allocation13 + $0x768] sm:$0xf0] }
 0x23b   : > { %v9278_v20 = vld [vmem:[#allocation13 + $0x688] sm:$0xf]  ;;  %v9023_v0 = vor.u32 %v11487_v19, %v9022_v37  ;;  %3236 = vmatpush.bf16.msra.mxu3 %v8767_v35  ;;  %v8864_v37 = vld [vmem:[#allocation13 + $0x368] sm:$0xf0]  ;;  %v8611_v35 = vor.u32 %v11379_v49, %v8608_v5 }
 0x23c   : > { %v11551_v8 = vld [vmem:[#allocation13 + $0x6a4] sm:$0xf0]  ;;  %v11507_v19 = vld [vmem:[#allocation13 + $0x54c] sm:$0xf] }
 0x23d   : > { %v8478_v28 = vld [vmem:[#allocation13 + $0x48] sm:$0xf]  ;;  %v9279_v29 = vor.u32 %v11551_v8, %v9278_v20  ;;  %3250 = vmatpush.bf16.msrb.mxu0 %v9023_v0  ;;  %v9120_v20 = vld [vmem:[#allocation13 + $0x568] sm:$0xf0] }
 0x23e   : > { %v11351_v51 = vld [vmem:[#allocation13 + $0x64] sm:$0xf0]  ;;  %v11571_v8 = vld [vmem:[#allocation13 + $0x74c] sm:$0xf] }
 0x23f   : > { %v8734_v42 = vld [vmem:[#allocation13 + $0x248] sm:$0xf]  ;;  %v8479_v38 = vor.u32 %v11351_v51, %v8478_v28  ;;  %3264 = vmatpush.bf16.msrb.mxu1 %v9279_v29  ;;  %v8867_v28 = vor.u32 %v11443_v9, %v8864_v37  ;;  %v11371_v51 = vld [vmem:[#allocation13 + $0x10c] sm:$0xf]  ;;  %v9123_v29 = vor.u32 %v11507_v19, %v9120_v20 }
 0x240   : > { %v11415_v62 = vld [vmem:[#allocation13 + $0x264] sm:$0xf0]  ;;  %v8576_v0 = vld [vmem:[#allocation13 + $0x128] sm:$0xf0] }
 0x241   : > { %v8990_v22 = vld [vmem:[#allocation13 + $0x448] sm:$0xf]  ;;  %v8735_v26 = vor.u32 %v11415_v62, %v8734_v42  ;;  %3223 = vmatpush.bf16.msra.mxu2 %v8479_v38  ;;  %v9379_v42 = vor.u32 %v11571_v8, %v9376_v33  ;;  %v11435_v62 = vld [vmem:[#allocation13 + $0x30c] sm:$0xf]  ;;  %v8579_v38 = vor.u32 %v11371_v51, %v8576_v0  ;;  %v11400_v51 = vld [vmem:[#allocation13 + $0x1ec] sm:$0xf0] }
 0x242   : > { %v11479_v52 = vld [vmem:[#allocation13 + $0x464] sm:$0xf0]  ;;  %v11355_v24 = vld [vmem:[#allocation13 + $0x8c] sm:$0xf]  ;;  %v8934_v0 = vld [vmem:[#allocation13 + $0x3d0] sm:$0xf] }
 0x243   : > { %v9246_v45 = vld [vmem:[#allocation13 + $0x648] sm:$0xf]  ;;  %v8991_v44 = vor.u32 %v11479_v52, %v8990_v22  ;;  %3237 = vmatpush.bf16.msra.mxu3 %v8735_v26  ;;  %v8832_v22 = vld [vmem:[#allocation13 + $0x328] sm:$0xf0] }
 0x244   : > { %v11543_v16 = vld [vmem:[#allocation13 + $0x664] sm:$0xf0]  ;;  %v11499_v52 = vld [vmem:[#allocation13 + $0x50c] sm:$0xf]  ;;  %v8835_v26 = vor.u32 %v11435_v62, %v8832_v22 }
 0x245   : > { %v8446_v17 = vld [vmem:[#allocation13 + $0x8] sm:$0xf]  ;;  %v9247_v46 = vor.u32 %v11543_v16, %v9246_v45  ;;  %3251 = vmatpush.bf16.msrb.mxu0 %v8991_v44  ;;  %v9088_v45 = vld [vmem:[#allocation13 + $0x528] sm:$0xf0] }
 0x246   : > { %v11343_v43 = vld [vmem:[#allocation13 + $0x24] sm:$0xf0]  ;;  %v11563_v16 = vld [vmem:[#allocation13 + $0x70c] sm:$0xf] }
 0x247   : > { %v8702_v23 = vld [vmem:[#allocation13 + $0x208] sm:$0xf]  ;;  %v8447_v7 = vor.u32 %v11343_v43, %v8446_v17  ;;  %3265 = vmatpush.bf16.msrb.mxu1 %v9247_v46  ;;  %v9344_v17 = vld [vmem:[#allocation13 + $0x728] sm:$0xf0] }
 0x248   : > { %v11407_v56 = vld [vmem:[#allocation13 + $0x224] sm:$0xf0]  ;;  %v11363_v43 = vld [vmem:[#allocation13 + $0xcc] sm:$0xf]  ;;  %v9347_v44 = vor.u32 %v11563_v16, %v9344_v17  ;;  %v11592_v16 = vld [vmem:[#allocation13 + $0x7ec] sm:$0xf0] }
 0x249   : > { %v8958_v57 = vld [vmem:[#allocation13 + $0x408] sm:$0xf]  ;;  %v8703_v55 = vor.u32 %v11407_v56, %v8702_v23  ;;  %3224 = vmatpush.bf16.msra.mxu2 %v8447_v7  ;;  %v8544_v23 = vld [vmem:[#allocation13 + $0xe8] sm:$0xf0]  ;;  %v9091_v56 = vor.u32 %v11499_v52, %v9088_v45  ;;  %v11528_v52 = vld [vmem:[#allocation13 + $0x5ec] sm:$0xf0] }
 0x24a   : > { %v11471_v54 = vld [vmem:[#allocation13 + $0x424] sm:$0xf0]  ;;  %v11427_v46 = vld [vmem:[#allocation13 + $0x2cc] sm:$0xf]  ;;  %v8547_v48 = vor.u32 %v11363_v43, %v8544_v23  ;;  %v9446_v45 = vld [vmem:[#allocation13 + $0x7d0] sm:$0xf] }
 0x24b   : > { %v9214_v14 = vld [vmem:[#allocation13 + $0x608] sm:$0xf]  ;;  %v8959_v50 = vor.u32 %v11471_v54, %v8958_v57  ;;  %3238 = vmatpush.bf16.msra.mxu3 %v8703_v55  ;;  %v8800_v57 = vld [vmem:[#allocation13 + $0x2e8] sm:$0xf0]  ;;  %v8646_v23 = vld [vmem:[#allocation13 + $0x190] sm:$0xf] }
 0x24c   : > { %v11535_v47 = vld [vmem:[#allocation13 + $0x624] sm:$0xf0]  ;;  %3225 = vmatmul.bf16.vlgmr.msra.gmra.mxu2 %v13340_v3  ;;  %v11491_v54 = vld [vmem:[#allocation13 + $0x4cc] sm:$0xf]  ;;  %v8803_v53 = vor.u32 %v11427_v46, %v8800_v57  ;;  %v9447_v46 = vor.u32 %v11592_v16, %v9446_v45  ;;  %v8902_v57 = vld [vmem:[#allocation13 + $0x390] sm:$0xf] }
 0x24d   : > { %v9215_v1 = vor.u32 %v11535_v47, %v9214_v14  ;;  %3252 = vmatpush.bf16.msrb.mxu0 %v8959_v50  ;;  %3273 = vmatpush.bf16.msrb.mxu2 %v8675_v11  ;;  %v9056_v14 = vld [vmem:[#allocation13 + $0x4e8] sm:$0xf0]  ;;  %v11424_v45 = vld [vmem:[#allocation13 + $0x2ac] sm:$0xf0] }
 0x24e   : > { %3239 = vmatmul.bf16.vlgmr.msra.gmra.mxu3 %v13342_v30  ;;  %v11555_v47 = vld [vmem:[#allocation13 + $0x6cc] sm:$0xf]  ;;  %v9059_v7 = vor.u32 %v11491_v54, %v9056_v14  ;;  %v11456_v54 = vld [vmem:[#allocation13 + $0x3ac] sm:$0xf0] }
 0x24f   : > { %3266 = vmatpush.bf16.msrb.mxu1 %v9215_v1  ;;  %3287 = vmatpush.bf16.msrb.mxu3 %v8931_v25  ;;  %v8512_v63 = vld [vmem:[#allocation13 + $0xa8] sm:$0xf0]  ;;  %v9315_v55 = vor.u32 %v11555_v47, %v9312_v36  ;;  %v9158_v14 = vld [vmem:[#allocation13 + $0x590] sm:$0xf] }
 0x250   : > { %3253 = vmatmul.bf16.vlgmr.msrb.gmra.mxu0 %v13344_v32  ;;  %v11419_v58 = vld [vmem:[#allocation13 + $0x28c] sm:$0xf]  ;;  %v8515_v25 = vor.u32 %v11355_v24, %v8512_v63  ;;  %v11520_v47 = vld [vmem:[#allocation13 + $0x5ac] sm:$0xf0]  ;;  %v8903_v24 = vor.u32 %v11456_v54, %v8902_v57 }
 0x251   : > { %3301 = vmatpush.bf16.msra.mxu0 %v9187_v27  ;;  %3274 = vmatpush.bf16.msrb.mxu2 %v8643_v6  ;;  %v8768_v59 = vld [vmem:[#allocation13 + $0x2a8] sm:$0xf0]  ;;  %v9414_v36 = vld [vmem:[#allocation13 + $0x790] sm:$0xf] }
 0x252   : > { %3267 = vmatmul.bf16.vlgmr.msrb.gmra.mxu1 %v13346_v2  ;;  %v11483_v4 = vld [vmem:[#allocation13 + $0x48c] sm:$0xf]  ;;  %v8771_v61 = vor.u32 %v11419_v58, %v8768_v59  ;;  %v8614_v63 = vld [vmem:[#allocation13 + $0x150] sm:$0xf] }
 0x253   : > { %3315 = vmatpush.bf16.msra.mxu1 %v9443_v41  ;;  %3288 = vmatpush.bf16.msrb.mxu3 %v8899_v21  ;;  %v9024_v50 = vld [vmem:[#allocation13 + $0x4a8] sm:$0xf0]  ;;  %v8870_v59 = vld [vmem:[#allocation13 + $0x350] sm:$0xf] }
 0x254   : > { %v11547_v1 = vld [vmem:[#allocation13 + $0x68c] sm:$0xf]  ;;  %v9027_v41 = vor.u32 %v11483_v4, %v9024_v50  ;;  %v11448_v4 = vld [vmem:[#allocation13 + $0x36c] sm:$0xf0] }
 0x255   : > { %3302 = vmatpush.bf16.msra.mxu0 %v9155_v13  ;;  %3275 = vmatpush.bf16.msrb.mxu2 %v8611_v35  ;;  %v9280_v11 = vld [vmem:[#allocation13 + $0x6a8] sm:$0xf0]  ;;  %v9126_v50 = vld [vmem:[#allocation13 + $0x550] sm:$0xf] }
 0x256   : > { %v11347_v40 = vld [vmem:[#allocation13 + $0x4c] sm:$0xf]  ;;  %v9283_v39 = vor.u32 %v11547_v1, %v9280_v11  ;;  %v11512_v1 = vld [vmem:[#allocation13 + $0x56c] sm:$0xf0] }
 0x257   : > { %3316 = vmatpush.bf16.msra.mxu1 %v9411_v34  ;;  %3289 = vmatpush.bf16.msrb.mxu3 %v8867_v28  ;;  %v8480_v27 = vld [vmem:[#allocation13 + $0x68] sm:$0xf0]  ;;  %v8678_v28 = vld [vmem:[#allocation13 + $0x1d0] sm:$0xf] }
 0x258   : > { %v11411_v18 = vld [vmem:[#allocation13 + $0x24c] sm:$0xf]  ;;  %v8483_v49 = vor.u32 %v11347_v40, %v8480_v27  ;;  %v9382_v11 = vld [vmem:[#allocation13 + $0x750] sm:$0xf]  ;;  %v8871_v40 = vor.u32 %v11448_v4, %v8870_v59 }
 0x259   : > { %3303 = vmatpush.bf16.msra.mxu0 %v9123_v29  ;;  %3276 = vmatpush.bf16.msrb.mxu2 %v8579_v38  ;;  %v8736_v10 = vld [vmem:[#allocation13 + $0x268] sm:$0xf0]  ;;  %v11464_v29 = vld [vmem:[#allocation13 + $0x3ec] sm:$0xf0] }
 0x25a   : > { %v11475_v15 = vld [vmem:[#allocation13 + $0x44c] sm:$0xf]  ;;  %v8739_v5 = vor.u32 %v11411_v18, %v8736_v10  ;;  %v8935_v43 = vor.u32 %v11464_v29, %v8934_v0  ;;  %v8582_v27 = vld [vmem:[#allocation13 + $0x110] sm:$0xf] }
 0x25b   : > { %3317 = vmatpush.bf16.msra.mxu1 %v9379_v42  ;;  %3290 = vmatpush.bf16.msrb.mxu3 %v8835_v26  ;;  %v8992_v60 = vld [vmem:[#allocation13 + $0x468] sm:$0xf0]  ;;  %v9190_v42 = vld [vmem:[#allocation13 + $0x5d0] sm:$0xf]  ;;  %v8679_v26 = vor.u32 %v11400_v51, %v8678_v28 }
 0x25c   : > { %v11539_v12 = vld [vmem:[#allocation13 + $0x64c] sm:$0xf]  ;;  %v8995_v37 = vor.u32 %v11475_v15, %v8992_v60  ;;  %v8838_v10 = vld [vmem:[#allocation13 + $0x310] sm:$0xf] }
 0x25d   : > { %3304 = vmatpush.bf16.msra.mxu0 %v9091_v56  ;;  %3277 = vmatpush.bf16.msrb.mxu2 %v8547_v48  ;;  %v9248_v6 = vld [vmem:[#allocation13 + $0x668] sm:$0xf0]  ;;  %v11392_v56 = vld [vmem:[#allocation13 + $0x1ac] sm:$0xf0] }
 0x25e   : > { %v11339_v21 = vld [vmem:[#allocation13 + $0xc] sm:$0xf]  ;;  %v9251_v19 = vor.u32 %v11539_v12, %v9248_v6  ;;  %v11584_v48 = vld [vmem:[#allocation13 + $0x7ac] sm:$0xf0] }
 0x25f   : > { %3318 = vmatpush.bf16.msra.mxu1 %v9347_v44  ;;  %3291 = vmatpush.bf16.msrb.mxu3 %v8803_v53  ;;  %v8448_v13 = vld [vmem:[#allocation13 + $0x28] sm:$0xf0]  ;;  %v9191_v44 = vor.u32 %v11528_v52, %v9190_v42  ;;  %v8647_v53 = vor.u32 %v11392_v56, %v8646_v23  ;;  %v9415_v58 = vor.u32 %v11584_v48, %v9414_v36  ;;  %v11440_v15 = vld [vmem:[#allocation13 + $0x32c] sm:$0xf0] }
 0x260   : > { %v11403_v34 = vld [vmem:[#allocation13 + $0x20c] sm:$0xf]  ;;  %v8451_v62 = vor.u32 %v11339_v21, %v8448_v13  ;;  %v9094_v60 = vld [vmem:[#allocation13 + $0x510] sm:$0xf] }
 0x261   : > { %3305 = vmatpush.bf16.msra.mxu0 %v9059_v7  ;;  %3278 = vmatpush.bf16.msrb.mxu2 %v8515_v25  ;;  %v8704_v9 = vld [vmem:[#allocation13 + $0x228] sm:$0xf0]  ;;  %v11384_v7 = vld [vmem:[#allocation13 + $0x16c] sm:$0xf0] }
 0x262   : > { %v11467_v20 = vld [vmem:[#allocation13 + $0x40c] sm:$0xf]  ;;  %v8707_v22 = vor.u32 %v11403_v34, %v8704_v9  ;;  %v11576_v25 = vld [vmem:[#allocation13 + $0x76c] sm:$0xf0] }
 0x263   : > { %3319 = vmatpush.bf16.msra.mxu1 %v9315_v55  ;;  %3292 = vmatpush.bf16.msrb.mxu3 %v8771_v61  ;;  %v8960_v8 = vld [vmem:[#allocation13 + $0x428] sm:$0xf0]  ;;  %v9159_v55 = vor.u32 %v11520_v47, %v9158_v14  ;;  %v8615_v61 = vor.u32 %v11384_v7, %v8614_v63  ;;  %v9383_v18 = vor.u32 %v11576_v25, %v9382_v11  ;;  %v11504_v12 = vld [vmem:[#allocation13 + $0x52c] sm:$0xf0] }
 0x264   : > { %v11531_v33 = vld [vmem:[#allocation13 + $0x60c] sm:$0xf]  ;;  %v8963_v17 = vor.u32 %v11467_v20, %v8960_v8  ;;  %v9350_v6 = vld [vmem:[#allocation13 + $0x710] sm:$0xf]  ;;  %v9095_v9 = vor.u32 %v11504_v12, %v9094_v60  ;;  %v9192_v60 = vld [vmem:[#allocation13 + $0x5f0] sm:$0xf0] }
 0x265   : > { %3306 = vmatpush.bf16.msra.mxu0 %v9027_v41  ;;  %v9216_v35 = vld [vmem:[#allocation13 + $0x628] sm:$0xf0]  ;;  %3279 = vmatpush.bf16.msrb.mxu2 %v8483_v49  ;;  %v11376_v41 = vld [vmem:[#allocation13 + $0x12c] sm:$0xf0]  ;;  %v11588_v12 = vld [vmem:[#allocation13 + $0x7d4] sm:$0xf] }
 0x266   : > { %v9219_v38 = vor.u32 %v11531_v33, %v9216_v35  ;;  %v11568_v21 = vld [vmem:[#allocation13 + $0x72c] sm:$0xf0]  ;;  %v8583_v49 = vor.u32 %v11376_v41, %v8582_v27  ;;  %v8680_v27 = vld [vmem:[#allocation13 + $0x1f0] sm:$0xf0] }
 0x267   : > { %3320 = vmatpush.bf16.msra.mxu1 %v9283_v39  ;;  %3293 = vmatpush.bf16.msrb.mxu3 %v8739_v5  ;;  %v9127_v39 = vor.u32 %v11512_v1, %v9126_v50  ;;  %v8839_v5 = vor.u32 %v11440_v15, %v8838_v10  ;;  %v8550_v13 = vld [vmem:[#allocation13 + $0xd0] sm:$0xf]  ;;  %v11460_v41 = vld [vmem:[#allocation13 + $0x3d4] sm:$0xf] }
 0x268   : > { %v11368_v34 = vld [vmem:[#allocation13 + $0xec] sm:$0xf0] }
 0x269   : > { %3307 = vmatpush.bf16.msra.mxu0 %v8995_v37  ;;  %3280 = vmatpush.bf16.msrb.mxu2 %v8451_v62  ;;  %v9351_v37 = vor.u32 %v11568_v21, %v9350_v6  ;;  %v11432_v20 = vld [vmem:[#allocation13 + $0x2ec] sm:$0xf0]  ;;  %v8551_v51 = vor.u32 %v11368_v34, %v8550_v13  ;;  %v9448_v6 = vld [vmem:[#allocation13 + $0x7f0] sm:$0xf0] }
 0x26a   : > { %v9062_v8 = vld [vmem:[#allocation13 + $0x4d0] sm:$0xf]  ;;  %v11388_v34 = vld [vmem:[#allocation13 + $0x194] sm:$0xf] }
 0x26b   : > { %3321 = vmatpush.bf16.msra.mxu1 %v9251_v19  ;;  %3294 = vmatpush.bf16.msrb.mxu3 %v8707_v22  ;;  %v8806_v19 = vld [vmem:[#allocation13 + $0x2d0] sm:$0xf] }
 0x26c   : > { %3281 = vmatmul.bf16.vlgmr.msrb.gmra.mxu2 %v13340_v3  ;;  %v11496_v33 = vld [vmem:[#allocation13 + $0x4ec] sm:$0xf0]  ;;  %v8807_v0 = vor.u32 %v11432_v20, %v8806_v19  ;;  %v9451_v19 = vor.u32 %v11588_v12, %v9448_v6  ;;  %v11452_v20 = vld [vmem:[#allocation13 + $0x394] sm:$0xf] }
 0x26d   : > { %3308 = vmatpush.bf16.msra.mxu0 %v8963_v17  ;;  %3329 = vmatpush.bf16.msra.mxu2 %v8679_v26  ;;  %v9318_v35 = vld [vmem:[#allocation13 + $0x6d0] sm:$0xf]  ;;  %v9063_v62 = vor.u32 %v11496_v33, %v9062_v8  ;;  %v8904_v8 = vld [vmem:[#allocation13 + $0x3b0] sm:$0xf0] }
 0x26e   : > { %3295 = vmatmul.bf16.vlgmr.msrb.gmra.mxu3 %v13342_v30  ;;  %v11560_v28 = vld [vmem:[#allocation13 + $0x6ec] sm:$0xf0]  ;;  %v11516_v33 = vld [vmem:[#allocation13 + $0x594] sm:$0xf] }
 0x26f   : > { %3322 = vmatpush.bf16.msra.mxu1 %v9219_v38  ;;  %3343 = vmatpush.bf16.msra.mxu3 %v8935_v43  ;;  %v8518_v29 = vld [vmem:[#allocation13 + $0x90] sm:$0xf]  ;;  %v9319_v22 = vor.u32 %v11560_v28, %v9318_v35  ;;  %v9160_v35 = vld [vmem:[#allocation13 + $0x5b0] sm:$0xf0] }
 0x270   : > { %3309 = vmatmul.bf16.vlgmr.msra.gmra.mxu0 %v13344_v32  ;;  %v11360_v42 = vld [vmem:[#allocation13 + $0xac] sm:$0xf0]  ;;  %v11580_v28 = vld [vmem:[#allocation13 + $0x794] sm:$0xf] }
 0x271   : > { %3357 = vmatpush.bf16.msrb.mxu0 %v9191_v44  ;;  %3330 = vmatpush.bf16.msra.mxu2 %v8647_v53  ;;  %v8774_v52 = vld [vmem:[#allocation13 + $0x290] sm:$0xf]  ;;  %v8519_v43 = vor.u32 %v11360_v42, %v8518_v29  ;;  %v8907_v29 = vor.u32 %v11452_v20, %v8904_v8  ;;  %v11380_v42 = vld [vmem:[#allocation13 + $0x154] sm:$0xf] }
 0x272   : > { %3323 = vmatmul.bf16.vlgmr.msra.gmra.mxu1 %v13346_v2  ;;  %v9030_v16 = vld [vmem:[#allocation13 + $0x490] sm:$0xf]  ;;  %v8775_v23 = vor.u32 %v11424_v45, %v8774_v52  ;;  %v11444_v45 = vld [vmem:[#allocation13 + $0x354] sm:$0xf] }
 0x273   : > { %3371 = vmatpush.bf16.msrb.mxu1 %v9447_v46  ;;  %3344 = vmatpush.bf16.msra.mxu3 %v8903_v24  ;;  %v11488_v17 = vld [vmem:[#allocation13 + $0x4ac] sm:$0xf0]  ;;  %v8776_v12 = vld [vmem:[#allocation13 + $0x2b0] sm:$0xf0] }
 0x274   : > { %v9286_v38 = vld [vmem:[#allocation13 + $0x690] sm:$0xf]  ;;  %v9031_v46 = vor.u32 %v11488_v17, %v9030_v16  ;;  %v8872_v16 = vld [vmem:[#allocation13 + $0x370] sm:$0xf0] }
 0x275   : > { %3358 = vmatpush.bf16.msrb.mxu0 %v9159_v55  ;;  %3331 = vmatpush.bf16.msra.mxu2 %v8615_v61  ;;  %v11552_v26 = vld [vmem:[#allocation13 + $0x6ac] sm:$0xf0]  ;;  %v11508_v17 = vld [vmem:[#allocation13 + $0x554] sm:$0xf] }
 0x276   : > { %v8486_v56 = vld [vmem:[#allocation13 + $0x50] sm:$0xf]  ;;  %v9287_v57 = vor.u32 %v11552_v26, %v9286_v38  ;;  %v9128_v38 = vld [vmem:[#allocation13 + $0x570] sm:$0xf0] }
 0x277   : > { %3372 = vmatpush.bf16.msrb.mxu1 %v9415_v58  ;;  %3345 = vmatpush.bf16.msra.mxu3 %v8871_v40  ;;  %v11352_v44 = vld [vmem:[#allocation13 + $0x6c] sm:$0xf0]  ;;  %v11396_v40 = vld [vmem:[#allocation13 + $0x1d4] sm:$0xf] }
 0x278   : > { %v8742_v54 = vld [vmem:[#allocation13 + $0x250] sm:$0xf]  ;;  %v8487_v63 = vor.u32 %v11352_v44, %v8486_v56  ;;  %v11572_v26 = vld [vmem:[#allocation13 + $0x754] sm:$0xf]  ;;  %v8875_v56 = vor.u32 %v11444_v45, %v8872_v16 }
 0x279   : > { %3359 = vmatpush.bf16.msrb.mxu0 %v9127_v39  ;;  %3332 = vmatpush.bf16.msra.mxu2 %v8583_v49  ;;  %v11416_v14 = vld [vmem:[#allocation13 + $0x26c] sm:$0xf0]  ;;  %v8936_v39 = vld [vmem:[#allocation13 + $0x3f0] sm:$0xf0] }
 0x27a   : > { %v8998_v47 = vld [vmem:[#allocation13 + $0x450] sm:$0xf]  ;;  %v8743_v7 = vor.u32 %v11416_v14, %v8742_v54  ;;  %v8939_v13 = vor.u32 %v11460_v41, %v8936_v39  ;;  %v11372_v44 = vld [vmem:[#allocation13 + $0x114] sm:$0xf] }
 0x27b   : > { %3373 = vmatpush.bf16.msrb.mxu1 %v9383_v18  ;;  %3346 = vmatpush.bf16.msra.mxu3 %v8839_v5  ;;  %v11480_v36 = vld [vmem:[#allocation13 + $0x46c] sm:$0xf0]  ;;  %v11524_v18 = vld [vmem:[#allocation13 + $0x5d4] sm:$0xf]  ;;  %v8683_v5 = vor.u32 %v11396_v40, %v8680_v27 }
 0x27c   : > { %v9254_v48 = vld [vmem:[#allocation13 + $0x650] sm:$0xf]  ;;  %v8999_v4 = vor.u32 %v11480_v36, %v8998_v47  ;;  %v11436_v14 = vld [vmem:[#allocation13 + $0x314] sm:$0xf] }
 0x27d   : > { %3360 = vmatpush.bf16.msrb.mxu0 %v9095_v9  ;;  %3333 = vmatpush.bf16.msra.mxu2 %v8551_v51  ;;  %v11544_v53 = vld [vmem:[#allocation13 + $0x66c] sm:$0xf0]  ;;  %v8648_v9 = vld [vmem:[#allocation13 + $0x1b0] sm:$0xf0] }
 0x27e   : > { %v8454_v24 = vld [vmem:[#allocation13 + $0x10] sm:$0xf]  ;;  %v9255_v50 = vor.u32 %v11544_v53, %v9254_v48  ;;  %v9416_v51 = vld [vmem:[#allocation13 + $0x7b0] sm:$0xf0] }
 0x27f   : > { %3374 = vmatpush.bf16.msrb.mxu1 %v9351_v37  ;;  %3347 = vmatpush.bf16.msra.mxu3 %v8807_v0  ;;  %v11344_v55 = vld [vmem:[#allocation13 + $0x2c] sm:$0xf0]  ;;  %v9195_v37 = vor.u32 %v11524_v18, %v9192_v60  ;;  %v8651_v0 = vor.u32 %v11388_v34, %v8648_v9  ;;  %v9419_v52 = vor.u32 %v11580_v28, %v9416_v51  ;;  %v8840_v47 = vld [vmem:[#allocation13 + $0x330] sm:$0xf0] }
 0x280   : > { %v8710_v58 = vld [vmem:[#allocation13 + $0x210] sm:$0xf]  ;;  %v8455_v10 = vor.u32 %v11344_v55, %v8454_v24  ;;  %v11500_v36 = vld [vmem:[#allocation13 + $0x514] sm:$0xf] }
 0x281   : > { %3361 = vmatpush.bf16.msrb.mxu0 %v9063_v62  ;;  %3334 = vmatpush.bf16.msra.mxu2 %v8519_v43  ;;  %v11408_v59 = vld [vmem:[#allocation13 + $0x22c] sm:$0xf0]  ;;  %v8616_v62 = vld [vmem:[#allocation13 + $0x170] sm:$0xf0] }
 0x282   : > { %v8966_v1 = vld [vmem:[#allocation13 + $0x410] sm:$0xf]  ;;  %v8711_v15 = vor.u32 %v11408_v59, %v8710_v58  ;;  %v9384_v43 = vld [vmem:[#allocation13 + $0x770] sm:$0xf0] }
 0x283   : > { %3375 = vmatpush.bf16.msrb.mxu1 %v9319_v22  ;;  %3348 = vmatpush.bf16.msra.mxu3 %v8775_v23  ;;  %v11472_v11 = vld [vmem:[#allocation13 + $0x42c] sm:$0xf0]  ;;  %v9163_v22 = vor.u32 %v11516_v33, %v9160_v35  ;;  %v8619_v23 = vor.u32 %v11380_v42, %v8616_v62  ;;  %v9387_v54 = vor.u32 %v11572_v26, %v9384_v43  ;;  %v9096_v48 = vld [vmem:[#allocation13 + $0x530] sm:$0xf0] }
 0x284   : > { %v9222_v25 = vld [vmem:[#allocation13 + $0x610] sm:$0xf]  ;;  %v8967_v21 = vor.u32 %v11472_v11, %v8966_v1  ;;  %v11564_v53 = vld [vmem:[#allocation13 + $0x714] sm:$0xf]  ;;  %v9099_v59 = vor.u32 %v11500_v36, %v9096_v48  ;;  %v11529_v36 = vld [vmem:[#allocation13 + $0x5f4] sm:$0xf0] }
 0x285   : > { %3362 = vmatpush.bf16.msrb.mxu0 %v9031_v46  ;;  %v11536_v61 = vld [vmem:[#allocation13 + $0x62c] sm:$0xf0]  ;;  %3335 = vmatpush.bf16.msra.mxu2 %v8487_v63  ;;  %v8584_v46 = vld [vmem:[#allocation13 + $0x130] sm:$0xf0]  ;;  %v9454_v48 = vld [vmem:[#allocation13 + $0x7d8] sm:$0xf] }
 0x286   : > { %v9223_v49 = vor.u32 %v11536_v61, %v9222_v25  ;;  %v9352_v24 = vld [vmem:[#allocation13 + $0x730] sm:$0xf0]  ;;  %v8587_v63 = vor.u32 %v11372_v44, %v8584_v46  ;;  %v11401_v44 = vld [vmem:[#allocation13 + $0x1f4] sm:$0xf0] }
 0x287   : > { %3376 = vmatpush.bf16.msrb.mxu1 %v9287_v57  ;;  %3349 = vmatpush.bf16.msra.mxu3 %v8743_v7  ;;  %v9131_v57 = vor.u32 %v11508_v17, %v9128_v38  ;;  %v8843_v7 = vor.u32 %v11436_v14, %v8840_v47  ;;  %v11364_v55 = vld [vmem:[#allocation13 + $0xd4] sm:$0xf]  ;;  %v8942_v46 = vld [vmem:[#allocation13 + $0x3d8] sm:$0xf] }
 0x288   : > { %v8552_v58 = vld [vmem:[#allocation13 + $0xf0] sm:$0xf0] }
 0x289   : > { %3363 = vmatpush.bf16.msrb.mxu0 %v8999_v4  ;;  %3336 = vmatpush.bf16.msra.mxu2 %v8455_v10  ;;  %v9355_v4 = vor.u32 %v11564_v53, %v9352_v24  ;;  %v8808_v1 = vld [vmem:[#allocation13 + $0x2f0] sm:$0xf0]  ;;  %v8555_v27 = vor.u32 %v11364_v55, %v8552_v58  ;;  %v11593_v53 = vld [vmem:[#allocation13 + $0x7f4] sm:$0xf0] }
 0x28a   : > { %v11492_v11 = vld [vmem:[#allocation13 + $0x4d4] sm:$0xf]  ;;  %v8654_v58 = vld [vmem:[#allocation13 + $0x198] sm:$0xf] }
 0x28b   : > { %3377 = vmatpush.bf16.msrb.mxu1 %v9255_v50  ;;  %3350 = vmatpush.bf16.msra.mxu3 %v8711_v15  ;;  %v11428_v50 = vld [vmem:[#allocation13 + $0x2d4] sm:$0xf] }
 0x28c   : > { %3337 = vmatmul.bf16.vlgmr.msra.gmra.mxu2 %v13340_v3  ;;  %v9064_v25 = vld [vmem:[#allocation13 + $0x4f0] sm:$0xf0]  ;;  %v8811_v41 = vor.u32 %v11428_v50, %v8808_v1  ;;  %v9455_v50 = vor.u32 %v11593_v53, %v9454_v48  ;;  %v8910_v1 = vld [vmem:[#allocation13 + $0x398] sm:$0xf] }
 0x28d   : > { %3364 = vmatpush.bf16.msrb.mxu0 %v8967_v21  ;;  %3385 = vmatpush.bf16.msrb.mxu2 %v8683_v5  ;;  %v11556_v61 = vld [vmem:[#allocation13 + $0x6d4] sm:$0xf]  ;;  %v9067_v10 = vor.u32 %v11492_v11, %v9064_v25  ;;  %v11457_v11 = vld [vmem:[#allocation13 + $0x3b4] sm:$0xf0] }
 0x28e   : > { %3351 = vmatmul.bf16.vlgmr.msra.gmra.mxu3 %v13342_v30  ;;  %v9320_v40 = vld [vmem:[#allocation13 + $0x6f0] sm:$0xf0]  ;;  %v9166_v25 = vld [vmem:[#allocation13 + $0x598] sm:$0xf] }
 0x28f   : > { %3378 = vmatpush.bf16.msrb.mxu1 %v9223_v49  ;;  %3399 = vmatpush.bf16.msrb.mxu3 %v8939_v13  ;;  %v11356_v39 = vld [vmem:[#allocation13 + $0x94] sm:$0xf]  ;;  %v9323_v15 = vor.u32 %v11556_v61, %v9320_v40  ;;  %v11521_v61 = vld [vmem:[#allocation13 + $0x5b4] sm:$0xf0] }
 0x290   : > { %3365 = vmatmul.bf16.vlgmr.msrb.gmra.mxu0 %v13344_v32  ;;  %v8520_v18 = vld [vmem:[#allocation13 + $0xb0] sm:$0xf0]  ;;  %v9422_v40 = vld [vmem:[#allocation13 + $0x798] sm:$0xf] }
 0x291   : > { %3413 = vmatpush.bf16.msra.mxu0 %v9195_v37  ;;  %3386 = vmatpush.bf16.msrb.mxu2 %v8651_v0  ;;  %v11420_v60 = vld [vmem:[#allocation13 + $0x294] sm:$0xf]  ;;  %v8523_v13 = vor.u32 %v11356_v39, %v8520_v18  ;;  %v8911_v39 = vor.u32 %v11457_v11, %v8910_v1  ;;  %v8622_v18 = vld [vmem:[#allocation13 + $0x158] sm:$0xf] }
 0x292   : > { %3379 = vmatmul.bf16.vlgmr.msrb.gmra.mxu1 %v13346_v2  ;;  %v11484_v6 = vld [vmem:[#allocation13 + $0x494] sm:$0xf]  ;;  %v8779_v34 = vor.u32 %v11420_v60, %v8776_v12  ;;  %v8878_v12 = vld [vmem:[#allocation13 + $0x358] sm:$0xf] }
 0x293   : > { %3427 = vmatpush.bf16.msra.mxu1 %v9451_v19  ;;  %3400 = vmatpush.bf16.msrb.mxu3 %v8907_v29  ;;  %v9032_v21 = vld [vmem:[#allocation13 + $0x4b0] sm:$0xf0]  ;;  %v8526_v53 = vld [vmem:[#allocation13 + $0x98] sm:$0xf] }
 0x294   : > { %v11548_v49 = vld [vmem:[#allocation13 + $0x694] sm:$0xf]  ;;  %v9035_v19 = vor.u32 %v11484_v6, %v9032_v21  ;;  %v11449_v6 = vld [vmem:[#allocation13 + $0x374] sm:$0xf0] }
 0x295   : > { %3414 = vmatpush.bf16.msra.mxu0 %v9163_v22  ;;  %3387 = vmatpush.bf16.msrb.mxu2 %v8619_v23  ;;  %v9288_v5 = vld [vmem:[#allocation13 + $0x6b0] sm:$0xf0]  ;;  %v9134_v21 = vld [vmem:[#allocation13 + $0x558] sm:$0xf] }
 0x296   : > { %v11348_v9 = vld [vmem:[#allocation13 + $0x54] sm:$0xf]  ;;  %v9291_v20 = vor.u32 %v11548_v49, %v9288_v5  ;;  %v11513_v49 = vld [vmem:[#allocation13 + $0x574] sm:$0xf0] }
 0x297   : > { %3428 = vmatpush.bf16.msra.mxu1 %v9419_v52  ;;  %3401 = vmatpush.bf16.msrb.mxu3 %v8875_v56  ;;  %v8488_v37 = vld [vmem:[#allocation13 + $0x70] sm:$0xf0]  ;;  %v8686_v56 = vld [vmem:[#allocation13 + $0x1d8] sm:$0xf] }
 0x298   : > { %v11412_v8 = vld [vmem:[#allocation13 + $0x254] sm:$0xf]  ;;  %v8491_v42 = vor.u32 %v11348_v9, %v8488_v37  ;;  %v9390_v5 = vld [vmem:[#allocation13 + $0x758] sm:$0xf]  ;;  %v8879_v9 = vor.u32 %v11449_v6, %v8878_v12 }
 0x299   : > { %3415 = vmatpush.bf16.msra.mxu0 %v9131_v57  ;;  %3388 = vmatpush.bf16.msrb.mxu2 %v8587_v63  ;;  %v8744_v33 = vld [vmem:[#allocation13 + $0x270] sm:$0xf0]  ;;  %v11465_v57 = vld [vmem:[#allocation13 + $0x3f4] sm:$0xf0] }
 0x29a   : > { %v11476_v35 = vld [vmem:[#allocation13 + $0x454] sm:$0xf]  ;;  %v8747_v62 = vor.u32 %v11412_v8, %v8744_v33  ;;  %v8943_v55 = vor.u32 %v11465_v57, %v8942_v46  ;;  %v8590_v37 = vld [vmem:[#allocation13 + $0x118] sm:$0xf] }
 0x29b   : > { %3429 = vmatpush.bf16.msra.mxu1 %v9387_v54  ;;  %3402 = vmatpush.bf16.msrb.mxu3 %v8843_v7  ;;  %v9000_v28 = vld [vmem:[#allocation13 + $0x470] sm:$0xf0]  ;;  %v9198_v54 = vld [vmem:[#allocation13 + $0x5d8] sm:$0xf]  ;;  %v8687_v7 = vor.u32 %v11401_v44, %v8686_v56 }
 0x29c   : > { %v11540_v51 = vld [vmem:[#allocation13 + $0x654] sm:$0xf]  ;;  %v9003_v16 = vor.u32 %v11476_v35, %v9000_v28  ;;  %v8846_v33 = vld [vmem:[#allocation13 + $0x318] sm:$0xf] }
 0x29d   : > { %3416 = vmatpush.bf16.msra.mxu0 %v9099_v59  ;;  %3389 = vmatpush.bf16.msrb.mxu2 %v8555_v27  ;;  %v9256_v0 = vld [vmem:[#allocation13 + $0x670] sm:$0xf0]  ;;  %v11393_v59 = vld [vmem:[#allocation13 + $0x1b4] sm:$0xf0] }
 0x29e   : > { %v11340_v29 = vld [vmem:[#allocation13 + $0x14] sm:$0xf]  ;;  %v9259_v17 = vor.u32 %v11540_v51, %v9256_v0  ;;  %v11585_v27 = vld [vmem:[#allocation13 + $0x7b4] sm:$0xf0]  ;;  %v3142_v51 = vpop.f32.mrf.mxu0 }
 0x29f   : > { %3430 = vmatpush.bf16.msra.mxu1 %v9355_v4  ;;  %3403 = vmatpush.bf16.msrb.mxu3 %v8811_v41  ;;  %v8456_v22 = vld [vmem:[#allocation13 + $0x30] sm:$0xf0]  ;;  %v9199_v4 = vor.u32 %v11529_v36, %v9198_v54  ;;  %v8655_v41 = vor.u32 %v11393_v59, %v8654_v58  ;;  %v9423_v60 = vor.u32 %v11585_v27, %v9422_v40  ;;  %v11441_v35 = vld [vmem:[#allocation13 + $0x334] sm:$0xf0] }
 0x2a0   : > { %v11404_v52 = vld [vmem:[#allocation13 + $0x214] sm:$0xf]  ;;  %v8459_v14 = vor.u32 %v11340_v29, %v8456_v22  ;;  %v9102_v28 = vld [vmem:[#allocation13 + $0x518] sm:$0xf] }
 0x2a1   : > { %3417 = vmatpush.bf16.msra.mxu0 %v9067_v10  ;;  %3390 = vmatpush.bf16.msrb.mxu2 %v8523_v13  ;;  %v8712_v45 = vld [vmem:[#allocation13 + $0x230] sm:$0xf0]  ;;  %v11385_v10 = vld [vmem:[#allocation13 + $0x174] sm:$0xf0] }
 0x2a2   : > { %v11468_v38 = vld [vmem:[#allocation13 + $0x414] sm:$0xf]  ;;  %v8715_v47 = vor.u32 %v11404_v52, %v8712_v45  ;;  %v11577_v13 = vld [vmem:[#allocation13 + $0x774] sm:$0xf0]  ;;  %v8847_v52 = vor.u32 %v11441_v35, %v8846_v33 }
 0x2a3   : > { %3431 = vmatpush.bf16.msra.mxu1 %v9323_v15  ;;  %3404 = vmatpush.bf16.msrb.mxu3 %v8779_v34  ;;  %v8968_v26 = vld [vmem:[#allocation13 + $0x430] sm:$0xf0]  ;;  %v9167_v15 = vor.u32 %v11521_v61, %v9166_v25  ;;  %v8623_v34 = vor.u32 %v11385_v10, %v8622_v18  ;;  %v9391_v8 = vor.u32 %v11577_v13, %v9390_v5  ;;  %v11505_v0 = vld [vmem:[#allocation13 + $0x534] sm:$0xf0] }
 0x2a4   : > { %v11532_v43 = vld [vmem:[#allocation13 + $0x614] sm:$0xf]  ;;  %v8971_v24 = vor.u32 %v11468_v38, %v8968_v26  ;;  %v9358_v29 = vld [vmem:[#allocation13 + $0x718] sm:$0xf]  ;;  %v3114_v26 = vpop.f32.mrf.mxu2 }
 0x2a5   : > { %3418 = vmatpush.bf16.msra.mxu0 %v9035_v19  ;;  %v9224_v23 = vld [vmem:[#allocation13 + $0x630] sm:$0xf0]  ;;  %3391 = vmatpush.bf16.msrb.mxu2 %v8491_v42  ;;  %v11377_v19 = vld [vmem:[#allocation13 + $0x134] sm:$0xf0] }
 0x2a6   : > { %v9227_v63 = vor.u32 %v11532_v43, %v9224_v23  ;;  %v11569_v42 = vld [vmem:[#allocation13 + $0x734] sm:$0xf0]  ;;  %v8591_v22 = vor.u32 %v11377_v19, %v8590_v37  ;;  %v3128_v43 = vpop.f32.mrf.mxu3  ;;  %v13374_v25 = vpop.f32.mrf.mxu0 }
 0x2a7   : > { %3432 = vmatpush.bf16.msra.mxu1 %v9291_v20  ;;  %3405 = vmatpush.bf16.msrb.mxu3 %v8747_v62  ;;  %v9135_v20 = vor.u32 %v11513_v49, %v9134_v21  ;;  %v3156_v62 = vpop.f32.mrf.mxu1  ;;  %v8558_v45 = vld [vmem:[#allocation13 + $0xd8] sm:$0xf]  ;;  %v9359_v38 = vor.u32 %v11569_v42, %v9358_v29  ;;  %v3129_v46 = vadd.f32 %v3128_v43, %v3114_v26  ;;  %v11397_v42 = vld [vmem:[#allocation13 + $0x1dc] sm:$0xf] }
 0x2a8   : > { %v8814_v23 = vld [vmem:[#allocation13 + $0x2d8] sm:$0xf]  ;;  %v11589_v26 = vld [vmem:[#allocation13 + $0x7dc] sm:$0xf] }
 0x2a9   : > { %3419 = vmatpush.bf16.msra.mxu0 %v9003_v16  ;;  %3392 = vmatpush.bf16.msrb.mxu2 %v8459_v14  ;;  %v11369_v16 = vld [vmem:[#allocation13 + $0xf4] sm:$0xf0]  ;;  %v9456_v43 = vld [vmem:[#allocation13 + $0x7f8] sm:$0xf0] }
 0x2aa   : > { %v11433_v56 = vld [vmem:[#allocation13 + $0x2f4] sm:$0xf0]  ;;  %v8559_v36 = vor.u32 %v11369_v16, %v8558_v45  ;;  %v11525_v45 = vld [vmem:[#allocation13 + $0x5dc] sm:$0xf] }
 0x2ab   : > { %3433 = vmatpush.bf16.msra.mxu1 %v9259_v17  ;;  %3406 = vmatpush.bf16.msrb.mxu3 %v8715_v47  ;;  %v9103_v17 = vor.u32 %v11505_v0, %v9102_v28  ;;  %v9070_v44 = vld [vmem:[#allocation13 + $0x4d8] sm:$0xf]  ;;  %v3143_v47 = vadd.f32 %v3142_v51, %v3129_v46  ;;  %v8815_v48 = vor.u32 %v11433_v56, %v8814_v23 }
 0x2ac   : > { %3393 = vmatmul.bf16.vlgmr.msrb.gmra.mxu2 %v13340_v3  ;;  %v11497_v57 = vld [vmem:[#allocation13 + $0x4f4] sm:$0xf0]  ;;  %v13376_v10 = vpop.f32.mrf.mxu2 }
 0x2ad   : > { %3420 = vmatpush.bf16.msra.mxu0 %v8971_v24  ;;  %3441 = vmatpush.bf16.msra.mxu2 %v8687_v7  ;;  %v9326_v54 = vld [vmem:[#allocation13 + $0x6d8] sm:$0xf] }
 0x2ae   : > { %3407 = vmatmul.bf16.vlgmr.msrb.gmra.mxu3 %v13342_v30  ;;  %v11561_v14 = vld [vmem:[#allocation13 + $0x6f4] sm:$0xf0] }
 0x2af   : > { %3434 = vmatpush.bf16.msra.mxu1 %v9227_v63  ;;  %3455 = vmatpush.bf16.msra.mxu3 %v8943_v55  ;;  %v11361_v24 = vld [vmem:[#allocation13 + $0xb4] sm:$0xf0]  ;;  %v9071_v63 = vor.u32 %v11497_v57, %v9070_v44  ;;  %v9327_v7 = vor.u32 %v11561_v14, %v9326_v54  ;;  %v13380_v21 = vpop.f32.mrf.mxu1  ;;  %v3198_v57 = vpop.f32.mrf.mxu0 }
 0x2b0   : > { %3421 = vmatmul.bf16.vlgmr.msra.gmra.mxu0 %v13344_v32  ;;  %v8782_v55 = vld [vmem:[#allocation13 + $0x298] sm:$0xf]  ;;  %v8527_v61 = vor.u32 %v11361_v24, %v8526_v53  ;;  %v9459_v24 = vor.u32 %v11589_v26, %v9456_v43  ;;  %v8560_v26 = vld [vmem:[#allocation13 + $0xf8] sm:$0xf0] }
 0x2b1   : > { %3469 = vmatpush.bf16.msrb.mxu0 %v9199_v4  ;;  %3442 = vmatpush.bf16.msra.mxu2 %v8655_v41  ;;  %v11425_v58 = vld [vmem:[#allocation13 + $0x2b4] sm:$0xf0]  ;;  %v13372_v4 = vadd.f32 %v3156_v62, %v3143_v47  ;;  %v8688_v62 = vld [vmem:[#allocation13 + $0x1f8] sm:$0xf0] }
 0x2b2   : > { %3435 = vmatmul.bf16.vlgmr.msra.gmra.mxu1 %v13346_v2  ;;  %v9038_v59 = vld [vmem:[#allocation13 + $0x498] sm:$0xf]  ;;  %v8783_v40 = vor.u32 %v11425_v58, %v8782_v55  ;;  %v8691_v54 = vor.u32 %v11397_v42, %v8688_v62  ;;  %v11517_v55 = vld [vmem:[#allocation13 + $0x59c] sm:$0xf] }
 0x2b3   : > { %3483 = vmatpush.bf16.msrb.mxu1 %v9455_v50  ;;  %3456 = vmatpush.bf16.msra.mxu3 %v8911_v39  ;;  %v11489_v50 = vld [vmem:[#allocation13 + $0x4b4] sm:$0xf0]  ;;  %v9104_v62 = vld [vmem:[#allocation13 + $0x538] sm:$0xf0] }
 0x2b4   : > { %v9294_v1 = vld [vmem:[#allocation13 + $0x698] sm:$0xf]  ;;  %v9039_v39 = vor.u32 %v11489_v50, %v9038_v59  ;;  %v3170_v44 = vpop.f32.mrf.mxu2  ;;  %v9168_v50 = vld [vmem:[#allocation13 + $0x5b8] sm:$0xf0] }
 0x2b5   : > { %3470 = vmatpush.bf16.msrb.mxu0 %v9167_v15  ;;  %3443 = vmatpush.bf16.msra.mxu2 %v8623_v34  ;;  %v11553_v11 = vld [vmem:[#allocation13 + $0x6b4] sm:$0xf0]  ;;  %v13378_v15 = vpop.f32.mrf.mxu3 }
 0x2b6   : > { %v8494_v27 = vld [vmem:[#allocation13 + $0x58] sm:$0xf]  ;;  %v9295_v18 = vor.u32 %v11553_v11, %v9294_v1  ;;  %v11581_v1 = vld [vmem:[#allocation13 + $0x79c] sm:$0xf] }
 0x2b7   : > { %3484 = vmatpush.bf16.msrb.mxu1 %v9423_v60  ;;  %3457 = vmatpush.bf16.msra.mxu3 %v8879_v9  ;;  %v11353_v41 = vld [vmem:[#allocation13 + $0x74] sm:$0xf0]  ;;  %v3212_v58 = vpop.f32.mrf.mxu1  ;;  %v9424_v11 = vld [vmem:[#allocation13 + $0x7b8] sm:$0xf0]  ;;  %v13392_v42 = vpop.f32.mrf.mxu0 }
 0x2b8   : > { %v8750_v60 = vld [vmem:[#allocation13 + $0x258] sm:$0xf]  ;;  %v8495_v9 = vor.u32 %v11353_v41, %v8494_v27  ;;  %v11381_v41 = vld [vmem:[#allocation13 + $0x15c] sm:$0xf] }
 0x2b9   : > { %3471 = vmatpush.bf16.msrb.mxu0 %v9135_v20  ;;  %3444 = vmatpush.bf16.msra.mxu2 %v8591_v22  ;;  %v11417_v12 = vld [vmem:[#allocation13 + $0x274] sm:$0xf0]  ;;  %v11461_v22 = vld [vmem:[#allocation13 + $0x3dc] sm:$0xf] }
 0x2ba   : > { %v9006_v6 = vld [vmem:[#allocation13 + $0x458] sm:$0xf]  ;;  %v8751_v37 = vor.u32 %v11417_v12, %v8750_v60  ;;  %v9427_v60 = vor.u32 %v11581_v1, %v9424_v11  ;;  %v11445_v12 = vld [vmem:[#allocation13 + $0x35c] sm:$0xf] }
 0x2bb   : > { %3485 = vmatpush.bf16.msrb.mxu1 %v9391_v8  ;;  %3458 = vmatpush.bf16.msra.mxu3 %v8847_v52  ;;  %v11481_v49 = vld [vmem:[#allocation13 + $0x474] sm:$0xf0]  ;;  %v8944_v52 = vld [vmem:[#allocation13 + $0x3f8] sm:$0xf0] }
 0x2bc   : > { %v9262_v5 = vld [vmem:[#allocation13 + $0x658] sm:$0xf]  ;;  %v9007_v33 = vor.u32 %v11481_v49, %v9006_v6  ;;  %v8947_v14 = vor.u32 %v11461_v22, %v8944_v52  ;;  %v8880_v6 = vld [vmem:[#allocation13 + $0x378] sm:$0xf0] }
 0x2bd   : > { %3472 = vmatpush.bf16.msrb.mxu0 %v9103_v17  ;;  %3445 = vmatpush.bf16.msra.mxu2 %v8559_v36  ;;  %v11545_v13 = vld [vmem:[#allocation13 + $0x674] sm:$0xf0]  ;;  %v3184_v46 = vpop.f32.mrf.mxu3  ;;  %v11389_v36 = vld [vmem:[#allocation13 + $0x19c] sm:$0xf] }
 0x2be   : > { %v8462_v34 = vld [vmem:[#allocation13 + $0x18] sm:$0xf]  ;;  %v9263_v35 = vor.u32 %v11545_v13, %v9262_v5  ;;  %v3185_v47 = vadd.f32 %v3184_v46, %v3170_v44  ;;  %v11509_v49 = vld [vmem:[#allocation13 + $0x55c] sm:$0xf] }
 0x2bf   : > { %3486 = vmatpush.bf16.msrb.mxu1 %v9359_v38  ;;  %3459 = vmatpush.bf16.msra.mxu3 %v8815_v48  ;;  %v11345_v19 = vld [vmem:[#allocation13 + $0x34] sm:$0xf0]  ;;  %v9200_v38 = vld [vmem:[#allocation13 + $0x5f8] sm:$0xf0] }
 0x2c0   : > { %v8718_v20 = vld [vmem:[#allocation13 + $0x218] sm:$0xf]  ;;  %v8463_v16 = vor.u32 %v11345_v19, %v8462_v34  ;;  %v8656_v48 = vld [vmem:[#allocation13 + $0x1b8] sm:$0xf0]  ;;  %v9203_v53 = vor.u32 %v11525_v45, %v9200_v38  ;;  %v3199_v59 = vadd.f32 %v3198_v57, %v3185_v47  ;;  %v13394_v45 = vpop.f32.mrf.mxu1 }
 0x2c1   : > { %3473 = vmatpush.bf16.msrb.mxu0 %v9071_v63  ;;  %3446 = vmatpush.bf16.msra.mxu2 %v8527_v61  ;;  %v11409_v8 = vld [vmem:[#allocation13 + $0x234] sm:$0xf0]  ;;  %v11453_v63 = vld [vmem:[#allocation13 + $0x39c] sm:$0xf] }
 0x2c2   : > { %v8974_v28 = vld [vmem:[#allocation13 + $0x418] sm:$0xf]  ;;  %v8719_v17 = vor.u32 %v11409_v8, %v8718_v20  ;;  %v13382_v61 = vadd.f32 %v3212_v58, %v3199_v59  ;;  %v9136_v5 = vld [vmem:[#allocation13 + $0x578] sm:$0xf0]  ;;  %v8883_v20 = vor.u32 %v11445_v12, %v8880_v6 }
 0x2c3   : > { %3487 = vmatpush.bf16.msrb.mxu1 %v9327_v7  ;;  %3460 = vmatpush.bf16.msra.mxu3 %v8783_v40  ;;  %v11473_v51 = vld [vmem:[#allocation13 + $0x434] sm:$0xf0]  ;;  %v8912_v7 = vld [vmem:[#allocation13 + $0x3b8] sm:$0xf0]  ;;  %v8659_v40 = vor.u32 %v11389_v36, %v8656_v48 }
 0x2c4   : > { %v9230_v0 = vld [vmem:[#allocation13 + $0x618] sm:$0xf]  ;;  %v8975_v23 = vor.u32 %v11473_v51, %v8974_v28  ;;  %v8915_v27 = vor.u32 %v11453_v63, %v8912_v7  ;;  %v11573_v13 = vld [vmem:[#allocation13 + $0x75c] sm:$0xf] }
 0x2c5   : > { %3474 = vmatpush.bf16.msrb.mxu0 %v9039_v39  ;;  %v11537_v29 = vld [vmem:[#allocation13 + $0x634] sm:$0xf0]  ;;  %3447 = vmatpush.bf16.msra.mxu2 %v8495_v9  ;;  %v8624_v39 = vld [vmem:[#allocation13 + $0x178] sm:$0xf0]  ;;  %v13388_v9 = vpop.f32.mrf.mxu2 }
 0x2c6   : > { %v9231_v56 = vor.u32 %v11537_v29, %v9230_v0  ;;  %v9392_v34 = vld [vmem:[#allocation13 + $0x778] sm:$0xf0]  ;;  %v8627_v19 = vor.u32 %v11381_v41, %v8624_v39 }
 0x2c7   : > { %3488 = vmatpush.bf16.msrb.mxu1 %v9295_v18  ;;  %3461 = vmatpush.bf16.msra.mxu3 %v8751_v37  ;;  %v9171_v18 = vor.u32 %v11517_v55, %v9168_v50  ;;  %v13390_v37 = vpop.f32.mrf.mxu3  ;;  %v11373_v8 = vld [vmem:[#allocation13 + $0x11c] sm:$0xf]  ;;  %v9395_v28 = vor.u32 %v11573_v13, %v9392_v34 }
 0x2c8   : > { %v11437_v51 = vld [vmem:[#allocation13 + $0x31c] sm:$0xf] }
 0x2c9   : > { %3475 = vmatpush.bf16.msrb.mxu0 %v9007_v33  ;;  %3448 = vmatpush.bf16.msra.mxu2 %v8463_v16  ;;  %v8592_v33 = vld [vmem:[#allocation13 + $0x138] sm:$0xf0] }
 0x2ca   : > { %v8848_v0 = vld [vmem:[#allocation13 + $0x338] sm:$0xf0]  ;;  %v8595_v16 = vor.u32 %v11373_v8, %v8592_v33 }
 0x2cb   : > { %3489 = vmatpush.bf16.msrb.mxu1 %v9263_v35  ;;  %3462 = vmatpush.bf16.msra.mxu3 %v8719_v17  ;;  %v9139_v35 = vor.u32 %v11509_v49, %v9136_v5  ;;  %v11501_v29 = vld [vmem:[#allocation13 + $0x51c] sm:$0xf]  ;;  %v8851_v17 = vor.u32 %v11437_v51, %v8848_v0 }
 0x2cc   : > { %3449 = vmatmul.bf16.vlgmr.msra.gmra.mxu2 %v13340_v3  ;;  %v11565_v22 = vld [vmem:[#allocation13 + $0x71c] sm:$0xf]  ;;  %v9107_v43 = vor.u32 %v11501_v29, %v9104_v62 }
 0x2cd   : > { %3476 = vmatpush.bf16.msrb.mxu0 %v8975_v23  ;;  %3497 = vmatpush.bf16.msrb.mxu2 %v8691_v54  ;;  %v9360_v52 = vld [vmem:[#allocation13 + $0x738] sm:$0xf0]  ;;  %v3254_v41 = vpop.f32.mrf.mxu0 }
 0x2ce   : > { %3463 = vmatmul.bf16.vlgmr.msra.gmra.mxu3 %v13342_v30  ;;  %v11365_v38 = vld [vmem:[#allocation13 + $0xdc] sm:$0xf]  ;;  %v9363_v23 = vor.u32 %v11565_v22, %v9360_v52 }
 0x2cf   : > { %3490 = vmatpush.bf16.msrb.mxu1 %v9231_v56  ;;  %3511 = vmatpush.bf16.msrb.mxu3 %v8947_v14  ;;  %v11429_v56 = vld [vmem:[#allocation13 + $0x2dc] sm:$0xf]  ;;  %v8563_v47 = vor.u32 %v11365_v38, %v8560_v26  ;;  %v3226_v7 = vpop.f32.mrf.mxu2 }
 0x2d0   : > { %3477 = vmatmul.bf16.vlgmr.msrb.gmra.mxu0 %v13344_v32  ;;  %v8816_v44 = vld [vmem:[#allocation13 + $0x2f8] sm:$0xf0] }
 0x2d1   : > { %3525 = vmatpush.bf16.msra.mxu0 %v9203_v53  ;;  %3498 = vmatpush.bf16.msrb.mxu2 %v8659_v40  ;;  %v11493_v46 = vld [vmem:[#allocation13 + $0x4dc] sm:$0xf]  ;;  %v8819_v36 = vor.u32 %v11429_v56, %v8816_v44  ;;  %v3240_v55 = vpop.f32.mrf.mxu3 }
 0x2d2   : > { %3491 = vmatmul.bf16.vlgmr.msrb.gmra.mxu1 %v13346_v2  ;;  %v9072_v57 = vld [vmem:[#allocation13 + $0x4f8] sm:$0xf0] }
 0x2d3   : > { %3539 = vmatpush.bf16.msra.mxu1 %v9459_v24  ;;  %3512 = vmatpush.bf16.msrb.mxu3 %v8915_v27  ;;  %v11557_v54 = vld [vmem:[#allocation13 + $0x6dc] sm:$0xf]  ;;  %v9075_v24 = vor.u32 %v11493_v46, %v9072_v57  ;;  %v3241_v27 = vadd.f32 %v3240_v55, %v3226_v7 }
 0x2d4   : > { %v9328_v14 = vld [vmem:[#allocation13 + $0x6f8] sm:$0xf0] }
 0x2d5   : > { %3526 = vmatpush.bf16.msra.mxu0 %v9171_v18  ;;  %3499 = vmatpush.bf16.msrb.mxu2 %v8627_v19  ;;  %v11357_v48 = vld [vmem:[#allocation13 + $0x9c] sm:$0xf]  ;;  %v9331_v63 = vor.u32 %v11557_v54, %v9328_v14  ;;  %v3255_v6 = vadd.f32 %v3254_v41, %v3241_v27 }
 0x2d6   : > { %v8528_v53 = vld [vmem:[#allocation13 + $0xb8] sm:$0xf0] }
 0x2d7   : > { %3540 = vmatpush.bf16.msra.mxu1 %v9427_v60  ;;  %3513 = vmatpush.bf16.msrb.mxu3 %v8883_v20  ;;  %v11421_v58 = vld [vmem:[#allocation13 + $0x29c] sm:$0xf]  ;;  %v8531_v39 = vor.u32 %v11357_v48, %v8528_v53  ;;  %v3268_v20 = vpop.f32.mrf.mxu1  ;;  %v3228_v54 = vpop.f32.mrf.mxu2 }
 0x2d8   : > { %v8784_v59 = vld [vmem:[#allocation13 + $0x2b8] sm:$0xf0] }
 0x2d9   : > { %3527 = vmatpush.bf16.msra.mxu0 %v9139_v35  ;;  %3500 = vmatpush.bf16.msrb.mxu2 %v8595_v16  ;;  %v11485_v50 = vld [vmem:[#allocation13 + $0x49c] sm:$0xf]  ;;  %v8787_v18 = vor.u32 %v11421_v58, %v8784_v59  ;;  %v3242_v14 = vpop.f32.mrf.mxu3  ;;  %v3555_v59 = vrot.slane %v13372_v4, 4 }
 0x2da   : > { %v9040_v1 = vld [vmem:[#allocation13 + $0x4b8] sm:$0xf0] }
 0x2db   : > { %3541 = vmatpush.bf16.msra.mxu1 %v9395_v28  ;;  %3514 = vmatpush.bf16.msrb.mxu3 %v8851_v17  ;;  %v11549_v11 = vld [vmem:[#allocation13 + $0x69c] sm:$0xf]  ;;  %v9043_v49 = vor.u32 %v11485_v50, %v9040_v1  ;;  %v13396_v28 = vadd.f32 %v3268_v20, %v3255_v6  ;;  %v3561_v1 = vrot.slane %v13382_v61, 4 }
 0x2dc   : > { %v9296_v40 = vld [vmem:[#allocation13 + $0x6b8] sm:$0xf0] }
 0x2dd   : > { %3528 = vmatpush.bf16.msra.mxu0 %v9107_v43  ;;  %3501 = vmatpush.bf16.msrb.mxu2 %v8563_v47  ;;  %v11349_v60 = vld [vmem:[#allocation13 + $0x5c] sm:$0xf]  ;;  %v9299_v5 = vor.u32 %v11549_v11, %v9296_v40  ;;  %v3256_v47 = vpop.f32.mrf.mxu0  ;;  %v3556_v40 = vadd.f32 %v3555_v59, %v13372_v4  ;;  %v3567_v27 = vrot.slane %v13396_v28, 4 }
 0x2de   : > { %v8496_v12 = vld [vmem:[#allocation13 + $0x78] sm:$0xf0] }
 0x2df   : > { %3542 = vmatpush.bf16.msra.mxu1 %v9363_v23  ;;  %3515 = vmatpush.bf16.msrb.mxu3 %v8819_v36  ;;  %v11413_v13 = vld [vmem:[#allocation13 + $0x25c] sm:$0xf]  ;;  %v8499_v51 = vor.u32 %v11349_v60, %v8496_v12  ;;  %v3270_v36 = vpop.f32.mrf.mxu1  ;;  %v3568_v60 = vadd.f32 %v3567_v27, %v13396_v28 }
 0x2e0   : > { %v8752_v34 = vld [vmem:[#allocation13 + $0x278] sm:$0xf0] }
 0x2e1   : > { %3529 = vmatpush.bf16.msra.mxu0 %v9075_v24  ;;  %v11477_v19 = vld [vmem:[#allocation13 + $0x45c] sm:$0xf]  ;;  %3502 = vmatpush.bf16.msrb.mxu2 %v8531_v39  ;;  %v8755_v0 = vor.u32 %v11413_v13, %v8752_v34 }
 0x2e2   : > { %v9008_v8 = vld [vmem:[#allocation13 + $0x478] sm:$0xf0] }
 0x2e3   : > { %3543 = vmatpush.bf16.msra.mxu1 %v9331_v63  ;;  %v11541_v33 = vld [vmem:[#allocation13 + $0x65c] sm:$0xf]  ;;  %3516 = vmatpush.bf16.msrb.mxu3 %v8787_v18  ;;  %v9011_v22 = vor.u32 %v11477_v19, %v9008_v8 }
 0x2e4   : > { %v9264_v35 = vld [vmem:[#allocation13 + $0x678] sm:$0xf0] }
 0x2e5   : > { %v11341_v29 = vld [vmem:[#allocation13 + $0x1c] sm:$0xf]  ;;  %3530 = vmatpush.bf16.msra.mxu0 %v9043_v49  ;;  %v9267_v52 = vor.u32 %v11541_v33, %v9264_v35  ;;  %3503 = vmatpush.bf16.msrb.mxu2 %v8499_v51  ;;  %v3569_v33 = vrot.slane %v3568_v60, 2 }
 0x2e6   : > { %v8464_v62 = vld [vmem:[#allocation13 + $0x38] sm:$0xf0] }
 0x2e7   : > { %3544 = vmatpush.bf16.msra.mxu1 %v9299_v5  ;;  %v11405_v16 = vld [vmem:[#allocation13 + $0x21c] sm:$0xf]  ;;  %3517 = vmatpush.bf16.msrb.mxu3 %v8755_v0  ;;  %v8467_v56 = vor.u32 %v11341_v29, %v8464_v62 }
 0x2e8   : > { %v8720_v17 = vld [vmem:[#allocation13 + $0x238] sm:$0xf0] }
 0x2e9   : > { %v11469_v38 = vld [vmem:[#allocation13 + $0x41c] sm:$0xf]  ;;  %v8723_v44 = vor.u32 %v11405_v16, %v8720_v17  ;;  %3531 = vmatpush.bf16.msra.mxu0 %v9011_v22  ;;  %3504 = vmatpush.bf16.msrb.mxu2 %v8467_v56  ;;  %v3570_v17 = vadd.f32 %v3569_v33, %v3568_v60 }
 0x2ea   : > { %v8976_v26 = vld [vmem:[#allocation13 + $0x438] sm:$0xf0] }
 0x2eb   : > { %v11533_v43 = vld [vmem:[#allocation13 + $0x61c] sm:$0xf]  ;;  %3545 = vmatpush.bf16.msra.mxu1 %v9267_v52  ;;  %v8979_v46 = vor.u32 %v11469_v38, %v8976_v26  ;;  %3518 = vmatpush.bf16.msrb.mxu3 %v8723_v44 }
 0x2ec   : > { %v9232_v23 = vld [vmem:[#allocation13 + $0x638] sm:$0xf0]  ;;  %3505 = vmatmul.bf16.vlgmr.msrb.gmra.mxu2 %v13340_v3  ;;  %v3131_v3 = vadd.f32 %v13378_v15, %v13376_v10  ;;  %v3243_v15 = vadd.f32 %v3242_v14, %v3228_v54  ;;  %v3571_v14 = vrot.slane %v3570_v17, 1 }
 0x2ed   : > { %v9235_v57 = vor.u32 %v11533_v43, %v9232_v23  ;;  %3532 = vmatpush.bf16.msra.mxu0 %v8979_v46  ;;  %v3310_v63 = vpop.f32.mrf.mxu0 }
 0x2ee   : > { %3519 = vmatmul.bf16.vlgmr.msrb.gmra.mxu3 %v13342_v30  ;;  %v3187_v30 = vadd.f32 %v13390_v37, %v13388_v9  ;;  %v3562_v9 = vadd.f32 %v3561_v1, %v13382_v61  ;;  %v3257_v39 = vadd.f32 %v3256_v47, %v3243_v15 }
 0x2ef   : > { %3546 = vmatpush.bf16.msra.mxu1 %v9235_v57  ;;  %v3282_v48 = vpop.f32.mrf.mxu2  ;;  %v3324_v55 = vpop.f32.mrf.mxu1 }
 0x2f0   : > { %3533 = vmatmul.bf16.vlgmr.msra.gmra.mxu0 %v13344_v32  ;;  %v3145_v32 = vadd.f32 %v13374_v25, %v3131_v3  ;;  %v3563_v18 = vrot.slane %v3562_v9, 2  ;;  %v13426_v5 = vadd.f32 %v3270_v36, %v3257_v39 }
 0x2f1   : > { %v3296_v53 = vpop.f32.mrf.mxu3 }
 0x2f2   : > { %3547 = vmatmul.bf16.vlgmr.msra.gmra.mxu1 %v13346_v2  ;;  %v3297_v24 = vadd.f32 %v3296_v53, %v3282_v48  ;;  %v3201_v2 = vadd.f32 %v13392_v42, %v3187_v30  ;;  %v13412_v50 = vadd.f32 %v13380_v21, %v3145_v32  ;;  %v3557_v21 = vrot.slane %v3556_v40, 2  ;;  %14410 = vst [vmem:[#allocation32_spill] sm:$0xff] %v13426_v5 }
 0x2f3   : > { %v3564_v34 = vadd.f32 %v3563_v18, %v3562_v9  ;;  %v3615_v29 = vrot.slane %v13426_v5, 4  ;;  %v3572_v30 = vadd.f32 %v3571_v14, %v3570_v17 }
 0x2f4   : > { %v3311_v7 = vadd.f32 %v3310_v63, %v3297_v24  ;;  %14408 = vst [vmem:[#allocation30_spill] sm:$0xff] %v13412_v50  ;;  %v13416_v11 = vadd.f32 %v13394_v45, %v3201_v2  ;;  %v3603_v10 = vrot.slane %v13412_v50, 4  ;;  %v3558_v12 = vadd.f32 %v3557_v21, %v3556_v40 }
 0x2f5   : > { %v3312_v49 = vpop.f32.mrf.mxu0  ;;  %v3565_v52 = vrot.slane %v3564_v34, 1  ;;  %v3616_v56 = vadd.f32 %v3615_v29, %v13426_v5 }
 0x2f6   : > { %v13402_v58 = vadd.f32 %v3324_v55, %v3311_v7  ;;  %14409 = vst [vmem:[#allocation31_spill] sm:$0xff] %v13416_v11  ;;  %v3609_v25 = vrot.slane %v13416_v11, 4  ;;  %v3604_v41 = vadd.f32 %v3603_v10, %v13412_v50  ;;  %v3559_v35 = vrot.slane %v3558_v12, 1 }
 0x2f7   : > { %v3284_v37 = vpop.f32.mrf.mxu2  ;;  %v3326_v0 = vpop.f32.mrf.mxu1  ;;  %v3566_v57 = vadd.f32 %v3565_v52, %v3564_v34  ;;  %v3617_v24 = vrot.slane %v3616_v56, 2 }
 0x2f8   : > { %14407 = vst [vmem:[#allocation29_spill] sm:$0xff] %v13402_v58  ;;  %v3610_v45 = vadd.f32 %v3609_v25, %v13416_v11  ;;  %v3605_v6 = vrot.slane %v3604_v41, 2  ;;  %v3573_v38 = vrot.slane %v13402_v58, 4  ;;  %v3560_v26 = vadd.f32 %v3559_v35, %v3558_v12 }
 0x2f9   : > { %v3298_v42 = vpop.f32.mrf.mxu3  ;;  %v13441_v55 = vmul.f32 %v3566_v57, %v12978_v31  ;;  %v3618_v1 = vadd.f32 %v3617_v24, %v3616_v56 }
 0x2fa   : > { %v3299_v13 = vadd.f32 %v3298_v42, %v3284_v37  ;;  %v3611_v19 = vrot.slane %v3610_v45, 2  ;;  %v3606_v51 = vadd.f32 %v3605_v6, %v3604_v41  ;;  %v3574_v47 = vadd.f32 %v3573_v38, %v13402_v58 }
 0x2fb   : > { %v13435_v36 = vmul.f32 %v3560_v26, %v12978_v31  ;;  %v3668_v15 = vsub.f32 %v13382_v61, %v13441_v55  ;;  %v13456_v42 = vmul.f32 %v3572_v30, %v12978_v31  ;;  %v3619_v18 = vrot.slane %v3618_v1, 1 }
 0x2fc   : > { %v3313_v62 = vadd.f32 %v3312_v49, %v3299_v13  ;;  %v3612_v16 = vadd.f32 %v3611_v19, %v3610_v45  ;;  %v3607_v43 = vrot.slane %v3606_v51, 1  ;;  %v3575_v32 = vrot.slane %v3574_v47, 2 }
 0x2fd   : > { %v3667_v2 = vsub.f32 %v13372_v4, %v13435_v36  ;;  %v3684_v6 = vmul.f32 %v3668_v15, %v3668_v15  ;;  %v3669_v13 = vsub.f32 %v13396_v28, %v13456_v42  ;;  %v3620_v33 = vadd.f32 %v3619_v18, %v3618_v1 }
 0x2fe   : > { %v13431_v44 = vadd.f32 %v3326_v0, %v3313_v62  ;;  %v3613_v54 = vrot.slane %v3612_v16, 1  ;;  %v3608_v48 = vadd.f32 %v3607_v43, %v3606_v51  ;;  %v3576_v27 = vadd.f32 %v3575_v32, %v3574_v47 }
 0x2ff   : > { %v3683_v21 = vmul.f32 %v3667_v2, %v3667_v2  ;;  %v3705_v29 = vrot.slane %v3684_v6, 4  ;;  %v13466_v26 = vmul.f32 %v3620_v33, %v12978_v31 }
 0x300   : > { %14411 = vst [vmem:[#allocation33_spill] sm:$0xff] %v13431_v44  ;;  %v3621_v63 = vrot.slane %v13431_v44, 4  ;;  %v3614_v3 = vadd.f32 %v3613_v54, %v3612_v16  ;;  %v13446_v59 = vmul.f32 %v3608_v48, %v12978_v31  ;;  %v3577_v34 = vrot.slane %v3576_v27, 1 }
 0x301   : > { %14414 = vst [vmem:[#allocation36_spill] sm:$0xff] %v13466_v26  ;;  %v3706_v54 = vadd.f32 %v3705_v29, %v3684_v6  ;;  %v3677_v32 = vsub.f32 %v13426_v5, %v13466_v26 }
 0x302   : > { %14413 = vst [vmem:[#allocation35_spill] sm:$0xff] %v13446_v59  ;;  %v3622_v40 = vadd.f32 %v3621_v63, %v13431_v44  ;;  %v13453_v9 = vmul.f32 %v3614_v3, %v12978_v31  ;;  %v3675_v41 = vsub.f32 %v13412_v50, %v13446_v59  ;;  %v3578_v52 = vadd.f32 %v3577_v34, %v3576_v27  ;;  %v11625_v59 = vld [vmem:[#allocation17 + $0xf8] sm:$0xf0] }
 0x303   : > { %v3693_v18 = vmul.f32 %v3677_v32, %v3677_v32 }
 0x304   : > { %v3623_v45 = vrot.slane %v3622_v40, 2  ;;  %v3676_v49 = vsub.f32 %v13416_v11, %v13453_v9 }
 0x306   : > { %v3624_v35 = vadd.f32 %v3623_v45, %v3622_v40  ;;  %v3692_v62 = vmul.f32 %v3676_v49, %v3676_v49 }
 0x308   : > { %v3625_v43 = vrot.slane %v3624_v35, 1  ;;  %v3753_v14 = vrot.slane %v3692_v62, 4 }
 0x30a   : > { %v3626_v2 = vadd.f32 %v3625_v43, %v3624_v35  ;;  %v3754_v15 = vadd.f32 %v3753_v14, %v3692_v62  ;;  %v3759_v62 = vrot.slane %v3693_v18, 4 }
 0x30c   : > { %v13482_v45 = vmul.f32 %v3626_v2, %v12978_v31  ;;  %v3755_v34 = vrot.slane %v3754_v15, 2 }
 0x30d   : > { %v3366_v23 = vpop.f32.mrf.mxu0 }
 0x30e   : > { %14417 = vst [vmem:[#allocation39_spill] sm:$0xff] %v13482_v45  ;;  %v3756_v43 = vadd.f32 %v3755_v34, %v3754_v15 }
 0x30f   : > { %v3338_v20 = vpop.f32.mrf.mxu2  ;;  %v3380_v53 = vpop.f32.mrf.mxu1 }
 0x310   : > { %v3757_v2 = vrot.slane %v3756_v43, 1 }
 0x311   : > { %v3352_v8 = vpop.f32.mrf.mxu3 }
 0x312   : > { %v3353_v22 = vadd.f32 %v3352_v8, %v3338_v20  ;;  %v3699_v20 = vrot.slane %v3683_v21, 4  ;;  %v3691_v8 = vmul.f32 %v3675_v41, %v3675_v41 }
 0x314   : > { %v3367_v46 = vadd.f32 %v3366_v23, %v3353_v22  ;;  %v3685_v22 = vmul.f32 %v3669_v13, %v3669_v13  ;;  %v3700_v16 = vadd.f32 %v3699_v20, %v3683_v21  ;;  %v3747_v17 = vrot.slane %v3691_v8, 4 }
 0x315   : > { %v3368_v39 = vpop.f32.mrf.mxu0 }
 0x316   : > { %v13438_v7 = vadd.f32 %v3380_v53, %v3367_v46  ;;  %v3711_v48 = vrot.slane %v3685_v22, 4  ;;  %v13471_v53 = vmul.f32 %v3578_v52, %v12978_v31  ;;  %v3701_v63 = vrot.slane %v3700_v16, 2 }
 0x317   : > { %v3340_v25 = vpop.f32.mrf.mxu2  ;;  %v3382_v19 = vpop.f32.mrf.mxu1  ;;  %v3748_v3 = vadd.f32 %v3747_v17, %v3691_v8 }
 0x318   : > { %14412 = vst [vmem:[#allocation34_spill] sm:$0xff] %v13438_v7  ;;  %v3579_v10 = vrot.slane %v13438_v7, 4  ;;  %v3670_v27 = vsub.f32 %v13402_v58, %v13471_v53  ;;  %v3702_v21 = vadd.f32 %v3701_v63, %v3700_v16 }
 0x319   : > { %v3354_v37 = vpop.f32.mrf.mxu3  ;;  %v3749_v41 = vrot.slane %v3748_v3, 2 }
 0x31a   : > { %v3580_v60 = vadd.f32 %v3579_v10, %v13438_v7  ;;  %v3355_v12 = vadd.f32 %v3354_v37, %v3340_v25  ;;  %v3707_v10 = vrot.slane %v3706_v54, 2  ;;  %v3712_v37 = vadd.f32 %v3711_v48, %v3685_v22 }
 0x31b   : > { %v3686_v33 = vmul.f32 %v3670_v27, %v3670_v27  ;;  %v3678_v22 = vsub.f32 %v13431_v44, %v13482_v45 }
 0x31c   : > { %v3581_v51 = vrot.slane %v3580_v60, 2  ;;  %v3369_v0 = vadd.f32 %v3368_v39, %v3355_v12  ;;  %v3708_v13 = vadd.f32 %v3707_v10, %v3706_v54  ;;  %v3713_v8 = vrot.slane %v3712_v37, 2 }
 0x31d   : > { %v3717_v54 = vrot.slane %v3686_v33, 4  ;;  %v3694_v63 = vmul.f32 %v3678_v22, %v3678_v22 }
 0x31e   : > { %v3582_v23 = vadd.f32 %v3581_v51, %v3580_v60  ;;  %v13468_v56 = vadd.f32 %v3382_v19, %v3369_v0  ;;  %v3703_v51 = vrot.slane %v3702_v21, 1  ;;  %v3750_v0 = vadd.f32 %v3749_v41, %v3748_v3 }
 0x31f   : > { %v3718_v15 = vadd.f32 %v3717_v54, %v3686_v33  ;;  %v3765_v41 = vrot.slane %v3694_v63, 4 }
 0x320   : > { %14415 = vst [vmem:[#allocation37_spill] sm:$0xff] %v13468_v56  ;;  %v3583_v1 = vrot.slane %v3582_v23, 1  ;;  %v3627_v40 = vrot.slane %v13468_v56, 4  ;;  %v3704_v14 = vadd.f32 %v3703_v51, %v3702_v21 }
 0x321   : > { %v3766_v33 = vadd.f32 %v3765_v41, %v3694_v63 }
 0x322   : > { %v3584_v60 = vadd.f32 %v3583_v1, %v3582_v23  ;;  %v3628_v12 = vadd.f32 %v3627_v40, %v13468_v56 }
 0x324   : > { %v13489_v52 = vmul.f32 %v3584_v60, %v12978_v31  ;;  %v3629_v16 = vrot.slane %v3628_v12, 2 }
 0x326   : > { %v3671_v3 = vsub.f32 %v13438_v7, %v13489_v52 }
 0x32d   : > { %v3422_v38 = vpop.f32.mrf.mxu0 }
 0x32f   : > { %v3394_v46 = vpop.f32.mrf.mxu2  ;;  %v3436_v24 = vpop.f32.mrf.mxu1 }
 0x331   : > { %v3408_v57 = vpop.f32.mrf.mxu3 }
 0x332   : > { %v3409_v47 = vadd.f32 %v3408_v57, %v3394_v46  ;;  %v3714_v57 = vadd.f32 %v3713_v8, %v3712_v37  ;;  %v3795_v37 = vmul.f32 %v3704_v14, %v12978_v31 }
 0x334   : > { %v3423_v30 = vadd.f32 %v3422_v38, %v3409_v47  ;;  %v3709_v38 = vrot.slane %v3708_v13, 1  ;;  %v3751_v47 = vrot.slane %v3750_v0, 1  ;;  %v3715_v10 = vrot.slane %v3714_v57, 1 }
 0x335   : > { %v3424_v35 = vpop.f32.mrf.mxu0 }
 0x336   : > { %v13476_v25 = vadd.f32 %v3436_v24, %v3423_v30  ;;  %v3760_v24 = vadd.f32 %v3759_v62, %v3693_v18  ;;  %v3630_v30 = vadd.f32 %v3629_v16, %v3628_v12  ;;  %v3710_v32 = vadd.f32 %v3709_v38, %v3708_v13 }
 0x337   : > { %v3396_v6 = vpop.f32.mrf.mxu2  ;;  %v3438_v17 = vpop.f32.mrf.mxu1  ;;  %v3752_v27 = vadd.f32 %v3751_v47, %v3750_v0  ;;  %v3716_v12 = vadd.f32 %v3715_v10, %v3714_v57  ;;  %v3719_v13 = vrot.slane %v3718_v15, 2 }
 0x338   : > { %14416 = vst [vmem:[#allocation38_spill] sm:$0xff] %v13476_v25  ;;  %v3585_v39 = vrot.slane %v13476_v25, 4  ;;  %v3761_v21 = vrot.slane %v3760_v24, 2  ;;  %v3631_v60 = vrot.slane %v3630_v30, 1  ;;  %v3796_v18 = vmul.f32 %v3710_v32, %v12978_v31 }
 0x339   : > { %v3410_v49 = vpop.f32.mrf.mxu3  ;;  %v3797_v16 = vmul.f32 %v3716_v12, %v12978_v31 }
 0x33a   : > { %v3586_v19 = vadd.f32 %v3585_v39, %v13476_v25  ;;  %v3411_v20 = vadd.f32 %v3410_v49, %v3396_v6  ;;  %v3687_v39 = vmul.f32 %v3671_v3, %v3671_v3  ;;  %v3758_v6 = vadd.f32 %v3757_v2, %v3756_v43 }
 0x33b   : > { %v3762_v8 = vadd.f32 %v3761_v21, %v3760_v24  ;;  %v3632_v51 = vadd.f32 %v3631_v60, %v3630_v30  ;;  %v13502_v0 = vadd.f32 1e-05, %v3796_v18  ;;  %v13518_v63 = vadd.f32 1e-05, %v3797_v16 }
 0x33c   : > { %v3425_v29 = vadd.f32 %v3424_v35, %v3411_v20  ;;  %v3587_v23 = vrot.slane %v3586_v19, 2  ;;  %v13499_v20 = vadd.f32 1e-05, %v3795_v37  ;;  %v3723_v35 = vrot.slane %v3687_v39, 4 }
 0x33d   : > { %v3763_v43 = vrot.slane %v3762_v8, 1  ;;  %v13510_v54 = vmul.f32 %v3632_v51, %v12978_v31  ;;  %vm3843_vm13 = vweird.f32 %v13502_v0  ;;  %vm3853_vm5 = vweird.f32 %v13518_v63 }
 0x33e   : > { %v13491_v46 = vadd.f32 %v3438_v17, %v3425_v29  ;;  %v3588_v1 = vadd.f32 %v3587_v23, %v3586_v19  ;;  %v3803_v19 = vmul.f32 %v3752_v27, %v12978_v31  ;;  %v3804_v29 = vmul.f32 %v3758_v6, %v12978_v31 }
 0x33f   : > { %v3720_v17 = vadd.f32 %v3719_v13, %v3718_v15  ;;  %12220 = vrsqrt.f32 %v13499_v20  ;;  %v3767_v23 = vrot.slane %v3766_v33, 2  ;;  %v3724_v57 = vadd.f32 %v3723_v35, %v3687_v39  ;;  %14419 = vst [vmem:[#allocation41_spill] sm:$0xff] %v13510_v54 }
 0x340   : > { %14418 = vst [vmem:[#allocation40_spill] sm:$0xff] %v13491_v46  ;;  %v3633_v48 = vrot.slane %v13491_v46, 4  ;;  %v3589_v49 = vrot.slane %v3588_v1, 1  ;;  %v13507_v38 = vadd.f32 1e-05, %v3803_v19  ;;  %12222 = vrsqrt.f32 %v13502_v0 }
 0x341   : > { %v13513_v14 = vadd.f32 1e-05, %v3804_v29  ;;  %v3721_v3 = vrot.slane %v3720_v17, 1  ;;  %v3725_v10 = vrot.slane %v3724_v57, 2  ;;  %v3679_v15 = vsub.f32 %v13468_v56, %v13510_v54 }
 0x342   : > { %v3634_v40 = vadd.f32 %v3633_v48, %v13491_v46  ;;  %v3590_v62 = vadd.f32 %v3589_v49, %v3588_v1  ;;  %12224 = vrsqrt.f32 %v13507_v38  ;;  %v3764_v1 = vadd.f32 %v3763_v43, %v3762_v8 }
 0x343   : > { %12226 = vrsqrt.f32 %v13513_v14  ;;  %v3722_v60 = vadd.f32 %v3721_v3, %v3720_v17  ;;  %v3726_v12 = vadd.f32 %v3725_v10, %v3724_v57  ;;  %v3695_v13 = vmul.f32 %v3679_v15, %v3679_v15 }
 0x344   : > { %v3635_v34 = vrot.slane %v3634_v40, 2  ;;  %v13516_v47 = vmul.f32 %v3590_v62, %v12978_v31  ;;  %12228 = vrsqrt.f32 %v13518_v63  ;;  %v3805_v49 = vmul.f32 %v3764_v1, %v12978_v31 }
 0x345   : > { %v13523_v27 = vpop.eup %12220  ;;  %v3798_v62 = vmul.f32 %v3722_v60, %v12978_v31  ;;  %v3727_v3 = vrot.slane %v3726_v12, 1  ;;  %vm3923_vm0 = vweird.f32 %v13513_v14 }
 0x346   : > { %v3636_v22 = vadd.f32 %v3635_v34, %v3634_v40  ;;  %v3768_v40 = vadd.f32 %v3767_v23, %v3766_v33  ;;  %v3672_v21 = vsub.f32 %v13476_v25, %v13516_v47  ;;  %v13529_v18 = vpop.eup %12222  ;;  %v3828_v51 = vmul.f32 %v13523_v27, %v13499_v20 }
 0x347   : > { %v3838_v29 = vmul.f32 %v13529_v18, %v13502_v0  ;;  %vm3844_vm14 = vweird.f32 %v13529_v18 }
 0x348   : > { %v3637_v48 = vrot.slane %v3636_v22, 1  ;;  %v3769_v34 = vrot.slane %v3768_v40, 1  ;;  %v13534_v19 = vpop.eup %12224  ;;  %v3688_v8 = vmul.f32 %v3672_v21, %v3672_v21  ;;  %vm13603_vm15 = vmor %vm3843_vm13, %vm3844_vm14 }
 0x349   : > { %v13545_v17 = vpop.eup %12226  ;;  %v3839_v21 = vmul.f32 %v13529_v18, %v3838_v29  ;;  %v3728_v29 = vadd.f32 %v3727_v3, %v3726_v12 }
 0x34a   : > { %v3638_v41 = vadd.f32 %v3637_v48, %v3636_v22  ;;  %v13548_v57 = vpop.eup %12228  ;;  %v13550_v48 = vadd.f32 1e-05, %v3805_v49  ;;  %vm3924_vm1 = vweird.f32 %v13545_v17 }
 0x34b   : > { %v3848_v49 = vmul.f32 %v13548_v57, %v13518_v63  ;;  %vm3854_vm2 = vweird.f32 %v13548_v57  ;;  %vm13632_vm4 = vmor %vm3923_vm0, %vm3924_vm1 }
 0x34c   : > { %v13537_v33 = vmul.f32 %v3638_v41, %v12978_v31  ;;  %v3918_v41 = vmul.f32 %v13545_v17, %v13513_v14  ;;  %12230 = vrsqrt.f32 %v13550_v48  ;;  %vm13644_vm6 = vmor %vm3853_vm5, %vm3854_vm2  ;;  %vm3933_vm10 = vweird.f32 %v13550_v48 }
 0x34d   : > { %v3478_v24 = vpop.f32.mrf.mxu0  ;;  %v3849_v12 = vmul.f32 %v13548_v57, %v3848_v49 }
 0x34e   : > { %14421 = vst [vmem:[#allocation43_spill] sm:$0xff] %v13537_v33  ;;  %v3680_v1 = vsub.f32 %v13491_v46, %v13537_v33  ;;  %v3840_v46 = vmul.f32 0.5, %v3839_v21  ;;  %v3919_v25 = vmul.f32 %v13545_v17, %v3918_v41 }
 0x34f   : > { %v3450_v30 = vpop.f32.mrf.mxu2  ;;  %v3492_v37 = vpop.f32.mrf.mxu1 }
 0x350   : > { %v3841_v21 = vsub.f32 1.5, %v3840_v46  ;;  %v3920_v41 = vmul.f32 0.5, %v3919_v25 }
 0x351   : > { %v3464_v32 = vpop.f32.mrf.mxu3 }
 0x352   : > { %v3465_v2 = vadd.f32 %v3464_v32, %v3450_v30  ;;  %v3771_v30 = vrot.slane %v3695_v13, 4 }
 0x354   : > { %v3479_v39 = vadd.f32 %v3478_v24, %v3465_v2  ;;  %v3770_v24 = vadd.f32 %v3769_v34, %v3768_v40  ;;  %v3729_v2 = vrot.slane %v3688_v8, 4  ;;  %v3908_v40 = vmul.f32 %v13534_v19, %v13507_v38 }
 0x355   : > { %v3480_v32 = vpop.f32.mrf.mxu0 }
 0x356   : > { %v13531_v6 = vadd.f32 %v3492_v37, %v3479_v39  ;;  %v3829_v37 = vmul.f32 %v13523_v27, %v3828_v51  ;;  %v13558_v39 = vadd.f32 1e-05, %v3798_v62  ;;  %v3806_v51 = vmul.f32 %v3770_v24, %v12978_v31 }
 0x357   : > { %v3452_v22 = vpop.f32.mrf.mxu2  ;;  %v3494_v60 = vpop.f32.mrf.mxu1 }
 0x358   : > { %14420 = vst [vmem:[#allocation42_spill] sm:$0xff] %v13531_v6  ;;  %v3591_v35 = vrot.slane %v13531_v6, 4  ;;  %12232 = vrsqrt.f32 %v13558_v39  ;;  %v13571_v56 = vmul.f32 0.5, %v3829_v37  ;;  %v13582_v37 = vpop.eup %12230  ;;  %vm3863_vm12 = vweird.f32 %v13558_v39 }
 0x359   : > { %v3466_v16 = vpop.f32.mrf.mxu3  ;;  %vm3934_vm7 = vweird.f32 %v13582_v37 }
 0x35a   : > { %v3592_v43 = vadd.f32 %v3591_v35, %v13531_v6  ;;  %v3467_v23 = vadd.f32 %v3466_v16, %v3452_v22  ;;  %v3772_v22 = vadd.f32 %v3771_v30, %v3695_v13  ;;  %v3730_v16 = vadd.f32 %v3729_v2, %v3688_v8  ;;  %vm13696_vm11 = vmor %vm3933_vm10, %vm3934_vm7 }
 0x35b   : > { %v13576_v13 = vadd.f32 1e-05, %v3806_v51  ;;  %v3799_v8 = vmul.f32 %v3728_v29, %v12978_v31  ;;  %v3850_v29 = vmul.f32 0.5, %v3849_v12  ;;  %vm3834_vm7 = vweird.f32 %v13523_v27 }
 0x35c   : > { %v3593_v10 = vrot.slane %v3592_v43, 2  ;;  %v3481_v15 = vadd.f32 %v3480_v32, %v3467_v23  ;;  %v3696_v23 = vmul.f32 %v3680_v1, %v3680_v1  ;;  %v3773_v24 = vrot.slane %v3772_v22, 2 }
 0x35d   : > { %v3731_v3 = vrot.slane %v3730_v16, 2  ;;  %12234 = vrsqrt.f32 %v13576_v13  ;;  %vm3943_vm14 = vweird.f32 %v13576_v13  ;;  %vm3913_vm10 = vweird.f32 %v13507_v38 }
 0x35e   : > { %v3594_v34 = vadd.f32 %v3593_v10, %v3592_v43  ;;  %v13564_v35 = vadd.f32 %v3494_v60, %v3481_v15  ;;  %v3909_v43 = vmul.f32 %v13534_v19, %v3908_v40  ;;  %v3777_v30 = vrot.slane %v3696_v23, 4  ;;  %v13589_v51 = vpop.eup %12232 }
 0x35f   : > { %v3842_v60 = vmul.f32 %v13529_v18, %v3841_v21  ;;  %v3858_v12 = vmul.f32 %v13589_v51, %v13558_v39  ;;  %vm3864_vm13 = vweird.f32 %v13589_v51  ;;  %v11730_v39 = vld [vmem:[#allocation17 + $0x440] sm:$0xf0] }
 0x360   : > { %14422 = vst [vmem:[#allocation44_spill] sm:$0xff] %v13564_v35  ;;  %v3595_v62 = vrot.slane %v3594_v34, 1  ;;  %v3639_v32 = vrot.slane %v13564_v35, 4  ;;  %v13585_v40 = vmul.f32 0.5, %v3909_v43  ;;  %v3778_v7 = vadd.f32 %v3777_v30, %v3696_v23  ;;  %vm13743_vm1 = vmor %vm3863_vm12, %vm3864_vm13 }
 0x361   : > { %v3921_v43 = vsub.f32 1.5, %v3920_v41  ;;  %v3846_v41 = vsel %vm13603_vm15, %v13529_v18, %v3842_v60 }
 0x362   : > { %v3596_v10 = vadd.f32 %v3595_v62, %v3594_v34  ;;  %v3640_v15 = vadd.f32 %v3639_v32, %v13564_v35  ;;  %v13592_v62 = vadd.f32 1e-05, %v3799_v8  ;;  %v3774_v32 = vadd.f32 %v3773_v24, %v3772_v22 }
 0x363   : > { %v13608_v21 = vpop.eup %12234  ;;  %v13624_v44 = vrot.slane %v3846_v41, 7 }
 0x364   : > { %v13580_v2 = vmul.f32 %v3596_v10, %v12978_v31  ;;  %v3641_v1 = vrot.slane %v3640_v15, 2  ;;  %v3732_v10 = vadd.f32 %v3731_v3, %v3730_v16  ;;  %v3851_v16 = vsub.f32 1.5, %v3850_v29 }
 0x365   : > { %12236 = vrsqrt.f32 %v13592_v62  ;;  %v3775_v23 = vrot.slane %v3774_v32, 1  ;;  %v3779_v3 = vrot.slane %v3778_v7, 2  ;;  %vm3944_vm15 = vweird.f32 %v13608_v21 }
 0x366   : > { %v3673_v49 = vsub.f32 %v13531_v6, %v13580_v2  ;;  %v3642_v34 = vadd.f32 %v3641_v1, %v3640_v15  ;;  %v3928_v15 = vmul.f32 %v13582_v37, %v13550_v48  ;;  %v3733_v0 = vrot.slane %v3732_v10, 1  ;;  %vm13754_vm2 = vmor %vm3943_vm14, %vm3944_vm15 }
 0x367   : > { %v3852_v24 = vmul.f32 %v13548_v57, %v3851_v16  ;;  %v3776_v18 = vadd.f32 %v3775_v23, %v3774_v32  ;;  %v3780_v5 = vadd.f32 %v3779_v3, %v3778_v7 }
 0x368   : > { %v3689_v46 = vmul.f32 %v3673_v49, %v3673_v49  ;;  %v3643_v25 = vrot.slane %v3642_v34, 1  ;;  %v3922_v49 = vmul.f32 %v13545_v17, %v3921_v43 }
 0x369   : > { %v3856_v63 = vsel %vm13644_vm6, %v13548_v57, %v3852_v24  ;;  %v3807_v23 = vmul.f32 %v3776_v18, %v12978_v31  ;;  %v3781_v41 = vrot.slane %v3780_v5, 1  ;;  %vm3833_vm6 = vweird.f32 %v13499_v20 }
 0x36a   : > { %v3735_v8 = vrot.slane %v3689_v46, 4  ;;  %v3644_v1 = vadd.f32 %v3643_v25, %v3642_v34  ;;  %v3929_v25 = vmul.f32 %v13582_v37, %v3928_v15  ;;  %v3926_v7 = vsel %vm13632_vm4, %v13545_v17, %v3922_v49  ;;  %vm13822_vm12 = vmor %vm3833_vm6, %vm3834_vm7 }
 0x36b   : > { %v13626_v58 = vpop.eup %12236  ;;  %v13663_v57 = vrot.slane %v3856_v63, 6  ;;  %v13667_v15 = vadd.f32 1e-05, %v3807_v23  ;;  %v11646_v23 = vld [vmem:[#allocation17 + $0x1a0] sm:$0xf0]  ;;  %vm3873_vm4 = vweird.f32 %v13592_v62 }
 0x36c   : > { %v3736_v30 = vadd.f32 %v3735_v8, %v3689_v46  ;;  %v13616_v34 = vmul.f32 %v3644_v1, %v12978_v31  ;;  %v3859_v46 = vmul.f32 %v13589_v51, %v3858_v12  ;;  %v3734_v1 = vadd.f32 %v3733_v0, %v3732_v10 }
 0x36d   : > { %v3534_v29 = vpop.f32.mrf.mxu0  ;;  %v3930_v14 = vmul.f32 0.5, %v3929_v25  ;;  %v3868_v17 = vmul.f32 %v13626_v58, %v13592_v62  ;;  %vm3874_vm0 = vweird.f32 %v13626_v58 }
 0x36e   : > { %14425 = vst [vmem:[#allocation45_spill] sm:$0xff] %v13616_v34  ;;  %v3737_v8 = vrot.slane %v3736_v30, 2  ;;  %v3681_v60 = vsub.f32 %v13564_v35, %v13616_v34  ;;  %v11814_v34 = vld [vmem:[#allocation17 + $0x6e0] sm:$0xf0]  ;;  %vm13771_vm5 = vmor %vm3873_vm4, %vm3874_vm0  ;;  %vm4020_vm4 = vcmask 1044484  }
 0x36f   : > { %v3506_v22 = vpop.f32.mrf.mxu2  ;;  %v3548_v50 = vpop.f32.mrf.mxu1  ;;  %v3931_v24 = vsub.f32 1.5, %v3930_v14 }
 0x370   : > { %v3738_v11 = vadd.f32 %v3737_v8, %v3736_v30  ;;  %v3697_v32 = vmul.f32 %v3681_v60, %v3681_v60  ;;  %v3800_v30 = vmul.f32 %v3734_v1, %v12978_v31 }
 0x371   : > { %v3520_v6 = vpop.f32.mrf.mxu3  ;;  %v13678_v35 = vmul.f32 %v13582_v37, %v3931_v24 }
 0x372   : > { %v3521_v43 = vadd.f32 %v3520_v6, %v3506_v22  ;;  %v3938_v6 = vmul.f32 %v13608_v21, %v13576_v13  ;;  %v13648_v22 = vmul.f32 0.5, %v3859_v46  ;;  %v3739_v16 = vrot.slane %v3738_v11, 1 }
 0x373   : > { %v3783_v0 = vrot.slane %v3697_v32, 4 }
 0x374   : > { %v3535_v10 = vadd.f32 %v3534_v29, %v3521_v43  ;;  %v3740_v49 = vadd.f32 %v3739_v16, %v3738_v11  ;;  %v13659_v29 = vrot.slane %v3926_v7, 7  ;;  %v3939_v25 = vmul.f32 %v13608_v21, %v3938_v6 }
 0x375   : > { %v3784_v46 = vadd.f32 %v3783_v0, %v3697_v32  ;;  %v3869_v6 = vmul.f32 %v13626_v58, %v3868_v17  ;;  %v13671_v32 = vadd.f32 1e-05, %v3800_v30  ;;  %v3782_v7 = vadd.f32 %v3781_v41, %v3780_v5  ;;  %v3536_v14 = vpop.f32.mrf.mxu0  ;;  %v9882_v30 = vld [vmem:[#allocation17 + $0x348] sm:$0xf] }
 0x376   : > { %v13654_v3 = vadd.f32 %v3548_v50, %v3535_v10  ;;  %v3801_v18 = vmul.f32 %v3740_v49, %v12978_v31  ;;  %v13675_v16 = vmul.f32 0.5, %v3939_v25  ;;  %v9658_v50 = vld [vmem:[#allocation17 + $0x188] sm:$0xf] }
 0x377   : > { %v3508_v60 = vpop.f32.mrf.mxu2  ;;  %v3785_v1 = vrot.slane %v3784_v46, 2  ;;  %v9659_v17 = vor.u32 %v11646_v23, %v9658_v50  ;;  %v10106_v5 = vld [vmem:[#allocation17 + $0x508] sm:$0xf]  ;;  %12238 = vrsqrt.f32 %v13671_v32  ;;  %v3808_v24 = vmul.f32 %v3782_v7, %v12978_v31  ;;  %v10078_v7 = vld [vmem:[#allocation17 + $0x4d0] sm:$0xf] }
 0x378   : > { %v3597_v8 = vrot.slane %v13654_v3, 4  ;;  %v13673_v12 = vadd.f32 1e-05, %v3801_v18  ;;  %vm3883_vm15 = vweird.f32 %v13671_v32 }
 0x379   : > { %v3522_v43 = vpop.f32.mrf.mxu3  ;;  %v3786_v63 = vadd.f32 %v3785_v1, %v3784_v46  ;;  %v11758_v46 = vld [vmem:[#allocation17 + $0x520] sm:$0xf0]  ;;  %v10330_v1 = vld [vmem:[#allocation17 + $0x6c8] sm:$0xf]  ;;  %7091 = vmatpush.bf16.msra.mxu2 %v9659_v17 }
 0x37a   : > { %v3598_v11 = vadd.f32 %v3597_v8, %v13654_v3  ;;  %v3523_v10 = vadd.f32 %v3522_v43, %v3508_v60  ;;  %v3550_v8 = vpop.f32.mrf.mxu1  ;;  %v11702_v60 = vld [vmem:[#allocation17 + $0x360] sm:$0xf0]  ;;  %12240 = vrsqrt.f32 %v13673_v12 }
 0x37b   : > { %v3787_v41 = vrot.slane %v3786_v63, 1  ;;  %v9883_v25 = vor.u32 %v11702_v60, %v9882_v30  ;;  %v11695_v30 = vld [vmem:[#allocation17 + $0x328] sm:$0xf0]  ;;  %12242 = vrsqrt.f32 %v13667_v15 }
 0x37c   : > { %v3599_v0 = vrot.slane %v3598_v11, 2  ;;  %v3537_v49 = vadd.f32 %v3536_v14, %v3523_v10  ;;  %v13683_v10 = vmul.f32 0.5, %v3869_v6  ;;  %v10107_v14 = vor.u32 %v11758_v46, %v10106_v5 }
 0x37d   : > { %v3788_v50 = vadd.f32 %v3787_v41, %v3786_v63  ;;  %7105 = vmatpush.bf16.msra.mxu3 %v9883_v25  ;;  %v11751_v41 = vld [vmem:[#allocation17 + $0x4e8] sm:$0xf0] }
 0x37e   : > { %v3600_v18 = vadd.f32 %v3599_v0, %v3598_v11  ;;  %v13681_v43 = vadd.f32 %v3550_v8, %v3537_v49  ;;  %v10331_v11 = vor.u32 %v11814_v34, %v10330_v1  ;;  %v9630_v0 = vld [vmem:[#allocation17 + $0x150] sm:$0xf]  ;;  %v11639_v49 = vld [vmem:[#allocation17 + $0x168] sm:$0xf0]  ;;  %7119 = vmatpush.bf16.msrb.mxu0 %v10107_v14  ;;  %v3941_v1 = vsub.f32 1.5, %v13675_v16 }
 0x37f   : > { %v9631_v6 = vor.u32 %v11639_v49, %v9630_v0  ;;  %v9854_v8 = vld [vmem:[#allocation17 + $0x310] sm:$0xf]  ;;  %v3809_v17 = vmul.f32 %v3788_v50, %v12978_v31  ;;  %v11807_v25 = vld [vmem:[#allocation17 + $0x6a8] sm:$0xf0]  ;;  %v13701_v14 = vadd.f32 1e-05, %v3808_v24  ;;  %v13713_v24 = vpop.eup %12238 }
 0x380   : > { %14430 = vst [vmem:[#allocation46_spill] sm:$0xff] %v13681_v43  ;;  %v3601_v23 = vrot.slane %v3600_v18, 1  ;;  %v3645_v33 = vrot.slane %v13681_v43, 4  ;;  %7133 = vmatpush.bf16.msrb.mxu1 %v10331_v11  ;;  %v9855_v5 = vor.u32 %v11695_v30, %v9854_v8  ;;  %v10302_v34 = vld [vmem:[#allocation17 + $0x690] sm:$0xf]  ;;  %v3871_v0 = vsub.f32 1.5, %v13683_v10 }
 0x381   : > { %7092 = vmatpush.bf16.msra.mxu2 %v9631_v6  ;;  %v9602_v11 = vld [vmem:[#allocation17 + $0x118] sm:$0xf]  ;;  %v11632_v16 = vld [vmem:[#allocation17 + $0x130] sm:$0xf0]  ;;  %12244 = vrsqrt.f32 %v13701_v14  ;;  %vm3884_vm14 = vweird.f32 %v13713_v24 }
 0x382   : > { %v3602_v60 = vadd.f32 %v3601_v23, %v3600_v18  ;;  %v3646_v63 = vadd.f32 %v3645_v33, %v13681_v43  ;;  %v10079_v18 = vor.u32 %v11751_v41, %v10078_v7  ;;  %v10303_v33 = vor.u32 %v11807_v25, %v10302_v34  ;;  %7106 = vmatpush.bf16.msra.mxu3 %v9855_v5  ;;  %v9826_v8 = vld [vmem:[#allocation17 + $0x2d8] sm:$0xf]  ;;  %v11688_v30 = vld [vmem:[#allocation17 + $0x2f0] sm:$0xf0]  ;;  %v13726_v34 = vpop.eup %12240  ;;  %vm13856_vm0 = vmor %vm3883_vm15, %vm3884_vm14 }
 0x383   : > { %v13708_v23 = vadd.f32 1e-05, %v3809_v17  ;;  %v9603_v6 = vor.u32 %v11632_v16, %v9602_v11  ;;  %v14433_v7 = vsub.f32 1.5, %v13648_v22  ;;  %v10050_v5 = vld [vmem:[#allocation17 + $0x498] sm:$0xf]  ;;  %v9827_v22 = vor.u32 %v11688_v30, %v9826_v8  ;;  %v13737_v8 = vpop.eup %12242 }
 0x384   : > { %v13711_v48 = vmul.f32 %v3602_v60, %v12978_v31  ;;  %v3647_v49 = vrot.slane %v3646_v63, 2  ;;  %7120 = vmatpush.bf16.msrb.mxu0 %v10079_v18  ;;  %7134 = vmatpush.bf16.msrb.mxu1 %v10303_v33  ;;  %v11744_v10 = vld [vmem:[#allocation17 + $0x4b0] sm:$0xf0]  ;;  %v10274_v41 = vld [vmem:[#allocation17 + $0x658] sm:$0xf]  ;;  %v13730_v16 = vmul.f32 %v13608_v21, %v3941_v1  ;;  %v13734_v54 = vmul.f32 %v13626_v58, %v3871_v0 }
 0x385   : > { %v13720_v17 = vmul.f32 %v13589_v51, %v14433_v7  ;;  %7093 = vmatpush.bf16.msra.mxu2 %v9603_v6  ;;  %v10051_v18 = vor.u32 %v11744_v10, %v10050_v5  ;;  %v11800_v11 = vld [vmem:[#allocation17 + $0x670] sm:$0xf0]  ;;  %v9574_v33 = vld [vmem:[#allocation17 + $0xe0] sm:$0xf]  ;;  %v11681_v6 = vld [vmem:[#allocation17 + $0x2b8] sm:$0xf0]  ;;  %v3878_v0 = vmul.f32 %v13713_v24, %v13671_v32  ;;  %12246 = vrsqrt.f32 %v13708_v23 }
 0x386   : > { %v3674_v60 = vsub.f32 %v13654_v3, %v13711_v48  ;;  %v3648_v25 = vadd.f32 %v3647_v49, %v3646_v63  ;;  %v10275_v50 = vor.u32 %v11800_v11, %v10274_v41  ;;  %7107 = vmatpush.bf16.msra.mxu3 %v9827_v22  ;;  %v9575_v63 = vor.u32 %v11625_v59, %v9574_v33  ;;  %v9798_v49 = vld [vmem:[#allocation17 + $0x2a0] sm:$0xf]  ;;  %v11737_v5 = vld [vmem:[#allocation17 + $0x478] sm:$0xf0]  ;;  %v9546_v33 = vld [vmem:[#allocation17 + $0xa8] sm:$0xf] }
 0x387   : > { %v9799_v59 = vor.u32 %v11681_v6, %v9798_v49  ;;  %v3888_v10 = vmul.f32 %v13726_v34, %v13673_v12  ;;  %v3866_v11 = vsel %vm13743_vm1, %v13589_v51, %v13720_v17  ;;  %v3946_v13 = vsel %vm13754_vm2, %v13608_v21, %v13730_v16  ;;  %v13775_v49 = vpop.eup %12244  ;;  %v9770_v16 = vld [vmem:[#allocation17 + $0x268] sm:$0xf]  ;;  %v11674_v6 = vld [vmem:[#allocation17 + $0x280] sm:$0xf0] }
 0x388   : > { %v3690_v7 = vmul.f32 %v3674_v60, %v3674_v60  ;;  %v3649_v45 = vrot.slane %v3648_v25, 1  ;;  %7121 = vmatpush.bf16.msrb.mxu0 %v10051_v18  ;;  %7135 = vmatpush.bf16.msrb.mxu1 %v10275_v50  ;;  %v10022_v60 = vld [vmem:[#allocation17 + $0x460] sm:$0xf]  ;;  %v11793_v18 = vld [vmem:[#allocation17 + $0x638] sm:$0xf0]  ;;  %v3948_v51 = vmul.f32 %v13737_v8, %v13667_v15  ;;  %v3958_v62 = vmul.f32 %v13775_v49, %v13701_v14 }
 0x389   : > { %7094 = vmatpush.bf16.msra.mxu2 %v9575_v63  ;;  %v10023_v22 = vor.u32 %v11737_v5, %v10022_v60  ;;  %v10246_v50 = vld [vmem:[#allocation17 + $0x620] sm:$0xf]  ;;  %v11618_v63 = vld [vmem:[#allocation17 + $0xc0] sm:$0xf0]  ;;  %v9994_v1 = vld [vmem:[#allocation17 + $0x428] sm:$0xf]  ;;  %v9771_v5 = vor.u32 %v11674_v6, %v9770_v16  ;;  %vm3953_vm1 = vweird.f32 %v13667_v15  ;;  %vm3954_vm2 = vweird.f32 %v13737_v8 }
 0x38a   : > { %v3741_v30 = vrot.slane %v3690_v7, 4  ;;  %v3650_v41 = vadd.f32 %v3649_v45, %v3648_v25  ;;  %v10247_v25 = vor.u32 %v11793_v18, %v10246_v50  ;;  %7108 = vmatpush.bf16.msra.mxu3 %v9799_v59  ;;  %v9547_v21 = vor.u32 %v11618_v63, %v9546_v33  ;;  %v9742_v63 = vld [vmem:[#allocation17 + $0x230] sm:$0xf]  ;;  %vm13903_vm6 = vmor %vm3953_vm1, %vm3954_vm2 }
 0x38b   : > { %v14441_v59 = vsel %vm13696_vm11, %v13582_v37, %v13678_v35  ;;  %v13795_v50 = vrot.slane %v3866_v11, 5  ;;  %v3889_v18 = vmul.f32 %v13726_v34, %v3888_v10  ;;  %v9518_v35 = vld [vmem:[#allocation17 + $0x70] sm:$0xf]  ;;  %v11611_v37 = vld [vmem:[#allocation17 + $0x88] sm:$0xf0]  ;;  %v13804_v11 = vrot.slane %v3946_v13, 5 }
 0x38c   : > { %v3742_v45 = vadd.f32 %v3741_v30, %v3690_v7  ;;  %v13780_v17 = vmul.f32 %v3650_v41, %v12978_v31  ;;  %7122 = vmatpush.bf16.msrb.mxu0 %v10023_v22  ;;  %v3876_v7 = vsel %vm13771_vm5, %v13626_v58, %v13734_v54  ;;  %v3879_v30 = vmul.f32 %v13713_v24, %v3878_v0  ;;  %v10218_v41 = vld [vmem:[#allocation17 + $0x5e8] sm:$0xf]  ;;  %v11786_v54 = vld [vmem:[#allocation17 + $0x600] sm:$0xf0]  ;;  %v13800_v0 = vpop.eup %12246 }
 0x38d   : > { %7136 = vmatpush.bf16.msrb.mxu1 %v10247_v25  ;;  %v13793_v22 = vrot.slane %v14441_v59, 6  ;;  %7095 = vmatpush.bf16.msra.mxu2 %v9547_v21  ;;  %v9995_v25 = vor.u32 %v11730_v39, %v9994_v1  ;;  %v10219_v33 = vor.u32 %v11786_v54, %v10218_v41  ;;  %v13806_v16 = vrot.slane %v3876_v7, 4  ;;  %v11667_v21 = vld [vmem:[#allocation17 + $0x248] sm:$0xf0]  ;;  %v9966_v59 = vld [vmem:[#allocation17 + $0x3f0] sm:$0xf] }
 0x38e   : > { %14440 = vst [vmem:[#allocation47_spill] sm:$0xff] %v13780_v17  ;;  %v3743_v60 = vrot.slane %v3742_v45, 2  ;;  %v3682_v58 = vsub.f32 %v13681_v43, %v13780_v17  ;;  %7109 = vmatpush.bf16.msra.mxu3 %v9771_v5  ;;  %v9519_v6 = vor.u32 %v11611_v37, %v9518_v35  ;;  %v3949_v43 = vmul.f32 %v13737_v8, %v3948_v51  ;;  %v11723_v1 = vld [vmem:[#allocation17 + $0x408] sm:$0xf0]  ;;  %v9490_v54 = vld [vmem:[#allocation17 + $0x38] sm:$0xf] }
 0x38f   : > { %v3880_v17 = vmul.f32 0.5, %v3879_v30  ;;  %v13809_v39 = vmul.f32 0.5, %v3889_v18  ;;  %v3968_v13 = vmul.f32 %v13800_v0, %v13708_v23  ;;  %v9967_v5 = vor.u32 %v11723_v1, %v9966_v59  ;;  %v11779_v41 = vld [vmem:[#allocation17 + $0x5c8] sm:$0xf0]  ;;  %v11660_v37 = vld [vmem:[#allocation17 + $0x210] sm:$0xf0] }
 0x390   : > { %v3744_v46 = vadd.f32 %v3743_v60, %v3742_v45  ;;  %v3698_v10 = vmul.f32 %v3682_v58, %v3682_v58  ;;  %7123 = vmatpush.bf16.msrb.mxu0 %v9995_v25  ;;  %v9743_v45 = vor.u32 %v11667_v21, %v9742_v63  ;;  %v10190_v60 = vld [vmem:[#allocation17 + $0x5b0] sm:$0xf]  ;;  %v3959_v51 = vmul.f32 %v13775_v49, %v3958_v62  ;;  %v11604_v25 = vld [vmem:[#allocation17 + $0x50] sm:$0xf0]  ;;  %v9938_v63 = vld [vmem:[#allocation17 + $0x3b8] sm:$0xf] }
 0x391   : > { %7137 = vmatpush.bf16.msrb.mxu1 %v10219_v33  ;;  %7096 = vmatpush.bf16.msra.mxu2 %v9519_v6  ;;  %v10191_v58 = vor.u32 %v11779_v41, %v10190_v60  ;;  %v9714_v33 = vld [vmem:[#allocation17 + $0x1f8] sm:$0xf]  ;;  %vm3914_vm11 = vweird.f32 %v13534_v19  ;;  %v9491_v35 = vor.u32 %v11604_v25, %v9490_v54  ;;  %v11716_v6 = vld [vmem:[#allocation17 + $0x3d0] sm:$0xf0]  ;;  %v3881_v21 = vsub.f32 1.5, %v3880_v17 }
 0x392   : > { %v3745_v26 = vrot.slane %v3744_v46, 1  ;;  %v3789_v7 = vrot.slane %v3698_v10, 4  ;;  %7110 = vmatpush.bf16.msra.mxu3 %v9743_v45  ;;  %v9939_v62 = vor.u32 %v11716_v6, %v9938_v63  ;;  %v11772_v1 = vld [vmem:[#allocation17 + $0x590] sm:$0xf0]  ;;  %v13826_v45 = vmul.f32 0.5, %v3949_v43  ;;  %vm13833_vm13 = vmor %vm3913_vm10, %vm3914_vm11 }
 0x393   : > { %v3969_v17 = vmul.f32 %v13800_v0, %v3968_v13  ;;  %v13838_v20 = vmul.f32 0.5, %v3959_v51  ;;  %v9462_v13 = vld [vmem:[#allocation17] sm:$0xf]  ;;  %v14447_v54 = vsub.f32 1.5, %v13585_v40  ;;  %v11226_v43 = vld [vmem:[#allocation17 + $0xdc8] sm:$0xf]  ;;  %vm3894_vm5 = vweird.f32 %v13726_v34 }
 0x394   : > { %v3746_v30 = vadd.f32 %v3745_v26, %v3744_v46  ;;  %v3790_v18 = vadd.f32 %v3789_v7, %v3698_v10  ;;  %7124 = vmatpush.bf16.msrb.mxu0 %v9967_v5  ;;  %v9715_v26 = vor.u32 %v11660_v37, %v9714_v33  ;;  %v10162_v46 = vld [vmem:[#allocation17 + $0x578] sm:$0xf]  ;;  %v11597_v33 = vld [vmem:[#allocation17 + $0x18] sm:$0xf0]  ;;  %v9686_v51 = vld [vmem:[#allocation17 + $0x1c0] sm:$0xf]  ;;  %v3882_v37 = vmul.f32 %v13713_v24, %v3881_v21 }
 0x395   : > { %7138 = vmatpush.bf16.msrb.mxu1 %v10191_v58  ;;  %7097 = vmatpush.bf16.msra.mxu2 %v9491_v35  ;;  %v10163_v7 = vor.u32 %v11772_v1, %v10162_v46  ;;  %v3912_v38 = vmul.f32 %v13534_v19, %v14447_v54  ;;  %v11653_v35 = vld [vmem:[#allocation17 + $0x1d8] sm:$0xf0]  ;;  %v9910_v6 = vld [vmem:[#allocation17 + $0x380] sm:$0xf]  ;;  %v12038_v10 = vld [vmem:[#allocation17 + $0xde0] sm:$0xf0]  ;;  %vm3964_vm10 = vweird.f32 %v13775_v49  ;;  %vm3893_vm11 = vweird.f32 %v13673_v12 }
 0x396   : > { %v3802_v59 = vmul.f32 %v3746_v30, %v12978_v31  ;;  %v3791_v60 = vrot.slane %v3790_v18, 2  ;;  %v14446_v30 = vsub.f32 1.5, %v13571_v56  ;;  %7111 = vmatpush.bf16.msra.mxu3 %v9715_v26  ;;  %v9463_v56 = vor.u32 %v11597_v33, %v9462_v13  ;;  %v10134_v40 = vld [vmem:[#allocation17 + $0x540] sm:$0xf]  ;;  %v11765_v1 = vld [vmem:[#allocation17 + $0x558] sm:$0xf0] }
 0x397   : > { %v9687_v63 = vor.u32 %v11653_v35, %v9686_v51  ;;  %v13860_v26 = vmul.f32 0.5, %v3969_v17  ;;  %v10778_v13 = vld [vmem:[#allocation17 + $0xa48] sm:$0xf]  ;;  %v11982_v17 = vld [vmem:[#allocation17 + $0xc20] sm:$0xf0]  ;;  %vm4022_vm15 = vcmask 1046534   ;;  %vm3963_vm1 = vweird.f32 %v13701_v14 }
 0x398   : > { %v13841_v41 = vadd.f32 1e-05, %v3802_v59  ;;  %v3832_v58 = vmul.f32 %v13523_v27, %v14446_v30  ;;  %v3792_v25 = vadd.f32 %v3791_v60, %v3790_v18  ;;  %7125 = vmatpush.bf16.msrb.mxu0 %v9939_v62  ;;  %v11709_v59 = vld [vmem:[#allocation17 + $0x398] sm:$0xf0]  ;;  %v10554_v62 = vld [vmem:[#allocation17 + $0x888] sm:$0xf]  ;;  %v10135_v60 = vor.u32 %v11765_v1, %v10134_v40 }
 0x399   : > { %7139 = vmatpush.bf16.msrb.mxu1 %v10163_v7  ;;  %v9911_v46 = vor.u32 %v11709_v59, %v9910_v6  ;;  %7098 = vmatpush.bf16.msra.mxu2 %v9463_v56  ;;  %v11870_v7 = vld [vmem:[#allocation17 + $0x8a0] sm:$0xf0]  ;;  %v11002_v35 = vld [vmem:[#allocation17 + $0xc08] sm:$0xf]  ;;  %v3916_v6 = vsel %vm13833_vm13, %v13534_v19, %v3912_v38  ;;  %v3886_v56 = vsel %vm13856_vm0, %v13713_v24, %v3882_v37  ;;  %v11919_v1 = vld [vmem:[#allocation17 + $0xa28] sm:$0xf0]  ;;  %vm3974_vm2 = vweird.f32 %v13800_v0 }
 0x39a   : > { %12248 = vrsqrt.f32 %v13841_v41  ;;  %v3793_v21 = vrot.slane %v3792_v25, 1  ;;  %v11926_v30 = vld [vmem:[#allocation17 + $0xa60] sm:$0xf0]  ;;  %v3836_v54 = vsel %vm13822_vm12, %v13523_v27, %v3832_v58  ;;  %7112 = vmatpush.bf16.msra.mxu3 %v9687_v63  ;;  %v10555_v33 = vor.u32 %v11870_v7, %v10554_v62  ;;  %v10526_v27 = vld [vmem:[#allocation17 + $0x850] sm:$0xf]  ;;  %vm13919_vm12 = vmor %vm3893_vm11, %vm3894_vm5 }
 0x39b   : > { %v10779_v51 = vor.u32 %v11926_v30, %v10778_v13  ;;  %v11003_v59 = vor.u32 %v11982_v17, %v11002_v35  ;;  %v11863_v58 = vld [vmem:[#allocation17 + $0x868] sm:$0xf0]  ;;  %v11227_v63 = vor.u32 %v12038_v10, %v11226_v43  ;;  %v10974_v5 = vld [vmem:[#allocation17 + $0xbd0] sm:$0xf]  ;;  %v4017_v24 = vsel %vm1444_vm8, %v3836_v54, %v13624_v44  ;;  %v11856_v7 = vld [vmem:[#allocation17 + $0x830] sm:$0xf0] }
 0x39c   : > { %v3794_v32 = vadd.f32 %v3793_v21, %v3792_v25  ;;  %7126 = vmatpush.bf16.msrb.mxu0 %v9911_v46  ;;  %v10527_v40 = vor.u32 %v11863_v58, %v10526_v27  ;;  %v10750_v21 = vld [vmem:[#allocation17 + $0xa10] sm:$0xf]  ;;  %v13878_v38 = vsel %vm1444_vm8, %v3916_v6, %v13659_v29  ;;  %v11975_v43 = vld [vmem:[#allocation17 + $0xbe8] sm:$0xf0]  ;;  %v10498_v29 = vld [vmem:[#allocation17 + $0x818] sm:$0xf]  ;;  %vm3903_vm13 = vweird.f32 %v13841_v41 }
 0x39d   : > { %7140 = vmatpush.bf16.msrb.mxu1 %v10135_v60  ;;  %7147 = vmatpush.bf16.msrb.mxu2 %v10555_v33  ;;  %v10751_v37 = vor.u32 %v11919_v1, %v10750_v21  ;;  %v11198_v18 = vld [vmem:[#allocation17 + $0xd90] sm:$0xf]  ;;  %v12031_v46 = vld [vmem:[#allocation17 + $0xda8] sm:$0xf0]  ;;  %v10975_v44 = vor.u32 %v11975_v43, %v10974_v5  ;;  %v3951_v13 = vsub.f32 1.5, %v13826_v45  ;;  %v10499_v33 = vor.u32 %v11856_v7, %v10498_v29 }
 0x39e   : > { %v3810_v25 = vmul.f32 %v3794_v32, %v12978_v31  ;;  %7161 = vmatpush.bf16.msrb.mxu3 %v10779_v51  ;;  %v4018_v31 = vsel %vm1446_vm9, %v13663_v57, %v13795_v50  ;;  %v13890_v57 = vrot.slane %v3886_v56, 3  ;;  %v11199_v50 = vor.u32 %v12031_v46, %v11198_v18  ;;  %v10722_v30 = vld [vmem:[#allocation17 + $0x9d8] sm:$0xf]  ;;  %v11912_v54 = vld [vmem:[#allocation17 + $0x9f0] sm:$0xf0] }
 0x39f   : > { %v10723_v51 = vor.u32 %v11912_v54, %v10722_v30  ;;  %v10946_v35 = vld [vmem:[#allocation17 + $0xb98] sm:$0xf]  ;;  %v11968_v17 = vld [vmem:[#allocation17 + $0xbb0] sm:$0xf0]  ;;  %v3961_v45 = vsub.f32 1.5, %v13838_v20  ;;  %v14450_v56 = vsub.f32 1.5, %v13809_v39  ;;  %v13910_v21 = vmul.f32 %v13737_v8, %v3951_v13 }
 0x3a0   : > { %v13872_v19 = vpop.eup %12248  ;;  %7175 = vmatpush.bf16.msra.mxu0 %v11003_v59  ;;  %v13886_v60 = vadd.f32 1e-05, %v3810_v25  ;;  %v11170_v6 = vld [vmem:[#allocation17 + $0xd58] sm:$0xf]  ;;  %v10947_v10 = vor.u32 %v11968_v17, %v10946_v35  ;;  %v12024_v27 = vld [vmem:[#allocation17 + $0xd70] sm:$0xf0]  ;;  %v13915_v15 = vsel %vm1448_vm3, %v4017_v24, %v4018_v31  ;;  %vm3973_vm5 = vweird.f32 %v13708_v23 }
 0x3a1   : > { %v3898_v62 = vmul.f32 %v13872_v19, %v13841_v41  ;;  %7189 = vmatpush.bf16.msra.mxu1 %v11227_v63  ;;  %7148 = vmatpush.bf16.msrb.mxu2 %v10527_v40  ;;  %v3892_v59 = vmul.f32 %v13726_v34, %v14450_v56  ;;  %v3971_v25 = vsub.f32 1.5, %v13860_v26  ;;  %vm3904_vm7 = vweird.f32 %v13872_v19  ;;  %v10470_v63 = vld [vmem:[#allocation17 + $0x7e0] sm:$0xf]  ;;  %v11849_v40 = vld [vmem:[#allocation17 + $0x7f8] sm:$0xf0]  ;;  %vm13956_vm11 = vmor %vm3973_vm5, %vm3974_vm2 }
 0x3a2   : > { %12250 = vrsqrt.f32 %v13886_v60  ;;  %7162 = vmatpush.bf16.msrb.mxu3 %v10751_v37  ;;  %v11171_v39 = vor.u32 %v12024_v27, %v11170_v6  ;;  %v10694_v1 = vld [vmem:[#allocation17 + $0x9a0] sm:$0xf]  ;;  %v11905_v5 = vld [vmem:[#allocation17 + $0x9b8] sm:$0xf0]  ;;  %v10471_v18 = vor.u32 %v11849_v40, %v10470_v63  ;;  %vm13929_vm14 = vmor %vm3903_vm13, %vm3904_vm7  ;;  %vm4024_vm0 = vcmask 1045508  }
 0x3a3   : > { %v3899_v32 = vmul.f32 %v13872_v19, %v3898_v62  ;;  %v10918_v26 = vld [vmem:[#allocation17 + $0xb60] sm:$0xf]  ;;  %v10695_v46 = vor.u32 %v11905_v5, %v10694_v1  ;;  %v11961_v12 = vld [vmem:[#allocation17 + $0xb78] sm:$0xf0]  ;;  %v3896_v24 = vsel %vm13919_vm12, %v13726_v34, %v3892_v59  ;;  %v10442_v13 = vld [vmem:[#allocation17 + $0x7a8] sm:$0xf]  ;;  %v3962_v54 = vmul.f32 %v13775_v49, %v3961_v45 }
 0x3a4   : > { %7176 = vmatpush.bf16.msra.mxu0 %v10975_v44  ;;  %v11142_v62 = vld [vmem:[#allocation17 + $0xd20] sm:$0xf]  ;;  %v10919_v41 = vor.u32 %v11961_v12, %v10918_v26  ;;  %v12017_v44 = vld [vmem:[#allocation17 + $0xd38] sm:$0xf0]  ;;  %v10666_v30 = vld [vmem:[#allocation17 + $0x968] sm:$0xf]  ;;  %v3956_v63 = vsel %vm13903_vm6, %v13737_v8, %v13910_v21  ;;  %v4021_v40 = vsel %vm4020_vm4, %v13806_v16, %v13890_v57  ;;  %vm3983_vm6 = vweird.f32 %v13886_v60 }
 0x3a5   : > { %v3900_v20 = vmul.f32 0.5, %v3899_v32  ;;  %7190 = vmatpush.bf16.msra.mxu1 %v11199_v50  ;;  %7149 = vmatpush.bf16.msrb.mxu2 %v10499_v33  ;;  %v11143_v34 = vor.u32 %v12017_v44, %v11142_v62  ;;  %v11842_v50 = vld [vmem:[#allocation17 + $0x7c0] sm:$0xf0]  ;;  %v3972_v32 = vmul.f32 %v13800_v0, %v3971_v25  ;;  %v10890_v35 = vld [vmem:[#allocation17 + $0xb28] sm:$0xf]  ;;  %vm13947_vm7 = vmor %vm3963_vm1, %vm3964_vm10  ;;  %v4008_v56 = vrot.slane %v3896_v24, 2 }
 0x3a6   : > { %7163 = vmatpush.bf16.msrb.mxu3 %v10723_v51  ;;  %v11898_v51 = vld [vmem:[#allocation17 + $0x980] sm:$0xf0]  ;;  %v10443_v23 = vor.u32 %v11842_v50, %v10442_v13  ;;  %vm4026_vm10 = vcmask 1043456   ;;  %v10414_v5 = vld [vmem:[#allocation17 + $0x770] sm:$0xf] }
 0x3a7   : > { %v3901_v43 = vsub.f32 1.5, %v3900_v20  ;;  %v11954_v17 = vld [vmem:[#allocation17 + $0xb40] sm:$0xf0]  ;;  %v10667_v59 = vor.u32 %v11898_v51, %v10666_v30  ;;  %v11835_v26 = vld [vmem:[#allocation17 + $0x788] sm:$0xf0] }
 0x3a8   : > { %7177 = vmatpush.bf16.msra.mxu0 %v10947_v10  ;;  %v13933_v29 = vpop.eup %12250  ;;  %v11114_v10 = vld [vmem:[#allocation17 + $0xce8] sm:$0xf]  ;;  %v12010_v27 = vld [vmem:[#allocation17 + $0xd00] sm:$0xf0]  ;;  %v10638_v37 = vld [vmem:[#allocation17 + $0x930] sm:$0xf] }
 0x3a9   : > { %v3902_v7 = vmul.f32 %v13872_v19, %v3901_v43  ;;  %7191 = vmatpush.bf16.msra.mxu1 %v11171_v39  ;;  %v3978_v33 = vmul.f32 %v13933_v29, %v13886_v60  ;;  %7150 = vmatpush.bf16.msrb.mxu2 %v10471_v18  ;;  %v10891_v39 = vor.u32 %v11954_v17, %v10890_v35  ;;  %v11891_v21 = vld [vmem:[#allocation17 + $0x948] sm:$0xf0]  ;;  %v10862_v16 = vld [vmem:[#allocation17 + $0xaf0] sm:$0xf]  ;;  %v10386_v50 = vld [vmem:[#allocation17 + $0x738] sm:$0xf]  ;;  %vm3984_vm12 = vweird.f32 %v13933_v29 }
 0x3aa   : > { %7164 = vmatpush.bf16.msrb.mxu3 %v10695_v46  ;;  %v11115_v1 = vor.u32 %v12010_v27, %v11114_v10  ;;  %v3966_v43 = vsel %vm13947_vm7, %v13775_v49, %v3962_v54  ;;  %v10415_v18 = vor.u32 %v11835_v26, %v10414_v5  ;;  %v10639_v46 = vor.u32 %v11891_v21, %v10638_v37  ;;  %v11947_v12 = vld [vmem:[#allocation17 + $0xb08] sm:$0xf0]  ;;  %v11086_v62 = vld [vmem:[#allocation17 + $0xcb0] sm:$0xf]  ;;  %v11828_v30 = vld [vmem:[#allocation17 + $0x750] sm:$0xf0] }
 0x3ab   : > { %v3906_v45 = vsel %vm13929_vm14, %v13872_v19, %v3902_v7  ;;  %v3979_v20 = vmul.f32 %v13933_v29, %v3978_v33  ;;  %v4029_v19 = vsel %vm1446_vm9, %v13793_v22, %v13804_v11  ;;  %v3976_v22 = vsel %vm13956_vm11, %v13800_v0, %v3972_v32  ;;  %v13977_v11 = vld [vmem:[#allocation14] sm:$0xff]  ;;  %v12003_v49 = vld [vmem:[#allocation17 + $0xcc8] sm:$0xf0]  ;;  %vm3985_vm13 = vmor %vm3983_vm6, %vm3984_vm12 }
 0x3ac   : > { %v4009_v14 = vrot.slane %v3906_v45, 1  ;;  %7178 = vmatpush.bf16.msra.mxu0 %v10919_v41  ;;  %v13983_v24 = vsel %vm1448_vm3, %v13878_v38, %v4029_v19  ;;  %v4013_v0 = vrot.slane %v3956_v63, 4  ;;  %v10863_v41 = vor.u32 %v11947_v12, %v10862_v16  ;;  %v11058_v19 = vld [vmem:[#allocation17 + $0xc78] sm:$0xf]  ;;  %v10582_v21 = vld [vmem:[#allocation17 + $0x8c0] sm:$0xf] }
 0x3ad   : > { %7192 = vmatpush.bf16.msra.mxu1 %v11143_v34  ;;  %v3980_v58 = vmul.f32 0.5, %v3979_v20  ;;  %7151 = vmatpush.bf16.msrb.mxu2 %v10443_v23  ;;  %v4014_v44 = vrot.slane %v3966_v43, 3  ;;  %v11087_v13 = vor.u32 %v12003_v49, %v11086_v62  ;;  %v13990_v54 = vrot.slane %v3976_v22, 2  ;;  %v11884_v20 = vld [vmem:[#allocation17 + $0x910] sm:$0xf0] }
 0x3ae   : > { %v4023_v8 = vsel %vm4022_vm15, %v4008_v56, %v4009_v14  ;;  %7165 = vmatpush.bf16.msrb.mxu3 %v10667_v59  ;;  %v10387_v38 = vor.u32 %v11828_v30, %v10386_v50  ;;  %v10610_v14 = vld [vmem:[#allocation17 + $0x8f8] sm:$0xf]  ;;  %v11877_v16 = vld [vmem:[#allocation17 + $0x8d8] sm:$0xf0]  ;;  %v10806_v62 = vld [vmem:[#allocation17 + $0xa80] sm:$0xf] }
 0x3af   : > { %v4025_v57 = vsel %vm4024_vm0, %v4021_v40, %v4023_v8  ;;  %v3981_v34 = vsub.f32 1.5, %v3980_v58  ;;  %v4031_v43 = vsel %vm4020_vm4, %v4013_v0, %v4014_v44  ;;  %v11821_v58 = vld [vmem:[#allocation17 + $0x718] sm:$0xf0] }
 0x3b0   : > { %v4027_v31 = vsel %vm4026_vm10, %v13915_v15, %v4025_v57  ;;  %7179 = vmatpush.bf16.msra.mxu0 %v10891_v39  ;;  %v11940_v39 = vld [vmem:[#allocation17 + $0xad0] sm:$0xf0]  ;;  %v14033_v57 = vld [vmem:[#allocation16] sm:$0xff] }
 0x3b1   : > { %v13988_v7 = vmul.f32 %v4027_v31, %v13977_v11  ;;  %7193 = vmatpush.bf16.msra.mxu1 %v11115_v1  ;;  %7152 = vmatpush.bf16.msrb.mxu2 %v10415_v18  ;;  %v3982_v10 = vmul.f32 %v13933_v29, %v3981_v34  ;;  %v11933_v49 = vld [vmem:[#allocation17 + $0xa98] sm:$0xf0]  ;;  %v10611_v31 = vor.u32 %v11884_v20, %v10610_v14 }
 0x3b2   : > { %7166 = vmatpush.bf16.msrb.mxu3 %v10639_v46  ;;  %v11989_v34 = vld [vmem:[#allocation17 + $0xc58] sm:$0xf0] }
 0x3b3   : > { %v4041_v15 = vperm.slane %v13988_v7, 0  ;;  %v4042_v32 = vperm.slane %v13988_v7, 1  ;;  %v4043_v33 = vperm.slane %v13988_v7, 2  ;;  %v4044_v51 = vperm.slane %v13988_v7, 3 }
 0x3b4   : > { %v4045_v35 = vperm.slane %v13988_v7, 4  ;;  %v4046_v17 = vperm.slane %v13988_v7, 5  ;;  %v4047_v6 = vperm.slane %v13988_v7, 6  ;;  %v4048_v56 = vperm.slane %v13988_v7, 7  ;;  %7180 = vmatpush.bf16.msra.mxu0 %v10863_v41  ;;  %v10024_v7 = vld [vmem:[#allocation17 + $0x47c] sm:$0xf0] }
 0x3b5   : > { %v4074_v45 = vmul.f32 %v4042_v32, %v13441_v55  ;;  %v4075_v23 = vmul.f32 %v4043_v33, %v13456_v42  ;;  %v4076_v59 = vmul.f32 %v4044_v51, %v13471_v53  ;;  %7194 = vmatpush.bf16.msra.mxu1 %v11087_v13  ;;  %v10834_v53 = vld [vmem:[#allocation17 + $0xab8] sm:$0xf]  ;;  %v4073_v63 = vmul.f32 %v4041_v15, %v13435_v36 }
 0x3b6   : > { %v4077_v27 = vmul.f32 %v4045_v35, %v13489_v52  ;;  %v4078_v25 = vmul.f32 %v4046_v17, %v13516_v47  ;;  %v4079_v55 = vmul.f32 %v4047_v6, %v13580_v2  ;;  %v4080_v42 = vmul.f32 %v4048_v56, %v13711_v48  ;;  %7153 = vmatpush.bf16.msrb.mxu2 %v10387_v38  ;;  %v11996_v47 = vld [vmem:[#allocation17 + $0xc90] sm:$0xf0]  ;;  %v10358_v48 = vld [vmem:[#allocation17 + $0x700] sm:$0xf] }
 0x3b7   : > { %v4105_v52 = vrot.slane %v4074_v45, 7  ;;  %v4106_v40 = vrot.slane %v4075_v23, 6  ;;  %v4107_v1 = vrot.slane %v4076_v59, 5  ;;  %v3986_v8 = vsel %vm3985_vm13, %v13933_v29, %v3982_v10  ;;  %v11030_v29 = vld [vmem:[#allocation17 + $0xc40] sm:$0xf]  ;;  %7167 = vmatpush.bf16.msrb.mxu3 %v10611_v31 }
 0x3b8   : > { %v4108_v5 = vrot.slane %v4077_v27, 4  ;;  %v4109_v26 = vrot.slane %v4078_v25, 3  ;;  %v4110_v37 = vrot.slane %v4079_v55, 2  ;;  %v4111_v2 = vrot.slane %v4080_v42, 1 }
 0x3b9   : > { %v4119_v22 = vsel %vm1444_vm8, %v4073_v63, %v4105_v52  ;;  %v4120_v36 = vsel %vm1446_vm9, %v4106_v40, %v4107_v1  ;;  %v4016_v12 = vrot.slane %v3986_v8, 1  ;;  %v10835_v41 = vor.u32 %v11940_v39, %v10834_v53  ;;  %v14462_v1 = vld [vmem:[#allocation39_spill] sm:$0xff] }
 0x3ba   : > { %v4121_v18 = vsel %vm1448_vm3, %v4119_v22, %v4120_v36  ;;  %v4122_v46 = vsel %vm4020_vm4, %v4108_v5, %v4109_v26  ;;  %v4123_v60 = vsel %vm4022_vm15, %v4110_v37, %v4111_v2  ;;  %v11059_v44 = vor.u32 %v11996_v47, %v11058_v19  ;;  %v14463_v5 = vld [vmem:[#allocation41_spill] sm:$0xff]  ;;  %v14464_v37 = vld [vmem:[#allocation35_spill] sm:$0xff] }
 0x3bb   : > { %v4124_v0 = vsel %vm4024_vm0, %v4122_v46, %v4123_v60  ;;  %v4032_v50 = vsel %vm4022_vm15, %v13990_v54, %v4016_v12  ;;  %v10359_v30 = vor.u32 %v11821_v58, %v10358_v48  ;;  %v10583_v38 = vor.u32 %v11877_v16, %v10582_v21  ;;  %7181 = vmatpush.bf16.msra.mxu0 %v10835_v41  ;;  %v14465_v48 = vld [vmem:[#allocation43_spill] sm:$0xff]  ;;  %v14466_v22 = vld [vmem:[#allocation45_spill] sm:$0xff] }
 0x3bc   : > { %v4125_v13 = vsel %vm4026_vm10, %v4121_v18, %v4124_v0  ;;  %v4033_v23 = vsel %vm4024_vm0, %v4031_v43, %v4032_v50  ;;  %v10807_v59 = vor.u32 %v11933_v49, %v10806_v62  ;;  %7195 = vmatpush.bf16.msra.mxu1 %v11059_v44  ;;  %v11031_v27 = vor.u32 %v11989_v34, %v11030_v29  ;;  %v14468_v60 = vld [vmem:[#allocation29_spill] sm:$0xff]  ;;  %v14469_v34 = vld [vmem:[#allocation46_spill] sm:$0xff] }
 0x3bd   : > { %v14043_v45 = vsub.f32 %v14033_v57, %v4125_v13  ;;  %v4034_v10 = vsel %vm4026_vm10, %v13983_v24, %v4033_v23  ;;  %7154 = vmatpush.bf16.msrb.mxu2 %v10359_v30  ;;  %v4144_v54 = vmul.f32 %v4048_v56, %v13654_v3  ;;  %v4137_v42 = vmul.f32 %v4041_v15, %v13372_v4  ;;  %v14470_v23 = vld [vmem:[#allocation30_spill] sm:$0xff] }
 0x3be   : > { %v14049_v25 = vmul.f32 %v4034_v10, %v13977_v11  ;;  %7168 = vmatpush.bf16.msrb.mxu3 %v10583_v38  ;;  %v4138_v3 = vmul.f32 %v4042_v32, %v13382_v61  ;;  %v4139_v63 = vmul.f32 %v4043_v33, %v13396_v28  ;;  %v14461_v32 = vld [vmem:[#allocation36_spill] sm:$0xff]  ;;  %v14467_v33 = vld [vmem:[#allocation47_spill] sm:$0xff]  ;;  %v4140_v12 = vmul.f32 %v4044_v51, %v14468_v60 }
 0x3bf   : > { %v4162_v55 = vperm.slane %v14043_v45, 7  ;;  %v4155_v14 = vperm.slane %v14043_v45, 0  ;;  %7182 = vmatpush.bf16.msra.mxu0 %v10807_v59  ;;  %v4156_v19 = vperm.slane %v14043_v45, 1  ;;  %v4157_v52 = vperm.slane %v14043_v45, 2  ;;  %v14471_v10 = vld [vmem:[#allocation31_spill] sm:$0xff] }
 0x3c0   : > { %v4049_v20 = vperm.slane %v14049_v25, 0  ;;  %v4050_v24 = vperm.slane %v14049_v25, 1  ;;  %v4051_v53 = vperm.slane %v14049_v25, 2  ;;  %v4052_v11 = vperm.slane %v14049_v25, 3  ;;  %7196 = vmatpush.bf16.msra.mxu1 %v11031_v27 }
 0x3c1   : > { %v4053_v56 = vperm.slane %v14049_v25, 4  ;;  %v4054_v4 = vperm.slane %v14049_v25, 5  ;;  %v4055_v15 = vperm.slane %v14049_v25, 6  ;;  %v4056_v39 = vperm.slane %v14049_v25, 7  ;;  %v9772_v25 = vld [vmem:[#allocation17 + $0x284] sm:$0xf0] }
 0x3c2   : > { %v4082_v61 = vmul.f32 %v4050_v24, %v13453_v9  ;;  %v4083_v40 = vmul.f32 %v4051_v53, %v14461_v32  ;;  %v4084_v47 = vmul.f32 %v4052_v11, %v14462_v1  ;;  %v4081_v2 = vmul.f32 %v4049_v20, %v14464_v37  ;;  %v14473_v32 = vld [vmem:[#allocation33_spill] sm:$0xff] }
 0x3c3   : > { %v4085_v26 = vmul.f32 %v4053_v56, %v14463_v5  ;;  %v4086_v43 = vmul.f32 %v4054_v4, %v14465_v48  ;;  %v4087_v28 = vmul.f32 %v4055_v15, %v14466_v22  ;;  %v4088_v9 = vmul.f32 %v4056_v39, %v14467_v33  ;;  %v14109_v1 = vld [vmem:[#allocation17 + $0x1a4] sm:$0xf0] }
 0x3c4   : > { %v4112_v36 = vrot.slane %v4082_v61, 7  ;;  %v4113_v8 = vrot.slane %v4083_v40, 6  ;;  %v4114_v58 = vrot.slane %v4084_v47, 5  ;;  %v14090_v62 = vadd.f32 %v4162_v55, %v4144_v54  ;;  %v14107_v40 = vld [vmem:[#allocation17 + $0x18c] sm:$0xf] }
 0x3c5   : > { %v4115_v21 = vrot.slane %v4085_v26, 4  ;;  %v4116_v16 = vrot.slane %v4086_v43, 3  ;;  %v4117_v18 = vrot.slane %v4087_v28, 2  ;;  %v4118_v46 = vrot.slane %v4088_v9, 1  ;;  %v14112_v47 = vld [vmem:[#allocation17 + $0x34c] sm:$0xf] }
 0x3c6   : > { %v4126_v49 = vsel %vm1444_vm8, %v4081_v2, %v4112_v36  ;;  %v4127_v0 = vsel %vm1446_vm9, %v4113_v8, %v4114_v58  ;;  %v4187_v31 = vadd.f32 %v4155_v14, %v4137_v42  ;;  %v4152_v13 = vmul.f32 %v4056_v39, %v14469_v34  ;;  %v14472_v14 = vld [vmem:[#allocation32_spill] sm:$0xff]  ;;  %v11755_v58 = vld [vmem:[#allocation17 + $0x50c] sm:$0xf] }
 0x3c7   : > { %v4128_v41 = vsel %vm1448_vm3, %v4126_v49, %v4127_v0  ;;  %v4129_v44 = vsel %vm4020_vm4, %v4115_v21, %v4116_v16  ;;  %v4130_v29 = vsel %vm4022_vm15, %v4117_v18, %v4118_v46  ;;  %v4188_v51 = vadd.f32 %v4156_v19, %v4138_v3  ;;  %v10108_v21 = vld [vmem:[#allocation17 + $0x524] sm:$0xf0]  ;;  %v11811_v16 = vld [vmem:[#allocation17 + $0x6cc] sm:$0xf] }
 0x3c8   : > { %v4131_v50 = vsel %vm4024_vm0, %v4129_v44, %v4130_v29  ;;  %vm4203_vm14 = vcmp.gt.f32.partialorder %v4187_v31, 0.0  ;;  %v4219_v30 = vmul.f32 0.2, %v4187_v31  ;;  %v4145_v59 = vmul.f32 %v4049_v20, %v14470_v23  ;;  %v10332_v18 = vld [vmem:[#allocation17 + $0x6e4] sm:$0xf0] }
 0x3c9   : > { %v4132_v38 = vsel %vm4026_vm10, %v4128_v41, %v4131_v50  ;;  %v4146_v27 = vmul.f32 %v4050_v24, %v14471_v10  ;;  %v4189_v54 = vadd.f32 %v4157_v52, %v4139_v63  ;;  %v4220_v42 = vmul.f32 0.2, %v4188_v51  ;;  %v9632_v41 = vld [vmem:[#allocation17 + $0x16c] sm:$0xf0]  ;;  %v14126_v44 = vld [vmem:[#allocation17 + $0x314] sm:$0xf] }
 0x3ca   : > { %v14103_v55 = vsub.f32 %v14033_v57, %v4132_v38  ;;  %v4147_v61 = vmul.f32 %v4051_v53, %v14472_v14  ;;  %v4148_v39 = vmul.f32 %v4052_v11, %v14473_v32  ;;  %v4235_v3 = vsel %vm4203_vm14, %v4187_v31, %v4219_v30  ;;  %v14117_v53 = vld [vmem:[#allocation17 + $0x364] sm:$0xf0]  ;;  %v11636_v31 = vld [vmem:[#allocation17 + $0x154] sm:$0xf]  ;;  %v9856_v29 = vld [vmem:[#allocation17 + $0x32c] sm:$0xf0] }
 0x3cb   : > { %vm4204_vm8 = vcmp.gt.f32.partialorder %v4188_v51, 0.0  ;;  %v4221_v19 = vmul.f32 0.2, %v4189_v54  ;;  %v4158_v20 = vperm.slane %v14043_v45, 3  ;;  %vm4205_vm9 = vcmp.gt.f32.partialorder %v4189_v54, 0.0 }
 0x3cc   : > { %v4170_v24 = vperm.slane %v14103_v55, 7  ;;  %v4163_v57 = vperm.slane %v14103_v55, 0  ;;  %v4164_v63 = vperm.slane %v14103_v55, 1  ;;  %v4165_v11 = vperm.slane %v14103_v55, 2  ;;  %v11748_v30 = vld [vmem:[#allocation17 + $0x4d4] sm:$0xf] }
 0x3cd   : > { %v4166_v52 = vperm.slane %v14103_v55, 3  ;;  %v4190_v5 = vadd.f32 %v4158_v20, %v4140_v12  ;;  %v9663_v26 = vor.u32 %v14107_v40, %v14109_v1  ;;  %v4236_v43 = vsel %vm4204_vm8, %v4188_v51, %v4220_v42  ;;  %v10080_v51 = vld [vmem:[#allocation17 + $0x4ec] sm:$0xf0]  ;;  %v14135_v42 = vld [vmem:[#allocation17 + $0x11c] sm:$0xf] }
 0x3ce   : > { %v4202_v37 = vadd.f32 %v4170_v24, %v4152_v13  ;;  %v4195_v2 = vadd.f32 %v4163_v57, %v4145_v59  ;;  %v4196_v48 = vadd.f32 %v4164_v63, %v4146_v27  ;;  %v4197_v22 = vadd.f32 %v4165_v11, %v4147_v61  ;;  %v11804_v27 = vld [vmem:[#allocation17 + $0x694] sm:$0xf]  ;;  %v14140_v40 = vld [vmem:[#allocation17 + $0x2dc] sm:$0xf]  ;;  %v14142_v1 = vld [vmem:[#allocation17 + $0x2f4] sm:$0xf0] }
 0x3cf   : > { %v4237_v28 = vsel %vm4205_vm9, %v4189_v54, %v4221_v19  ;;  %v4198_v33 = vadd.f32 %v4166_v52, %v4148_v39  ;;  %v9887_v9 = vor.u32 %v14112_v47, %v14117_v53  ;;  %vm4206_vm4 = vcmp.gt.f32.partialorder %v4190_v5, 0.0  ;;  %v10304_v54 = vld [vmem:[#allocation17 + $0x6ac] sm:$0xf0]  ;;  %v9604_v39 = vld [vmem:[#allocation17 + $0x134] sm:$0xf0] }
 0x3d0   : > { %vm4211_vm3 = vcmp.gt.f32.partialorder %v4195_v2, 0.0  ;;  %v4227_v36 = vmul.f32 0.2, %v4195_v2  ;;  %v4222_v8 = vmul.f32 0.2, %v4190_v5  ;;  %vm4212_vm15 = vcmp.gt.f32.partialorder %v4196_v48, 0.0 }
 0x3d1   : > { %v4228_v46 = vmul.f32 0.2, %v4196_v48  ;;  %vm4213_vm0 = vcmp.gt.f32.partialorder %v4197_v22, 0.0  ;;  %v4229_v60 = vmul.f32 0.2, %v4197_v22  ;;  %vm4214_vm1 = vcmp.gt.f32.partialorder %v4198_v33, 0.0 }
 0x3d2   : > { %v4234_v12 = vmul.f32 0.2, %v4202_v37  ;;  %v4243_v49 = vsel %vm4211_vm3, %v4195_v2, %v4227_v36  ;;  %v4230_v0 = vmul.f32 0.2, %v4198_v33  ;;  %vm4218_vm2 = vcmp.gt.f32.partialorder %v4202_v37, 0.0  ;;  %v14475_v36 = vld [vmem:[#allocation34_spill] sm:$0xff] }
 0x3d3   : > { %v14128_v34 = vpack.c.bf16 %v4243_v49, %v4235_v3  ;;  %v4244_v13 = vsel %vm4212_vm15, %v4196_v48, %v4228_v46  ;;  %v4245_v50 = vsel %vm4213_vm0, %v4197_v22, %v4229_v60  ;;  %v4238_v59 = vsel %vm4206_vm4, %v4190_v5, %v4222_v8  ;;  %v14474_v3 = vld [vmem:[#allocation42_spill] sm:$0xff]  ;;  %v11741_v24 = vld [vmem:[#allocation17 + $0x49c] sm:$0xf]  ;;  %v10052_v57 = vld [vmem:[#allocation17 + $0x4b4] sm:$0xf0] }
 0x3d4   : > { %v14130_v38 = vpack.c.bf16 %v4244_v13, %v4236_v43  ;;  %v14132_v23 = vpack.c.bf16 %v4245_v50, %v4237_v28  ;;  %v4246_v10 = vsel %vm4214_vm1, %v4198_v33, %v4230_v0  ;;  %v10111_v61 = vor.u32 %v11755_v58, %v10108_v21  ;;  %v11797_v53 = vld [vmem:[#allocation17 + $0x65c] sm:$0xf]  ;;  %v10276_v11 = vld [vmem:[#allocation17 + $0x674] sm:$0xf0]  ;;  %v11622_v28 = vld [vmem:[#allocation17 + $0xe4] sm:$0xf] }
 0x3d5   : > { %7099 = vmatmul.bf16.vlgmr.msra.gmra.mxu2 %v14128_v34  ;;  %v14138_v14 = vpack.c.bf16 %v4246_v10, %v4238_v59  ;;  %v10335_v32 = vor.u32 %v11811_v16, %v10332_v18  ;;  %v4143_v19 = vmul.f32 %v4047_v6, %v14474_v3  ;;  %v14148_v20 = vmul.f32 0.2, %v14090_v62  ;;  %v9576_v33 = vld [vmem:[#allocation17 + $0xfc] sm:$0xf0]  ;;  %v14476_v58 = vld [vmem:[#allocation37_spill] sm:$0xff]  ;;  %v14477_v18 = vld [vmem:[#allocation38_spill] sm:$0xff] }
 0x3d6   : > { %v14151_v47 = vsel %vm4218_vm2, %v4202_v37, %v4234_v12  ;;  %7113 = vmatmul.bf16.vlgmr.msra.gmra.mxu3 %v14130_v38  ;;  %7127 = vmatmul.bf16.vlgmr.msrb.gmra.mxu0 %v14132_v23  ;;  %vm4210_vm5 = vcmp.gt.f32.partialorder %v14090_v62, 0.0  ;;  %v9635_v63 = vor.u32 %v11636_v31, %v9632_v41  ;;  %v9859_v6 = vor.u32 %v14126_v44, %v9856_v29  ;;  %v11678_v16 = vld [vmem:[#allocation17 + $0x2a4] sm:$0xf]  ;;  %v9800_v0 = vld [vmem:[#allocation17 + $0x2bc] sm:$0xf0] }
 0x3d7   : > { %7141 = vmatmul.bf16.vlgmr.msrb.gmra.mxu1 %v14138_v14  ;;  %7203 = vmatpush.bf16.msra.mxu2 %v9663_v26  ;;  %v4159_v52 = vperm.slane %v14043_v45, 4  ;;  %v4167_v5 = vperm.slane %v14103_v55, 4  ;;  %v10083_v37 = vor.u32 %v11748_v30, %v10080_v51  ;;  %v10307_v2 = vor.u32 %v11804_v27, %v10304_v54  ;;  %v14478_v60 = vld [vmem:[#allocation40_spill] sm:$0xff]  ;;  %v11671_v3 = vld [vmem:[#allocation17 + $0x26c] sm:$0xf] }
 0x3d8   : > { %7217 = vmatpush.bf16.msra.mxu3 %v9887_v9  ;;  %7231 = vmatpush.bf16.msrb.mxu0 %v10111_v61  ;;  %v9607_v48 = vor.u32 %v14135_v42, %v9604_v39  ;;  %v4160_v43 = vperm.slane %v14043_v45, 5  ;;  %v9831_v26 = vor.u32 %v14140_v40, %v14142_v1  ;;  %v10055_v22 = vor.u32 %v11741_v24, %v10052_v57  ;;  %v11734_v31 = vld [vmem:[#allocation17 + $0x464] sm:$0xf]  ;;  %v10248_v13 = vld [vmem:[#allocation17 + $0x63c] sm:$0xf0] }
 0x3d9   : > { %7245 = vmatpush.bf16.msrb.mxu1 %v10335_v32  ;;  %v4141_v8 = vmul.f32 %v4045_v35, %v14475_v36  ;;  %v4149_v9 = vmul.f32 %v4053_v56, %v14476_v58  ;;  %v10279_v21 = vor.u32 %v11797_v53, %v10276_v11  ;;  %v4142_v46 = vmul.f32 %v4046_v17, %v14477_v18  ;;  %v11790_v17 = vld [vmem:[#allocation17 + $0x624] sm:$0xf]  ;;  %v11615_v61 = vld [vmem:[#allocation17 + $0xac] sm:$0xf]  ;;  %v9548_v32 = vld [vmem:[#allocation17 + $0xc4] sm:$0xf0] }
 0x3da   : > { %v4150_v12 = vmul.f32 %v4054_v4, %v14478_v60  ;;  %v4168_v49 = vperm.slane %v14103_v55, 5  ;;  %v4161_v44 = vperm.slane %v14043_v45, 6  ;;  %v4169_v56 = vperm.slane %v14103_v55, 6  ;;  %v14479_v59 = vld [vmem:[#allocation44_spill] sm:$0xff]  ;;  %v9744_v58 = vld [vmem:[#allocation17 + $0x24c] sm:$0xf0] }
 0x3db   : > { %7204 = vmatpush.bf16.msra.mxu2 %v9635_v63  ;;  %v4191_v35 = vadd.f32 %v4159_v52, %v4141_v8  ;;  %v4199_v41 = vadd.f32 %v4167_v5, %v4149_v9  ;;  %v9579_v29 = vor.u32 %v11622_v28, %v9576_v33  ;;  %v4192_v50 = vadd.f32 %v4160_v43, %v4142_v46  ;;  %v9996_v63 = vld [vmem:[#allocation17 + $0x444] sm:$0xf0]  ;;  %v11783_v52 = vld [vmem:[#allocation17 + $0x5ec] sm:$0xf]  ;;  %v9520_v28 = vld [vmem:[#allocation17 + $0x8c] sm:$0xf0] }
 0x3dc   : > { %7218 = vmatpush.bf16.msra.mxu3 %v9859_v6  ;;  %7232 = vmatpush.bf16.msrb.mxu0 %v10083_v37  ;;  %v4200_v30 = vadd.f32 %v4168_v49, %v4150_v12  ;;  %v4151_v10 = vmul.f32 %v4055_v15, %v14479_v59  ;;  %v9803_v27 = vor.u32 %v11678_v16, %v9800_v0  ;;  %v11727_v15 = vld [vmem:[#allocation17 + $0x42c] sm:$0xf]  ;;  %v10220_v5 = vld [vmem:[#allocation17 + $0x604] sm:$0xf0]  ;;  %v11664_v8 = vld [vmem:[#allocation17 + $0x234] sm:$0xf] }
 0x3dd   : > { %7246 = vmatpush.bf16.msrb.mxu1 %v10307_v2  ;;  %vm4215_vm7 = vcmp.gt.f32.partialorder %v4199_v41, 0.0  ;;  %v4223_v4 = vmul.f32 0.2, %v4191_v35  ;;  %v4231_v51 = vmul.f32 0.2, %v4199_v41  ;;  %vm4207_vm10 = vcmp.gt.f32.partialorder %v4191_v35, 0.0 }
 0x3de   : > { %vm4216_vm11 = vcmp.gt.f32.partialorder %v4200_v30, 0.0  ;;  %v4224_v45 = vmul.f32 0.2, %v4192_v50  ;;  %v4232_v55 = vmul.f32 0.2, %v4200_v30  ;;  %vm4208_vm6 = vcmp.gt.f32.partialorder %v4192_v50, 0.0 }
 0x3df   : > { %7205 = vmatpush.bf16.msra.mxu2 %v9607_v48  ;;  %v4193_v54 = vadd.f32 %v4161_v44, %v4143_v19  ;;  %v4201_v42 = vadd.f32 %v4169_v56, %v4151_v10  ;;  %v10027_v39 = vor.u32 %v11734_v31, %v10024_v7  ;;  %v4247_v40 = vsel %vm4215_vm7, %v4199_v41, %v4231_v51  ;;  %v11720_v9 = vld [vmem:[#allocation17 + $0x3f4] sm:$0xf]  ;;  %v10192_v18 = vld [vmem:[#allocation17 + $0x5cc] sm:$0xf0]  ;;  %v11601_v12 = vld [vmem:[#allocation17 + $0x3c] sm:$0xf] }
 0x3e0   : > { %7219 = vmatpush.bf16.msra.mxu3 %v9831_v26  ;;  %7233 = vmatpush.bf16.msrb.mxu0 %v10055_v22  ;;  %v4248_v1 = vsel %vm4216_vm11, %v4200_v30, %v4232_v55  ;;  %v10251_v24 = vor.u32 %v11790_v17, %v10248_v13  ;;  %v4242_v19 = vsel %vm4210_vm5, %v14090_v62, %v14148_v20  ;;  %v11608_v22 = vld [vmem:[#allocation17 + $0x74] sm:$0xf]  ;;  %v9492_v49 = vld [vmem:[#allocation17 + $0x54] sm:$0xf0]  ;;  %v11713_v44 = vld [vmem:[#allocation17 + $0x3bc] sm:$0xf] }
 0x3e1   : > { %7247 = vmatpush.bf16.msrb.mxu1 %v10279_v21  ;;  %vm4209_vm12 = vcmp.gt.f32.partialorder %v4193_v54, 0.0  ;;  %vm4217_vm13 = vcmp.gt.f32.partialorder %v4201_v42, 0.0  ;;  %v4225_v57 = vmul.f32 0.2, %v4193_v54  ;;  %v4239_v6 = vsel %vm4207_vm10, %v4191_v35, %v4223_v4  ;;  %v9968_v21 = vld [vmem:[#allocation17 + $0x40c] sm:$0xf0] }
 0x3e2   : > { %v4240_v53 = vsel %vm4208_vm6, %v4192_v50, %v4224_v45  ;;  %v4233_v11 = vmul.f32 0.2, %v4201_v42  ;;  %v14190_v37 = vpack.c.bf16 %v14151_v47, %v4242_v19  ;;  %v14192_v2 = vpack.c.bf16 %v4247_v40, %v4239_v6  ;;  %v11776_v16 = vld [vmem:[#allocation17 + $0x5b4] sm:$0xf]  ;;  %v11657_v35 = vld [vmem:[#allocation17 + $0x1fc] sm:$0xf] }
 0x3e3   : > { %7206 = vmatpush.bf16.msra.mxu2 %v9579_v29  ;;  %v14194_v48 = vpack.c.bf16 %v4248_v1, %v4240_v53  ;;  %v9551_v43 = vor.u32 %v11615_v61, %v9548_v32  ;;  %v4241_v62 = vsel %vm4209_vm12, %v4193_v54, %v4225_v57  ;;  %v9775_v26 = vor.u32 %v11671_v3, %v9772_v25  ;;  %v9716_v41 = vld [vmem:[#allocation17 + $0x214] sm:$0xf0]  ;;  %v11769_v29 = vld [vmem:[#allocation17 + $0x57c] sm:$0xf]  ;;  %v11594_v17 = vld [vmem:[#allocation17 + $0x4] sm:$0xf] }
 0x3e4   : > { %7220 = vmatpush.bf16.msra.mxu3 %v9803_v27  ;;  %7234 = vmatpush.bf16.msrb.mxu0 %v10027_v39  ;;  %v4249_v20 = vsel %vm4217_vm13, %v4201_v42, %v4233_v11  ;;  %v9999_v33 = vor.u32 %v11727_v15, %v9996_v63  ;;  %v10223_v36 = vor.u32 %v11783_v52, %v10220_v5  ;;  %v9940_v56 = vld [vmem:[#allocation17 + $0x3d4] sm:$0xf0]  ;;  %v9464_v30 = vld [vmem:[#allocation17 + $0x1c] sm:$0xf0]  ;;  %v11650_v4 = vld [vmem:[#allocation17 + $0x1c4] sm:$0xf] }
 0x3e5   : > { %7248 = vmatpush.bf16.msrb.mxu1 %v10251_v24  ;;  %7155 = vmatmul.bf16.vlgmr.msrb.gmra.mxu2 %v14192_v2  ;;  %v14199_v47 = vpack.c.bf16 %v4249_v20, %v4241_v62  ;;  %v9523_v46 = vor.u32 %v11608_v22, %v9520_v28  ;;  %v9747_v60 = vor.u32 %v11664_v8, %v9744_v58  ;;  %v10164_v7 = vld [vmem:[#allocation17 + $0x594] sm:$0xf0]  ;;  %v9688_v51 = vld [vmem:[#allocation17 + $0x1dc] sm:$0xf0]  ;;  %v11706_v27 = vld [vmem:[#allocation17 + $0x384] sm:$0xf] }
 0x3e6   : > { %7169 = vmatmul.bf16.vlgmr.msrb.gmra.mxu3 %v14194_v48  ;;  %v9971_v0 = vor.u32 %v11720_v9, %v9968_v21  ;;  %v10195_v31 = vor.u32 %v11776_v16, %v10192_v18  ;;  %v9495_v13 = vor.u32 %v11601_v12, %v9492_v49  ;;  %v9719_v50 = vor.u32 %v11657_v35, %v9716_v41  ;;  %v9912_v45 = vld [vmem:[#allocation17 + $0x39c] sm:$0xf0]  ;;  %v11762_v55 = vld [vmem:[#allocation17 + $0x544] sm:$0xf]  ;;  %v11867_v42 = vld [vmem:[#allocation17 + $0x88c] sm:$0xf] }
 0x3e7   : > { %7183 = vmatmul.bf16.vlgmr.msra.gmra.mxu0 %v14199_v47  ;;  %7197 = vmatmul.bf16.vlgmr.msra.gmra.mxu1 %v14190_v37  ;;  %v9943_v59 = vor.u32 %v11713_v44, %v9940_v56  ;;  %v10167_v10 = vor.u32 %v11769_v29, %v10164_v7  ;;  %v10136_v54 = vld [vmem:[#allocation17 + $0x55c] sm:$0xf0]  ;;  %v10556_v61 = vld [vmem:[#allocation17 + $0x8a4] sm:$0xf0]  ;;  %v11923_v32 = vld [vmem:[#allocation17 + $0xa4c] sm:$0xf]  ;;  %v9467_v1 = vor.u32 %v11594_v17, %v9464_v30 }
 0x3e8   : > { %7207 = vmatpush.bf16.msra.mxu2 %v9551_v43  ;;  %7221 = vmatpush.bf16.msra.mxu3 %v9775_v26  ;;  %v10780_v39 = vld [vmem:[#allocation17 + $0xa64] sm:$0xf0]  ;;  %v11979_v40 = vld [vmem:[#allocation17 + $0xc0c] sm:$0xf]  ;;  %v9691_v3 = vor.u32 %v11650_v4, %v9688_v51  ;;  %v9915_v57 = vor.u32 %v11706_v27, %v9912_v45  ;;  %v10139_v63 = vor.u32 %v11762_v55, %v10136_v54  ;;  %v11860_v53 = vld [vmem:[#allocation17 + $0x854] sm:$0xf] }
 0x3e9   : > { %7235 = vmatpush.bf16.msrb.mxu0 %v9999_v33  ;;  %7249 = vmatpush.bf16.msrb.mxu1 %v10223_v36  ;;  %v11004_v25 = vld [vmem:[#allocation17 + $0xc24] sm:$0xf0]  ;;  %v12035_v15 = vld [vmem:[#allocation17 + $0xdcc] sm:$0xf]  ;;  %v10559_v19 = vor.u32 %v11867_v42, %v10556_v61  ;;  %v10783_v6 = vor.u32 %v11923_v32, %v10780_v39  ;;  %v10528_v11 = vld [vmem:[#allocation17 + $0x86c] sm:$0xf0] }
 0x3ea   : > { %v11228_v24 = vld [vmem:[#allocation17 + $0xde4] sm:$0xf0]  ;;  %v11007_v52 = vor.u32 %v11979_v40, %v11004_v25  ;;  %v11916_v43 = vld [vmem:[#allocation17 + $0xa14] sm:$0xf]  ;;  %v10752_v62 = vld [vmem:[#allocation17 + $0xa2c] sm:$0xf0]  ;;  %v10531_v33 = vor.u32 %v11860_v53, %v10528_v11 }
 0x3eb   : > { %v11231_v5 = vor.u32 %v12035_v15, %v11228_v24  ;;  %v11972_v20 = vld [vmem:[#allocation17 + $0xbd4] sm:$0xf]  ;;  %v10976_v26 = vld [vmem:[#allocation17 + $0xbec] sm:$0xf0]  ;;  %v10755_v36 = vor.u32 %v11916_v43, %v10752_v62  ;;  %v11853_v8 = vld [vmem:[#allocation17 + $0x81c] sm:$0xf] }
 0x3ec   : > { %7208 = vmatpush.bf16.msra.mxu2 %v9523_v46  ;;  %7222 = vmatpush.bf16.msra.mxu3 %v9747_v60  ;;  %v12028_v22 = vld [vmem:[#allocation17 + $0xd94] sm:$0xf]  ;;  %v11200_v28 = vld [vmem:[#allocation17 + $0xdac] sm:$0xf0]  ;;  %v10500_v58 = vld [vmem:[#allocation17 + $0x834] sm:$0xf0]  ;;  %v10979_v9 = vor.u32 %v11972_v20, %v10976_v26 }
 0x3ed   : > { %7236 = vmatpush.bf16.msrb.mxu0 %v9971_v0  ;;  %7250 = vmatpush.bf16.msrb.mxu1 %v10195_v31  ;;  %v11203_v21 = vor.u32 %v12028_v22, %v11200_v28  ;;  %v11909_v16 = vld [vmem:[#allocation17 + $0x9dc] sm:$0xf]  ;;  %v10724_v18 = vld [vmem:[#allocation17 + $0x9f4] sm:$0xf0]  ;;  %v10503_v0 = vor.u32 %v11853_v8, %v10500_v58  ;;  %v11846_v35 = vld [vmem:[#allocation17 + $0x7e4] sm:$0xf] }
 0x3ee   : > { %v11965_v46 = vld [vmem:[#allocation17 + $0xb9c] sm:$0xf]  ;;  %v10948_v60 = vld [vmem:[#allocation17 + $0xbb4] sm:$0xf0]  ;;  %v10727_v31 = vor.u32 %v11909_v16, %v10724_v18  ;;  %v10472_v41 = vld [vmem:[#allocation17 + $0x7fc] sm:$0xf0] }
 0x3ef   : > { %v12021_v12 = vld [vmem:[#allocation17 + $0xd5c] sm:$0xf]  ;;  %v11172_v49 = vld [vmem:[#allocation17 + $0xd74] sm:$0xf0]  ;;  %v10951_v44 = vor.u32 %v11965_v46, %v10948_v60  ;;  %v11902_v29 = vld [vmem:[#allocation17 + $0x9a4] sm:$0xf]  ;;  %v10475_v4 = vor.u32 %v11846_v35, %v10472_v41 }
 0x3f0   : > { %7209 = vmatpush.bf16.msra.mxu2 %v9495_v13  ;;  %7223 = vmatpush.bf16.msra.mxu3 %v9719_v50  ;;  %v11175_v56 = vor.u32 %v12021_v12, %v11172_v49  ;;  %v10696_v7 = vld [vmem:[#allocation17 + $0x9bc] sm:$0xf0]  ;;  %v11958_v17 = vld [vmem:[#allocation17 + $0xb64] sm:$0xf]  ;;  %v11895_v55 = vld [vmem:[#allocation17 + $0x96c] sm:$0xf] }
 0x3f1   : > { %7237 = vmatpush.bf16.msrb.mxu0 %v9943_v59  ;;  %7251 = vmatpush.bf16.msrb.mxu1 %v10167_v10  ;;  %v10920_v13 = vld [vmem:[#allocation17 + $0xb7c] sm:$0xf0]  ;;  %v12014_v50 = vld [vmem:[#allocation17 + $0xd24] sm:$0xf]  ;;  %v10699_v51 = vor.u32 %v11902_v29, %v10696_v7  ;;  %v11839_v59 = vld [vmem:[#allocation17 + $0x7ac] sm:$0xf] }
 0x3f2   : > { %v11144_v30 = vld [vmem:[#allocation17 + $0xd3c] sm:$0xf0]  ;;  %v10444_v10 = vld [vmem:[#allocation17 + $0x7c4] sm:$0xf0]  ;;  %v10923_v27 = vor.u32 %v11958_v17, %v10920_v13  ;;  %v11951_v42 = vld [vmem:[#allocation17 + $0xb2c] sm:$0xf] }
 0x3f3   : > { %v11147_v45 = vor.u32 %v12014_v50, %v11144_v30  ;;  %v10668_v54 = vld [vmem:[#allocation17 + $0x984] sm:$0xf0]  ;;  %v12007_v32 = vld [vmem:[#allocation17 + $0xcec] sm:$0xf]  ;;  %v10447_v40 = vor.u32 %v11839_v59, %v10444_v10  ;;  %v10416_v25 = vld [vmem:[#allocation17 + $0x78c] sm:$0xf0] }
 0x3f4   : > { %7210 = vmatpush.bf16.msra.mxu2 %v9467_v1  ;;  %7224 = vmatpush.bf16.msra.mxu3 %v9691_v3  ;;  %v10892_v61 = vld [vmem:[#allocation17 + $0xb44] sm:$0xf0]  ;;  %v10671_v1 = vor.u32 %v11895_v55, %v10668_v54  ;;  %v11832_v3 = vld [vmem:[#allocation17 + $0x774] sm:$0xf]  ;;  %v11088_v11 = vld [vmem:[#allocation17 + $0xccc] sm:$0xf0] }
 0x3f5   : > { %7238 = vmatpush.bf16.msrb.mxu0 %v9915_v57  ;;  %7252 = vmatpush.bf16.msrb.mxu1 %v10139_v63  ;;  %v11116_v39 = vld [vmem:[#allocation17 + $0xd04] sm:$0xf0]  ;;  %v10895_v15 = vor.u32 %v11951_v42, %v10892_v61  ;;  %v11888_v57 = vld [vmem:[#allocation17 + $0x934] sm:$0xf]  ;;  %v10640_v63 = vld [vmem:[#allocation17 + $0x94c] sm:$0xf0] }
 0x3f6   : > { %v11119_v24 = vor.u32 %v12007_v32, %v11116_v39  ;;  %v12000_v53 = vld [vmem:[#allocation17 + $0xcb4] sm:$0xf]  ;;  %v11825_v43 = vld [vmem:[#allocation17 + $0x73c] sm:$0xf]  ;;  %v10388_v62 = vld [vmem:[#allocation17 + $0x754] sm:$0xf0] }
 0x3f7   : > { %7211 = vmatmul.bf16.vlgmr.msra.gmra.mxu2 %v14128_v34  ;;  %7225 = vmatmul.bf16.vlgmr.msra.gmra.mxu3 %v14130_v38  ;;  %v11091_v26 = vor.u32 %v12000_v53, %v11088_v11  ;;  %v11881_v22 = vld [vmem:[#allocation17 + $0x8fc] sm:$0xf]  ;;  %v10612_v28 = vld [vmem:[#allocation17 + $0x914] sm:$0xf0]  ;;  %v10360_v18 = vld [vmem:[#allocation17 + $0x71c] sm:$0xf0] }
 0x3f8   : > { %7259 = vmatpush.bf16.msrb.mxu2 %v10559_v19  ;;  %7273 = vmatpush.bf16.msrb.mxu3 %v10783_v6  ;;  %v11944_v19 = vld [vmem:[#allocation17 + $0xaf4] sm:$0xf]  ;;  %v10864_v6 = vld [vmem:[#allocation17 + $0xb0c] sm:$0xf0]  ;;  %v11993_v8 = vld [vmem:[#allocation17 + $0xc7c] sm:$0xf]  ;;  %v10615_v16 = vor.u32 %v11881_v22, %v10612_v28 }
 0x3f9   : > { %7287 = vmatpush.bf16.msra.mxu0 %v11007_v52  ;;  %7301 = vmatpush.bf16.msra.mxu1 %v11231_v5  ;;  %v10419_v52 = vor.u32 %v11832_v3, %v10416_v25  ;;  %v10643_v5 = vor.u32 %v11888_v57, %v10640_v63  ;;  %v10867_v20 = vor.u32 %v11944_v19, %v10864_v6  ;;  %v11060_v58 = vld [vmem:[#allocation17 + $0xc94] sm:$0xf0]  ;;  %v11874_v46 = vld [vmem:[#allocation17 + $0x8c4] sm:$0xf]  ;;  %v10584_v60 = vld [vmem:[#allocation17 + $0x8dc] sm:$0xf0] }
 0x3fa   : > { %7239 = vmatmul.bf16.vlgmr.msrb.gmra.mxu0 %v14132_v23  ;;  %7253 = vmatmul.bf16.vlgmr.msrb.gmra.mxu1 %v14138_v14  ;;  %v11063_v49 = vor.u32 %v11993_v8, %v11060_v58  ;;  %v11986_v35 = vld [vmem:[#allocation17 + $0xc44] sm:$0xf]  ;;  %v11032_v41 = vld [vmem:[#allocation17 + $0xc5c] sm:$0xf0]  ;;  %v9890_v29 = vld [vmem:[#allocation17 + $0x350] sm:$0xf]  ;;  %v10587_v50 = vor.u32 %v11874_v46, %v10584_v60 }
 0x3fb   : > { %v11703_v7 = vld [vmem:[#allocation17 + $0x368] sm:$0xf0]  ;;  %v10114_v17 = vld [vmem:[#allocation17 + $0x510] sm:$0xf]  ;;  %v11035_v10 = vor.u32 %v11986_v35, %v11032_v41  ;;  %v9638_v55 = vld [vmem:[#allocation17 + $0x158] sm:$0xf] }
 0x3fc   : > { %7260 = vmatpush.bf16.msrb.mxu2 %v10531_v33  ;;  %7274 = vmatpush.bf16.msrb.mxu3 %v10755_v36  ;;  %v11937_v33 = vld [vmem:[#allocation17 + $0xabc] sm:$0xf]  ;;  %v10836_v36 = vld [vmem:[#allocation17 + $0xad4] sm:$0xf0]  ;;  %v11759_v30 = vld [vmem:[#allocation17 + $0x528] sm:$0xf0] }
 0x3fd   : > { %7288 = vmatpush.bf16.msra.mxu0 %v10979_v9  ;;  %7302 = vmatpush.bf16.msra.mxu1 %v11203_v21  ;;  %v11818_v9 = vld [vmem:[#allocation17 + $0x704] sm:$0xf]  ;;  %v10391_v21 = vor.u32 %v11825_v43, %v10388_v62  ;;  %v10839_v12 = vor.u32 %v11937_v33, %v10836_v36  ;;  %v11640_v54 = vld [vmem:[#allocation17 + $0x170] sm:$0xf0]  ;;  %v10115_v42 = vor.u32 %v11759_v30, %v10114_v17  ;;  %v9862_v32 = vld [vmem:[#allocation17 + $0x318] sm:$0xf] }
 0x3fe   : > { %v10363_v13 = vor.u32 %v11818_v9, %v10360_v18  ;;  %v11696_v39 = vld [vmem:[#allocation17 + $0x330] sm:$0xf0]  ;;  %v10310_v3 = vld [vmem:[#allocation17 + $0x698] sm:$0xf]  ;;  %v9610_v57 = vld [vmem:[#allocation17 + $0x120] sm:$0xf] }
 0x3ff   : > { %v11808_v25 = vld [vmem:[#allocation17 + $0x6b0] sm:$0xf0]  ;;  %v11633_v63 = vld [vmem:[#allocation17 + $0x138] sm:$0xf0]  ;;  %v9834_v53 = vld [vmem:[#allocation17 + $0x2e0] sm:$0xf] }
 0x400   : > { %7261 = vmatpush.bf16.msrb.mxu2 %v10503_v0  ;;  %7275 = vmatpush.bf16.msrb.mxu3 %v10727_v31  ;;  %v11930_v0 = vld [vmem:[#allocation17 + $0xa84] sm:$0xf]  ;;  %v10808_v31 = vld [vmem:[#allocation17 + $0xa9c] sm:$0xf0]  ;;  %v10311_v6 = vor.u32 %v11808_v25, %v10310_v3  ;;  %v11689_v11 = vld [vmem:[#allocation17 + $0x2f8] sm:$0xf0] }
 0x401   : > { %7289 = vmatpush.bf16.msra.mxu0 %v10951_v44  ;;  %7303 = vmatpush.bf16.msra.mxu1 %v11175_v56  ;;  %v9666_v44 = vld [vmem:[#allocation17 + $0x190] sm:$0xf]  ;;  %v11647_v56 = vld [vmem:[#allocation17 + $0x1a8] sm:$0xf0]  ;;  %v10811_v59 = vor.u32 %v11930_v0, %v10808_v31  ;;  %v10282_v43 = vld [vmem:[#allocation17 + $0x660] sm:$0xf] }
 0x402   : > { %v11801_v62 = vld [vmem:[#allocation17 + $0x678] sm:$0xf0]  ;;  %v9582_v22 = vld [vmem:[#allocation17 + $0xe8] sm:$0xf]  ;;  %v11626_v28 = vld [vmem:[#allocation17 + $0x100] sm:$0xf0] }
 0x403   : > { %v10283_v36 = vor.u32 %v11801_v62, %v10282_v43  ;;  %v9806_v8 = vld [vmem:[#allocation17 + $0x2a8] sm:$0xf]  ;;  %v11682_v58 = vld [vmem:[#allocation17 + $0x2c0] sm:$0xf0]  ;;  %v9583_v46 = vor.u32 %v11626_v28, %v9582_v22  ;;  %v9778_v35 = vld [vmem:[#allocation17 + $0x270] sm:$0xf] }
 0x404   : > { %7262 = vmatpush.bf16.msrb.mxu2 %v10475_v4  ;;  %7276 = vmatpush.bf16.msrb.mxu3 %v10699_v51  ;;  %v10338_v4 = vld [vmem:[#allocation17 + $0x6d0] sm:$0xf]  ;;  %v11815_v51 = vld [vmem:[#allocation17 + $0x6e8] sm:$0xf0]  ;;  %v10030_v9 = vld [vmem:[#allocation17 + $0x468] sm:$0xf]  ;;  %v9807_v60 = vor.u32 %v11682_v58, %v9806_v8 }
 0x405   : > { %7290 = vmatpush.bf16.msra.mxu0 %v10923_v27  ;;  %7304 = vmatpush.bf16.msra.mxu1 %v11147_v45  ;;  %v9667_v27 = vor.u32 %v11647_v56, %v9666_v44  ;;  %v9891_v45 = vor.u32 %v11703_v7, %v9890_v29  ;;  %v10339_v61 = vor.u32 %v11815_v51, %v10338_v4  ;;  %v11794_v18 = vld [vmem:[#allocation17 + $0x640] sm:$0xf0]  ;;  %v11675_v41 = vld [vmem:[#allocation17 + $0x288] sm:$0xf0]  ;;  %v10002_v44 = vld [vmem:[#allocation17 + $0x430] sm:$0xf] }
 0x406   : > { %v11731_v56 = vld [vmem:[#allocation17 + $0x448] sm:$0xf0]  ;;  %v10226_v29 = vld [vmem:[#allocation17 + $0x5f0] sm:$0xf]  ;;  %v11612_v30 = vld [vmem:[#allocation17 + $0x90] sm:$0xf0] }
 0x407   : > { %v11787_v7 = vld [vmem:[#allocation17 + $0x608] sm:$0xf0]  ;;  %v10003_v4 = vor.u32 %v11731_v56, %v10002_v44  ;;  %v9722_v3 = vld [vmem:[#allocation17 + $0x200] sm:$0xf]  ;;  %v11661_v25 = vld [vmem:[#allocation17 + $0x218] sm:$0xf0] }
 0x408   : > { %7263 = vmatpush.bf16.msrb.mxu2 %v10447_v40  ;;  %7277 = vmatpush.bf16.msrb.mxu3 %v10671_v1  ;;  %v10086_v40 = vld [vmem:[#allocation17 + $0x4d8] sm:$0xf]  ;;  %v11752_v1 = vld [vmem:[#allocation17 + $0x4f0] sm:$0xf0]  ;;  %v10227_v51 = vor.u32 %v11787_v7, %v10226_v29  ;;  %v10142_v22 = vld [vmem:[#allocation17 + $0x548] sm:$0xf] }
 0x409   : > { %7291 = vmatpush.bf16.msra.mxu0 %v10895_v15  ;;  %7305 = vmatpush.bf16.msra.mxu1 %v11119_v24  ;;  %v9639_v15 = vor.u32 %v11640_v54, %v9638_v55  ;;  %v9863_v24 = vor.u32 %v11696_v39, %v9862_v32  ;;  %v10087_v19 = vor.u32 %v11752_v1, %v10086_v40  ;;  %v10198_v55 = vld [vmem:[#allocation17 + $0x5b8] sm:$0xf]  ;;  %v11780_v54 = vld [vmem:[#allocation17 + $0x5d0] sm:$0xf0]  ;;  %v9498_v32 = vld [vmem:[#allocation17 + $0x40] sm:$0xf] }
 0x40a   : > { %v11605_v39 = vld [vmem:[#allocation17 + $0x58] sm:$0xf0]  ;;  %v10199_v1 = vor.u32 %v11780_v54, %v10198_v55  ;;  %v11766_v28 = vld [vmem:[#allocation17 + $0x560] sm:$0xf0]  ;;  %v10786_v8 = vld [vmem:[#allocation17 + $0xa50] sm:$0xf] }
 0x40b   : > { %v11927_v58 = vld [vmem:[#allocation17 + $0xa68] sm:$0xf0]  ;;  %v10758_v29 = vld [vmem:[#allocation17 + $0xa18] sm:$0xf]  ;;  %v11920_v7 = vld [vmem:[#allocation17 + $0xa30] sm:$0xf0] }
 0x40c   : > { %7264 = vmatpush.bf16.msrb.mxu2 %v10419_v52  ;;  %7278 = vmatpush.bf16.msrb.mxu3 %v10643_v5  ;;  %v10058_v52 = vld [vmem:[#allocation17 + $0x4a0] sm:$0xf]  ;;  %v11745_v5 = vld [vmem:[#allocation17 + $0x4b8] sm:$0xf0] }
 0x40d   : > { %7292 = vmatpush.bf16.msra.mxu0 %v10867_v20  ;;  %7306 = vmatpush.bf16.msra.mxu1 %v11091_v26  ;;  %v9611_v20 = vor.u32 %v11633_v63, %v9610_v57  ;;  %v9835_v26 = vor.u32 %v11689_v11, %v9834_v53  ;;  %v10059_v33 = vor.u32 %v11745_v5, %v10058_v52  ;;  %v10170_v57 = vld [vmem:[#allocation17 + $0x580] sm:$0xf]  ;;  %v11773_v63 = vld [vmem:[#allocation17 + $0x598] sm:$0xf0]  ;;  %v11598_v11 = vld [vmem:[#allocation17 + $0x20] sm:$0xf0] }
 0x40e   : > { %v9723_v53 = vor.u32 %v11661_v25, %v9722_v3  ;;  %v9694_v52 = vld [vmem:[#allocation17 + $0x1c8] sm:$0xf]  ;;  %v11654_v5 = vld [vmem:[#allocation17 + $0x1e0] sm:$0xf0]  ;;  %v10171_v62 = vor.u32 %v11773_v63, %v10170_v57  ;;  %v10730_v55 = vld [vmem:[#allocation17 + $0x9e0] sm:$0xf] }
 0x40f   : > { %v11913_v54 = vld [vmem:[#allocation17 + $0x9f8] sm:$0xf0]  ;;  %v10478_v3 = vld [vmem:[#allocation17 + $0x7e8] sm:$0xf]  ;;  %v11850_v25 = vld [vmem:[#allocation17 + $0x800] sm:$0xf0] }
 0x410   : > { %7265 = vmatpush.bf16.msrb.mxu2 %v10391_v21  ;;  %7279 = vmatpush.bf16.msrb.mxu3 %v10615_v16  ;;  %v11738_v21 = vld [vmem:[#allocation17 + $0x480] sm:$0xf0]  ;;  %v10254_v16 = vld [vmem:[#allocation17 + $0x628] sm:$0xf] }
 0x411   : > { %7293 = vmatpush.bf16.msra.mxu0 %v10839_v12  ;;  %7307 = vmatpush.bf16.msra.mxu1 %v11063_v49  ;;  %v9554_v12 = vld [vmem:[#allocation17 + $0xb0] sm:$0xf]  ;;  %v11619_v49 = vld [vmem:[#allocation17 + $0xc8] sm:$0xf0]  ;;  %v10031_v0 = vor.u32 %v11738_v21, %v10030_v9  ;;  %v10255_v31 = vor.u32 %v11794_v18, %v10254_v16  ;;  %v9695_v16 = vor.u32 %v11654_v5, %v9694_v52  ;;  %v10702_v57 = vld [vmem:[#allocation17 + $0x9a8] sm:$0xf] }
 0x412   : > { %v9555_v17 = vor.u32 %v11619_v49, %v9554_v12  ;;  %v11010_v9 = vld [vmem:[#allocation17 + $0xc10] sm:$0xf]  ;;  %v11983_v18 = vld [vmem:[#allocation17 + $0xc28] sm:$0xf0]  ;;  %v10143_v49 = vor.u32 %v11766_v28, %v10142_v22  ;;  %v11906_v63 = vld [vmem:[#allocation17 + $0x9c0] sm:$0xf0]  ;;  %v10479_v52 = vor.u32 %v11850_v25, %v10478_v3 }
 0x413   : > { %v11011_v44 = vor.u32 %v11983_v18, %v11010_v9  ;;  %v10703_v5 = vor.u32 %v11906_v63, %v10702_v57  ;;  %v10674_v22 = vld [vmem:[#allocation17 + $0x970] sm:$0xf]  ;;  %v11899_v28 = vld [vmem:[#allocation17 + $0x988] sm:$0xf0]  ;;  %v11836_v18 = vld [vmem:[#allocation17 + $0x790] sm:$0xf0] }
 0x414   : > { %7266 = vmatpush.bf16.msrb.mxu2 %v10363_v13  ;;  %7280 = vmatpush.bf16.msrb.mxu3 %v10587_v50  ;;  %v9779_v13 = vor.u32 %v11675_v41, %v9778_v35  ;;  %v9526_v50 = vld [vmem:[#allocation17 + $0x78] sm:$0xf]  ;;  %v11864_v41 = vld [vmem:[#allocation17 + $0x870] sm:$0xf0]  ;;  %v11038_v3 = vld [vmem:[#allocation17 + $0xc48] sm:$0xf] }
 0x415   : > { %7294 = vmatpush.bf16.msra.mxu0 %v10811_v59  ;;  %7308 = vmatpush.bf16.msra.mxu1 %v11035_v10  ;;  %v9750_v59 = vld [vmem:[#allocation17 + $0x238] sm:$0xf]  ;;  %v11668_v10 = vld [vmem:[#allocation17 + $0x250] sm:$0xf0]  ;;  %v11990_v25 = vld [vmem:[#allocation17 + $0xc60] sm:$0xf0] }
 0x416   : > { %v10534_v35 = vld [vmem:[#allocation17 + $0x858] sm:$0xf]  ;;  %v11700_v57 = vld [vmem:[#allocation17 + $0x354] sm:$0xf]  ;;  %v9892_v63 = vld [vmem:[#allocation17 + $0x36c] sm:$0xf0] }
 0x417   : > { %7267 = vmatmul.bf16.vlgmr.msrb.gmra.mxu2 %v14192_v2  ;;  %7281 = vmatmul.bf16.vlgmr.msrb.gmra.mxu3 %v14194_v48 }
 0x418   : > { %7315 = vmatpush.bf16.msra.mxu2 %v9667_v27  ;;  %7329 = vmatpush.bf16.msra.mxu3 %v9891_v45  ;;  %v9974_v27 = vld [vmem:[#allocation17 + $0x3f8] sm:$0xf]  ;;  %v11724_v45 = vld [vmem:[#allocation17 + $0x410] sm:$0xf0] }
 0x419   : > { %7343 = vmatpush.bf16.msrb.mxu0 %v10115_v42  ;;  %7357 = vmatpush.bf16.msrb.mxu1 %v10339_v61  ;;  %v9527_v42 = vor.u32 %v11612_v30, %v9526_v50  ;;  %v9751_v61 = vor.u32 %v11668_v10, %v9750_v59  ;;  %v9975_v40 = vor.u32 %v11724_v45, %v9974_v27  ;;  %v11206_v50 = vld [vmem:[#allocation17 + $0xd98] sm:$0xf]  ;;  %v12032_v30 = vld [vmem:[#allocation17 + $0xdb0] sm:$0xf0]  ;;  %v10506_v59 = vld [vmem:[#allocation17 + $0x820] sm:$0xf] }
 0x41a   : > { %7295 = vmatmul.bf16.vlgmr.msra.gmra.mxu0 %v14199_v47  ;;  %7309 = vmatmul.bf16.vlgmr.msra.gmra.mxu1 %v14190_v37  ;;  %v11857_v10 = vld [vmem:[#allocation17 + $0x838] sm:$0xf0]  ;;  %v11207_v45 = vor.u32 %v12032_v30, %v11206_v50  ;;  %v10618_v50 = vld [vmem:[#allocation17 + $0x900] sm:$0xf] }
 0x41b   : > { %v11885_v30 = vld [vmem:[#allocation17 + $0x918] sm:$0xf0] }
 0x41c   : > { %7316 = vmatpush.bf16.msra.mxu2 %v9639_v15  ;;  %7330 = vmatpush.bf16.msra.mxu3 %v9863_v24  ;;  %v9946_v15 = vld [vmem:[#allocation17 + $0x3c0] sm:$0xf]  ;;  %v11717_v24 = vld [vmem:[#allocation17 + $0x3d8] sm:$0xf0] }
 0x41d   : > { %7344 = vmatpush.bf16.msrb.mxu0 %v10087_v19  ;;  %7358 = vmatpush.bf16.msrb.mxu1 %v10311_v6  ;;  %v9470_v19 = vld [vmem:[#allocation17 + $0x8] sm:$0xf]  ;;  %v9499_v6 = vor.u32 %v11605_v39, %v9498_v32  ;;  %v9947_v43 = vor.u32 %v11717_v24, %v9946_v15  ;;  %v11178_v32 = vld [vmem:[#allocation17 + $0xd60] sm:$0xf]  ;;  %v12025_v39 = vld [vmem:[#allocation17 + $0xd78] sm:$0xf0] }
 0x41e   : > { %v9471_v21 = vor.u32 %v11598_v11, %v9470_v19  ;;  %v11179_v24 = vor.u32 %v12025_v39, %v11178_v32  ;;  %v10926_v19 = vld [vmem:[#allocation17 + $0xb68] sm:$0xf]  ;;  %v12018_v11 = vld [vmem:[#allocation17 + $0xd40] sm:$0xf0] }
 0x420   : > { %7317 = vmatpush.bf16.msra.mxu2 %v9611_v20  ;;  %7331 = vmatpush.bf16.msra.mxu3 %v9835_v26  ;;  %v9918_v20 = vld [vmem:[#allocation17 + $0x388] sm:$0xf]  ;;  %v11710_v26 = vld [vmem:[#allocation17 + $0x3a0] sm:$0xf0] }
 0x421   : > { %7345 = vmatpush.bf16.msrb.mxu0 %v10059_v33  ;;  %7359 = vmatpush.bf16.msrb.mxu1 %v10283_v36  ;;  %v10562_v33 = vld [vmem:[#allocation17 + $0x890] sm:$0xf]  ;;  %v11871_v36 = vld [vmem:[#allocation17 + $0x8a8] sm:$0xf0]  ;;  %v9919_v12 = vor.u32 %v11710_v26, %v9918_v20 }
 0x424   : > { %7318 = vmatpush.bf16.msra.mxu2 %v9583_v46  ;;  %7332 = vmatpush.bf16.msra.mxu3 %v9807_v60  ;;  %v11234_v46 = vld [vmem:[#allocation17 + $0xdd0] sm:$0xf]  ;;  %v12039_v60 = vld [vmem:[#allocation17 + $0xde8] sm:$0xf0] }
 0x425   : > { %7346 = vmatpush.bf16.msrb.mxu0 %v10031_v0  ;;  %7360 = vmatpush.bf16.msrb.mxu1 %v10255_v31  ;;  %v10563_v0 = vor.u32 %v11871_v36, %v10562_v33  ;;  %v10787_v31 = vor.u32 %v11927_v58, %v10786_v8  ;;  %v11235_v56 = vor.u32 %v12039_v60, %v11234_v46  ;;  %v10898_v33 = vld [vmem:[#allocation17 + $0xb30] sm:$0xf]  ;;  %v11955_v36 = vld [vmem:[#allocation17 + $0xb48] sm:$0xf0] }
 0x426   : > { %v11122_v8 = vld [vmem:[#allocation17 + $0xcf0] sm:$0xf]  ;;  %v12011_v58 = vld [vmem:[#allocation17 + $0xd08] sm:$0xf0]  ;;  %v10899_v46 = vor.u32 %v11955_v36, %v10898_v33 }
 0x427   : > { %v11123_v60 = vor.u32 %v12011_v58, %v11122_v8  ;;  %v11693_v8 = vld [vmem:[#allocation17 + $0x31c] sm:$0xf]  ;;  %v9864_v58 = vld [vmem:[#allocation17 + $0x334] sm:$0xf0] }
 0x428   : > { %7319 = vmatpush.bf16.msra.mxu2 %v9555_v17  ;;  %7333 = vmatpush.bf16.msra.mxu3 %v9779_v13  ;;  %v10982_v17 = vld [vmem:[#allocation17 + $0xbd8] sm:$0xf]  ;;  %v11976_v13 = vld [vmem:[#allocation17 + $0xbf0] sm:$0xf0] }
 0x429   : > { %7347 = vmatpush.bf16.msrb.mxu0 %v10003_v4  ;;  %7361 = vmatpush.bf16.msrb.mxu1 %v10227_v51  ;;  %v10535_v4 = vor.u32 %v11864_v41, %v10534_v35  ;;  %v10759_v51 = vor.u32 %v11920_v7, %v10758_v29  ;;  %v10983_v27 = vor.u32 %v11976_v13, %v10982_v17  ;;  %v11094_v35 = vld [vmem:[#allocation17 + $0xcb8] sm:$0xf]  ;;  %v12004_v41 = vld [vmem:[#allocation17 + $0xcd0] sm:$0xf0]  ;;  %v10394_v29 = vld [vmem:[#allocation17 + $0x740] sm:$0xf] }
 0x42a   : > { %v11829_v7 = vld [vmem:[#allocation17 + $0x758] sm:$0xf0]  ;;  %v11095_v13 = vor.u32 %v12004_v41, %v11094_v35  ;;  %v11686_v35 = vld [vmem:[#allocation17 + $0x2e4] sm:$0xf]  ;;  %v9836_v41 = vld [vmem:[#allocation17 + $0x2fc] sm:$0xf0] }
 0x42c   : > { %7320 = vmatpush.bf16.msra.mxu2 %v9527_v42  ;;  %7334 = vmatpush.bf16.msra.mxu3 %v9751_v61  ;;  %v10954_v42 = vld [vmem:[#allocation17 + $0xba0] sm:$0xf]  ;;  %v11969_v61 = vld [vmem:[#allocation17 + $0xbb8] sm:$0xf0] }
 0x42d   : > { %7348 = vmatpush.bf16.msrb.mxu0 %v9975_v40  ;;  %7362 = vmatpush.bf16.msrb.mxu1 %v10199_v1  ;;  %v10507_v40 = vor.u32 %v11857_v10, %v10506_v59  ;;  %v10731_v1 = vor.u32 %v11913_v54, %v10730_v55  ;;  %v10955_v15 = vor.u32 %v11969_v61, %v10954_v42  ;;  %v11066_v59 = vld [vmem:[#allocation17 + $0xc80] sm:$0xf]  ;;  %v11997_v10 = vld [vmem:[#allocation17 + $0xc98] sm:$0xf0]  ;;  %v11822_v54 = vld [vmem:[#allocation17 + $0x720] sm:$0xf0] }
 0x42e   : > { %v10619_v55 = vor.u32 %v11885_v30, %v10618_v50  ;;  %v10590_v42 = vld [vmem:[#allocation17 + $0x8c8] sm:$0xf]  ;;  %v11878_v61 = vld [vmem:[#allocation17 + $0x8e0] sm:$0xf0]  ;;  %v11067_v39 = vor.u32 %v11997_v10, %v11066_v59  ;;  %v11623_v50 = vld [vmem:[#allocation17 + $0xec] sm:$0xf] }
 0x42f   : > { %v9584_v30 = vld [vmem:[#allocation17 + $0x104] sm:$0xf0]  ;;  %v11679_v10 = vld [vmem:[#allocation17 + $0x2ac] sm:$0xf] }
 0x430   : > { %7321 = vmatpush.bf16.msra.mxu2 %v9499_v6  ;;  %7335 = vmatpush.bf16.msra.mxu3 %v9723_v53  ;;  %v11962_v6 = vld [vmem:[#allocation17 + $0xb80] sm:$0xf0]  ;;  %v11150_v53 = vld [vmem:[#allocation17 + $0xd28] sm:$0xf] }
 0x431   : > { %7349 = vmatpush.bf16.msrb.mxu0 %v9947_v43  ;;  %7363 = vmatpush.bf16.msrb.mxu1 %v10171_v62  ;;  %v10450_v43 = vld [vmem:[#allocation17 + $0x7b0] sm:$0xf]  ;;  %v11843_v62 = vld [vmem:[#allocation17 + $0x7c8] sm:$0xf0]  ;;  %v10927_v20 = vor.u32 %v11962_v6, %v10926_v19  ;;  %v11151_v26 = vor.u32 %v12018_v11, %v11150_v53  ;;  %v11756_v19 = vld [vmem:[#allocation17 + $0x514] sm:$0xf]  ;;  %v10591_v53 = vor.u32 %v11878_v61, %v10590_v42 }
 0x432   : > { %v10451_v9 = vor.u32 %v11843_v62, %v10450_v43  ;;  %v10116_v11 = vld [vmem:[#allocation17 + $0x52c] sm:$0xf0]  ;;  %v11039_v62 = vor.u32 %v11990_v25, %v11038_v3  ;;  %v11791_v42 = vld [vmem:[#allocation17 + $0x62c] sm:$0xf]  ;;  %v10256_v61 = vld [vmem:[#allocation17 + $0x644] sm:$0xf0] }
 0x433   : > { %v10119_v33 = vor.u32 %v11756_v19, %v10116_v11  ;;  %v11616_v25 = vld [vmem:[#allocation17 + $0xb4] sm:$0xf]  ;;  %v10004_v11 = vld [vmem:[#allocation17 + $0x44c] sm:$0xf0] }
 0x434   : > { %7322 = vmatpush.bf16.msra.mxu2 %v9471_v21  ;;  %7336 = vmatpush.bf16.msra.mxu3 %v9695_v16  ;;  %v10675_v21 = vor.u32 %v11899_v28, %v10674_v22  ;;  %v10422_v16 = vld [vmem:[#allocation17 + $0x778] sm:$0xf]  ;;  %v11637_v22 = vld [vmem:[#allocation17 + $0x15c] sm:$0xf]  ;;  %v11672_v19 = vld [vmem:[#allocation17 + $0x274] sm:$0xf] }
 0x435   : > { %7350 = vmatpush.bf16.msrb.mxu0 %v9919_v12  ;;  %7364 = vmatpush.bf16.msrb.mxu1 %v10143_v49  ;;  %v10646_v12 = vld [vmem:[#allocation17 + $0x938] sm:$0xf]  ;;  %v11892_v49 = vld [vmem:[#allocation17 + $0x950] sm:$0xf0] }
 0x436   : > { %v9640_v28 = vld [vmem:[#allocation17 + $0x174] sm:$0xf0] }
 0x437   : > { %7323 = vmatmul.bf16.vlgmr.msra.gmra.mxu2 %v14128_v34  ;;  %7337 = vmatmul.bf16.vlgmr.msra.gmra.mxu3 %v14130_v38 }
 0x438   : > { %7371 = vmatpush.bf16.msrb.mxu2 %v10563_v0  ;;  %7385 = vmatpush.bf16.msrb.mxu3 %v10787_v31  ;;  %v10870_v0 = vld [vmem:[#allocation17 + $0xaf8] sm:$0xf]  ;;  %v11948_v31 = vld [vmem:[#allocation17 + $0xb10] sm:$0xf0] }
 0x439   : > { %7399 = vmatpush.bf16.msra.mxu0 %v11011_v44  ;;  %7413 = vmatpush.bf16.msra.mxu1 %v11235_v56  ;;  %v10423_v44 = vor.u32 %v11836_v18, %v10422_v16  ;;  %v10647_v56 = vor.u32 %v11892_v49, %v10646_v12  ;;  %v10871_v17 = vor.u32 %v11948_v31, %v10870_v0  ;;  %v11805_v16 = vld [vmem:[#allocation17 + $0x69c] sm:$0xf]  ;;  %v10312_v18 = vld [vmem:[#allocation17 + $0x6b4] sm:$0xf0]  ;;  %v11630_v12 = vld [vmem:[#allocation17 + $0x124] sm:$0xf] }
 0x43a   : > { %7351 = vmatmul.bf16.vlgmr.msrb.gmra.mxu0 %v14132_v23  ;;  %7365 = vmatmul.bf16.vlgmr.msrb.gmra.mxu1 %v14138_v14  ;;  %v9612_v49 = vld [vmem:[#allocation17 + $0x13c] sm:$0xf0]  ;;  %v10315_v31 = vor.u32 %v11805_v16, %v10312_v18  ;;  %v10200_v16 = vld [vmem:[#allocation17 + $0x5d4] sm:$0xf0] }
 0x43c   : > { %7372 = vmatpush.bf16.msrb.mxu2 %v10535_v4  ;;  %7386 = vmatpush.bf16.msrb.mxu3 %v10759_v51  ;;  %v10842_v4 = vld [vmem:[#allocation17 + $0xac0] sm:$0xf]  ;;  %v11941_v51 = vld [vmem:[#allocation17 + $0xad8] sm:$0xf0] }
 0x43d   : > { %7400 = vmatpush.bf16.msra.mxu0 %v10983_v27  ;;  %7414 = vmatpush.bf16.msra.mxu1 %v11207_v45  ;;  %v10366_v27 = vld [vmem:[#allocation17 + $0x708] sm:$0xf]  ;;  %v10395_v45 = vor.u32 %v11829_v7, %v10394_v29  ;;  %v10843_v32 = vor.u32 %v11941_v51, %v10842_v4  ;;  %v11798_v29 = vld [vmem:[#allocation17 + $0x664] sm:$0xf]  ;;  %v10284_v7 = vld [vmem:[#allocation17 + $0x67c] sm:$0xf0] }
 0x43e   : > { %v10367_v6 = vor.u32 %v11822_v54, %v10366_v27  ;;  %v14220_v4 = vld [vmem:[#allocation19] sm:$0xff]  ;;  %v10287_v59 = vor.u32 %v11798_v29, %v10284_v7  ;;  %v9808_v27 = vld [vmem:[#allocation17 + $0x2c4] sm:$0xf0] }
 0x43f   : > { %v10032_v54 = vld [vmem:[#allocation17 + $0x484] sm:$0xf0]  ;;  %v9724_v29 = vld [vmem:[#allocation17 + $0x21c] sm:$0xf0]  ;;  %v11714_v7 = vld [vmem:[#allocation17 + $0x3c4] sm:$0xf] }
 0x440   : > { %7373 = vmatpush.bf16.msrb.mxu2 %v10507_v40  ;;  %7387 = vmatpush.bf16.msrb.mxu3 %v10731_v1  ;;  %v10814_v40 = vld [vmem:[#allocation17 + $0xa88] sm:$0xf]  ;;  %v11934_v1 = vld [vmem:[#allocation17 + $0xaa0] sm:$0xf0] }
 0x441   : > { %7401 = vmatpush.bf16.msra.mxu0 %v10955_v15  ;;  %7415 = vmatpush.bf16.msra.mxu1 %v11179_v24  ;;  %v11644_v15 = vld [vmem:[#allocation17 + $0x194] sm:$0xf]  ;;  %v9668_v24 = vld [vmem:[#allocation17 + $0x1ac] sm:$0xf0]  ;;  %v10815_v43 = vor.u32 %v11934_v1, %v10814_v40  ;;  %v9587_v40 = vor.u32 %v11623_v50, %v9584_v30  ;;  %v9811_v1 = vor.u32 %v11679_v10, %v9808_v27  ;;  %v11770_v50 = vld [vmem:[#allocation17 + $0x584] sm:$0xf] }
 0x442   : > { %v10172_v30 = vld [vmem:[#allocation17 + $0x59c] sm:$0xf0]  ;;  %v11595_v10 = vld [vmem:[#allocation17 + $0xc] sm:$0xf] }
 0x444   : > { %7374 = vmatpush.bf16.msrb.mxu2 %v10479_v52  ;;  %7388 = vmatpush.bf16.msrb.mxu3 %v10703_v5  ;;  %v11812_v52 = vld [vmem:[#allocation17 + $0x6d4] sm:$0xf]  ;;  %v10340_v5 = vld [vmem:[#allocation17 + $0x6ec] sm:$0xf0] }
 0x445   : > { %7402 = vmatpush.bf16.msra.mxu0 %v10927_v20  ;;  %7416 = vmatpush.bf16.msra.mxu1 %v11151_v26  ;;  %v9671_v20 = vor.u32 %v11644_v15, %v9668_v24  ;;  %v9895_v26 = vor.u32 %v11700_v57, %v9892_v63  ;;  %v10343_v36 = vor.u32 %v11812_v52, %v10340_v5  ;;  %v9556_v15 = vld [vmem:[#allocation17 + $0xcc] sm:$0xf0]  ;;  %v11784_v52 = vld [vmem:[#allocation17 + $0x5f4] sm:$0xf] }
 0x446   : > { %v10259_v57 = vor.u32 %v11791_v42, %v10256_v61  ;;  %v10228_v5 = vld [vmem:[#allocation17 + $0x60c] sm:$0xf0]  ;;  %v11651_v42 = vld [vmem:[#allocation17 + $0x1cc] sm:$0xf]  ;;  %v9696_v61 = vld [vmem:[#allocation17 + $0x1e4] sm:$0xf0] }
 0x448   : > { %7375 = vmatpush.bf16.msrb.mxu2 %v10451_v9  ;;  %7389 = vmatpush.bf16.msrb.mxu3 %v10675_v21  ;;  %v11749_v9 = vld [vmem:[#allocation17 + $0x4dc] sm:$0xf]  ;;  %v10088_v21 = vld [vmem:[#allocation17 + $0x4f4] sm:$0xf0] }
 0x449   : > { %7403 = vmatpush.bf16.msra.mxu0 %v10899_v46  ;;  %7417 = vmatpush.bf16.msra.mxu1 %v11123_v60  ;;  %v9643_v46 = vor.u32 %v11637_v22, %v9640_v28  ;;  %v9867_v60 = vor.u32 %v11693_v8, %v9864_v58  ;;  %v10091_v0 = vor.u32 %v11749_v9, %v10088_v21  ;;  %v9528_v22 = vld [vmem:[#allocation17 + $0x94] sm:$0xf0]  ;;  %v11721_v58 = vld [vmem:[#allocation17 + $0x3fc] sm:$0xf] }
 0x44a   : > { %v9752_v8 = vld [vmem:[#allocation17 + $0x254] sm:$0xf0]  ;;  %v11777_v21 = vld [vmem:[#allocation17 + $0x5bc] sm:$0xf] }
 0x44b   : > { %v9976_v9 = vld [vmem:[#allocation17 + $0x414] sm:$0xf0] }
 0x44c   : > { %7376 = vmatpush.bf16.msrb.mxu2 %v10423_v44  ;;  %7390 = vmatpush.bf16.msrb.mxu3 %v10647_v56  ;;  %v11742_v44 = vld [vmem:[#allocation17 + $0x4a4] sm:$0xf]  ;;  %v10060_v56 = vld [vmem:[#allocation17 + $0x4bc] sm:$0xf0] }
 0x44d   : > { %7404 = vmatpush.bf16.msra.mxu0 %v10871_v17  ;;  %7418 = vmatpush.bf16.msra.mxu1 %v11095_v13  ;;  %v9615_v17 = vor.u32 %v11630_v12, %v9612_v49  ;;  %v9839_v13 = vor.u32 %v11686_v35, %v9836_v41  ;;  %v10063_v51 = vor.u32 %v11742_v44, %v10060_v56  ;;  %v11658_v56 = vld [vmem:[#allocation17 + $0x204] sm:$0xf] }
 0x44e   : > { %v9979_v35 = vor.u32 %v11721_v58, %v9976_v9  ;;  %v10203_v41 = vor.u32 %v11777_v21, %v10200_v16  ;;  %v11861_v9 = vld [vmem:[#allocation17 + $0x85c] sm:$0xf]  ;;  %v10536_v21 = vld [vmem:[#allocation17 + $0x874] sm:$0xf0] }
 0x450   : > { %7377 = vmatpush.bf16.msrb.mxu2 %v10395_v45  ;;  %7391 = vmatpush.bf16.msrb.mxu3 %v10619_v55  ;;  %v11735_v45 = vld [vmem:[#allocation17 + $0x46c] sm:$0xf] }
 0x451   : > { %7405 = vmatpush.bf16.msra.mxu0 %v10843_v32  ;;  %7419 = vmatpush.bf16.msra.mxu1 %v11067_v39  ;;  %v4773_v32 = vperm.slane %v14220_v4, 0  ;;  %v10035_v24 = vor.u32 %v11735_v45, %v10032_v54  ;;  %v9727_v45 = vor.u32 %v11658_v56, %v9724_v29  ;;  %v9472_v54 = vld [vmem:[#allocation17 + $0x24] sm:$0xf0]  ;;  %v10539_v29 = vor.u32 %v11861_v9, %v10536_v21  ;;  %v11896_v9 = vld [vmem:[#allocation17 + $0x974] sm:$0xf] }
 0x452   : > { %v10676_v21 = vld [vmem:[#allocation17 + $0x98c] sm:$0xf0] }
 0x453   : > { %v7128_v55 = vpop.f32.mrf.mxu0 }
 0x454   : > { %7378 = vmatpush.bf16.msrb.mxu2 %v10367_v6  ;;  %7392 = vmatpush.bf16.msrb.mxu3 %v10591_v53  ;;  %v14223_v39 = vpop.f32.mrf.mxu1  ;;  %v9780_v6 = vld [vmem:[#allocation17 + $0x28c] sm:$0xf0]  ;;  %v11728_v53 = vld [vmem:[#allocation17 + $0x434] sm:$0xf] }
 0x455   : > { %7406 = vmatpush.bf16.msra.mxu0 %v10815_v43  ;;  %7420 = vmatpush.bf16.msra.mxu1 %v11039_v62  ;;  %v9559_v62 = vor.u32 %v11616_v25, %v9556_v15  ;;  %v10007_v28 = vor.u32 %v11728_v53, %v10004_v11  ;;  %v9920_v25 = vld [vmem:[#allocation17 + $0x3a4] sm:$0xf0]  ;;  %v11763_v15 = vld [vmem:[#allocation17 + $0x54c] sm:$0xf]  ;;  %v9475_v11 = vor.u32 %v11595_v10, %v9472_v54  ;;  %v10732_v10 = vld [vmem:[#allocation17 + $0x9fc] sm:$0xf0] }
 0x456   : > { %v10956_v54 = vld [vmem:[#allocation17 + $0xbbc] sm:$0xf0] }
 0x457   : > { %7379 = vmatmul.bf16.vlgmr.msrb.gmra.mxu2 %v14192_v2  ;;  %7393 = vmatmul.bf16.vlgmr.msrb.gmra.mxu3 %v14194_v48 }
 0x458   : > { %7427 = vmatpush.bf16.msra.mxu2 %v9671_v20  ;;  %7441 = vmatpush.bf16.msra.mxu3 %v9895_v26  ;;  %v7100_v3 = vpop.f32.mrf.mxu2  ;;  %v9783_v20 = vor.u32 %v11672_v19, %v9780_v6  ;;  %v11609_v26 = vld [vmem:[#allocation17 + $0x7c] sm:$0xf]  ;;  %v10788_v19 = vld [vmem:[#allocation17 + $0xa6c] sm:$0xf0]  ;;  %v11980_v6 = vld [vmem:[#allocation17 + $0xc14] sm:$0xf] }
 0x459   : > { %7455 = vmatpush.bf16.msrb.mxu0 %v10119_v33  ;;  %7469 = vmatpush.bf16.msrb.mxu1 %v10343_v36  ;;  %v7114_v63 = vpop.f32.mrf.mxu3  ;;  %v7101_v43 = vadd.f32 %v7100_v3, %v4773_v32  ;;  %v10231_v33 = vor.u32 %v11784_v52, %v10228_v5  ;;  %v11665_v36 = vld [vmem:[#allocation17 + $0x23c] sm:$0xf]  ;;  %v11707_v3 = vld [vmem:[#allocation17 + $0x38c] sm:$0xf]  ;;  %v9699_v52 = vor.u32 %v11651_v42, %v9696_v61  ;;  %v11012_v5 = vld [vmem:[#allocation17 + $0xc2c] sm:$0xf0] }
 0x45a   : > { %7407 = vmatmul.bf16.vlgmr.msra.gmra.mxu0 %v14199_v47  ;;  %7421 = vmatmul.bf16.vlgmr.msra.gmra.mxu1 %v14190_v37  ;;  %v9755_v12 = vor.u32 %v11665_v36, %v9752_v8  ;;  %v12022_v42 = vld [vmem:[#allocation17 + $0xd64] sm:$0xf]  ;;  %v11180_v61 = vld [vmem:[#allocation17 + $0xd7c] sm:$0xf0] }
 0x45b   : > { %v7115_v18 = vadd.f32 %v7114_v63, %v7101_v43  ;;  %v10564_v63 = vld [vmem:[#allocation17 + $0x8ac] sm:$0xf0]  ;;  %v12036_v43 = vld [vmem:[#allocation17 + $0xdd4] sm:$0xf] }
 0x45c   : > { %7428 = vmatpush.bf16.msra.mxu2 %v9643_v46  ;;  %7442 = vmatpush.bf16.msra.mxu3 %v9867_v60  ;;  %v14225_v46 = vpop.f32.mrf.mxu0  ;;  %v9531_v60 = vor.u32 %v11609_v26, %v9528_v22  ;;  %v9923_v26 = vor.u32 %v11707_v3, %v9920_v25 }
 0x45d   : > { %7456 = vmatpush.bf16.msrb.mxu0 %v10091_v0  ;;  %7470 = vmatpush.bf16.msrb.mxu1 %v10315_v31  ;;  %v11602_v0 = vld [vmem:[#allocation17 + $0x44] sm:$0xf]  ;;  %v9500_v31 = vld [vmem:[#allocation17 + $0x5c] sm:$0xf0] }
 0x45e   : > { %v9503_v27 = vor.u32 %v11602_v0, %v9500_v31  ;;  %v11973_v0 = vld [vmem:[#allocation17 + $0xbdc] sm:$0xf]  ;;  %v10984_v31 = vld [vmem:[#allocation17 + $0xbf4] sm:$0xf0] }
 0x460   : > { %7429 = vmatpush.bf16.msra.mxu2 %v9615_v17  ;;  %7443 = vmatpush.bf16.msra.mxu3 %v9839_v13  ;;  %v7102_v49 = vpop.f32.mrf.mxu2  ;;  %v14227_v17 = vpop.f32.mrf.mxu1  ;;  %v9948_v13 = vld [vmem:[#allocation17 + $0x3dc] sm:$0xf0] }
 0x461   : > { %7457 = vmatpush.bf16.msrb.mxu0 %v10063_v51  ;;  %7471 = vmatpush.bf16.msrb.mxu1 %v10287_v59  ;;  %v7116_v44 = vpop.f32.mrf.mxu3  ;;  %v7129_v51 = vadd.f32 %v7128_v55, %v7115_v18  ;;  %v7103_v59 = vadd.f32 %v7102_v49, %v4773_v32  ;;  %v11924_v32 = vld [vmem:[#allocation17 + $0xa54] sm:$0xf]  ;;  %v11015_v18 = vor.u32 %v11980_v6, %v11012_v5  ;;  %v10760_v49 = vld [vmem:[#allocation17 + $0xa34] sm:$0xf0]  ;;  %v11959_v6 = vld [vmem:[#allocation17 + $0xb6c] sm:$0xf] }
 0x462   : > { %v10791_v58 = vor.u32 %v11924_v32, %v10788_v19  ;;  %v11903_v32 = vld [vmem:[#allocation17 + $0x9ac] sm:$0xf]  ;;  %v10704_v19 = vld [vmem:[#allocation17 + $0x9c4] sm:$0xf0] }
 0x463   : > { %v7117_v55 = vadd.f32 %v7116_v44, %v7103_v59  ;;  %v7143_v53 = vadd.f32 %v14223_v39, %v7129_v51  ;;  %v11917_v39 = vld [vmem:[#allocation17 + $0xa1c] sm:$0xf]  ;;  %v11208_v44 = vld [vmem:[#allocation17 + $0xdb4] sm:$0xf0]  ;;  %v11910_v59 = vld [vmem:[#allocation17 + $0x9e4] sm:$0xf] }
 0x464   : > { %7430 = vmatpush.bf16.msra.mxu2 %v9587_v40  ;;  %7444 = vmatpush.bf16.msra.mxu3 %v9811_v1  ;;  %v9951_v40 = vor.u32 %v11714_v7, %v9948_v13  ;;  %v10175_v1 = vor.u32 %v11770_v50, %v10172_v30  ;;  %v7184_v36 = vpop.f32.mrf.mxu0  ;;  %v10763_v7 = vor.u32 %v11917_v39, %v10760_v49  ;;  %v10508_v50 = vld [vmem:[#allocation17 + $0x83c] sm:$0xf0]  ;;  %v11152_v5 = vld [vmem:[#allocation17 + $0xd44] sm:$0xf0]  ;;  %v11952_v39 = vld [vmem:[#allocation17 + $0xb34] sm:$0xf] }
 0x465   : > { %7458 = vmatpush.bf16.msrb.mxu0 %v10035_v24  ;;  %7472 = vmatpush.bf16.msrb.mxu1 %v10259_v57  ;;  %v10144_v24 = vld [vmem:[#allocation17 + $0x564] sm:$0xf0]  ;;  %v11868_v57 = vld [vmem:[#allocation17 + $0x894] sm:$0xf]  ;;  %v7131_v16 = vadd.f32 %v14225_v46, %v7117_v55  ;;  %v10987_v13 = vor.u32 %v11973_v0, %v10984_v31  ;;  %v11854_v46 = vld [vmem:[#allocation17 + $0x824] sm:$0xf]  ;;  %v10735_v25 = vor.u32 %v11910_v59, %v10732_v10 }
 0x466   : > { %v10147_v22 = vor.u32 %v11763_v15, %v10144_v24  ;;  %v10567_v8 = vor.u32 %v11868_v57, %v10564_v63  ;;  %v10511_v3 = vor.u32 %v11854_v46, %v10508_v50  ;;  %v11847_v15 = vld [vmem:[#allocation17 + $0x7ec] sm:$0xf]  ;;  %v10480_v24 = vld [vmem:[#allocation17 + $0x804] sm:$0xf0]  ;;  %v11183_v63 = vor.u32 %v12022_v42, %v11180_v61  ;;  %v11833_v0 = vld [vmem:[#allocation17 + $0x77c] sm:$0xf] }
 0x467   : > { %v10679_v49 = vor.u32 %v11896_v9, %v10676_v21  ;;  %v10424_v31 = vld [vmem:[#allocation17 + $0x794] sm:$0xf0]  ;;  %v10396_v59 = vld [vmem:[#allocation17 + $0x75c] sm:$0xf0]  ;;  %v11882_v10 = vld [vmem:[#allocation17 + $0x904] sm:$0xf] }
 0x468   : > { %7431 = vmatpush.bf16.msra.mxu2 %v9559_v62  ;;  %7445 = vmatpush.bf16.msra.mxu3 %v9783_v20  ;;  %v11236_v62 = vld [vmem:[#allocation17 + $0xdec] sm:$0xf0]  ;;  %v7156_v20 = vpop.f32.mrf.mxu2  ;;  %v11096_v46 = vld [vmem:[#allocation17 + $0xcd4] sm:$0xf0]  ;;  %v10427_v50 = vor.u32 %v11833_v0, %v10424_v31  ;;  %v10620_v42 = vld [vmem:[#allocation17 + $0x91c] sm:$0xf0] }
 0x469   : > { %7459 = vmatpush.bf16.msrb.mxu0 %v10007_v28  ;;  %7473 = vmatpush.bf16.msrb.mxu1 %v10231_v33  ;;  %v7157_v28 = vadd.f32 %v7156_v20, %v7143_v53  ;;  %v7170_v33 = vpop.f32.mrf.mxu3  ;;  %v10483_v20 = vor.u32 %v11847_v15, %v10480_v24  ;;  %v11938_v61 = vld [vmem:[#allocation17 + $0xac4] sm:$0xf]  ;;  %v10623_v15 = vor.u32 %v11882_v10, %v10620_v42  ;;  %v10368_v24 = vld [vmem:[#allocation17 + $0x724] sm:$0xf0] }
 0x46a   : > { %v11746_v42 = vld [vmem:[#allocation17 + $0x4c0] sm:$0xf0] }
 0x46c   : > { %7432 = vmatpush.bf16.msra.mxu2 %v9531_v60  ;;  %7446 = vmatpush.bf16.msra.mxu3 %v9755_v12  ;;  %v11239_v60 = vor.u32 %v12036_v43, %v11236_v62  ;;  %v7171_v12 = vadd.f32 %v7170_v33, %v7157_v28  ;;  %v7186_v53 = vpop.f32.mrf.mxu0  ;;  %v10452_v28 = vld [vmem:[#allocation17 + $0x7cc] sm:$0xf0] }
 0x46d   : > { %7460 = vmatpush.bf16.msrb.mxu0 %v9979_v35  ;;  %7474 = vmatpush.bf16.msrb.mxu1 %v10203_v41  ;;  %v7198_v35 = vpop.f32.mrf.mxu1  ;;  %v12029_v41 = vld [vmem:[#allocation17 + $0xd9c] sm:$0xf] }
 0x46e   : > { %v7185_v56 = vadd.f32 %v7184_v36, %v7171_v12  ;;  %v11211_v51 = vor.u32 %v12029_v41, %v11208_v44  ;;  %v11889_v44 = vld [vmem:[#allocation17 + $0x93c] sm:$0xf] }
 0x470   : > { %7433 = vmatpush.bf16.msra.mxu2 %v9503_v27  ;;  %7447 = vmatpush.bf16.msra.mxu3 %v9727_v45  ;;  %v7199_v30 = vadd.f32 %v7198_v35, %v7185_v56  ;;  %v11966_v27 = vld [vmem:[#allocation17 + $0xba4] sm:$0xf]  ;;  %v7145_v45 = vadd.f32 %v14227_v17, %v7131_v16  ;;  %v10900_v16 = vld [vmem:[#allocation17 + $0xb4c] sm:$0xf0]  ;;  %v10648_v56 = vld [vmem:[#allocation17 + $0x954] sm:$0xf0] }
 0x471   : > { %7461 = vmatpush.bf16.msrb.mxu0 %v9951_v40  ;;  %7475 = vmatpush.bf16.msrb.mxu1 %v10175_v1  ;;  %v7158_v40 = vpop.f32.mrf.mxu2  ;;  %v7172_v17 = vpop.f32.mrf.mxu3  ;;  %v10959_v57 = vor.u32 %v11966_v27, %v10956_v54  ;;  %v10903_v35 = vor.u32 %v11952_v39, %v10900_v16  ;;  %v4774_v39 = vperm.slane %v14220_v4, 1 }
 0x472   : > { %12252 = vtanh.f32 %v7199_v30  ;;  %v7159_v1 = vadd.f32 %v7158_v40, %v7145_v45  ;;  %v10651_v30 = vor.u32 %v11889_v44, %v10648_v56  ;;  %v10844_v40 = vld [vmem:[#allocation17 + $0xadc] sm:$0xf0]  ;;  %v11753_v56 = vld [vmem:[#allocation17 + $0x4f8] sm:$0xf0] }
 0x473   : > { %v10094_v44 = vld [vmem:[#allocation17 + $0x4e0] sm:$0xf] }
 0x474   : > { %7434 = vmatpush.bf16.msra.mxu2 %v9475_v11  ;;  %7448 = vmatpush.bf16.msra.mxu3 %v9699_v52  ;;  %v7173_v55 = vadd.f32 %v7172_v17, %v7159_v1  ;;  %v10928_v11 = vld [vmem:[#allocation17 + $0xb84] sm:$0xf0]  ;;  %v12015_v52 = vld [vmem:[#allocation17 + $0xd2c] sm:$0xf]  ;;  %v11994_v1 = vld [vmem:[#allocation17 + $0xc84] sm:$0xf] }
 0x475   : > { %7462 = vmatpush.bf16.msrb.mxu0 %v9923_v26  ;;  %7476 = vmatpush.bf16.msrb.mxu1 %v10147_v22  ;;  %v7200_v62 = vpop.f32.mrf.mxu1  ;;  %v10707_v26 = vor.u32 %v11903_v32, %v10704_v19  ;;  %v11840_v22 = vld [vmem:[#allocation17 + $0x7b4] sm:$0xf]  ;;  %v11931_v19 = vld [vmem:[#allocation17 + $0xa8c] sm:$0xf] }
 0x476   : > { %v7187_v43 = vadd.f32 %v7186_v53, %v7173_v55  ;;  %v10455_v12 = vor.u32 %v11840_v22, %v10452_v28  ;;  %v10847_v55 = vor.u32 %v11938_v61, %v10844_v40  ;;  %v11987_v53 = vld [vmem:[#allocation17 + $0xc4c] sm:$0xf]  ;;  %v10290_v61 = vld [vmem:[#allocation17 + $0x668] sm:$0xf]  ;;  %v11802_v40 = vld [vmem:[#allocation17 + $0x680] sm:$0xf0] }
 0x477   : > { %7435 = vmatmul.bf16.vlgmr.msra.gmra.mxu2 %v14128_v34  ;;  %7449 = vmatmul.bf16.vlgmr.msra.gmra.mxu3 %v14130_v38 }
 0x478   : > { %7483 = vmatpush.bf16.msrb.mxu2 %v10567_v8  ;;  %7497 = vmatpush.bf16.msrb.mxu3 %v10791_v58  ;;  %v12253_v33 = vpop.eup %12252  ;;  %v7201_v36 = vadd.f32 %v7200_v62, %v7187_v43  ;;  %v10931_v8 = vor.u32 %v11959_v6, %v10928_v11  ;;  %v11155_v58 = vor.u32 %v12015_v52, %v11152_v5  ;;  %v10816_v6 = vld [vmem:[#allocation17 + $0xaa4] sm:$0xf0]  ;;  %v9674_v52 = vld [vmem:[#allocation17 + $0x198] sm:$0xf]  ;;  %v11648_v5 = vld [vmem:[#allocation17 + $0x1b0] sm:$0xf0] }
 0x479   : > { %7511 = vmatpush.bf16.msra.mxu0 %v11015_v18  ;;  %7525 = vmatpush.bf16.msra.mxu1 %v11239_v60  ;;  %7889 = vst [vmem:[%s14239_s12] sm:$0xff] %v12253_v33  ;;  %v12008_v18 = vld [vmem:[#allocation17 + $0xcf4] sm:$0xf]  ;;  %v11124_v60 = vld [vmem:[#allocation17 + $0xd0c] sm:$0xf0]  ;;  %v11040_v11 = vld [vmem:[#allocation17 + $0xc64] sm:$0xf0]  ;;  %v10819_v9 = vor.u32 %v11931_v19, %v10816_v6  ;;  %v9675_v16 = vor.u32 %v11648_v5, %v9674_v52 }
 0x47a   : > { %7463 = vmatmul.bf16.vlgmr.msrb.gmra.mxu0 %v14132_v23  ;;  %7477 = vmatmul.bf16.vlgmr.msrb.gmra.mxu1 %v14138_v14  ;;  %12254 = vtanh.f32 %v7201_v36  ;;  %v11127_v41 = vor.u32 %v12008_v18, %v11124_v60  ;;  %v9898_v43 = vld [vmem:[#allocation17 + $0x358] sm:$0xf]  ;;  %v11704_v62 = vld [vmem:[#allocation17 + $0x370] sm:$0xf0]  ;;  %v11043_v21 = vor.u32 %v11987_v53, %v11040_v11  ;;  %v9646_v60 = vld [vmem:[#allocation17 + $0x160] sm:$0xf] }
 0x47b   : > { %v11760_v33 = vld [vmem:[#allocation17 + $0x530] sm:$0xf0]  ;;  %v10346_v36 = vld [vmem:[#allocation17 + $0x6d8] sm:$0xf]  ;;  %v9899_v18 = vor.u32 %v11704_v62, %v9898_v43  ;;  %v11683_v19 = vld [vmem:[#allocation17 + $0x2c8] sm:$0xf0] }
 0x47c   : > { %7484 = vmatpush.bf16.msrb.mxu2 %v10539_v29  ;;  %7498 = vmatpush.bf16.msrb.mxu3 %v10763_v7  ;;  %v11945_v29 = vld [vmem:[#allocation17 + $0xafc] sm:$0xf]  ;;  %v10872_v7 = vld [vmem:[#allocation17 + $0xb14] sm:$0xf0]  ;;  %v10038_v6 = vld [vmem:[#allocation17 + $0x470] sm:$0xf] }
 0x47d   : > { %7512 = vmatpush.bf16.msra.mxu0 %v10987_v13  ;;  %7526 = vmatpush.bf16.msra.mxu1 %v11211_v51  ;;  %v12001_v13 = vld [vmem:[#allocation17 + $0xcbc] sm:$0xf]  ;;  %v11826_v51 = vld [vmem:[#allocation17 + $0x744] sm:$0xf]  ;;  %v10875_v45 = vor.u32 %v11945_v29, %v10872_v7  ;;  %v10318_v29 = vld [vmem:[#allocation17 + $0x6a0] sm:$0xf] }
 0x47e   : > { %v11099_v54 = vor.u32 %v12001_v13, %v11096_v46  ;;  %v10399_v17 = vor.u32 %v11826_v51, %v10396_v59  ;;  %v11809_v7 = vld [vmem:[#allocation17 + $0x6b8] sm:$0xf0]  ;;  %v14244_v13 = vpop.f32.mrf.mxu1  ;;  %v11634_v51 = vld [vmem:[#allocation17 + $0x140] sm:$0xf0]  ;;  %v10095_v59 = vor.u32 %v11753_v56, %v10094_v44  ;;  %v11739_v53 = vld [vmem:[#allocation17 + $0x488] sm:$0xf0] }
 0x47f   : > { %v10319_v10 = vor.u32 %v11809_v7, %v10318_v29  ;;  %v10262_v11 = vld [vmem:[#allocation17 + $0x630] sm:$0xf]  ;;  %v11795_v52 = vld [vmem:[#allocation17 + $0x648] sm:$0xf0]  ;;  %v9758_v7 = vld [vmem:[#allocation17 + $0x240] sm:$0xf] }
 0x480   : > { %7485 = vmatpush.bf16.msrb.mxu2 %v10511_v3  ;;  %7499 = vmatpush.bf16.msrb.mxu3 %v10735_v25  ;;  %v12255_v27 = vpop.eup %12254  ;;  %v11068_v3 = vld [vmem:[#allocation17 + $0xc9c] sm:$0xf0]  ;;  %v11819_v25 = vld [vmem:[#allocation17 + $0x70c] sm:$0xf] }
 0x481   : > { %7513 = vmatpush.bf16.msra.mxu0 %v10959_v57  ;;  %7527 = vmatpush.bf16.msra.mxu1 %v11183_v63  ;;  %7896 = vst [vmem:[%s14239_s12 + $0x38] sm:$0xff] %v12255_v27  ;;  %v11875_v57 = vld [vmem:[#allocation17 + $0x8cc] sm:$0xf]  ;;  %v10592_v63 = vld [vmem:[#allocation17 + $0x8e4] sm:$0xf0]  ;;  %v11071_v32 = vor.u32 %v11994_v1, %v11068_v3  ;;  %v10371_v22 = vor.u32 %v11819_v25, %v10368_v24 }
 0x482   : > { %v10595_v28 = vor.u32 %v11875_v57, %v10592_v63  ;;  %v9842_v27 = vld [vmem:[#allocation17 + $0x2e8] sm:$0xf]  ;;  %v11627_v24 = vld [vmem:[#allocation17 + $0x108] sm:$0xf0] }
 0x484   : > { %7486 = vmatpush.bf16.msrb.mxu2 %v10483_v20  ;;  %7500 = vmatpush.bf16.msrb.mxu3 %v10707_v26  ;;  %v10122_v20 = vld [vmem:[#allocation17 + $0x518] sm:$0xf]  ;;  %v7212_v26 = vpop.f32.mrf.mxu2 }
 0x485   : > { %7514 = vmatpush.bf16.msra.mxu0 %v10931_v8  ;;  %7528 = vmatpush.bf16.msra.mxu1 %v11155_v58  ;;  %v11816_v8 = vld [vmem:[#allocation17 + $0x6f0] sm:$0xf0]  ;;  %v7226_v58 = vpop.f32.mrf.mxu3  ;;  %v10123_v0 = vor.u32 %v11760_v33, %v10122_v20  ;;  %v7213_v4 = vadd.f32 %v7212_v26, %v4774_v39 }
 0x486   : > { %v10347_v31 = vor.u32 %v11816_v8, %v10346_v36  ;;  %v7256_v33 = vpop.f32.mrf.mxu1  ;;  %v10039_v36 = vor.u32 %v11739_v53, %v10038_v6  ;;  %v10263_v8 = vor.u32 %v11795_v52, %v10262_v11  ;;  %v11599_v52 = vld [vmem:[#allocation17 + $0x28] sm:$0xf0] }
 0x487   : > { %v7227_v1 = vadd.f32 %v7226_v58, %v7213_v4  ;;  %v9786_v58 = vld [vmem:[#allocation17 + $0x278] sm:$0xf]  ;;  %v11669_v4 = vld [vmem:[#allocation17 + $0x258] sm:$0xf0] }
 0x488   : > { %7487 = vmatpush.bf16.msrb.mxu2 %v10455_v12  ;;  %7501 = vmatpush.bf16.msrb.mxu3 %v10679_v49  ;;  %v11641_v12 = vld [vmem:[#allocation17 + $0x178] sm:$0xf0]  ;;  %v7240_v49 = vpop.f32.mrf.mxu0 }
 0x489   : > { %7515 = vmatpush.bf16.msra.mxu0 %v10903_v35  ;;  %7529 = vmatpush.bf16.msra.mxu1 %v11127_v41  ;;  %v9870_v35 = vld [vmem:[#allocation17 + $0x320] sm:$0xf]  ;;  %v11697_v41 = vld [vmem:[#allocation17 + $0x338] sm:$0xf0]  ;;  %v9647_v46 = vor.u32 %v11641_v12, %v9646_v60  ;;  %v7241_v62 = vadd.f32 %v7240_v49, %v7227_v1  ;;  %v11788_v60 = vld [vmem:[#allocation17 + $0x610] sm:$0xf0] }
 0x48c   : > { %7488 = vmatpush.bf16.msrb.mxu2 %v10427_v50  ;;  %7502 = vmatpush.bf16.msrb.mxu3 %v10651_v30  ;;  %v9871_v50 = vor.u32 %v11697_v41, %v9870_v35  ;;  %v9618_v30 = vld [vmem:[#allocation17 + $0x128] sm:$0xf]  ;;  %v7214_v3 = vpop.f32.mrf.mxu2  ;;  %v11613_v35 = vld [vmem:[#allocation17 + $0x98] sm:$0xf0] }
 0x48d   : > { %7516 = vmatpush.bf16.msra.mxu0 %v10875_v45  ;;  %7530 = vmatpush.bf16.msra.mxu1 %v11099_v54  ;;  %v11690_v45 = vld [vmem:[#allocation17 + $0x300] sm:$0xf0]  ;;  %v10066_v54 = vld [vmem:[#allocation17 + $0x4a8] sm:$0xf]  ;;  %v9619_v25 = vor.u32 %v11634_v51, %v9618_v30  ;;  %v7228_v57 = vpop.f32.mrf.mxu3  ;;  %v7215_v43 = vadd.f32 %v7214_v3, %v4774_v39  ;;  %v11725_v30 = vld [vmem:[#allocation17 + $0x418] sm:$0xf0] }
 0x48e   : > { %v10067_v63 = vor.u32 %v11746_v42, %v10066_v54  ;;  %v10206_v51 = vld [vmem:[#allocation17 + $0x5c0] sm:$0xf]  ;;  %v9759_v54 = vor.u32 %v11669_v4, %v9758_v7  ;;  %v9506_v42 = vld [vmem:[#allocation17 + $0x48] sm:$0xf] }
 0x48f   : > { %v7229_v12 = vadd.f32 %v7228_v57, %v7215_v43  ;;  %v11718_v57 = vld [vmem:[#allocation17 + $0x3e0] sm:$0xf0]  ;;  %v11655_v43 = vld [vmem:[#allocation17 + $0x1e8] sm:$0xf0] }
 0x490   : > { %7489 = vmatpush.bf16.msrb.mxu2 %v10399_v17  ;;  %7503 = vmatpush.bf16.msrb.mxu3 %v10623_v15  ;;  %v9843_v17 = vor.u32 %v11690_v45, %v9842_v27  ;;  %v9590_v15 = vld [vmem:[#allocation17 + $0xf0] sm:$0xf]  ;;  %v7242_v5 = vpop.f32.mrf.mxu0 }
 0x491   : > { %7517 = vmatpush.bf16.msra.mxu0 %v10847_v55  ;;  %7531 = vmatpush.bf16.msra.mxu1 %v11071_v32  ;;  %v10291_v55 = vor.u32 %v11802_v40, %v10290_v61  ;;  %v9814_v32 = vld [vmem:[#allocation17 + $0x2b0] sm:$0xf]  ;;  %v9591_v20 = vor.u32 %v11627_v24, %v9590_v15  ;;  %v11606_v61 = vld [vmem:[#allocation17 + $0x60] sm:$0xf0]  ;;  %v9954_v15 = vld [vmem:[#allocation17 + $0x3c8] sm:$0xf] }
 0x492   : > { %v9815_v26 = vor.u32 %v11683_v19, %v9814_v32  ;;  %v9478_v19 = vld [vmem:[#allocation17 + $0x10] sm:$0xf]  ;;  %v9507_v53 = vor.u32 %v11606_v61, %v9506_v42  ;;  %v11977_v42 = vld [vmem:[#allocation17 + $0xbf8] sm:$0xf0]  ;;  %v11214_v61 = vld [vmem:[#allocation17 + $0xda0] sm:$0xf] }
 0x494   : > { %7490 = vmatpush.bf16.msrb.mxu2 %v10371_v22  ;;  %7504 = vmatpush.bf16.msrb.mxu3 %v10595_v28  ;;  %v9562_v22 = vld [vmem:[#allocation17 + $0xb8] sm:$0xf]  ;;  %v11620_v28 = vld [vmem:[#allocation17 + $0xd0] sm:$0xf0] }
 0x495   : > { %7518 = vmatpush.bf16.msra.mxu0 %v10819_v9  ;;  %7532 = vmatpush.bf16.msra.mxu1 %v11043_v21  ;;  %v11676_v9 = vld [vmem:[#allocation17 + $0x290] sm:$0xf0]  ;;  %v10010_v21 = vld [vmem:[#allocation17 + $0x438] sm:$0xf]  ;;  %v9563_v39 = vor.u32 %v11620_v28, %v9562_v22  ;;  %v9926_v22 = vld [vmem:[#allocation17 + $0x390] sm:$0xf] }
 0x496   : > { %v9787_v49 = vor.u32 %v11676_v9, %v9786_v58  ;;  %v11711_v28 = vld [vmem:[#allocation17 + $0x3a8] sm:$0xf0]  ;;  %v10570_v58 = vld [vmem:[#allocation17 + $0x898] sm:$0xf]  ;;  %v11872_v9 = vld [vmem:[#allocation17 + $0x8b0] sm:$0xf0] }
 0x497   : > { %7491 = vmatmul.bf16.vlgmr.msrb.gmra.mxu2 %v14192_v2  ;;  %7505 = vmatmul.bf16.vlgmr.msrb.gmra.mxu3 %v14194_v48  ;;  %v7310_v40 = vpop.f32.mrf.mxu1  ;;  %v10571_v7 = vor.u32 %v11872_v9, %v10570_v58 }
 0x498   : > { %7539 = vmatpush.bf16.msra.mxu2 %v9675_v16  ;;  %7553 = vmatpush.bf16.msra.mxu3 %v9899_v18  ;;  %v11732_v16 = vld [vmem:[#allocation17 + $0x450] sm:$0xf0]  ;;  %v10234_v18 = vld [vmem:[#allocation17 + $0x5f8] sm:$0xf]  ;;  %v7296_v27 = vpop.f32.mrf.mxu0 }
 0x499   : > { %7567 = vmatpush.bf16.msrb.mxu0 %v10123_v0  ;;  %7581 = vmatpush.bf16.msrb.mxu1 %v10347_v31  ;;  %v7255_v0 = vadd.f32 %v14244_v13, %v7241_v62  ;;  %v9534_v31 = vld [vmem:[#allocation17 + $0x80] sm:$0xf]  ;;  %v10011_v41 = vor.u32 %v11732_v16, %v10010_v21  ;;  %v10235_v44 = vor.u32 %v11788_v60, %v10234_v18  ;;  %v10794_v16 = vld [vmem:[#allocation17 + $0xa58] sm:$0xf]  ;;  %v11928_v18 = vld [vmem:[#allocation17 + $0xa70] sm:$0xf0] }
 0x49a   : > { %7519 = vmatmul.bf16.vlgmr.msra.gmra.mxu0 %v14199_v47  ;;  %7533 = vmatmul.bf16.vlgmr.msra.gmra.mxu1 %v14190_v37  ;;  %v7268_v56 = vpop.f32.mrf.mxu2  ;;  %v7282_v29 = vpop.f32.mrf.mxu3  ;;  %v9535_v45 = vor.u32 %v11613_v35, %v9534_v31  ;;  %v9955_v62 = vor.u32 %v11718_v57, %v9954_v15  ;;  %v11018_v60 = vld [vmem:[#allocation17 + $0xc18] sm:$0xf]  ;;  %v12040_v35 = vld [vmem:[#allocation17 + $0xdf0] sm:$0xf0]  ;;  %v10795_v4 = vor.u32 %v11928_v18, %v10794_v16  ;;  %v10738_v57 = vld [vmem:[#allocation17 + $0x9e8] sm:$0xf] }
 0x49b   : > { %v11242_v31 = vld [vmem:[#allocation17 + $0xdd8] sm:$0xf]  ;;  %v11844_v16 = vld [vmem:[#allocation17 + $0x7d0] sm:$0xf0] }
 0x49c   : > { %7540 = vmatpush.bf16.msra.mxu2 %v9647_v46  ;;  %7554 = vmatpush.bf16.msra.mxu3 %v9871_v50  ;;  %v9982_v46 = vld [vmem:[#allocation17 + $0x400] sm:$0xf]  ;;  %v7269_v50 = vadd.f32 %v7268_v56, %v7255_v0  ;;  %v11984_v0 = vld [vmem:[#allocation17 + $0xc30] sm:$0xf0] }
 0x49d   : > { %7568 = vmatpush.bf16.msrb.mxu0 %v10095_v59  ;;  %7582 = vmatpush.bf16.msrb.mxu1 %v10319_v10  ;;  %v11781_v59 = vld [vmem:[#allocation17 + $0x5d8] sm:$0xf0]  ;;  %v7243_v10 = vadd.f32 %v7242_v5, %v7229_v12  ;;  %v9983_v1 = vor.u32 %v11725_v30, %v9982_v46  ;;  %v9702_v5 = vld [vmem:[#allocation17 + $0x1d0] sm:$0xf]  ;;  %v10542_v46 = vld [vmem:[#allocation17 + $0x860] sm:$0xf] }
 0x49e   : > { %v7283_v13 = vadd.f32 %v7282_v29, %v7269_v50  ;;  %v10207_v3 = vor.u32 %v11781_v59, %v10206_v51  ;;  %v11865_v50 = vld [vmem:[#allocation17 + $0x878] sm:$0xf0]  ;;  %v11019_v51 = vor.u32 %v11984_v0, %v11018_v60  ;;  %v11243_v59 = vor.u32 %v12040_v35, %v11242_v31  ;;  %v11956_v0 = vld [vmem:[#allocation17 + $0xb50] sm:$0xf0]  ;;  %v11130_v31 = vld [vmem:[#allocation17 + $0xcf8] sm:$0xf] }
 0x49f   : > { %v7257_v32 = vadd.f32 %v7256_v33, %v7243_v10  ;;  %v11767_v33 = vld [vmem:[#allocation17 + $0x568] sm:$0xf0]  ;;  %v7312_v30 = vpop.f32.mrf.mxu1  ;;  %v10766_v10 = vld [vmem:[#allocation17 + $0xa20] sm:$0xf]  ;;  %v12012_v35 = vld [vmem:[#allocation17 + $0xd10] sm:$0xf0] }
 0x4a0   : > { %7541 = vmatpush.bf16.msra.mxu2 %v9619_v25  ;;  %7555 = vmatpush.bf16.msra.mxu3 %v9843_v17  ;;  %v9730_v25 = vld [vmem:[#allocation17 + $0x208] sm:$0xf]  ;;  %v11662_v17 = vld [vmem:[#allocation17 + $0x220] sm:$0xf0]  ;;  %v7297_v24 = vadd.f32 %v7296_v27, %v7283_v13  ;;  %v11921_v27 = vld [vmem:[#allocation17 + $0xa38] sm:$0xf0] }
 0x4a1   : > { %7569 = vmatpush.bf16.msrb.mxu0 %v10067_v63  ;;  %7583 = vmatpush.bf16.msrb.mxu1 %v10291_v55  ;;  %v10178_v63 = vld [vmem:[#allocation17 + $0x588] sm:$0xf]  ;;  %v11774_v55 = vld [vmem:[#allocation17 + $0x5a0] sm:$0xf0]  ;;  %v9731_v11 = vor.u32 %v11662_v17, %v9730_v25  ;;  %v10990_v13 = vld [vmem:[#allocation17 + $0xbe0] sm:$0xf] }
 0x4a2   : > { %v7311_v6 = vadd.f32 %v7310_v40, %v7297_v24  ;;  %v7284_v21 = vpop.f32.mrf.mxu3  ;;  %v12033_v40 = vld [vmem:[#allocation17 + $0xdb8] sm:$0xf0]  ;;  %v10514_v25 = vld [vmem:[#allocation17 + $0x828] sm:$0xf]  ;;  %v11858_v17 = vld [vmem:[#allocation17 + $0x840] sm:$0xf0]  ;;  %v10991_v15 = vor.u32 %v11977_v42, %v10990_v13 }
 0x4a3   : > { %v11215_v24 = vor.u32 %v12033_v40, %v11214_v61  ;;  %v10626_v40 = vld [vmem:[#allocation17 + $0x908] sm:$0xf] }
 0x4a4   : > { %7542 = vmatpush.bf16.msra.mxu2 %v9591_v20  ;;  %7556 = vmatpush.bf16.msra.mxu3 %v9815_v26  ;;  %v10179_v20 = vor.u32 %v11774_v55, %v10178_v63  ;;  %v7270_v26 = vpop.f32.mrf.mxu2  ;;  %12256 = vtanh.f32 %v7311_v6  ;;  %v11914_v63 = vld [vmem:[#allocation17 + $0xa00] sm:$0xf0]  ;;  %v10962_v55 = vld [vmem:[#allocation17 + $0xba8] sm:$0xf] }
 0x4a5   : > { %7570 = vmatpush.bf16.msrb.mxu0 %v10039_v36  ;;  %7584 = vmatpush.bf16.msrb.mxu1 %v10263_v8  ;;  %v10150_v36 = vld [vmem:[#allocation17 + $0x550] sm:$0xf]  ;;  %v7271_v8 = vadd.f32 %v7270_v26, %v7257_v32  ;;  %v11970_v32 = vld [vmem:[#allocation17 + $0xbc0] sm:$0xf0]  ;;  %v11907_v26 = vld [vmem:[#allocation17 + $0x9c8] sm:$0xf0] }
 0x4a6   : > { %v10151_v56 = vor.u32 %v11767_v33, %v10150_v36  ;;  %v12026_v6 = vld [vmem:[#allocation17 + $0xd80] sm:$0xf0]  ;;  %v11963_v36 = vld [vmem:[#allocation17 + $0xb88] sm:$0xf0] }
 0x4a7   : > { %v7285_v12 = vadd.f32 %v7284_v21, %v7271_v8  ;;  %v11158_v8 = vld [vmem:[#allocation17 + $0xd30] sm:$0xf]  ;;  %v12019_v33 = vld [vmem:[#allocation17 + $0xd48] sm:$0xf0]  ;;  %v10458_v21 = vld [vmem:[#allocation17 + $0x7b8] sm:$0xf] }
 0x4a8   : > { %7543 = vmatpush.bf16.msra.mxu2 %v9563_v39  ;;  %7557 = vmatpush.bf16.msra.mxu3 %v9787_v49  ;;  %v9479_v39 = vor.u32 %v11599_v52, %v9478_v19  ;;  %v9703_v49 = vor.u32 %v11655_v43, %v9702_v5  ;;  %v11186_v19 = vld [vmem:[#allocation17 + $0xd68] sm:$0xf]  ;;  %v10486_v52 = vld [vmem:[#allocation17 + $0x7f0] sm:$0xf]  ;;  %v11851_v5 = vld [vmem:[#allocation17 + $0x808] sm:$0xf0]  ;;  %v10963_v43 = vor.u32 %v11970_v32, %v10962_v55 }
 0x4a9   : > { %7571 = vmatpush.bf16.msrb.mxu0 %v10011_v41  ;;  %7585 = vmatpush.bf16.msrb.mxu1 %v10235_v44  ;;  %v7298_v41 = vpop.f32.mrf.mxu0  ;;  %v9927_v44 = vor.u32 %v11711_v28, %v9926_v22  ;;  %v10934_v22 = vld [vmem:[#allocation17 + $0xb70] sm:$0xf]  ;;  %v10487_v58 = vor.u32 %v11851_v5, %v10486_v52  ;;  %v11159_v60 = vor.u32 %v12019_v33, %v11158_v8  ;;  %v11823_v55 = vld [vmem:[#allocation17 + $0x728] sm:$0xf0] }
 0x4aa   : > { %v7299_v29 = vadd.f32 %v7298_v41, %v7285_v12  ;;  %v10935_v18 = vor.u32 %v11963_v36, %v10934_v22  ;;  %v10682_v12 = vld [vmem:[#allocation17 + $0x978] sm:$0xf]  ;;  %v10459_v41 = vor.u32 %v11844_v16, %v10458_v21  ;;  %v10598_v32 = vld [vmem:[#allocation17 + $0x8d0] sm:$0xf]  ;;  %v11935_v52 = vld [vmem:[#allocation17 + $0xaa8] sm:$0xf0] }
 0x4ab   : > { %v11046_v5 = vld [vmem:[#allocation17 + $0xc50] sm:$0xf]  ;;  %v9900_v22 = vld [vmem:[#allocation17 + $0x374] sm:$0xf0] }
 0x4ac   : > { %7544 = vmatpush.bf16.msra.mxu2 %v9535_v45  ;;  %7558 = vmatpush.bf16.msra.mxu3 %v9759_v54  ;;  %v12257_v45 = vpop.eup %12256  ;;  %v7313_v54 = vadd.f32 %v7312_v30, %v7299_v29  ;;  %v11837_v29 = vld [vmem:[#allocation17 + $0x798] sm:$0xf0]  ;;  %v10878_v30 = vld [vmem:[#allocation17 + $0xb00] sm:$0xf]  ;;  %v10348_v21 = vld [vmem:[#allocation17 + $0x6f4] sm:$0xf0] }
 0x4ad   : > { %7572 = vmatpush.bf16.msrb.mxu0 %v9983_v1  ;;  %7586 = vmatpush.bf16.msrb.mxu1 %v10207_v3  ;;  %7890 = vst [vmem:[%s14239_s12 + $0x8] sm:$0xff] %v12257_v45  ;;  %v10543_v1 = vor.u32 %v11865_v50, %v10542_v46  ;;  %v10767_v3 = vor.u32 %v11921_v27, %v10766_v10  ;;  %v10654_v46 = vld [vmem:[#allocation17 + $0x940] sm:$0xf]  ;;  %v11893_v50 = vld [vmem:[#allocation17 + $0x958] sm:$0xf0] }
 0x4ae   : > { %12258 = vtanh.f32 %v7313_v54  ;;  %v12005_v10 = vld [vmem:[#allocation17 + $0xcd8] sm:$0xf0]  ;;  %v10655_v13 = vor.u32 %v11893_v50, %v10654_v46  ;;  %v10402_v45 = vld [vmem:[#allocation17 + $0x748] sm:$0xf]  ;;  %v11830_v54 = vld [vmem:[#allocation17 + $0x760] sm:$0xf0] }
 0x4af   : > { %v10096_v46 = vld [vmem:[#allocation17 + $0x4fc] sm:$0xf0]  ;;  %v11806_v50 = vld [vmem:[#allocation17 + $0x6a4] sm:$0xf] }
 0x4b0   : > { %7545 = vmatpush.bf16.msra.mxu2 %v9507_v53  ;;  %7559 = vmatpush.bf16.msra.mxu3 %v9731_v11  ;;  %v10515_v53 = vor.u32 %v11858_v17, %v10514_v25  ;;  %v10739_v11 = vor.u32 %v11914_v63, %v10738_v57  ;;  %v11942_v25 = vld [vmem:[#allocation17 + $0xae0] sm:$0xf0]  ;;  %v11074_v17 = vld [vmem:[#allocation17 + $0xc88] sm:$0xf]  ;;  %v10403_v57 = vor.u32 %v11830_v54, %v10402_v45 }
 0x4b1   : > { %7573 = vmatpush.bf16.msrb.mxu0 %v9955_v62  ;;  %7587 = vmatpush.bf16.msrb.mxu1 %v10179_v20  ;;  %v11187_v62 = vor.u32 %v12026_v6, %v11186_v19  ;;  %v10710_v20 = vld [vmem:[#allocation17 + $0x9b0] sm:$0xf]  ;;  %v11879_v19 = vld [vmem:[#allocation17 + $0x8e8] sm:$0xf0]  ;;  %v9620_v45 = vld [vmem:[#allocation17 + $0x144] sm:$0xf0] }
 0x4b2   : > { %v10711_v9 = vor.u32 %v11907_v26, %v10710_v20  ;;  %v9676_v20 = vld [vmem:[#allocation17 + $0x1b4] sm:$0xf0]  ;;  %v11701_v26 = vld [vmem:[#allocation17 + $0x35c] sm:$0xf]  ;;  %v10599_v33 = vor.u32 %v11879_v19, %v10598_v32  ;;  %v9592_v32 = vld [vmem:[#allocation17 + $0x10c] sm:$0xf0] }
 0x4b4   : > { %7546 = vmatpush.bf16.msra.mxu2 %v9479_v39  ;;  %7560 = vmatpush.bf16.msra.mxu3 %v9703_v49  ;;  %v12259_v28 = vpop.eup %12258  ;;  %v11900_v39 = vld [vmem:[#allocation17 + $0x990] sm:$0xf0]  ;;  %v10906_v49 = vld [vmem:[#allocation17 + $0xb38] sm:$0xf] }
 0x4b5   : > { %7574 = vmatpush.bf16.msrb.mxu0 %v9927_v44  ;;  %7588 = vmatpush.bf16.msrb.mxu1 %v10151_v56  ;;  %7897 = vst [vmem:[%s14239_s12 + $0x40] sm:$0xff] %v12259_v28  ;;  %v10683_v44 = vor.u32 %v11900_v39, %v10682_v12  ;;  %v10430_v56 = vld [vmem:[#allocation17 + $0x780] sm:$0xf]  ;;  %v11757_v28 = vld [vmem:[#allocation17 + $0x51c] sm:$0xf] }
 0x4b6   : > { %v10431_v27 = vor.u32 %v11837_v29, %v10430_v56  ;;  %v14257_v12 = vld [vmem:[#allocation19] sm:$0xff] }
 0x4b7   : > { %7547 = vmatmul.bf16.vlgmr.msra.gmra.mxu2 %v14128_v34  ;;  %7561 = vmatmul.bf16.vlgmr.msra.gmra.mxu3 %v14130_v38  ;;  %v4775_v39 = vperm.slane %v14257_v12, 2  ;;  %v11694_v29 = vld [vmem:[#allocation17 + $0x324] sm:$0xf] }
 0x4b8   : > { %7595 = vmatpush.bf16.msrb.mxu2 %v10571_v7  ;;  %7609 = vmatpush.bf16.msrb.mxu3 %v10795_v4  ;;  %v10907_v7 = vor.u32 %v11956_v0, %v10906_v49  ;;  %v11131_v4 = vor.u32 %v12012_v35, %v11130_v31  ;;  %v9903_v0 = vor.u32 %v11701_v26, %v9900_v22  ;;  %v11638_v31 = vld [vmem:[#allocation17 + $0x164] sm:$0xf]  ;;  %v9648_v35 = vld [vmem:[#allocation17 + $0x17c] sm:$0xf0] }
 0x4b9   : > { %7623 = vmatpush.bf16.msra.mxu0 %v11019_v51  ;;  %7637 = vmatpush.bf16.msra.mxu1 %v11243_v59  ;;  %v11949_v51 = vld [vmem:[#allocation17 + $0xb18] sm:$0xf0]  ;;  %v11102_v59 = vld [vmem:[#allocation17 + $0xcc0] sm:$0xf] }
 0x4ba   : > { %7575 = vmatmul.bf16.vlgmr.msrb.gmra.mxu0 %v14132_v23  ;;  %7589 = vmatmul.bf16.vlgmr.msrb.gmra.mxu1 %v14138_v14  ;;  %v10879_v42 = vor.u32 %v11949_v51, %v10878_v30  ;;  %v11103_v61 = vor.u32 %v12005_v10, %v11102_v59  ;;  %v7324_v36 = vpop.f32.mrf.mxu2  ;;  %v7338_v16 = vpop.f32.mrf.mxu3  ;;  %v10320_v30 = vld [vmem:[#allocation17 + $0x6bc] sm:$0xf0]  ;;  %v9651_v10 = vor.u32 %v11638_v31, %v9648_v35  ;;  %v11785_v31 = vld [vmem:[#allocation17 + $0x5fc] sm:$0xf]  ;;  %v10236_v35 = vld [vmem:[#allocation17 + $0x614] sm:$0xf0] }
 0x4bb   : > { %v14260_v51 = vpop.f32.mrf.mxu1  ;;  %v7325_v59 = vadd.f32 %v7324_v36, %v4775_v39 }
 0x4bc   : > { %7596 = vmatpush.bf16.msrb.mxu2 %v10543_v1  ;;  %7610 = vmatpush.bf16.msrb.mxu3 %v10767_v3  ;;  %v11886_v1 = vld [vmem:[#allocation17 + $0x920] sm:$0xf0]  ;;  %v10850_v3 = vld [vmem:[#allocation17 + $0xac8] sm:$0xf] }
 0x4bd   : > { %7624 = vmatpush.bf16.msra.mxu0 %v10991_v15  ;;  %7638 = vmatpush.bf16.msra.mxu1 %v11215_v24  ;;  %v11998_v15 = vld [vmem:[#allocation17 + $0xca0] sm:$0xf0]  ;;  %v10374_v24 = vld [vmem:[#allocation17 + $0x710] sm:$0xf]  ;;  %v10627_v63 = vor.u32 %v11886_v1, %v10626_v40  ;;  %v10851_v6 = vor.u32 %v11942_v25, %v10850_v3  ;;  %v9844_v40 = vld [vmem:[#allocation17 + $0x304] sm:$0xf0] }
 0x4be   : > { %v10375_v8 = vor.u32 %v11823_v55, %v10374_v24  ;;  %v11743_v1 = vld [vmem:[#allocation17 + $0x4ac] sm:$0xf]  ;;  %v10068_v3 = vld [vmem:[#allocation17 + $0x4c4] sm:$0xf0]  ;;  %v11624_v55 = vld [vmem:[#allocation17 + $0xf4] sm:$0xf] }
 0x4bf   : > { %v11799_v25 = vld [vmem:[#allocation17 + $0x66c] sm:$0xf]  ;;  %v9595_v36 = vor.u32 %v11624_v55, %v9592_v32  ;;  %v9732_v55 = vld [vmem:[#allocation17 + $0x224] sm:$0xf0] }
 0x4c0   : > { %7597 = vmatpush.bf16.msrb.mxu2 %v10515_v53  ;;  %7611 = vmatpush.bf16.msrb.mxu3 %v10739_v11  ;;  %v11075_v53 = vor.u32 %v11998_v15, %v11074_v17  ;;  %v10822_v11 = vld [vmem:[#allocation17 + $0xa90] sm:$0xf]  ;;  %v10292_v17 = vld [vmem:[#allocation17 + $0x684] sm:$0xf0]  ;;  %v7339_v15 = vadd.f32 %v7338_v16, %v7325_v59  ;;  %v11666_v59 = vld [vmem:[#allocation17 + $0x244] sm:$0xf] }
 0x4c1   : > { %7625 = vmatpush.bf16.msra.mxu0 %v10963_v43  ;;  %7639 = vmatpush.bf16.msra.mxu1 %v11187_v62  ;;  %v11991_v43 = vld [vmem:[#allocation17 + $0xc68] sm:$0xf0]  ;;  %v11645_v62 = vld [vmem:[#allocation17 + $0x19c] sm:$0xf] }
 0x4c2   : > { %v9679_v49 = vor.u32 %v11645_v62, %v9676_v20  ;;  %v7326_v24 = vpop.f32.mrf.mxu2  ;;  %v7340_v19 = vpop.f32.mrf.mxu3  ;;  %v11792_v62 = vld [vmem:[#allocation17 + $0x634] sm:$0xf]  ;;  %v10264_v20 = vld [vmem:[#allocation17 + $0x64c] sm:$0xf0]  ;;  %v11715_v32 = vld [vmem:[#allocation17 + $0x3cc] sm:$0xf] }
 0x4c3   : > { %v7327_v22 = vadd.f32 %v7326_v24, %v4775_v39  ;;  %v10267_v16 = vor.u32 %v11792_v62, %v10264_v20 }
 0x4c4   : > { %7598 = vmatpush.bf16.msrb.mxu2 %v10487_v58  ;;  %7612 = vmatpush.bf16.msrb.mxu3 %v10711_v9  ;;  %v10124_v58 = vld [vmem:[#allocation17 + $0x534] sm:$0xf0]  ;;  %v11813_v9 = vld [vmem:[#allocation17 + $0x6dc] sm:$0xf] }
 0x4c5   : > { %7626 = vmatpush.bf16.msra.mxu0 %v10935_v18  ;;  %7640 = vmatpush.bf16.msra.mxu1 %v11159_v60  ;;  %v10823_v18 = vor.u32 %v11935_v52, %v10822_v11  ;;  %v11047_v60 = vor.u32 %v11991_v43, %v11046_v5  ;;  %v10351_v56 = vor.u32 %v11813_v9, %v10348_v21  ;;  %v11680_v11 = vld [vmem:[#allocation17 + $0x2b4] sm:$0xf]  ;;  %v9816_v52 = vld [vmem:[#allocation17 + $0x2cc] sm:$0xf0]  ;;  %v7368_v9 = vpop.f32.mrf.mxu1 }
 0x4c6   : > { %v11736_v5 = vld [vmem:[#allocation17 + $0x474] sm:$0xf]  ;;  %v10040_v43 = vld [vmem:[#allocation17 + $0x48c] sm:$0xf0] }
 0x4c7   : > { %v10043_v21 = vor.u32 %v11736_v5, %v10040_v43  ;;  %v11596_v5 = vld [vmem:[#allocation17 + $0x14] sm:$0xf] }
 0x4c8   : > { %7599 = vmatpush.bf16.msrb.mxu2 %v10459_v41  ;;  %7613 = vmatpush.bf16.msrb.mxu3 %v10683_v44  ;;  %v7352_v41 = vpop.f32.mrf.mxu0  ;;  %v10127_v44 = vor.u32 %v11757_v28, %v10124_v58  ;;  %v9564_v58 = vld [vmem:[#allocation17 + $0xd4] sm:$0xf0] }
 0x4c9   : > { %7627 = vmatpush.bf16.msra.mxu0 %v10907_v7  ;;  %7641 = vmatpush.bf16.msra.mxu1 %v11131_v4  ;;  %v9872_v7 = vld [vmem:[#allocation17 + $0x33c] sm:$0xf0]  ;;  %v11750_v4 = vld [vmem:[#allocation17 + $0x4e4] sm:$0xf]  ;;  %v7353_v28 = vadd.f32 %v7352_v41, %v7339_v15 }
 0x4ca   : > { %v10099_v54 = vor.u32 %v11750_v4, %v10096_v46  ;;  %v10239_v46 = vor.u32 %v11785_v31, %v10236_v35  ;;  %v11925_v31 = vld [vmem:[#allocation17 + $0xa5c] sm:$0xf]  ;;  %v10796_v35 = vld [vmem:[#allocation17 + $0xa74] sm:$0xf0] }
 0x4cc   : > { %7600 = vmatpush.bf16.msrb.mxu2 %v10431_v27  ;;  %7614 = vmatpush.bf16.msrb.mxu3 %v10655_v13  ;;  %v9875_v27 = vor.u32 %v11694_v29, %v9872_v7  ;;  %v11631_v13 = vld [vmem:[#allocation17 + $0x12c] sm:$0xf]  ;;  %v11610_v29 = vld [vmem:[#allocation17 + $0x84] sm:$0xf]  ;;  %v9536_v7 = vld [vmem:[#allocation17 + $0x9c] sm:$0xf0] }
 0x4cd   : > { %7628 = vmatpush.bf16.msra.mxu0 %v10879_v42  ;;  %7642 = vmatpush.bf16.msra.mxu1 %v11103_v61  ;;  %v10323_v42 = vor.u32 %v11806_v50, %v10320_v30  ;;  %v11687_v61 = vld [vmem:[#allocation17 + $0x2ec] sm:$0xf] }
 0x4d0   : > { %7601 = vmatpush.bf16.msrb.mxu2 %v10403_v57  ;;  %7615 = vmatpush.bf16.msrb.mxu3 %v10627_v63  ;;  %v9623_v57 = vor.u32 %v11631_v13, %v9620_v45  ;;  %v9847_v63 = vor.u32 %v11687_v61, %v9844_v40  ;;  %v7354_v26 = vpop.f32.mrf.mxu0  ;;  %v9984_v45 = vld [vmem:[#allocation17 + $0x41c] sm:$0xf0] }
 0x4d1   : > { %7629 = vmatpush.bf16.msra.mxu0 %v10851_v6  ;;  %7643 = vmatpush.bf16.msra.mxu1 %v11075_v53  ;;  %v10071_v6 = vor.u32 %v11743_v1, %v10068_v3  ;;  %v10295_v53 = vor.u32 %v11799_v25, %v10292_v17  ;;  %v9539_v1 = vor.u32 %v11610_v29, %v9536_v7  ;;  %v11603_v25 = vld [vmem:[#allocation17 + $0x4c] sm:$0xf]  ;;  %v9508_v17 = vld [vmem:[#allocation17 + $0x64] sm:$0xf0]  ;;  %v11020_v29 = vld [vmem:[#allocation17 + $0xc34] sm:$0xf0] }
 0x4d2   : > { %v9511_v62 = vor.u32 %v11603_v25, %v9508_v17  ;;  %v12037_v7 = vld [vmem:[#allocation17 + $0xddc] sm:$0xf]  ;;  %v10992_v17 = vld [vmem:[#allocation17 + $0xbfc] sm:$0xf0] }
 0x4d4   : > { %7602 = vmatpush.bf16.msrb.mxu2 %v10375_v8  ;;  %7616 = vmatpush.bf16.msrb.mxu3 %v10599_v33  ;;  %v9819_v8 = vor.u32 %v11680_v11, %v9816_v52  ;;  %v11617_v33 = vld [vmem:[#allocation17 + $0xbc] sm:$0xf]  ;;  %v10180_v11 = vld [vmem:[#allocation17 + $0x5a4] sm:$0xf0] }
 0x4d5   : > { %7630 = vmatpush.bf16.msra.mxu0 %v10823_v18  ;;  %7644 = vmatpush.bf16.msra.mxu1 %v11047_v60  ;;  %v11673_v18 = vld [vmem:[#allocation17 + $0x27c] sm:$0xf]  ;;  %v9788_v60 = vld [vmem:[#allocation17 + $0x294] sm:$0xf0]  ;;  %v9567_v39 = vor.u32 %v11617_v33, %v9564_v58  ;;  %v11708_v58 = vld [vmem:[#allocation17 + $0x394] sm:$0xf] }
 0x4d6   : > { %v9791_v41 = vor.u32 %v11673_v18, %v9788_v60  ;;  %v11869_v60 = vld [vmem:[#allocation17 + $0x89c] sm:$0xf] }
 0x4d7   : > { %7603 = vmatmul.bf16.vlgmr.msrb.gmra.mxu2 %v14192_v2  ;;  %7617 = vmatmul.bf16.vlgmr.msrb.gmra.mxu3 %v14194_v48  ;;  %v7422_v15 = vpop.f32.mrf.mxu1 }
 0x4d8   : > { %7651 = vmatpush.bf16.msra.mxu2 %v9679_v49  ;;  %7665 = vmatpush.bf16.msra.mxu3 %v9903_v0  ;;  %v11729_v49 = vld [vmem:[#allocation17 + $0x43c] sm:$0xf]  ;;  %v10012_v0 = vld [vmem:[#allocation17 + $0x454] sm:$0xf0]  ;;  %v7408_v40 = vpop.f32.mrf.mxu0 }
 0x4d9   : > { %7679 = vmatpush.bf16.msrb.mxu0 %v10127_v44  ;;  %7693 = vmatpush.bf16.msrb.mxu1 %v10351_v56  ;;  %v7341_v44 = vadd.f32 %v7340_v19, %v7327_v22  ;;  %v7367_v56 = vadd.f32 %v14260_v51, %v7353_v28  ;;  %v10015_v4 = vor.u32 %v11729_v49, %v10012_v0  ;;  %v11652_v22 = vld [vmem:[#allocation17 + $0x1d4] sm:$0xf]  ;;  %v9704_v28 = vld [vmem:[#allocation17 + $0x1ec] sm:$0xf0]  ;;  %v10572_v49 = vld [vmem:[#allocation17 + $0x8b4] sm:$0xf0] }
 0x4da   : > { %7631 = vmatmul.bf16.vlgmr.msra.gmra.mxu0 %v14199_v47  ;;  %7645 = vmatmul.bf16.vlgmr.msra.gmra.mxu1 %v14190_v37  ;;  %v7380_v50 = vpop.f32.mrf.mxu2  ;;  %v7394_v30 = vpop.f32.mrf.mxu3 }
 0x4db   : > { %v7381_v13 = vadd.f32 %v7380_v50, %v7367_v56  ;;  %v7355_v61 = vadd.f32 %v7354_v26, %v7341_v44  ;;  %v9480_v26 = vld [vmem:[#allocation17 + $0x2c] sm:$0xf0]  ;;  %v11981_v44 = vld [vmem:[#allocation17 + $0xc1c] sm:$0xf]  ;;  %v9707_v56 = vor.u32 %v11652_v22, %v9704_v28  ;;  %v11848_v22 = vld [vmem:[#allocation17 + $0x7f4] sm:$0xf] }
 0x4dc   : > { %7652 = vmatpush.bf16.msra.mxu2 %v9651_v10  ;;  %7666 = vmatpush.bf16.msra.mxu3 %v9875_v27  ;;  %v9760_v10 = vld [vmem:[#allocation17 + $0x25c] sm:$0xf0]  ;;  %v11722_v27 = vld [vmem:[#allocation17 + $0x404] sm:$0xf]  ;;  %v10488_v28 = vld [vmem:[#allocation17 + $0x80c] sm:$0xf0] }
 0x4dd   : > { %7680 = vmatpush.bf16.msrb.mxu0 %v10099_v54  ;;  %7694 = vmatpush.bf16.msrb.mxu1 %v10323_v42  ;;  %v11778_v54 = vld [vmem:[#allocation17 + $0x5c4] sm:$0xf]  ;;  %v10208_v42 = vld [vmem:[#allocation17 + $0x5dc] sm:$0xf0]  ;;  %v7395_v51 = vadd.f32 %v7394_v30, %v7381_v13  ;;  %v9763_v3 = vor.u32 %v11666_v59, %v9760_v10  ;;  %v9987_v24 = vor.u32 %v11722_v27, %v9984_v45 }
 0x4de   : > { %v7369_v52 = vadd.f32 %v7368_v9, %v7355_v61  ;;  %v10152_v9 = vld [vmem:[#allocation17 + $0x56c] sm:$0xf0]  ;;  %v10575_v10 = vor.u32 %v11869_v60, %v10572_v49  ;;  %v10799_v27 = vor.u32 %v11925_v31, %v10796_v35  ;;  %v11862_v13 = vld [vmem:[#allocation17 + $0x864] sm:$0xf]  ;;  %v10544_v45 = vld [vmem:[#allocation17 + $0x87c] sm:$0xf0]  ;;  %v10491_v49 = vor.u32 %v11848_v22, %v10488_v28 }
 0x4df   : > { %v7409_v19 = vadd.f32 %v7408_v40, %v7395_v51  ;;  %v11918_v40 = vld [vmem:[#allocation17 + $0xa24] sm:$0xf]  ;;  %v10768_v51 = vld [vmem:[#allocation17 + $0xa3c] sm:$0xf0]  ;;  %v11160_v60 = vld [vmem:[#allocation17 + $0xd4c] sm:$0xf0] }
 0x4e0   : > { %7653 = vmatpush.bf16.msra.mxu2 %v9623_v57  ;;  %7667 = vmatpush.bf16.msra.mxu3 %v9847_v63  ;;  %v10211_v57 = vor.u32 %v11778_v54, %v10208_v42  ;;  %v11659_v63 = vld [vmem:[#allocation17 + $0x20c] sm:$0xf]  ;;  %v7424_v54 = vpop.f32.mrf.mxu1  ;;  %v11023_v42 = vor.u32 %v11981_v44, %v11020_v29  ;;  %v11841_v31 = vld [vmem:[#allocation17 + $0x7bc] sm:$0xf]  ;;  %v10460_v35 = vld [vmem:[#allocation17 + $0x7d4] sm:$0xf0] }
 0x4e1   : > { %7681 = vmatpush.bf16.msrb.mxu0 %v10071_v6  ;;  %7695 = vmatpush.bf16.msrb.mxu1 %v10295_v53  ;;  %v9956_v6 = vld [vmem:[#allocation17 + $0x3e4] sm:$0xf0]  ;;  %v11771_v53 = vld [vmem:[#allocation17 + $0x58c] sm:$0xf]  ;;  %v7423_v43 = vadd.f32 %v7422_v15, %v7409_v19  ;;  %v9735_v20 = vor.u32 %v11659_v63, %v9732_v55  ;;  %v12030_v15 = vld [vmem:[#allocation17 + $0xda4] sm:$0xf]  ;;  %v10771_v63 = vor.u32 %v11918_v40, %v10768_v51 }
 0x4e2   : > { %v7382_v33 = vpop.f32.mrf.mxu2  ;;  %v7396_v0 = vpop.f32.mrf.mxu3  ;;  %v11855_v55 = vld [vmem:[#allocation17 + $0x82c] sm:$0xf]  ;;  %v11953_v29 = vld [vmem:[#allocation17 + $0xb3c] sm:$0xf]  ;;  %v12002_v40 = vld [vmem:[#allocation17 + $0xcc4] sm:$0xf] }
 0x4e3   : > { %12260 = vtanh.f32 %v7423_v43  ;;  %v7383_v18 = vadd.f32 %v7382_v33, %v7369_v52  ;;  %v11967_v52 = vld [vmem:[#allocation17 + $0xbac] sm:$0xf]  ;;  %v11904_v33 = vld [vmem:[#allocation17 + $0x9b4] sm:$0xf]  ;;  %v11104_v51 = vld [vmem:[#allocation17 + $0xcdc] sm:$0xf0] }
 0x4e4   : > { %7654 = vmatpush.bf16.msra.mxu2 %v9595_v36  ;;  %7668 = vmatpush.bf16.msra.mxu3 %v9819_v8  ;;  %v9959_v36 = vor.u32 %v11715_v32, %v9956_v6  ;;  %v10183_v8 = vor.u32 %v11771_v53, %v10180_v11  ;;  %v10516_v32 = vld [vmem:[#allocation17 + $0x844] sm:$0xf0]  ;;  %v11911_v53 = vld [vmem:[#allocation17 + $0x9ec] sm:$0xf]  ;;  %v11932_v22 = vld [vmem:[#allocation17 + $0xa94] sm:$0xf] }
 0x4e5   : > { %7682 = vmatpush.bf16.msrb.mxu0 %v10043_v21  ;;  %7696 = vmatpush.bf16.msrb.mxu1 %v10267_v16  ;;  %v9928_v21 = vld [vmem:[#allocation17 + $0x3ac] sm:$0xf0]  ;;  %v11764_v16 = vld [vmem:[#allocation17 + $0x554] sm:$0xf]  ;;  %v10740_v11 = vld [vmem:[#allocation17 + $0xa04] sm:$0xf0] }
 0x4e6   : > { %v9931_v50 = vor.u32 %v11708_v58, %v9928_v21  ;;  %v10155_v30 = vor.u32 %v11764_v16, %v10152_v9  ;;  %v12023_v43 = vld [vmem:[#allocation17 + $0xd6c] sm:$0xf]  ;;  %v10712_v58 = vld [vmem:[#allocation17 + $0x9cc] sm:$0xf0]  ;;  %v11960_v21 = vld [vmem:[#allocation17 + $0xb74] sm:$0xf] }
 0x4e7   : > { %v12016_v9 = vld [vmem:[#allocation17 + $0xd34] sm:$0xf]  ;;  %v10824_v28 = vld [vmem:[#allocation17 + $0xaac] sm:$0xf0] }
 0x4e8   : > { %7655 = vmatpush.bf16.msra.mxu2 %v9567_v39  ;;  %7669 = vmatpush.bf16.msra.mxu3 %v9791_v41  ;;  %v7397_v39 = vadd.f32 %v7396_v0, %v7383_v18  ;;  %v9483_v41 = vor.u32 %v11596_v5, %v9480_v26  ;;  %v10964_v5 = vld [vmem:[#allocation17 + $0xbc4] sm:$0xf0]  ;;  %v10743_v26 = vor.u32 %v11911_v53, %v10740_v11  ;;  %v10936_v18 = vld [vmem:[#allocation17 + $0xb8c] sm:$0xf0]  ;;  %v11820_v53 = vld [vmem:[#allocation17 + $0x714] sm:$0xf] }
 0x4e9   : > { %7683 = vmatpush.bf16.msrb.mxu0 %v10015_v4  ;;  %7697 = vmatpush.bf16.msrb.mxu1 %v10239_v46  ;;  %v11244_v4 = vld [vmem:[#allocation17 + $0xdf4] sm:$0xf0]  ;;  %v7410_v46 = vpop.f32.mrf.mxu0  ;;  %v10715_v0 = vor.u32 %v11904_v33, %v10712_v58  ;;  %v10939_v44 = vor.u32 %v11960_v21, %v10936_v18  ;;  %v9682_v33 = vld [vmem:[#allocation17 + $0x1a0] sm:$0xf]  ;;  %v11649_v58 = vld [vmem:[#allocation17 + $0x1b8] sm:$0xf0] }
 0x4ea   : > { %v7411_v59 = vadd.f32 %v7410_v46, %v7397_v39  ;;  %v11247_v61 = vor.u32 %v12037_v7, %v11244_v4  ;;  %v11163_v39 = vor.u32 %v12016_v9, %v11160_v60  ;;  %v10908_v7 = vld [vmem:[#allocation17 + $0xb54] sm:$0xf0]  ;;  %v12009_v4 = vld [vmem:[#allocation17 + $0xcfc] sm:$0xf]  ;;  %v9906_v21 = vld [vmem:[#allocation17 + $0x360] sm:$0xf] }
 0x4eb   : > { %v11132_v46 = vld [vmem:[#allocation17 + $0xd14] sm:$0xf0]  ;;  %v10130_v18 = vld [vmem:[#allocation17 + $0x520] sm:$0xf] }
 0x4ec   : > { %7656 = vmatpush.bf16.msra.mxu2 %v9539_v1  ;;  %7670 = vmatpush.bf16.msra.mxu3 %v9763_v3  ;;  %v11974_v1 = vld [vmem:[#allocation17 + $0xbe4] sm:$0xf]  ;;  %v12261_v3 = vpop.eup %12260  ;;  %v7425_v25 = vadd.f32 %v7424_v54, %v7411_v59  ;;  %v10656_v54 = vld [vmem:[#allocation17 + $0x95c] sm:$0xf0] }
 0x4ed   : > { %7684 = vmatpush.bf16.msrb.mxu0 %v9987_v24  ;;  %7698 = vmatpush.bf16.msrb.mxu1 %v10211_v57  ;;  %v11216_v24 = vld [vmem:[#allocation17 + $0xdbc] sm:$0xf0]  ;;  %7891 = vst [vmem:[%s14239_s12 + $0x10] sm:$0xff] %v12261_v3  ;;  %v10547_v57 = vor.u32 %v11862_v13, %v10544_v45  ;;  %v10995_v19 = vor.u32 %v11974_v1, %v10992_v17  ;;  %v11834_v59 = vld [vmem:[#allocation17 + $0x784] sm:$0xf] }
 0x4ee   : > { %12262 = vtanh.f32 %v7425_v25  ;;  %v11219_v6 = vor.u32 %v12030_v15, %v11216_v24  ;;  %v11135_v13 = vor.u32 %v12009_v4, %v11132_v46  ;;  %v11890_v45 = vld [vmem:[#allocation17 + $0x944] sm:$0xf]  ;;  %v11827_v25 = vld [vmem:[#allocation17 + $0x74c] sm:$0xf]  ;;  %v10404_v17 = vld [vmem:[#allocation17 + $0x764] sm:$0xf0]  ;;  %v11107_v24 = vor.u32 %v12002_v40, %v11104_v51 }
 0x4ef   : > { %v10659_v3 = vor.u32 %v11890_v45, %v10656_v54  ;;  %v10407_v11 = vor.u32 %v11827_v25, %v10404_v17  ;;  %v9654_v4 = vld [vmem:[#allocation17 + $0x168] sm:$0xf]  ;;  %v11642_v46 = vld [vmem:[#allocation17 + $0x180] sm:$0xf0] }
 0x4f0   : > { %7657 = vmatpush.bf16.msra.mxu2 %v9511_v62  ;;  %7671 = vmatpush.bf16.msra.mxu3 %v9735_v20  ;;  %v11188_v62 = vld [vmem:[#allocation17 + $0xd84] sm:$0xf0]  ;;  %v10519_v20 = vor.u32 %v11855_v55, %v10516_v32  ;;  %v11939_v55 = vld [vmem:[#allocation17 + $0xacc] sm:$0xf]  ;;  %v11754_v45 = vld [vmem:[#allocation17 + $0x500] sm:$0xf0]  ;;  %v9655_v40 = vor.u32 %v11642_v46, %v9654_v4 }
 0x4f1   : > { %7685 = vmatpush.bf16.msrb.mxu0 %v9959_v36  ;;  %7699 = vmatpush.bf16.msrb.mxu1 %v10183_v8  ;;  %v10967_v36 = vor.u32 %v11967_v52, %v10964_v5  ;;  %v11191_v8 = vor.u32 %v12023_v43, %v11188_v62  ;;  %v10852_v32 = vld [vmem:[#allocation17 + $0xae4] sm:$0xf0]  ;;  %v10376_v5 = vld [vmem:[#allocation17 + $0x72c] sm:$0xf0]  ;;  %v11876_v43 = vld [vmem:[#allocation17 + $0x8d4] sm:$0xf] }
 0x4f2   : > { %v10600_v62 = vld [vmem:[#allocation17 + $0x8ec] sm:$0xf0]  ;;  %v10379_v60 = vor.u32 %v11820_v53, %v10376_v5  ;;  %v10326_v54 = vld [vmem:[#allocation17 + $0x6a8] sm:$0xf]  ;;  %v11628_v5 = vld [vmem:[#allocation17 + $0x110] sm:$0xf0] }
 0x4f3   : > { %v11789_v4 = vld [vmem:[#allocation17 + $0x618] sm:$0xf0] }
 0x4f4   : > { %7658 = vmatpush.bf16.msra.mxu2 %v9483_v41  ;;  %7672 = vmatpush.bf16.msra.mxu3 %v9707_v56  ;;  %v12263_v16 = vpop.eup %12262  ;;  %v11897_v41 = vld [vmem:[#allocation17 + $0x97c] sm:$0xf]  ;;  %v10684_v56 = vld [vmem:[#allocation17 + $0x994] sm:$0xf0] }
 0x4f5   : > { %7686 = vmatpush.bf16.msrb.mxu0 %v9931_v50  ;;  %7700 = vmatpush.bf16.msrb.mxu1 %v10155_v30  ;;  %7898 = vst [vmem:[%s14239_s12 + $0x48] sm:$0xff] %v12263_v16  ;;  %v10463_v50 = vor.u32 %v11841_v31, %v10460_v35  ;;  %v10687_v30 = vor.u32 %v11897_v41, %v10684_v56  ;;  %v11705_v16 = vld [vmem:[#allocation17 + $0x378] sm:$0xf0]  ;;  %v10354_v31 = vld [vmem:[#allocation17 + $0x6e0] sm:$0xf]  ;;  %v4776_v56 = vperm.slane %v14257_v12, 3 }
 0x4f6   : > { %v11817_v35 = vld [vmem:[#allocation17 + $0x6f8] sm:$0xf0] }
 0x4f7   : > { %7659 = vmatmul.bf16.vlgmr.msra.gmra.mxu2 %v14128_v34  ;;  %7673 = vmatmul.bf16.vlgmr.msra.gmra.mxu3 %v14130_v38 }
 0x4f8   : > { %7707 = vmatpush.bf16.msrb.mxu2 %v10575_v10  ;;  %7721 = vmatpush.bf16.msrb.mxu3 %v10799_v27  ;;  %v10432_v10 = vld [vmem:[#allocation17 + $0x79c] sm:$0xf0]  ;;  %v10911_v27 = vor.u32 %v11953_v29, %v10908_v7  ;;  %v9683_v29 = vor.u32 %v11649_v58, %v9682_v33  ;;  %v9907_v7 = vor.u32 %v11705_v16, %v9906_v21  ;;  %v11796_v33 = vld [vmem:[#allocation17 + $0x650] sm:$0xf0] }
 0x4f9   : > { %7735 = vmatpush.bf16.msra.mxu0 %v11023_v42  ;;  %7749 = vmatpush.bf16.msra.mxu1 %v11247_v61  ;;  %v11946_v42 = vld [vmem:[#allocation17 + $0xb04] sm:$0xf]  ;;  %v10880_v61 = vld [vmem:[#allocation17 + $0xb1c] sm:$0xf0]  ;;  %v10435_v1 = vor.u32 %v11834_v59, %v10432_v10  ;;  %v10355_v59 = vor.u32 %v11817_v35, %v10354_v31  ;;  %v9878_v10 = vld [vmem:[#allocation17 + $0x328] sm:$0xf] }
 0x4fa   : > { %7687 = vmatmul.bf16.vlgmr.msrb.gmra.mxu0 %v14132_v23  ;;  %7701 = vmatmul.bf16.vlgmr.msrb.gmra.mxu1 %v14138_v14  ;;  %v10883_v15 = vor.u32 %v11946_v42, %v10880_v61  ;;  %v7436_v9 = vpop.f32.mrf.mxu2  ;;  %v11810_v42 = vld [vmem:[#allocation17 + $0x6c0] sm:$0xf0]  ;;  %v14274_v61 = vpop.f32.mrf.mxu1 }
 0x4fb   : > { %v7437_v12 = vadd.f32 %v7436_v9, %v4776_v56  ;;  %v10327_v17 = vor.u32 %v11810_v42, %v10326_v54  ;;  %v9766_v42 = vld [vmem:[#allocation17 + $0x248] sm:$0xf] }
 0x4fc   : > { %7708 = vmatpush.bf16.msrb.mxu2 %v10547_v57  ;;  %7722 = vmatpush.bf16.msrb.mxu3 %v10771_v63  ;;  %v11883_v57 = vld [vmem:[#allocation17 + $0x90c] sm:$0xf]  ;;  %v10628_v63 = vld [vmem:[#allocation17 + $0x924] sm:$0xf0] }
 0x4fd   : > { %7736 = vmatpush.bf16.msra.mxu0 %v10995_v19  ;;  %7750 = vmatpush.bf16.msra.mxu1 %v11219_v6  ;;  %v11995_v19 = vld [vmem:[#allocation17 + $0xc8c] sm:$0xf]  ;;  %v11076_v6 = vld [vmem:[#allocation17 + $0xca4] sm:$0xf0]  ;;  %v10631_v52 = vor.u32 %v11883_v57, %v10628_v63  ;;  %v10074_v57 = vld [vmem:[#allocation17 + $0x4b0] sm:$0xf] }
 0x4fe   : > { %v11747_v63 = vld [vmem:[#allocation17 + $0x4c8] sm:$0xf0] }
 0x500   : > { %7709 = vmatpush.bf16.msrb.mxu2 %v10519_v20  ;;  %7723 = vmatpush.bf16.msrb.mxu3 %v10743_v26  ;;  %v10855_v20 = vor.u32 %v11939_v55, %v10852_v32  ;;  %v11079_v26 = vor.u32 %v11995_v19, %v11076_v6  ;;  %v10298_v55 = vld [vmem:[#allocation17 + $0x670] sm:$0xf]  ;;  %v11803_v32 = vld [vmem:[#allocation17 + $0x688] sm:$0xf0] }
 0x501   : > { %7737 = vmatpush.bf16.msra.mxu0 %v10967_v36  ;;  %7751 = vmatpush.bf16.msra.mxu1 %v11191_v8  ;;  %v11988_v36 = vld [vmem:[#allocation17 + $0xc54] sm:$0xf]  ;;  %v11048_v8 = vld [vmem:[#allocation17 + $0xc6c] sm:$0xf0] }
 0x502   : > { %v11051_v41 = vor.u32 %v11988_v36, %v11048_v8  ;;  %v7438_v6 = vpop.f32.mrf.mxu2  ;;  %v11740_v36 = vld [vmem:[#allocation17 + $0x490] sm:$0xf0]  ;;  %v10270_v8 = vld [vmem:[#allocation17 + $0x638] sm:$0xf] }
 0x503   : > { %v7439_v21 = vadd.f32 %v7438_v6, %v4776_v56  ;;  %v10271_v35 = vor.u32 %v11796_v33, %v10270_v8  ;;  %v11600_v33 = vld [vmem:[#allocation17 + $0x30] sm:$0xf0] }
 0x504   : > { %7710 = vmatpush.bf16.msrb.mxu2 %v10491_v49  ;;  %7724 = vmatpush.bf16.msrb.mxu3 %v10715_v0  ;;  %v10603_v49 = vor.u32 %v11876_v43, %v10600_v62  ;;  %v11761_v0 = vld [vmem:[#allocation17 + $0x538] sm:$0xf0]  ;;  %v10075_v62 = vor.u32 %v11747_v63, %v10074_v57  ;;  %v9514_v63 = vld [vmem:[#allocation17 + $0x50] sm:$0xf] }
 0x505   : > { %7738 = vmatpush.bf16.msra.mxu0 %v10939_v44  ;;  %7752 = vmatpush.bf16.msra.mxu1 %v11163_v39  ;;  %v7450_v44 = vpop.f32.mrf.mxu3  ;;  %v10827_v39 = vor.u32 %v11932_v22, %v10824_v28  ;;  %v11684_v22 = vld [vmem:[#allocation17 + $0x2d0] sm:$0xf0]  ;;  %v10046_v28 = vld [vmem:[#allocation17 + $0x478] sm:$0xf] }
 0x506   : > { %v7451_v19 = vadd.f32 %v7450_v44, %v7437_v12  ;;  %v10047_v31 = vor.u32 %v11740_v36, %v10046_v28  ;;  %v9794_v44 = vld [vmem:[#allocation17 + $0x280] sm:$0xf]  ;;  %v11670_v12 = vld [vmem:[#allocation17 + $0x260] sm:$0xf0] }
 0x507   : > { %v9767_v57 = vor.u32 %v11670_v12, %v9766_v42 }
 0x508   : > { %7711 = vmatpush.bf16.msrb.mxu2 %v10463_v50  ;;  %7725 = vmatpush.bf16.msrb.mxu3 %v10687_v30  ;;  %v7464_v50 = vpop.f32.mrf.mxu0  ;;  %v10131_v30 = vor.u32 %v11761_v0, %v10130_v18  ;;  %v7480_v0 = vpop.f32.mrf.mxu1 }
 0x509   : > { %7739 = vmatpush.bf16.msra.mxu0 %v10911_v27  ;;  %7753 = vmatpush.bf16.msra.mxu1 %v11135_v13  ;;  %v11698_v27 = vld [vmem:[#allocation17 + $0x340] sm:$0xf0]  ;;  %v10102_v13 = vld [vmem:[#allocation17 + $0x4e8] sm:$0xf]  ;;  %v7465_v16 = vadd.f32 %v7464_v50, %v7451_v19 }
 0x50a   : > { %v9879_v51 = vor.u32 %v11698_v27, %v9878_v10  ;;  %v10103_v25 = vor.u32 %v11754_v45, %v10102_v13  ;;  %v11614_v10 = vld [vmem:[#allocation17 + $0xa0] sm:$0xf0] }
 0x50c   : > { %7712 = vmatpush.bf16.msrb.mxu2 %v10435_v1  ;;  %7726 = vmatpush.bf16.msrb.mxu3 %v10659_v3  ;;  %v9626_v1 = vld [vmem:[#allocation17 + $0x130] sm:$0xf]  ;;  %v11635_v3 = vld [vmem:[#allocation17 + $0x148] sm:$0xf0] }
 0x50d   : > { %7740 = vmatpush.bf16.msra.mxu0 %v10883_v15  ;;  %7754 = vmatpush.bf16.msra.mxu1 %v11107_v24  ;;  %v9850_v15 = vld [vmem:[#allocation17 + $0x2f0] sm:$0xf]  ;;  %v11691_v24 = vld [vmem:[#allocation17 + $0x308] sm:$0xf0]  ;;  %v9627_v53 = vor.u32 %v11635_v3, %v9626_v1  ;;  %v7452_v43 = vpop.f32.mrf.mxu3  ;;  %v11726_v1 = vld [vmem:[#allocation17 + $0x420] sm:$0xf0] }
 0x50e   : > { %v7453_v46 = vadd.f32 %v7452_v43, %v7439_v21  ;;  %v10214_v3 = vld [vmem:[#allocation17 + $0x5c8] sm:$0xf]  ;;  %v11719_v43 = vld [vmem:[#allocation17 + $0x3e8] sm:$0xf0]  ;;  %v11656_v21 = vld [vmem:[#allocation17 + $0x1f0] sm:$0xf0] }
 0x510   : > { %7713 = vmatpush.bf16.msrb.mxu2 %v10407_v11  ;;  %7727 = vmatpush.bf16.msrb.mxu3 %v10631_v52  ;;  %v9851_v11 = vor.u32 %v11691_v24, %v9850_v15  ;;  %v9598_v52 = vld [vmem:[#allocation17 + $0xf8] sm:$0xf]  ;;  %v7466_v58 = vpop.f32.mrf.mxu0 }
 0x511   : > { %7741 = vmatpush.bf16.msra.mxu0 %v10855_v20  ;;  %7755 = vmatpush.bf16.msra.mxu1 %v11079_v26  ;;  %v10299_v20 = vor.u32 %v11803_v32, %v10298_v55  ;;  %v9822_v26 = vld [vmem:[#allocation17 + $0x2b8] sm:$0xf]  ;;  %v9599_v18 = vor.u32 %v11628_v5, %v9598_v52  ;;  %v11607_v55 = vld [vmem:[#allocation17 + $0x68] sm:$0xf0]  ;;  %v9962_v52 = vld [vmem:[#allocation17 + $0x3d0] sm:$0xf] }
 0x512   : > { %v9823_v9 = vor.u32 %v11684_v22, %v9822_v26  ;;  %v9486_v22 = vld [vmem:[#allocation17 + $0x18] sm:$0xf]  ;;  %v9515_v36 = vor.u32 %v11607_v55, %v9514_v63  ;;  %v11978_v63 = vld [vmem:[#allocation17 + $0xc00] sm:$0xf0]  ;;  %v11222_v55 = vld [vmem:[#allocation17 + $0xda8] sm:$0xf] }
 0x514   : > { %7714 = vmatpush.bf16.msrb.mxu2 %v10379_v60  ;;  %7728 = vmatpush.bf16.msrb.mxu3 %v10603_v49  ;;  %v9570_v60 = vld [vmem:[#allocation17 + $0xc0] sm:$0xf]  ;;  %v11621_v49 = vld [vmem:[#allocation17 + $0xd8] sm:$0xf0] }
 0x515   : > { %7742 = vmatpush.bf16.msra.mxu0 %v10827_v39  ;;  %7756 = vmatpush.bf16.msra.mxu1 %v11051_v41  ;;  %v11677_v39 = vld [vmem:[#allocation17 + $0x298] sm:$0xf0]  ;;  %v10018_v41 = vld [vmem:[#allocation17 + $0x440] sm:$0xf]  ;;  %v9571_v56 = vor.u32 %v11621_v49, %v9570_v60  ;;  %v9934_v60 = vld [vmem:[#allocation17 + $0x398] sm:$0xf] }
 0x516   : > { %v9795_v50 = vor.u32 %v11677_v39, %v9794_v44  ;;  %v11712_v49 = vld [vmem:[#allocation17 + $0x3b0] sm:$0xf0]  ;;  %v10578_v44 = vld [vmem:[#allocation17 + $0x8a0] sm:$0xf]  ;;  %v11873_v39 = vld [vmem:[#allocation17 + $0x8b8] sm:$0xf0] }
 0x517   : > { %7715 = vmatmul.bf16.vlgmr.msrb.gmra.mxu2 %v14192_v2  ;;  %7729 = vmatmul.bf16.vlgmr.msrb.gmra.mxu3 %v14194_v48  ;;  %v7534_v32 = vpop.f32.mrf.mxu1  ;;  %v10579_v42 = vor.u32 %v11873_v39, %v10578_v44 }
 0x518   : > { %7763 = vmatpush.bf16.msra.mxu2 %v9683_v29  ;;  %7777 = vmatpush.bf16.msra.mxu3 %v9907_v7  ;;  %v11733_v29 = vld [vmem:[#allocation17 + $0x458] sm:$0xf0]  ;;  %v10242_v7 = vld [vmem:[#allocation17 + $0x600] sm:$0xf]  ;;  %v7520_v15 = vpop.f32.mrf.mxu0 }
 0x519   : > { %7791 = vmatpush.bf16.msrb.mxu0 %v10131_v30  ;;  %7805 = vmatpush.bf16.msrb.mxu1 %v10355_v59  ;;  %v7479_v30 = vadd.f32 %v14274_v61, %v7465_v16  ;;  %v9542_v59 = vld [vmem:[#allocation17 + $0x88] sm:$0xf]  ;;  %v10019_v27 = vor.u32 %v11733_v29, %v10018_v41  ;;  %v10243_v13 = vor.u32 %v11789_v4, %v10242_v7  ;;  %v10802_v29 = vld [vmem:[#allocation17 + $0xa60] sm:$0xf]  ;;  %v11929_v7 = vld [vmem:[#allocation17 + $0xa78] sm:$0xf0] }
 0x51a   : > { %7743 = vmatmul.bf16.vlgmr.msra.gmra.mxu0 %v14199_v47  ;;  %7757 = vmatmul.bf16.vlgmr.msra.gmra.mxu1 %v14190_v37  ;;  %v7492_v45 = vpop.f32.mrf.mxu2  ;;  %v7506_v54 = vpop.f32.mrf.mxu3  ;;  %v9543_v24 = vor.u32 %v11614_v10, %v9542_v59  ;;  %v9963_v16 = vor.u32 %v11719_v43, %v9962_v52  ;;  %v11026_v4 = vld [vmem:[#allocation17 + $0xc20] sm:$0xf]  ;;  %v12041_v10 = vld [vmem:[#allocation17 + $0xdf8] sm:$0xf0]  ;;  %v10803_v12 = vor.u32 %v11929_v7, %v10802_v29  ;;  %v10746_v43 = vld [vmem:[#allocation17 + $0x9f0] sm:$0xf] }
 0x51b   : > { %v11250_v59 = vld [vmem:[#allocation17 + $0xde0] sm:$0xf]  ;;  %v11901_v29 = vld [vmem:[#allocation17 + $0x998] sm:$0xf0] }
 0x51c   : > { %7764 = vmatpush.bf16.msra.mxu2 %v9655_v40  ;;  %7778 = vmatpush.bf16.msra.mxu3 %v9879_v51  ;;  %v9990_v40 = vld [vmem:[#allocation17 + $0x408] sm:$0xf]  ;;  %v7493_v51 = vadd.f32 %v7492_v45, %v7479_v30  ;;  %v11985_v30 = vld [vmem:[#allocation17 + $0xc38] sm:$0xf0]  ;;  %v10914_v7 = vld [vmem:[#allocation17 + $0xb40] sm:$0xf] }
 0x51d   : > { %7792 = vmatpush.bf16.msrb.mxu0 %v10103_v25  ;;  %7806 = vmatpush.bf16.msrb.mxu1 %v10327_v17  ;;  %v11782_v25 = vld [vmem:[#allocation17 + $0x5e0] sm:$0xf0]  ;;  %v7467_v17 = vadd.f32 %v7466_v58, %v7453_v46  ;;  %v9991_v19 = vor.u32 %v11726_v1, %v9990_v40  ;;  %v9710_v58 = vld [vmem:[#allocation17 + $0x1d8] sm:$0xf]  ;;  %v10550_v40 = vld [vmem:[#allocation17 + $0x868] sm:$0xf] }
 0x51e   : > { %v7507_v61 = vadd.f32 %v7506_v54, %v7493_v51  ;;  %v10215_v6 = vor.u32 %v11782_v25, %v10214_v3  ;;  %v11866_v51 = vld [vmem:[#allocation17 + $0x880] sm:$0xf0]  ;;  %v11027_v3 = vor.u32 %v11985_v30, %v11026_v4  ;;  %v11251_v25 = vor.u32 %v12041_v10, %v11250_v59  ;;  %v11957_v4 = vld [vmem:[#allocation17 + $0xb58] sm:$0xf0]  ;;  %v10438_v59 = vld [vmem:[#allocation17 + $0x788] sm:$0xf] }
 0x51f   : > { %v7481_v26 = vadd.f32 %v7480_v0, %v7467_v17  ;;  %v11768_v0 = vld [vmem:[#allocation17 + $0x570] sm:$0xf0]  ;;  %v7536_v1 = vpop.f32.mrf.mxu1  ;;  %v10774_v17 = vld [vmem:[#allocation17 + $0xa28] sm:$0xf]  ;;  %v11838_v10 = vld [vmem:[#allocation17 + $0x7a0] sm:$0xf0] }
 0x520   : > { %7765 = vmatpush.bf16.msra.mxu2 %v9627_v53  ;;  %7779 = vmatpush.bf16.msra.mxu3 %v9851_v11  ;;  %v9738_v53 = vld [vmem:[#allocation17 + $0x210] sm:$0xf]  ;;  %v11663_v11 = vld [vmem:[#allocation17 + $0x228] sm:$0xf0]  ;;  %v7521_v5 = vadd.f32 %v7520_v15, %v7507_v61  ;;  %v11922_v15 = vld [vmem:[#allocation17 + $0xa40] sm:$0xf0] }
 0x521   : > { %7793 = vmatpush.bf16.msrb.mxu0 %v10075_v62  ;;  %7807 = vmatpush.bf16.msrb.mxu1 %v10299_v20  ;;  %v10186_v62 = vld [vmem:[#allocation17 + $0x590] sm:$0xf]  ;;  %v11775_v20 = vld [vmem:[#allocation17 + $0x5a8] sm:$0xf0]  ;;  %v9739_v8 = vor.u32 %v11663_v11, %v9738_v53  ;;  %v10998_v61 = vld [vmem:[#allocation17 + $0xbe8] sm:$0xf] }
 0x522   : > { %v7535_v28 = vadd.f32 %v7534_v32, %v7521_v5  ;;  %v7508_v41 = vpop.f32.mrf.mxu3  ;;  %v12034_v32 = vld [vmem:[#allocation17 + $0xdc0] sm:$0xf0]  ;;  %v10522_v53 = vld [vmem:[#allocation17 + $0x830] sm:$0xf]  ;;  %v11859_v11 = vld [vmem:[#allocation17 + $0x848] sm:$0xf0]  ;;  %v10999_v52 = vor.u32 %v11978_v63, %v10998_v61 }
 0x523   : > { %v11223_v5 = vor.u32 %v12034_v32, %v11222_v55  ;;  %v10858_v63 = vld [vmem:[#allocation17 + $0xad0] sm:$0xf]  ;;  %v11943_v55 = vld [vmem:[#allocation17 + $0xae8] sm:$0xf0] }
 0x524   : > { %7766 = vmatpush.bf16.msra.mxu2 %v9599_v18  ;;  %7780 = vmatpush.bf16.msra.mxu3 %v9823_v9  ;;  %v10187_v18 = vor.u32 %v11775_v20, %v10186_v62  ;;  %v7494_v9 = vpop.f32.mrf.mxu2  ;;  %12264 = vtanh.f32 %v7535_v28  ;;  %v11915_v62 = vld [vmem:[#allocation17 + $0xa08] sm:$0xf0]  ;;  %v10970_v20 = vld [vmem:[#allocation17 + $0xbb0] sm:$0xf] }
 0x525   : > { %7794 = vmatpush.bf16.msrb.mxu0 %v10047_v31  ;;  %7808 = vmatpush.bf16.msrb.mxu1 %v10271_v35  ;;  %v10158_v31 = vld [vmem:[#allocation17 + $0x558] sm:$0xf]  ;;  %v7495_v35 = vadd.f32 %v7494_v9, %v7481_v26  ;;  %v11971_v26 = vld [vmem:[#allocation17 + $0xbc8] sm:$0xf0]  ;;  %v11082_v32 = vld [vmem:[#allocation17 + $0xc90] sm:$0xf] }
 0x526   : > { %v10159_v45 = vor.u32 %v11768_v0, %v10158_v31  ;;  %v12027_v28 = vld [vmem:[#allocation17 + $0xd88] sm:$0xf0]  ;;  %v11845_v0 = vld [vmem:[#allocation17 + $0x7d8] sm:$0xf0] }
 0x527   : > { %v7509_v46 = vadd.f32 %v7508_v41, %v7495_v35  ;;  %v10466_v35 = vld [vmem:[#allocation17 + $0x7c0] sm:$0xf] }
 0x528   : > { %7767 = vmatpush.bf16.msra.mxu2 %v9571_v56  ;;  %7781 = vmatpush.bf16.msra.mxu3 %v9795_v50  ;;  %v9487_v56 = vor.u32 %v11600_v33, %v9486_v22  ;;  %v9711_v50 = vor.u32 %v11656_v21, %v9710_v58  ;;  %v11194_v22 = vld [vmem:[#allocation17 + $0xd70] sm:$0xf]  ;;  %v10494_v33 = vld [vmem:[#allocation17 + $0x7f8] sm:$0xf]  ;;  %v11852_v58 = vld [vmem:[#allocation17 + $0x810] sm:$0xf0]  ;;  %v10971_v21 = vor.u32 %v11971_v26, %v10970_v20 }
 0x529   : > { %7795 = vmatpush.bf16.msrb.mxu0 %v10019_v27  ;;  %7809 = vmatpush.bf16.msrb.mxu1 %v10243_v13  ;;  %v7522_v27 = vpop.f32.mrf.mxu0  ;;  %v9935_v13 = vor.u32 %v11712_v49, %v9934_v60  ;;  %v11964_v60 = vld [vmem:[#allocation17 + $0xb90] sm:$0xf0]  ;;  %v11166_v49 = vld [vmem:[#allocation17 + $0xd38] sm:$0xf]  ;;  %v10690_v41 = vld [vmem:[#allocation17 + $0x980] sm:$0xf] }
 0x52a   : > { %v7523_v54 = vadd.f32 %v7522_v27, %v7509_v46  ;;  %v11138_v46 = vld [vmem:[#allocation17 + $0xd00] sm:$0xf]  ;;  %v10691_v30 = vor.u32 %v11901_v29, %v10690_v41  ;;  %v10915_v27 = vor.u32 %v11957_v4, %v10914_v7  ;;  %v11880_v20 = vld [vmem:[#allocation17 + $0x8f0] sm:$0xf0]  ;;  %v10830_v26 = vld [vmem:[#allocation17 + $0xa98] sm:$0xf] }
 0x52c   : > { %7768 = vmatpush.bf16.msra.mxu2 %v9543_v24  ;;  %7782 = vmatpush.bf16.msra.mxu3 %v9767_v57  ;;  %v12265_v24 = vpop.eup %12264  ;;  %v7537_v57 = vadd.f32 %v7536_v1, %v7523_v54  ;;  %v11894_v54 = vld [vmem:[#allocation17 + $0x960] sm:$0xf0]  ;;  %v10439_v1 = vor.u32 %v11838_v10, %v10438_v59 }
 0x52d   : > { %7796 = vmatpush.bf16.msrb.mxu0 %v9991_v19  ;;  %7810 = vmatpush.bf16.msrb.mxu1 %v10215_v6  ;;  %7892 = vst [vmem:[%s14239_s12 + $0x18] sm:$0xff] %v12265_v24  ;;  %v10551_v19 = vor.u32 %v11866_v51, %v10550_v40  ;;  %v10775_v6 = vor.u32 %v11922_v15, %v10774_v17  ;;  %v11110_v40 = vld [vmem:[#allocation17 + $0xcc8] sm:$0xf]  ;;  %v12006_v51 = vld [vmem:[#allocation17 + $0xce0] sm:$0xf0] }
 0x52e   : > { %12266 = vtanh.f32 %v7537_v57  ;;  %v11831_v17 = vld [vmem:[#allocation17 + $0x768] sm:$0xf0]  ;;  %v11111_v61 = vor.u32 %v12006_v51, %v11110_v40  ;;  %v10634_v24 = vld [vmem:[#allocation17 + $0x910] sm:$0xf] }
 0x52f   : > { %v11887_v57 = vld [vmem:[#allocation17 + $0x928] sm:$0xf0] }
 0x530   : > { %7769 = vmatpush.bf16.msra.mxu2 %v9515_v36  ;;  %7783 = vmatpush.bf16.msra.mxu3 %v9739_v8  ;;  %v10523_v36 = vor.u32 %v11859_v11, %v10522_v53  ;;  %v10747_v8 = vor.u32 %v11915_v62, %v10746_v43  ;;  %v10635_v53 = vor.u32 %v11887_v57, %v10634_v24  ;;  %v10382_v11 = vld [vmem:[#allocation17 + $0x718] sm:$0xf] }
 0x531   : > { %7797 = vmatpush.bf16.msrb.mxu0 %v9963_v16  ;;  %7811 = vmatpush.bf16.msrb.mxu1 %v10187_v18  ;;  %v10718_v16 = vld [vmem:[#allocation17 + $0x9b8] sm:$0xf] }
 0x532   : > { %v10942_v18 = vld [vmem:[#allocation17 + $0xb78] sm:$0xf] }
 0x533   : > { %v10943_v44 = vor.u32 %v11964_v60, %v10942_v18  ;;  %v10606_v62 = vld [vmem:[#allocation17 + $0x8d8] sm:$0xf] }
 0x534   : > { %7770 = vmatpush.bf16.msra.mxu2 %v9487_v56  ;;  %7784 = vmatpush.bf16.msra.mxu3 %v9711_v50  ;;  %v12267_v9 = vpop.eup %12266  ;;  %v12013_v56 = vld [vmem:[#allocation17 + $0xd18] sm:$0xf0]  ;;  %v10467_v50 = vor.u32 %v11845_v0, %v10466_v35 }
 0x535   : > { %7798 = vmatpush.bf16.msrb.mxu0 %v9935_v13  ;;  %7812 = vmatpush.bf16.msrb.mxu1 %v10159_v45  ;;  %7899 = vst [vmem:[%s14239_s12 + $0x50] sm:$0xff] %v12267_v9  ;;  %v11139_v13 = vor.u32 %v12013_v56, %v11138_v46  ;;  %v10662_v45 = vld [vmem:[#allocation17 + $0x948] sm:$0xf] }
 0x537   : > { %7771 = vmatmul.bf16.vlgmr.msra.gmra.mxu2 %v14128_v34  ;;  %7785 = vmatmul.bf16.vlgmr.msra.gmra.mxu3 %v14130_v38  ;;  %v11195_v34 = vor.u32 %v12027_v28, %v11194_v22  ;;  %v11908_v38 = vld [vmem:[#allocation17 + $0x9d0] sm:$0xf0]  ;;  %v11054_v28 = vld [vmem:[#allocation17 + $0xc58] sm:$0xf]  ;;  %v7576_v9 = vpop.f32.mrf.mxu0  ;;  %v7590_v60 = vpop.f32.mrf.mxu1 }
 0x538   : > { %7819 = vmatpush.bf16.msrb.mxu2 %v10579_v42  ;;  %7833 = vmatpush.bf16.msrb.mxu3 %v10803_v12  ;;  %v10719_v31 = vor.u32 %v11908_v38, %v10718_v16  ;;  %v10886_v42 = vld [vmem:[#allocation17 + $0xb08] sm:$0xf]  ;;  %v11950_v12 = vld [vmem:[#allocation17 + $0xb20] sm:$0xf0]  ;;  %v11936_v22 = vld [vmem:[#allocation17 + $0xab0] sm:$0xf0] }
 0x539   : > { %7847 = vmatpush.bf16.msra.mxu0 %v11027_v3  ;;  %7861 = vmatpush.bf16.msra.mxu1 %v11251_v25  ;;  %v10663_v3 = vor.u32 %v11894_v54, %v10662_v45  ;;  %v10410_v25 = vld [vmem:[#allocation17 + $0x750] sm:$0xf]  ;;  %v10887_v15 = vor.u32 %v11950_v12, %v10886_v42  ;;  %v14287_v38 = vld [vmem:[#allocation19] sm:$0xff] }
 0x53a   : > { %7799 = vmatmul.bf16.vlgmr.msrb.gmra.mxu0 %v14132_v23  ;;  %7813 = vmatmul.bf16.vlgmr.msrb.gmra.mxu1 %v14138_v14  ;;  %v12020_v23 = vld [vmem:[#allocation17 + $0xd50] sm:$0xf0]  ;;  %v10495_v14 = vor.u32 %v11852_v58, %v10494_v33  ;;  %v10607_v33 = vor.u32 %v11880_v20, %v10606_v62  ;;  %v7548_v58 = vpop.f32.mrf.mxu2  ;;  %v4777_v18 = vperm.slane %v14287_v38, 4 }
 0x53b   : > { %v11167_v39 = vor.u32 %v12020_v23, %v11166_v49 }
 0x53c   : > { %7820 = vmatpush.bf16.msrb.mxu2 %v10551_v19  ;;  %7834 = vmatpush.bf16.msrb.mxu3 %v10775_v6  ;;  %v11999_v19 = vld [vmem:[#allocation17 + $0xca8] sm:$0xf0]  ;;  %v10411_v6 = vor.u32 %v11831_v17, %v10410_v25  ;;  %v7549_v49 = vadd.f32 %v7548_v58, %v4777_v18  ;;  %v4778_v25 = vperm.slane %v14287_v38, 5 }
 0x53d   : > { %7848 = vmatpush.bf16.msra.mxu0 %v10999_v52  ;;  %7862 = vmatpush.bf16.msra.mxu1 %v11223_v5  ;;  %v11824_v52 = vld [vmem:[#allocation17 + $0x730] sm:$0xf0]  ;;  %v10859_v5 = vor.u32 %v11943_v55, %v10858_v63  ;;  %v11083_v43 = vor.u32 %v11999_v19, %v11082_v32 }
 0x53f   : > { %v7578_v35 = vpop.f32.mrf.mxu0 }
 0x540   : > { %7821 = vmatpush.bf16.msrb.mxu2 %v10523_v36  ;;  %7835 = vmatpush.bf16.msrb.mxu3 %v10747_v8  ;;  %v11992_v36 = vld [vmem:[#allocation17 + $0xc70] sm:$0xf0]  ;;  %v10383_v8 = vor.u32 %v11824_v52, %v10382_v11 }
 0x541   : > { %7849 = vmatpush.bf16.msra.mxu0 %v10971_v21  ;;  %7863 = vmatpush.bf16.msra.mxu1 %v11195_v34  ;;  %v7562_v21 = vpop.f32.mrf.mxu3  ;;  %v10831_v34 = vor.u32 %v11936_v22, %v10830_v26  ;;  %v11055_v16 = vor.u32 %v11992_v36, %v11054_v28 }
 0x542   : > { %v7563_v23 = vadd.f32 %v7562_v21, %v7549_v49 }
 0x544   : > { %7822 = vmatpush.bf16.msrb.mxu2 %v10495_v14  ;;  %7836 = vmatpush.bf16.msrb.mxu3 %v10719_v31  ;;  %v7550_v14 = vpop.f32.mrf.mxu2  ;;  %v7577_v0 = vadd.f32 %v7576_v9, %v7563_v23 }
 0x545   : > { %7850 = vmatpush.bf16.msra.mxu0 %v10943_v44  ;;  %7864 = vmatpush.bf16.msra.mxu1 %v11167_v39  ;;  %v7551_v44 = vadd.f32 %v7550_v14, %v4777_v18  ;;  %v7592_v39 = vpop.f32.mrf.mxu1 }
 0x546   : > { %v7591_v29 = vadd.f32 %v7590_v60, %v7577_v0 }
 0x548   : > { %7823 = vmatpush.bf16.msrb.mxu2 %v10467_v50  ;;  %7837 = vmatpush.bf16.msrb.mxu3 %v10691_v30 }
 0x549   : > { %7851 = vmatpush.bf16.msra.mxu0 %v10915_v27  ;;  %7865 = vmatpush.bf16.msra.mxu1 %v11139_v13  ;;  %v7564_v31 = vpop.f32.mrf.mxu3 }
 0x54a   : > { %v7565_v41 = vadd.f32 %v7564_v31, %v7551_v44 }
 0x54c   : > { %7824 = vmatpush.bf16.msrb.mxu2 %v10439_v1  ;;  %7838 = vmatpush.bf16.msrb.mxu3 %v10663_v3 }
 0x54d   : > { %7852 = vmatpush.bf16.msra.mxu0 %v10887_v15  ;;  %7866 = vmatpush.bf16.msra.mxu1 %v11111_v61 }
 0x550   : > { %7825 = vmatpush.bf16.msrb.mxu2 %v10411_v6  ;;  %7839 = vmatpush.bf16.msrb.mxu3 %v10635_v53 }
 0x551   : > { %7853 = vmatpush.bf16.msra.mxu0 %v10859_v5  ;;  %7867 = vmatpush.bf16.msra.mxu1 %v11083_v43 }
 0x554   : > { %7826 = vmatpush.bf16.msrb.mxu2 %v10383_v8  ;;  %7840 = vmatpush.bf16.msrb.mxu3 %v10607_v33 }
 0x555   : > { %7854 = vmatpush.bf16.msra.mxu0 %v10831_v34  ;;  %7868 = vmatpush.bf16.msra.mxu1 %v11055_v16 }
 0x557   : > { %7827 = vmatmul.bf16.vlgmr.msrb.gmra.mxu2 %v14192_v2  ;;  %7841 = vmatmul.bf16.vlgmr.msrb.gmra.mxu3 %v14194_v48  ;;  %v7632_v56 = vpop.f32.mrf.mxu0  ;;  %v7579_v2 = vadd.f32 %v7578_v35, %v7565_v41  ;;  %v7646_v50 = vpop.f32.mrf.mxu1  ;;  %v4779_v35 = vperm.slane %v14287_v38, 6 }
 0x558   : > { %7855 = vmatmul.bf16.vlgmr.msra.gmra.mxu0 %v14199_v47  ;;  %7869 = vmatmul.bf16.vlgmr.msra.gmra.mxu1 %v14190_v37 }
 0x559   : > { %v7593_v30 = vadd.f32 %v7592_v39, %v7579_v2 }
 0x55a   : > { %v7604_v7 = vpop.f32.mrf.mxu2  ;;  %v7618_v4 = vpop.f32.mrf.mxu3 }
 0x55b   : > { %v7605_v46 = vadd.f32 %v7604_v7, %v7591_v29 }
 0x55d   : > { %v7619_v48 = vadd.f32 %v7618_v4, %v7605_v46 }
 0x55f   : > { %v7633_v47 = vadd.f32 %v7632_v56, %v7619_v48  ;;  %v7634_v45 = vpop.f32.mrf.mxu0  ;;  %v7648_v42 = vpop.f32.mrf.mxu1 }
 0x561   : > { %v7647_v37 = vadd.f32 %v7646_v50, %v7633_v47 }
 0x562   : > { %v7606_v59 = vpop.f32.mrf.mxu2  ;;  %v7620_v27 = vpop.f32.mrf.mxu3 }
 0x563   : > { %12268 = vtanh.f32 %v7647_v37  ;;  %v7607_v10 = vadd.f32 %v7606_v59, %v7593_v30 }
 0x565   : > { %v7621_v13 = vadd.f32 %v7620_v27, %v7607_v10 }
 0x567   : > { %v7635_v54 = vadd.f32 %v7634_v45, %v7621_v13 }
 0x569   : > { %v12269_v12 = vpop.eup %12268  ;;  %v7649_v40 = vadd.f32 %v7648_v42, %v7635_v54 }
 0x56a   : > { %7893 = vst [vmem:[%s14239_s12 + $0x20] sm:$0xff] %v12269_v12 }
 0x56b   : > { %12270 = vtanh.f32 %v7649_v40 }
 0x571   : > { %v12271_v51 = vpop.eup %12270 }
 0x572   : > { %7900 = vst [vmem:[%s14239_s12 + $0x58] sm:$0xff] %v12271_v51 }
 0x577   : > { %v7688_v17 = vpop.f32.mrf.mxu0  ;;  %v7702_v15 = vpop.f32.mrf.mxu1 }
 0x57a   : > { %v7660_v1 = vpop.f32.mrf.mxu2  ;;  %v7674_v3 = vpop.f32.mrf.mxu3 }
 0x57b   : > { %v7661_v61 = vadd.f32 %v7660_v1, %v4778_v25 }
 0x57d   : > { %v7675_v24 = vadd.f32 %v7674_v3, %v7661_v61 }
 0x57f   : > { %v7690_v55 = vpop.f32.mrf.mxu0  ;;  %v7689_v32 = vadd.f32 %v7688_v17, %v7675_v24  ;;  %v7704_v6 = vpop.f32.mrf.mxu1 }
 0x581   : > { %v7703_v11 = vadd.f32 %v7702_v15, %v7689_v32 }
 0x582   : > { %v7662_v57 = vpop.f32.mrf.mxu2  ;;  %v7676_v63 = vpop.f32.mrf.mxu3 }
 0x583   : > { %v7663_v19 = vadd.f32 %v7662_v57, %v4778_v25 }
 0x585   : > { %v7677_v53 = vadd.f32 %v7676_v63, %v7663_v19 }
 0x587   : > { %v7691_v20 = vadd.f32 %v7690_v55, %v7677_v53 }
 0x589   : > { %v7705_v8 = vadd.f32 %v7704_v6, %v7691_v20 }
 0x597   : > { %v7744_v62 = vpop.f32.mrf.mxu0  ;;  %v7758_v22 = vpop.f32.mrf.mxu1 }
 0x59a   : > { %v7716_v52 = vpop.f32.mrf.mxu2  ;;  %v7730_v5 = vpop.f32.mrf.mxu3 }
 0x59b   : > { %v7717_v43 = vadd.f32 %v7716_v52, %v7703_v11 }
 0x59d   : > { %v7731_v26 = vadd.f32 %v7730_v5, %v7717_v43 }
 0x59f   : > { %v7745_v28 = vadd.f32 %v7744_v62, %v7731_v26  ;;  %v7746_v16 = vpop.f32.mrf.mxu0  ;;  %v7760_v9 = vpop.f32.mrf.mxu1 }
 0x5a1   : > { %v7759_v36 = vadd.f32 %v7758_v22, %v7745_v28 }
 0x5a2   : > { %v7718_v33 = vpop.f32.mrf.mxu2  ;;  %v7732_v21 = vpop.f32.mrf.mxu3 }
 0x5a3   : > { %12272 = vtanh.f32 %v7759_v36  ;;  %v7719_v58 = vadd.f32 %v7718_v33, %v7705_v8 }
 0x5a5   : > { %v7733_v34 = vadd.f32 %v7732_v21, %v7719_v58 }
 0x5a7   : > { %v7747_v18 = vadd.f32 %v7746_v16, %v7733_v34 }
 0x5a9   : > { %v12273_v60 = vpop.eup %12272  ;;  %v7761_v49 = vadd.f32 %v7760_v9, %v7747_v18 }
 0x5aa   : > { %7894 = vst [vmem:[%s14239_s12 + $0x28] sm:$0xff] %v12273_v60 }
 0x5ab   : > { %12274 = vtanh.f32 %v7761_v49 }
 0x5b1   : > { %v12275_v23 = vpop.eup %12274 }
 0x5b2   : > { %7901 = vst [vmem:[%s14239_s12 + $0x60] sm:$0xff] %v12275_v23 }
 0x5b7   : > { %v7800_v0 = vpop.f32.mrf.mxu0  ;;  %v7814_v44 = vpop.f32.mrf.mxu1 }
 0x5ba   : > { %v7772_v14 = vpop.f32.mrf.mxu2  ;;  %v7786_v31 = vpop.f32.mrf.mxu3 }
 0x5bb   : > { %v7773_v39 = vadd.f32 %v7772_v14, %v4779_v35 }
 0x5bd   : > { %v7787_v41 = vadd.f32 %v7786_v31, %v7773_v39 }
 0x5bf   : > { %v7802_v4 = vpop.f32.mrf.mxu0  ;;  %v7801_v46 = vadd.f32 %v7800_v0, %v7787_v41  ;;  %v7816_v2 = vpop.f32.mrf.mxu1 }
 0x5c1   : > { %v7815_v50 = vadd.f32 %v7814_v44, %v7801_v46 }
 0x5c2   : > { %v7774_v29 = vpop.f32.mrf.mxu2  ;;  %v7788_v7 = vpop.f32.mrf.mxu3 }
 0x5c3   : > { %v7775_v56 = vadd.f32 %v7774_v29, %v4779_v35 }
 0x5c5   : > { %v7789_v48 = vadd.f32 %v7788_v7, %v7775_v56 }
 0x5c7   : > { %v7803_v10 = vadd.f32 %v7802_v4, %v7789_v48 }
 0x5c9   : > { %v7817_v54 = vadd.f32 %v7816_v2, %v7803_v10 }
 0x5d5   : > { %v7856_v59 = vpop.f32.mrf.mxu0  ;;  %v7870_v38 = vpop.f32.mrf.mxu1 }
 0x5da   : > { %v7828_v47 = vpop.f32.mrf.mxu2  ;;  %v7842_v37 = vpop.f32.mrf.mxu3 }
 0x5db   : > { %v7829_v30 = vadd.f32 %v7828_v47, %v7815_v50 }
 0x5dd   : > { %v7843_v27 = vadd.f32 %v7842_v37, %v7829_v30  ;;  %v7858_v1 = vpop.f32.mrf.mxu0  ;;  %v7872_v25 = vpop.f32.mrf.mxu1 }
 0x5df   : > { %v7857_v13 = vadd.f32 %v7856_v59, %v7843_v27 }
 0x5e1   : > { %v7871_v45 = vadd.f32 %v7870_v38, %v7857_v13 }
 0x5e2   : > { %v7830_v42 = vpop.f32.mrf.mxu2  ;;  %v7844_v40 = vpop.f32.mrf.mxu3 }
 0x5e3   : > { %12276 = vtanh.f32 %v7871_v45  ;;  %v7831_v12 = vadd.f32 %v7830_v42, %v7817_v54 }
 0x5e5   : > { %v7845_v51 = vadd.f32 %v7844_v40, %v7831_v12 }
 0x5e7   : > { %v7859_v3 = vadd.f32 %v7858_v1, %v7845_v51 }
 0x5e9   : > { %v12277_v17 = vpop.eup %12276  ;;  %v7873_v15 = vadd.f32 %v7872_v25, %v7859_v3 }
 0x5ea   : > { %7895 = vst [vmem:[%s14239_s12 + $0x30] sm:$0xff] %v12277_v17 }
 0x5eb   : > { %12278 = vtanh.f32 %v7873_v15 }
 0x5f1   : > { %v12279_v61 = vpop.eup %12278 }
 0x5f2   : > { %7902 = vst [vmem:[%s14239_s12 + $0x68] sm:$0xff] %v12279_v61 }
 0x5f3   : > { %12639 = shalt.err (!%p12636_p9)
}
 0x5f4   : > { %s12719_s23 = smov 896   ;;  %s12720_s12 = smov 56  }
 0x5f5   : > { %12086 = dma.vmem_to_hbm [thread:$0]  (%p12901_p4), %s7918_s22, 1792, %s7920_s15, %s7904_s1, %s12719_s23, %s12719_s23, %s12720_s12  }
 0x5f6 PF: > { %s7934_s26 = sand.u32 1, %s12686_s17   ;;  %p14481_p10 = scmp.ge.s32.totalorder %s12698_s20, 2 }
 0x5f7   : > { %s7935_s11 = scalar_lea.sflag [#allocation4], %s7934_s26 }
 0x5f8   : > { %p12124_p13 = pnand %p14481_p10, %p12905_p6 }
 0x5fa   : > { %p12125_p11 = pneg %p12124_p13 }
 0x5fc   : > { %12681 = dma.done.wait (%p12125_p11), %s7935_s11, 1792  }
 0x5fd   : > { %12683 = vsyncadd (%p12125_p11), %s7935_s11, 4294965504  ;;  %p29_p0 = scmp.ge.s32.totalorder %s12875_s14, 4   ;;  %s14482_s17 = smov %s12690_s18 }
 0x5fe   : > { %s14483_s18 = smov %s12694_s19  ;;  %s14484_s19 = smov %s12886_s28 }
 0x5ff   : > { %s14485_s20 = smov %s12875_s14  ;;  %31 = sbr.rel (!%p29_p0) target bundleno = 16 (0x10), region = 149 }
 0x604   :  { %7941 = vsyncpa [#allocation3], 1 }
 0x605   :  { %7943 = vsyncpa [#allocation3 + $0x1], 1 }
 0x606   :  { %7944 = vsyncpa [#allocation6], 1 }
 0x607   :  { %7945 = vsyncpa [#allocation9], 1 }
 0x608   :  { %7946 = vsyncpa [#allocation12], 1 }
 0x609   :  { %7947 = vsyncpa [#allocation15], 1 }
 0x60a   :  { %7948 = vsyncpa [#allocation18], 1 }
 0x60b   :  { %7949 = vsyncpa [#allocation4], 1 }
 0x60c   :  { %7951 = vsyncpa [#allocation4 + $0x1], 1 }

</bundles_post_ra>
